<compile_context>
chip_gen: v6e
topology: v6e:2x2x1
jax: 0.10.0
libtpu: 0.0.40
codegen_flags: <defaults>
</compile_context>

<pallas_src>
import functools

import jax
import jax.numpy as jnp
from jax import lax
from jax.experimental import pallas as pl
from jax.experimental.pallas import tpu as pltpu


_CONV_TAPS = tuple((dh, dw) for dh in (-1, 0, 1) for dw in (-1, 0, 1))


def _compiler_params():
    return pltpu.CompilerParams(
        dimension_semantics=("parallel",),
        vmem_limit_bytes=32 * 1024 * 1024,
    )


# --------------------------- in-kernel helpers ------------------------------ #

def _col_keep_masks(hw, img_w):
    # keep-masks for dw=-1 / dw=+1 taps (hoisted: built once per kernel invocation)
    col = lax.broadcasted_iota(jnp.int32, (1, hw), 1) % img_w
    return col > 0, col < (img_w - 1)


def _shift_flat(x, img_w, dh, dw, keep_l, keep_r):
    """x: (C, H*W) channels-on-sublane, row-major flattened spatial on lanes.

    Returns xt with xt[c, h*W + w] = x[c, (h+dh)*W + (w+dw)], zero outside the image.
    For |dh| <= 1 the flat zero-fill at the ends handles the h-boundary; only the
    w-boundary (dw != 0) needs an explicit lane mask.
    """
    c, hw = x.shape
    s = dh * img_w + dw
    if s > 0:
        xt = jnp.concatenate([x[:, s:], jnp.zeros((c, s), x.dtype)], axis=1)
    elif s < 0:
        xt = jnp.concatenate([jnp.zeros((c, -s), x.dtype), x[:, :s]], axis=1)
    else:
        xt = x
    if dw > 0:
        xt = jnp.where(keep_r, xt, jnp.zeros((), x.dtype))
    elif dw < 0:
        xt = jnp.where(keep_l, xt, jnp.zeros((), x.dtype))
    return xt


def _group_norm_scale_shift(pieces, gamma, beta, n_per_group, eps=1e-5):
    """pieces: list of (C, HW) f32 arrays jointly forming one GroupNorm(2) instance.

    One-pass sum/sumsq stats (f32).  Returns per-channel (C, 1) scale/shift so that
    y * scale + shift == GroupNorm(y) * gamma + beta.
    """
    C = pieces[0].shape[0]
    C2 = C // 2
    ch_sum = jnp.sum(pieces[0], axis=1, keepdims=True)
    ch_ssq = jnp.sum(pieces[0] * pieces[0], axis=1, keepdims=True)
    for p in pieces[1:]:
        ch_sum = ch_sum + jnp.sum(p, axis=1, keepdims=True)
        ch_ssq = ch_ssq + jnp.sum(p * p, axis=1, keepdims=True)
    inv_n = 1.0 / float(n_per_group)
    m0 = jnp.sum(ch_sum[:C2]) * inv_n
    m1 = jnp.sum(ch_sum[C2:]) * inv_n
    v0 = jnp.sum(ch_ssq[:C2]) * inv_n - m0 * m0     # biased variance (torch GroupNorm)
    v1 = jnp.sum(ch_ssq[C2:]) * inv_n - m1 * m1
    r0 = lax.rsqrt(v0 + eps)
    r1 = lax.rsqrt(v1 + eps)
    inv_c = jnp.concatenate(
        [jnp.broadcast_to(r0, (C2, 1)), jnp.broadcast_to(r1, (C2, 1))], axis=0)
    mean_c = jnp.concatenate(
        [jnp.broadcast_to(m0, (C2, 1)), jnp.broadcast_to(m1, (C2, 1))], axis=0)
    scale = gamma * inv_c
    shift = beta - mean_c * scale
    return scale, shift


# ------------------------------- kernels ------------------------------------ #

def _conv3x3_gn_lrelu_kernel(x_ref, w_ref, b_ref, g_ref, be_ref, o_ref, *, img_w, n_group):
    # x_ref: (1, Cin, HW) bf16   w_ref: (Cout, 9*Cin) bf16   b/g/be: (Cout, 1) f32
    x = x_ref[0]
    keep_l, keep_r = _col_keep_masks(x.shape[1], img_w)
    patches = jnp.concatenate(
        [_shift_flat(x, img_w, dh, dw, keep_l, keep_r) for dh, dw in _CONV_TAPS], axis=0)
    y = jnp.dot(w_ref[...], patches, preferred_element_type=jnp.float32) + b_ref[...]
    scale, shift = _group_norm_scale_shift([y], g_ref[...], be_ref[...], n_group)
    z = y * scale + shift
    z = jnp.maximum(z, 0.2 * z)                      # LeakyReLU(0.2), single VPU op
    o_ref[0] = z.astype(o_ref.dtype)


def _convT3x3_s2_gn_lrelu_kernel(x_ref, w_ref, b_ref, g_ref, be_ref, o_ref, *, img_w, n_group):
    # Sub-pixel ConvTranspose2d(k=3, s=2, p=1, op=1): one matmul over the original HxW
    # grid produces the 4 interleaved sub-outputs stacked along the channel axis.
    # x_ref: (1, Cin, HW) bf16   w_ref: (4*Cout, 4*Cin) bf16   o_ref: (1, 4*Cout, HW)
    x = x_ref[0]
    keep_l, keep_r = _col_keep_masks(x.shape[1], img_w)
    patches = jnp.concatenate(
        [x,
         _shift_flat(x, img_w, 0, 1, keep_l, keep_r),
         _shift_flat(x, img_w, 1, 0, keep_l, keep_r),
         _shift_flat(x, img_w, 1, 1, keep_l, keep_r)], axis=0)     # (4*Cin, HW)
    cout = g_ref.shape[0]
    b4 = jnp.concatenate([b_ref[...]] * 4, axis=0)                 # (4*Cout, 1)
    ys = jnp.dot(w_ref[...], patches, preferred_element_type=jnp.float32) + b4
    pieces = [ys[k * cout:(k + 1) * cout] for k in range(4)]       # stats over all 4 sub-outputs
    scale, shift = _group_norm_scale_shift(pieces, g_ref[...], be_ref[...], n_group)
    scale4 = jnp.concatenate([scale] * 4, axis=0)
    shift4 = jnp.concatenate([shift] * 4, axis=0)
    z = ys * scale4 + shift4
    z = jnp.maximum(z, 0.2 * z)
    o_ref[0] = z.astype(o_ref.dtype)


def _conv3x3_dual_gn_lrelu_agg_kernel(x_ref, e_ref, w_ref, b_ref, g_ref, be_ref,
                                      aw_ref, ab_ref, o_ref, *, img_w, n_group):
    # dec[3] on cat([x, enc1]) without the concat: weight split along K, one matmul.
    # Fused epilogue: GroupNorm + LeakyReLU + 1x1 aggregation conv.
    x = x_ref[0]
    e = e_ref[0]
    keep_l, keep_r = _col_keep_masks(x.shape[1], img_w)
    px = [_shift_flat(x, img_w, dh, dw, keep_l, keep_r) for dh, dw in _CONV_TAPS]
    pe = [_shift_flat(e, img_w, dh, dw, keep_l, keep_r) for dh, dw in _CONV_TAPS]
    patches = jnp.concatenate(px + pe, axis=0)                     # (18*Chid, HW)
    y = jnp.dot(w_ref[...], patches, preferred_element_type=jnp.float32) + b_ref[...]
    scale, shift = _group_norm_scale_shift([y], g_ref[...], be_ref[...], n_group)
    z = y * scale + shift
    z = jnp.maximum(z, 0.2 * z)
    out = jnp.dot(aw_ref[...], z.astype(jnp.bfloat16), preferred_element_type=jnp.float32)
    o_ref[0] = (out + ab_ref[...]).astype(o_ref.dtype)


# --------------------------- pallas_call wrappers ---------------------------- #

def conv3x3_gn_lrelu(x, w, b, gamma, beta, img_w, out_dtype=jnp.bfloat16):
    B, Cin, HW = x.shape
    Cout = w.shape[0]
    kern = functools.partial(_conv3x3_gn_lrelu_kernel, img_w=img_w,
                             n_group=(Cout // 2) * HW)
    return pl.pallas_call(
        kern,
        out_shape=jax.ShapeDtypeStruct((B, Cout, HW), out_dtype),
        grid=(B,),
        in_specs=[
            pl.BlockSpec((1, Cin, HW), lambda i: (i, 0, 0)),
            pl.BlockSpec(w.shape, lambda i: (0, 0)),
            pl.BlockSpec((Cout, 1), lambda i: (0, 0)),
            pl.BlockSpec((Cout, 1), lambda i: (0, 0)),
            pl.BlockSpec((Cout, 1), lambda i: (0, 0)),
        ],
        out_specs=pl.BlockSpec((1, Cout, HW), lambda i: (i, 0, 0)),
        compiler_params=_compiler_params(),
    )(x, w, b, gamma, beta)


def convT3x3_s2_gn_lrelu(x, w_big, b, gamma, beta, img_h, img_w, out_dtype=jnp.bfloat16):
    B, Cin, HW = x.shape
    Cout4 = w_big.shape[0]
    Cout = Cout4 // 4
    kern = functools.partial(_convT3x3_s2_gn_lrelu_kernel, img_w=img_w,
                             n_group=(Cout // 2) * 4 * HW)
    y4 = pl.pallas_call(
        kern,
        out_shape=jax.ShapeDtypeStruct((B, Cout4, HW), out_dtype),
        grid=(B,),
        in_specs=[
            pl.BlockSpec((1, Cin, HW), lambda i: (i, 0, 0)),
            pl.BlockSpec(w_big.shape, lambda i: (0, 0)),
            pl.BlockSpec((Cout, 1), lambda i: (0, 0)),
            pl.BlockSpec((Cout, 1), lambda i: (0, 0)),
            pl.BlockSpec((Cout, 1), lambda i: (0, 0)),
        ],
        out_specs=pl.BlockSpec((1, Cout4, HW), lambda i: (i, 0, 0)),
        compiler_params=_compiler_params(),
    )(x, w_big, b, gamma, beta)
    # Sub-pixel interleave: wrapper-side layout plumbing keeps kernel stores lane-dense.
    y = y4.reshape(B, 2, 2, Cout, img_h, img_w)          # (B, r, c, C, H, W)
    y = jnp.transpose(y, (0, 3, 4, 1, 5, 2))             # (B, C, H, r, W, c)
    return y.reshape(B, Cout, 2 * img_h, 2 * img_w)


def conv3x3_dual_gn_lrelu_agg(x, e, w, b, gamma, beta, aw, ab, img_w):
    B, Chid, HW = x.shape
    Cout = w.shape[0]
    Cagg = aw.shape[0]
    kern = functools.partial(_conv3x3_dual_gn_lrelu_agg_kernel, img_w=img_w,
                             n_group=(Cout // 2) * HW)
    return pl.pallas_call(
        kern,
        out_shape=jax.ShapeDtypeStruct((B, Cagg, HW), jnp.float32),
        grid=(B,),
        in_specs=[
            pl.BlockSpec((1, Chid, HW), lambda i: (i, 0, 0)),
            pl.BlockSpec((1, Chid, HW), lambda i: (i, 0, 0)),
            pl.BlockSpec(w.shape, lambda i: (0, 0)),
            pl.BlockSpec((Cout, 1), lambda i: (0, 0)),
            pl.BlockSpec((Cout, 1), lambda i: (0, 0)),
            pl.BlockSpec((Cout, 1), lambda i: (0, 0)),
            pl.BlockSpec(aw.shape, lambda i: (0, 0)),
            pl.BlockSpec((Cagg, 1), lambda i: (0, 0)),
        ],
        out_specs=pl.BlockSpec((1, Cagg, HW), lambda i: (i, 0, 0)),
        compiler_params=_compiler_params(),
    )(x, e, w, b, gamma, beta, aw, ab)


# --------------------------- weight packing (wrapper) ------------------------ #
# Math layout of conv weights: w[kh, kw, cin, cout], cross-correlation with padding 1.

def _pack_conv_w(w):
    # (3,3,Cin,Cout) -> (Cout, 9*Cin) bf16, K ordered (kh, kw, cin) to match _CONV_TAPS.
    cout = w.shape[3]
    return jnp.transpose(w, (3, 0, 1, 2)).reshape(cout, -1).astype(jnp.bfloat16)


def _pack_convT_w(w):
    # ConvTranspose2d(k=3, s=2, p=1, op=1) sub-pixel weight: (3,3,Cin,Cout) ->
    # (4*Cout, 4*Cin) bf16 acting on the tap stack [x(h,w), x(h,w+1), x(h+1,w), x(h+1,w+1)]
    # and producing the stacked sub-outputs [(2h,2w), (2h,2w+1), (2h+1,2w), (2h+1,2w+1)].
    cin, cout = w.shape[2], w.shape[3]
    wt = jnp.transpose(w, (0, 1, 3, 2))                  # (3,3,Cout,Cin)
    z = jnp.zeros((cout, cin), w.dtype)
    rows = [
        jnp.concatenate([wt[1, 1], z,        z,        z       ], axis=1),
        jnp.concatenate([wt[1, 2], wt[1, 0], z,        z       ], axis=1),
        jnp.concatenate([wt[2, 1], z,        wt[0, 1], z       ], axis=1),
        jnp.concatenate([wt[2, 2], wt[2, 0], wt[0, 2], wt[0, 0]], axis=1),
    ]
    return jnp.concatenate(rows, axis=0).astype(jnp.bfloat16)


def _col(v):
    return v.reshape(-1, 1).astype(jnp.float32)


# --------------------------- MultiGridDecoder forward ------------------------ #

def multigrid_decoder_forward(hid, enc1, params):
    """hid: (B, hid_dim, H/4, W/4) NCHW; enc1: (B, hid_dim, H, W) NCHW -> (B, C_out, H, W)."""
    B, Ch, H1, W1 = hid.shape
    _, _, H, W = enc1.shape

    # NCHW with flattened spatial == channels-on-sublane / lane-dense HW. No transpose.
    x = hid.reshape(B, Ch, H1 * W1).astype(jnp.bfloat16)

    p = params["dec0"]          # ConvTranspose2d stride 2 : H/4 -> H/2
    x = convT3x3_s2_gn_lrelu(x, _pack_convT_w(p["w"]), _col(p["b"]),
                             _col(p["gamma"]), _col(p["beta"]), H1, W1)
    H2, W2 = 2 * H1, 2 * W1
    x = x.reshape(B, Ch, H2 * W2)

    p = params["dec1"]          # Conv2d stride 1
    x = conv3x3_gn_lrelu(x, _pack_conv_w(p["w"]), _col(p["b"]),
                         _col(p["gamma"]), _col(p["beta"]), W2)

    p = params["dec2"]          # ConvTranspose2d stride 2 : H/2 -> H
    x = convT3x3_s2_gn_lrelu(x, _pack_convT_w(p["w"]), _col(p["b"]),
                             _col(p["gamma"]), _col(p["beta"]), H2, W2)
    x = x.reshape(B, Ch, H * W)

    # dec[3] (Conv2d(2*hid, hid, 3) on cat([x, enc1])) fused with the 1x1 aggregation.
    p = params["dec3"]
    wx = _pack_conv_w(p["w"][:, :, :Ch, :])
    we = _pack_conv_w(p["w"][:, :, Ch:, :])
    w_full = jnp.concatenate([wx, we], axis=1)                     # (hid, 18*hid)
    e = enc1.reshape(B, Ch, H * W).astype(jnp.bfloat16)
    aw = jnp.transpose(params["agg_w"]).astype(jnp.bfloat16)       # (C_out, hid)
    ab = _col(params["agg_b"])
    y = conv3x3_dual_gn_lrelu_agg(x, e, w_full, _col(p["b"]), _col(p["gamma"]),
                                  _col(p["beta"]), aw, ab, W)
    return y.reshape(B, -1, H, W)


# --------------------------- pure-JAX reference ------------------------------ #

def _ref_conv3x3(x, w, b):
    w_oihw = jnp.transpose(w, (3, 2, 0, 1))
    y = lax.conv_general_dilated(x, w_oihw, (1, 1), ((1, 1), (1, 1)),
                                 dimension_numbers=("NCHW", "OIHW", "NCHW"))
    return y + b[None, :, None, None]


def _ref_convT3x3_s2(x, w, b):
    # ConvTranspose2d(k=3, s=2, p=1, output_padding=1) == lhs-dilated conv with
    # padding (1, 2) and the spatially flipped kernel.
    w_oihw = jnp.transpose(w[::-1, ::-1], (3, 2, 0, 1))
    y = lax.conv_general_dilated(x, w_oihw, (1, 1), ((1, 2), (1, 2)),
                                 lhs_dilation=(2, 2),
                                 dimension_numbers=("NCHW", "OIHW", "NCHW"))
    return y + b[None, :, None, None]


def _ref_gn_lrelu(y, gamma, beta, eps=1e-5):
    B, C, H, W = y.shape
    yg = y.reshape(B, 2, C // 2, H, W)
    m = jnp.mean(yg, axis=(2, 3, 4), keepdims=True)
    v = jnp.mean((yg - m) ** 2, axis=(2, 3, 4), keepdims=True)
    yn = ((yg - m) / jnp.sqrt(v + eps)).reshape(B, C, H, W)
    yn = yn * gamma[None, :, None, None] + beta[None, :, None, None]
    return jnp.where(yn >= 0, yn, 0.2 * yn)


def reference_forward(hid, enc1, params):
    p = params["dec0"]
    x = _ref_gn_lrelu(_ref_convT3x3_s2(hid, p["w"], p["b"]), p["gamma"], p["beta"])
    p = params["dec1"]
    x = _ref_gn_lrelu(_ref_conv3x3(x, p["w"], p["b"]), p["gamma"], p["beta"])
    p = params["dec2"]
    x = _ref_gn_lrelu(_ref_convT3x3_s2(x, p["w"], p["b"]), p["gamma"], p["beta"])
    x = jnp.concatenate([x, enc1], axis=1)
    p = params["dec3"]
    x = _ref_gn_lrelu(_ref_conv3x3(x, p["w"], p["b"]), p["gamma"], p["beta"])
    y = jnp.einsum("bchw,co->bohw", x, params["agg_w"])
    return y + params["agg_b"][None, :, None, None]


# ------------------------------ parameter init ------------------------------- #

def init_params(key, hidden, c_out):
    def layer(k, cin, cout):
        k1, k2, k3, k4 = jax.random.split(k, 4)
        return {
            "w": 0.1 * jax.random.normal(k1, (3, 3, cin, cout), jnp.float32),
            "b": 0.1 * jax.random.normal(k2, (cout,), jnp.float32),
            "gamma": 1.0 + 0.1 * jax.random.normal(k3, (cout,), jnp.float32),
            "beta": 0.1 * jax.random.normal(k4, (cout,), jnp.float32),
        }

    ks = jax.random.split(key, 6)
    return {
        "dec0": layer(ks[0], hidden, hidden),
        "dec1": layer(ks[1], hidden, hidden),
        "dec2": layer(ks[2], hidden, hidden),
        "dec3": layer(ks[3], 2 * hidden, hidden),
        "agg_w": 0.1 * jax.random.normal(ks[4], (hidden, c_out), jnp.float32),
        "agg_b": 0.1 * jax.random.normal(ks[5], (c_out,), jnp.float32),
    }


# ------------------------------------ main ------------------------------------ #

if __name__ == "__main__":
    B, hidden, C_out = 2, 16, 4
    H1, W1 = 16, 16                      # coarse latent grid (H1*W1 = 256 lanes)
    H, W = 4 * H1, 4 * W1                # full output resolution

    key = jax.random.PRNGKey(0)
    k_hid, k_enc, k_par = jax.random.split(key, 3)
    hid = jax.random.normal(k_hid, (B, hidden, H1, W1), jnp.float32)       # NCHW
    enc1 = jax.random.normal(k_enc, (B, hidden, H, W), jnp.float32)        # NCHW
    params = init_params(k_par, hidden, C_out)

    fwd = jax.jit(multigrid_decoder_forward)
    out = jax.block_until_ready(fwd(hid, enc1, params))

    assert out.shape == (B, C_out, H, W), out.shape
    assert bool(jnp.all(jnp.isfinite(out)))

    # Numerical sanity check against a pure-JAX f32 reference (tolerances sized for the
    # intentional bf16 matmul inputs / bf16 intermediate activations in the kernels).
    ref = jax.jit(reference_forward)(hid, enc1, params)
    diff = out - ref
    rel = jnp.linalg.norm(diff.ravel()) / (jnp.linalg.norm(ref.ravel()) + 1e-12)
    max_abs = jnp.max(jnp.abs(diff))
    assert float(rel) < 8e-2 and float(max_abs) < 0.35, (float(rel), float(max_abs))

    print("KERNEL_OK")
</pallas_src>

<mosaic_0001>
module attributes {stable_mosaic.version = 11 : i64} {
  func.func @_convT3x3_s2_gn_lrelu_kernel(%arg0: i32, %arg1: memref<1x16x256xbf16, #tpu.memory_space<vmem>>, %arg2: memref<64x64xbf16, #tpu.memory_space<vmem>>, %arg3: memref<16x1xf32, #tpu.memory_space<vmem>>, %arg4: memref<16x1xf32, #tpu.memory_space<vmem>>, %arg5: memref<16x1xf32, #tpu.memory_space<vmem>>, %arg6: memref<1x64x256xbf16, #tpu.memory_space<vmem>>) attributes {dimension_semantics = [#tpu.dimension_semantics<parallel>], iteration_bounds = array<i64: 2>, scalar_prefetch = 0 : i64, scratch_operands = 0 : i64, tpu.core_type = #tpu.core_type<tc>, window_params = [{transform_indices = @transform_0, window_bounds = array<i64: 1, 16, 256>}, {pipeline_mode = #tpu.pipeline_mode<synchronous>, transform_indices = @transform_1, window_bounds = array<i64: 64, 64>}, {pipeline_mode = #tpu.pipeline_mode<synchronous>, transform_indices = @transform_2, window_bounds = array<i64: 16, 1>}, {pipeline_mode = #tpu.pipeline_mode<synchronous>, transform_indices = @transform_3, window_bounds = array<i64: 16, 1>}, {pipeline_mode = #tpu.pipeline_mode<synchronous>, transform_indices = @transform_4, window_bounds = array<i64: 16, 1>}, {transform_indices = @transform_5, window_bounds = array<i64: 1, 64, 256>}]} {
    %c0 = arith.constant 0 : index
    %c0_0 = arith.constant 0 : index
    %c0_1 = arith.constant 0 : index
    %0 = vector.load %arg1[%c0, %c0_0, %c0_1] : memref<1x16x256xbf16, #tpu.memory_space<vmem>>, vector<1x16x256xbf16>
    %1 = vector.shape_cast %0 : vector<1x16x256xbf16> to vector<16x256xbf16>
    %2 = tpu.iota {dimensions = array<i32: 1>} : vector<1x256xi32>
    %c16_i32 = arith.constant 16 : i32
    %c0_i32 = arith.constant 0 : i32
    %3 = arith.cmpi eq, %c16_i32, %c0_i32 : i32
    %c1_i32 = arith.constant 1 : i32
    %4 = arith.select %3, %c1_i32, %c16_i32 : i32
    %5 = vector.broadcast %4 : i32 to vector<1x256xi32>
    %6 = arith.remsi %2, %5 : vector<1x256xi32>
    %c0_i32_2 = arith.constant 0 : i32
    %7 = vector.broadcast %c0_i32_2 : i32 to vector<1x256xi32>
    %8 = arith.cmpi ne, %6, %7 : vector<1x256xi32>
    %c0_i32_3 = arith.constant 0 : i32
    %9 = vector.broadcast %c0_i32_3 : i32 to vector<1x256xi32>
    %10 = arith.cmpi slt, %6, %9 : vector<1x256xi32>
    %c0_i32_4 = arith.constant 0 : i32
    %11 = arith.cmpi slt, %4, %c0_i32_4 : i32
    %12 = vector.broadcast %11 : i1 to vector<1x256xi1>
    %13 = vector.broadcast %12 : vector<1x256xi1> to vector<1x256xi1>
    %14 = arith.xori %10, %13 : vector<1x256xi1>
    %15 = arith.andi %14, %8 : vector<1x256xi1>
    %16 = vector.broadcast %4 : i32 to vector<1x256xi32>
    %17 = arith.addi %6, %16 : vector<1x256xi32>
    %18 = arith.select %15, %17, %6 : vector<1x256xi1>, vector<1x256xi32>
    %c15_i32 = arith.constant 15 : i32
    %19 = vector.broadcast %c15_i32 : i32 to vector<1x256xi32>
    %20 = arith.cmpi slt, %18, %19 : vector<1x256xi32>
    %21 = vector.extract_strided_slice %1 {offsets = [0, 1], sizes = [16, 255], strides = [1, 1]} : vector<16x256xbf16> to vector<16x255xbf16>
    %cst = arith.constant 0.000000e+00 : bf16
    %22 = vector.broadcast %cst : bf16 to vector<16x1xbf16>
    %23 = tpu.concatenate %21, %22 in 1 : vector<16x255xbf16>, vector<16x1xbf16> -> vector<16x256xbf16>
    %cst_5 = arith.constant 0.000000e+00 : bf16
    %24 = vector.shape_cast %20 : vector<1x256xi1> to vector<1x256xi1>
    %25 = vector.broadcast %24 : vector<1x256xi1> to vector<16x256xi1>
    %26 = vector.broadcast %cst_5 : bf16 to vector<16x256xbf16>
    %27 = arith.select %25, %23, %26 : vector<16x256xi1>, vector<16x256xbf16>
    %28 = vector.extract_strided_slice %1 {offsets = [0, 16], sizes = [16, 240], strides = [1, 1]} : vector<16x256xbf16> to vector<16x240xbf16>
    %cst_6 = arith.constant 0.000000e+00 : bf16
    %29 = vector.broadcast %cst_6 : bf16 to vector<16x16xbf16>
    %30 = tpu.concatenate %28, %29 in 1 : vector<16x240xbf16>, vector<16x16xbf16> -> vector<16x256xbf16>
    %31 = vector.extract_strided_slice %1 {offsets = [0, 17], sizes = [16, 239], strides = [1, 1]} : vector<16x256xbf16> to vector<16x239xbf16>
    %cst_7 = arith.constant 0.000000e+00 : bf16
    %32 = vector.broadcast %cst_7 : bf16 to vector<16x17xbf16>
    %33 = tpu.concatenate %31, %32 in 1 : vector<16x239xbf16>, vector<16x17xbf16> -> vector<16x256xbf16>
    %cst_8 = arith.constant 0.000000e+00 : bf16
    %34 = vector.shape_cast %20 : vector<1x256xi1> to vector<1x256xi1>
    %35 = vector.broadcast %34 : vector<1x256xi1> to vector<16x256xi1>
    %36 = vector.broadcast %cst_8 : bf16 to vector<16x256xbf16>
    %37 = arith.select %35, %33, %36 : vector<16x256xi1>, vector<16x256xbf16>
    %38 = tpu.concatenate %1, %27, %30, %37 in 0 : vector<16x256xbf16>, vector<16x256xbf16>, vector<16x256xbf16>, vector<16x256xbf16> -> vector<64x256xbf16>
    %c0_9 = arith.constant 0 : index
    %c0_10 = arith.constant 0 : index
    %39 = vector.load %arg3[%c0_9, %c0_10] : memref<16x1xf32, #tpu.memory_space<vmem>>, vector<16x1xf32>
    %40 = tpu.concatenate %39, %39, %39, %39 in 0 : vector<16x1xf32>, vector<16x1xf32>, vector<16x1xf32>, vector<16x1xf32> -> vector<64x1xf32>
    %c0_11 = arith.constant 0 : index
    %c0_12 = arith.constant 0 : index
    %41 = vector.load %arg2[%c0_11, %c0_12] : memref<64x64xbf16, #tpu.memory_space<vmem>>, vector<64x64xbf16>
    %cst_13 = arith.constant dense<0.000000e+00> : vector<64x256xf32>
    %42 = tpu.matmul %41, %38, %cst_13 {dimension_numbers = #tpu.dot_dimension_numbers<[1], [0], [0], [1], [0, 0, 1, 1], [], []>} : vector<64x64xbf16>, vector<64x256xbf16>, vector<64x256xf32> -> vector<64x256xf32>
    %43 = vector.broadcast %40 : vector<64x1xf32> to vector<64x256xf32>
    %44 = arith.addf %42, %43 : vector<64x256xf32>
    %45 = vector.extract_strided_slice %44 {offsets = [0, 0], sizes = [16, 256], strides = [1, 1]} : vector<64x256xf32> to vector<16x256xf32>
    %46 = vector.extract_strided_slice %44 {offsets = [16, 0], sizes = [16, 256], strides = [1, 1]} : vector<64x256xf32> to vector<16x256xf32>
    %47 = vector.extract_strided_slice %44 {offsets = [32, 0], sizes = [16, 256], strides = [1, 1]} : vector<64x256xf32> to vector<16x256xf32>
    %48 = vector.extract_strided_slice %44 {offsets = [48, 0], sizes = [16, 256], strides = [1, 1]} : vector<64x256xf32> to vector<16x256xf32>
    %c0_14 = arith.constant 0 : index
    %c0_15 = arith.constant 0 : index
    %49 = vector.load %arg4[%c0_14, %c0_15] : memref<16x1xf32, #tpu.memory_space<vmem>>, vector<16x1xf32>
    %c0_16 = arith.constant 0 : index
    %c0_17 = arith.constant 0 : index
    %50 = vector.load %arg5[%c0_16, %c0_17] : memref<16x1xf32, #tpu.memory_space<vmem>>, vector<16x1xf32>
    %cst_18 = arith.constant dense<0.000000e+00> : vector<16xf32>
    %51 = vector.multi_reduction <add>, %45, %cst_18 [1] : vector<16x256xf32> to vector<16xf32>
    %52 = vector.shape_cast %51 : vector<16xf32> to vector<16x1xf32>
    %53 = arith.mulf %45, %45 : vector<16x256xf32>
    %cst_19 = arith.constant dense<0.000000e+00> : vector<16xf32>
    %54 = vector.multi_reduction <add>, %53, %cst_19 [1] : vector<16x256xf32> to vector<16xf32>
    %55 = vector.shape_cast %54 : vector<16xf32> to vector<16x1xf32>
    %cst_20 = arith.constant dense<0.000000e+00> : vector<16xf32>
    %56 = vector.multi_reduction <add>, %46, %cst_20 [1] : vector<16x256xf32> to vector<16xf32>
    %57 = vector.shape_cast %56 : vector<16xf32> to vector<16x1xf32>
    %58 = arith.addf %52, %57 : vector<16x1xf32>
    %59 = arith.mulf %46, %46 : vector<16x256xf32>
    %cst_21 = arith.constant dense<0.000000e+00> : vector<16xf32>
    %60 = vector.multi_reduction <add>, %59, %cst_21 [1] : vector<16x256xf32> to vector<16xf32>
    %61 = vector.shape_cast %60 : vector<16xf32> to vector<16x1xf32>
    %62 = arith.addf %55, %61 : vector<16x1xf32>
    %cst_22 = arith.constant dense<0.000000e+00> : vector<16xf32>
    %63 = vector.multi_reduction <add>, %47, %cst_22 [1] : vector<16x256xf32> to vector<16xf32>
    %64 = vector.shape_cast %63 : vector<16xf32> to vector<16x1xf32>
    %65 = arith.addf %58, %64 : vector<16x1xf32>
    %66 = arith.mulf %47, %47 : vector<16x256xf32>
    %cst_23 = arith.constant dense<0.000000e+00> : vector<16xf32>
    %67 = vector.multi_reduction <add>, %66, %cst_23 [1] : vector<16x256xf32> to vector<16xf32>
    %68 = vector.shape_cast %67 : vector<16xf32> to vector<16x1xf32>
    %69 = arith.addf %62, %68 : vector<16x1xf32>
    %cst_24 = arith.constant dense<0.000000e+00> : vector<16xf32>
    %70 = vector.multi_reduction <add>, %48, %cst_24 [1] : vector<16x256xf32> to vector<16xf32>
    %71 = vector.shape_cast %70 : vector<16xf32> to vector<16x1xf32>
    %72 = arith.addf %65, %71 : vector<16x1xf32>
    %73 = arith.mulf %48, %48 : vector<16x256xf32>
    %cst_25 = arith.constant dense<0.000000e+00> : vector<16xf32>
    %74 = vector.multi_reduction <add>, %73, %cst_25 [1] : vector<16x256xf32> to vector<16xf32>
    %75 = vector.shape_cast %74 : vector<16xf32> to vector<16x1xf32>
    %76 = arith.addf %69, %75 : vector<16x1xf32>
    %77 = vector.extract_strided_slice %72 {offsets = [0, 0], sizes = [8, 1], strides = [1, 1]} : vector<16x1xf32> to vector<8x1xf32>
    %78 = vector.shape_cast %77 : vector<8x1xf32> to vector<1x8x1xf32>
    %cst_26 = arith.constant dense<0.000000e+00> : vector<1xf32>
    %79 = vector.multi_reduction <add>, %78, %cst_26 [1, 2] : vector<1x8x1xf32> to vector<1xf32>
    %80 = vector.shape_cast %79 : vector<1xf32> to vector<1x1x1xf32>
    %81 = vector.extract %80[0, 0, 0] : f32 from vector<1x1x1xf32>
    %cst_27 = arith.constant 1.22070313E-4 : f32
    %82 = arith.mulf %81, %cst_27 : f32
    %83 = vector.extract_strided_slice %72 {offsets = [8, 0], sizes = [8, 1], strides = [1, 1]} : vector<16x1xf32> to vector<8x1xf32>
    %84 = vector.shape_cast %83 : vector<8x1xf32> to vector<1x8x1xf32>
    %cst_28 = arith.constant dense<0.000000e+00> : vector<1xf32>
    %85 = vector.multi_reduction <add>, %84, %cst_28 [1, 2] : vector<1x8x1xf32> to vector<1xf32>
    %86 = vector.shape_cast %85 : vector<1xf32> to vector<1x1x1xf32>
    %87 = vector.extract %86[0, 0, 0] : f32 from vector<1x1x1xf32>
    %cst_29 = arith.constant 1.22070313E-4 : f32
    %88 = arith.mulf %87, %cst_29 : f32
    %89 = vector.extract_strided_slice %76 {offsets = [0, 0], sizes = [8, 1], strides = [1, 1]} : vector<16x1xf32> to vector<8x1xf32>
    %90 = vector.shape_cast %89 : vector<8x1xf32> to vector<1x8x1xf32>
    %cst_30 = arith.constant dense<0.000000e+00> : vector<1xf32>
    %91 = vector.multi_reduction <add>, %90, %cst_30 [1, 2] : vector<1x8x1xf32> to vector<1xf32>
    %92 = vector.shape_cast %91 : vector<1xf32> to vector<1x1x1xf32>
    %93 = vector.extract %92[0, 0, 0] : f32 from vector<1x1x1xf32>
    %cst_31 = arith.constant 1.22070313E-4 : f32
    %94 = arith.mulf %93, %cst_31 : f32
    %95 = arith.mulf %82, %82 : f32
    %96 = arith.subf %94, %95 : f32
    %97 = vector.extract_strided_slice %76 {offsets = [8, 0], sizes = [8, 1], strides = [1, 1]} : vector<16x1xf32> to vector<8x1xf32>
    %98 = vector.shape_cast %97 : vector<8x1xf32> to vector<1x8x1xf32>
    %cst_32 = arith.constant dense<0.000000e+00> : vector<1xf32>
    %99 = vector.multi_reduction <add>, %98, %cst_32 [1, 2] : vector<1x8x1xf32> to vector<1xf32>
    %100 = vector.shape_cast %99 : vector<1xf32> to vector<1x1x1xf32>
    %101 = vector.extract %100[0, 0, 0] : f32 from vector<1x1x1xf32>
    %cst_33 = arith.constant 1.22070313E-4 : f32
    %102 = arith.mulf %101, %cst_33 : f32
    %103 = arith.mulf %88, %88 : f32
    %104 = arith.subf %102, %103 : f32
    %cst_34 = arith.constant 9.99999974E-6 : f32
    %105 = arith.addf %96, %cst_34 : f32
    %106 = math.rsqrt %105 : f32
    %cst_35 = arith.constant 9.99999974E-6 : f32
    %107 = arith.addf %104, %cst_35 : f32
    %108 = math.rsqrt %107 : f32
    %109 = vector.broadcast %106 : f32 to vector<8x1xf32>
    %110 = vector.broadcast %108 : f32 to vector<8x1xf32>
    %111 = tpu.concatenate %109, %110 in 0 : vector<8x1xf32>, vector<8x1xf32> -> vector<16x1xf32>
    %112 = vector.broadcast %82 : f32 to vector<8x1xf32>
    %113 = vector.broadcast %88 : f32 to vector<8x1xf32>
    %114 = tpu.concatenate %112, %113 in 0 : vector<8x1xf32>, vector<8x1xf32> -> vector<16x1xf32>
    %115 = arith.mulf %49, %111 : vector<16x1xf32>
    %116 = arith.mulf %114, %115 : vector<16x1xf32>
    %117 = arith.subf %50, %116 : vector<16x1xf32>
    %118 = tpu.concatenate %115, %115, %115, %115 in 0 : vector<16x1xf32>, vector<16x1xf32>, vector<16x1xf32>, vector<16x1xf32> -> vector<64x1xf32>
    %119 = tpu.concatenate %117, %117, %117, %117 in 0 : vector<16x1xf32>, vector<16x1xf32>, vector<16x1xf32>, vector<16x1xf32> -> vector<64x1xf32>
    %120 = vector.broadcast %118 : vector<64x1xf32> to vector<64x256xf32>
    %121 = arith.mulf %44, %120 : vector<64x256xf32>
    %122 = vector.broadcast %119 : vector<64x1xf32> to vector<64x256xf32>
    %123 = arith.addf %121, %122 : vector<64x256xf32>
    %cst_36 = arith.constant 2.000000e-01 : f32
    %124 = vector.broadcast %cst_36 : f32 to vector<64x256xf32>
    %125 = arith.mulf %124, %123 : vector<64x256xf32>
    %126 = arith.maximumf %123, %125 : vector<64x256xf32>
    %127 = arith.truncf %126 : vector<64x256xf32> to vector<64x256xbf16>
    %c0_37 = arith.constant 0 : index
    %c0_38 = arith.constant 0 : index
    %c0_39 = arith.constant 0 : index
    %128 = vector.load %arg6[%c0_37, %c0_38, %c0_39] : memref<1x64x256xbf16, #tpu.memory_space<vmem>>, vector<1x64x256xbf16>
    %129 = vector.shape_cast %128 : vector<1x64x256xbf16> to vector<64x256xbf16>
    %130 = vector.shape_cast %127 : vector<64x256xbf16> to vector<1x64x256xbf16>
    tpu.vector_store %arg6[%c0_37, %c0_38, %c0_39], %130 {strides = array<i32>} : memref<1x64x256xbf16, #tpu.memory_space<vmem>>, vector<1x64x256xbf16>,
    return
  }
  func.func @transform_0(%arg0: i32) -> (i32, i32, i32) {
    %c0_i32 = arith.constant 0 : i32
    %c0_i32_0 = arith.constant 0 : i32
    %c0_i32_1 = arith.constant 0 : i32
    return %arg0, %c0_i32, %c0_i32_0 : i32, i32, i32
  }
  func.func @transform_1(%arg0: i32) -> (i32, i32) {
    %c0_i32 = arith.constant 0 : i32
    %c0_i32_0 = arith.constant 0 : i32
    %c0_i32_1 = arith.constant 0 : i32
    return %c0_i32, %c0_i32_0 : i32, i32
  }
  func.func @transform_2(%arg0: i32) -> (i32, i32) {
    %c0_i32 = arith.constant 0 : i32
    %c0_i32_0 = arith.constant 0 : i32
    %c0_i32_1 = arith.constant 0 : i32
    return %c0_i32, %c0_i32_0 : i32, i32
  }
  func.func @transform_3(%arg0: i32) -> (i32, i32) {
    %c0_i32 = arith.constant 0 : i32
    %c0_i32_0 = arith.constant 0 : i32
    %c0_i32_1 = arith.constant 0 : i32
    return %c0_i32, %c0_i32_0 : i32, i32
  }
  func.func @transform_4(%arg0: i32) -> (i32, i32) {
    %c0_i32 = arith.constant 0 : i32
    %c0_i32_0 = arith.constant 0 : i32
    %c0_i32_1 = arith.constant 0 : i32
    return %c0_i32, %c0_i32_0 : i32, i32
  }
  func.func @transform_5(%arg0: i32) -> (i32, i32, i32) {
    %c0_i32 = arith.constant 0 : i32
    %c0_i32_0 = arith.constant 0 : i32
    %c0_i32_1 = arith.constant 0 : i32
    return %arg0, %c0_i32, %c0_i32_0 : i32, i32, i32
  }
}

module attributes {stable_mosaic.version = 11 : i64} {
  func.func @_convT3x3_s2_gn_lrelu_kernel(%arg0: i32, %arg1: memref<1x16x1024xbf16, #tpu.memory_space<vmem>>, %arg2: memref<64x64xbf16, #tpu.memory_space<vmem>>, %arg3: memref<16x1xf32, #tpu.memory_space<vmem>>, %arg4: memref<16x1xf32, #tpu.memory_space<vmem>>, %arg5: memref<16x1xf32, #tpu.memory_space<vmem>>, %arg6: memref<1x64x1024xbf16, #tpu.memory_space<vmem>>) attributes {dimension_semantics = [#tpu.dimension_semantics<parallel>], iteration_bounds = array<i64: 2>, scalar_prefetch = 0 : i64, scratch_operands = 0 : i64, tpu.core_type = #tpu.core_type<tc>, window_params = [{transform_indices = @transform_0, window_bounds = array<i64: 1, 16, 1024>}, {pipeline_mode = #tpu.pipeline_mode<synchronous>, transform_indices = @transform_1, window_bounds = array<i64: 64, 64>}, {pipeline_mode = #tpu.pipeline_mode<synchronous>, transform_indices = @transform_2, window_bounds = array<i64: 16, 1>}, {pipeline_mode = #tpu.pipeline_mode<synchronous>, transform_indices = @transform_3, window_bounds = array<i64: 16, 1>}, {pipeline_mode = #tpu.pipeline_mode<synchronous>, transform_indices = @transform_4, window_bounds = array<i64: 16, 1>}, {transform_indices = @transform_5, window_bounds = array<i64: 1, 64, 1024>}]} {
    %c0 = arith.constant 0 : index
    %c0_0 = arith.constant 0 : index
    %c0_1 = arith.constant 0 : index
    %0 = vector.load %arg1[%c0, %c0_0, %c0_1] : memref<1x16x1024xbf16, #tpu.memory_space<vmem>>, vector<1x16x1024xbf16>
    %1 = vector.shape_cast %0 : vector<1x16x1024xbf16> to vector<16x1024xbf16>
    %2 = tpu.iota {dimensions = array<i32: 1>} : vector<1x1024xi32>
    %c32_i32 = arith.constant 32 : i32
    %c0_i32 = arith.constant 0 : i32
    %3 = arith.cmpi eq, %c32_i32, %c0_i32 : i32
    %c1_i32 = arith.constant 1 : i32
    %4 = arith.select %3, %c1_i32, %c32_i32 : i32
    %5 = vector.broadcast %4 : i32 to vector<1x1024xi32>
    %6 = arith.remsi %2, %5 : vector<1x1024xi32>
    %c0_i32_2 = arith.constant 0 : i32
    %7 = vector.broadcast %c0_i32_2 : i32 to vector<1x1024xi32>
    %8 = arith.cmpi ne, %6, %7 : vector<1x1024xi32>
    %c0_i32_3 = arith.constant 0 : i32
    %9 = vector.broadcast %c0_i32_3 : i32 to vector<1x1024xi32>
    %10 = arith.cmpi slt, %6, %9 : vector<1x1024xi32>
    %c0_i32_4 = arith.constant 0 : i32
    %11 = arith.cmpi slt, %4, %c0_i32_4 : i32
    %12 = vector.broadcast %11 : i1 to vector<1x1024xi1>
    %13 = vector.broadcast %12 : vector<1x1024xi1> to vector<1x1024xi1>
    %14 = arith.xori %10, %13 : vector<1x1024xi1>
    %15 = arith.andi %14, %8 : vector<1x1024xi1>
    %16 = vector.broadcast %4 : i32 to vector<1x1024xi32>
    %17 = arith.addi %6, %16 : vector<1x1024xi32>
    %18 = arith.select %15, %17, %6 : vector<1x1024xi1>, vector<1x1024xi32>
    %c31_i32 = arith.constant 31 : i32
    %19 = vector.broadcast %c31_i32 : i32 to vector<1x1024xi32>
    %20 = arith.cmpi slt, %18, %19 : vector<1x1024xi32>
    %21 = vector.extract_strided_slice %1 {offsets = [0, 1], sizes = [16, 1023], strides = [1, 1]} : vector<16x1024xbf16> to vector<16x1023xbf16>
    %cst = arith.constant 0.000000e+00 : bf16
    %22 = vector.broadcast %cst : bf16 to vector<16x1xbf16>
    %23 = tpu.concatenate %21, %22 in 1 : vector<16x1023xbf16>, vector<16x1xbf16> -> vector<16x1024xbf16>
    %cst_5 = arith.constant 0.000000e+00 : bf16
    %24 = vector.shape_cast %20 : vector<1x1024xi1> to vector<1x1024xi1>
    %25 = vector.broadcast %24 : vector<1x1024xi1> to vector<16x1024xi1>
    %26 = vector.broadcast %cst_5 : bf16 to vector<16x1024xbf16>
    %27 = arith.select %25, %23, %26 : vector<16x1024xi1>, vector<16x1024xbf16>
    %28 = vector.extract_strided_slice %1 {offsets = [0, 32], sizes = [16, 992], strides = [1, 1]} : vector<16x1024xbf16> to vector<16x992xbf16>
    %cst_6 = arith.constant 0.000000e+00 : bf16
    %29 = vector.broadcast %cst_6 : bf16 to vector<16x32xbf16>
    %30 = tpu.concatenate %28, %29 in 1 : vector<16x992xbf16>, vector<16x32xbf16> -> vector<16x1024xbf16>
    %31 = vector.extract_strided_slice %1 {offsets = [0, 33], sizes = [16, 991], strides = [1, 1]} : vector<16x1024xbf16> to vector<16x991xbf16>
    %cst_7 = arith.constant 0.000000e+00 : bf16
    %32 = vector.broadcast %cst_7 : bf16 to vector<16x33xbf16>
    %33 = tpu.concatenate %31, %32 in 1 : vector<16x991xbf16>, vector<16x33xbf16> -> vector<16x1024xbf16>
    %cst_8 = arith.constant 0.000000e+00 : bf16
    %34 = vector.shape_cast %20 : vector<1x1024xi1> to vector<1x1024xi1>
    %35 = vector.broadcast %34 : vector<1x1024xi1> to vector<16x1024xi1>
    %36 = vector.broadcast %cst_8 : bf16 to vector<16x1024xbf16>
    %37 = arith.select %35, %33, %36 : vector<16x1024xi1>, vector<16x1024xbf16>
    %38 = tpu.concatenate %1, %27, %30, %37 in 0 : vector<16x1024xbf16>, vector<16x1024xbf16>, vector<16x1024xbf16>, vector<16x1024xbf16> -> vector<64x1024xbf16>
    %c0_9 = arith.constant 0 : index
    %c0_10 = arith.constant 0 : index
    %39 = vector.load %arg3[%c0_9, %c0_10] : memref<16x1xf32, #tpu.memory_space<vmem>>, vector<16x1xf32>
    %40 = tpu.concatenate %39, %39, %39, %39 in 0 : vector<16x1xf32>, vector<16x1xf32>, vector<16x1xf32>, vector<16x1xf32> -> vector<64x1xf32>
    %c0_11 = arith.constant 0 : index
    %c0_12 = arith.constant 0 : index
    %41 = vector.load %arg2[%c0_11, %c0_12] : memref<64x64xbf16, #tpu.memory_space<vmem>>, vector<64x64xbf16>
    %cst_13 = arith.constant dense<0.000000e+00> : vector<64x1024xf32>
    %42 = tpu.matmul %41, %38, %cst_13 {dimension_numbers = #tpu.dot_dimension_numbers<[1], [0], [0], [1], [0, 0, 1, 1], [], []>} : vector<64x64xbf16>, vector<64x1024xbf16>, vector<64x1024xf32> -> vector<64x1024xf32>
    %43 = vector.broadcast %40 : vector<64x1xf32> to vector<64x1024xf32>
    %44 = arith.addf %42, %43 : vector<64x1024xf32>
    %45 = vector.extract_strided_slice %44 {offsets = [0, 0], sizes = [16, 1024], strides = [1, 1]} : vector<64x1024xf32> to vector<16x1024xf32>
    %46 = vector.extract_strided_slice %44 {offsets = [16, 0], sizes = [16, 1024], strides = [1, 1]} : vector<64x1024xf32> to vector<16x1024xf32>
    %47 = vector.extract_strided_slice %44 {offsets = [32, 0], sizes = [16, 1024], strides = [1, 1]} : vector<64x1024xf32> to vector<16x1024xf32>
    %48 = vector.extract_strided_slice %44 {offsets = [48, 0], sizes = [16, 1024], strides = [1, 1]} : vector<64x1024xf32> to vector<16x1024xf32>
    %c0_14 = arith.constant 0 : index
    %c0_15 = arith.constant 0 : index
    %49 = vector.load %arg4[%c0_14, %c0_15] : memref<16x1xf32, #tpu.memory_space<vmem>>, vector<16x1xf32>
    %c0_16 = arith.constant 0 : index
    %c0_17 = arith.constant 0 : index
    %50 = vector.load %arg5[%c0_16, %c0_17] : memref<16x1xf32, #tpu.memory_space<vmem>>, vector<16x1xf32>
    %cst_18 = arith.constant dense<0.000000e+00> : vector<16xf32>
    %51 = vector.multi_reduction <add>, %45, %cst_18 [1] : vector<16x1024xf32> to vector<16xf32>
    %52 = vector.shape_cast %51 : vector<16xf32> to vector<16x1xf32>
    %53 = arith.mulf %45, %45 : vector<16x1024xf32>
    %cst_19 = arith.constant dense<0.000000e+00> : vector<16xf32>
    %54 = vector.multi_reduction <add>, %53, %cst_19 [1] : vector<16x1024xf32> to vector<16xf32>
    %55 = vector.shape_cast %54 : vector<16xf32> to vector<16x1xf32>
    %cst_20 = arith.constant dense<0.000000e+00> : vector<16xf32>
    %56 = vector.multi_reduction <add>, %46, %cst_20 [1] : vector<16x1024xf32> to vector<16xf32>
    %57 = vector.shape_cast %56 : vector<16xf32> to vector<16x1xf32>
    %58 = arith.addf %52, %57 : vector<16x1xf32>
    %59 = arith.mulf %46, %46 : vector<16x1024xf32>
    %cst_21 = arith.constant dense<0.000000e+00> : vector<16xf32>
    %60 = vector.multi_reduction <add>, %59, %cst_21 [1] : vector<16x1024xf32> to vector<16xf32>
    %61 = vector.shape_cast %60 : vector<16xf32> to vector<16x1xf32>
    %62 = arith.addf %55, %61 : vector<16x1xf32>
    %cst_22 = arith.constant dense<0.000000e+00> : vector<16xf32>
    %63 = vector.multi_reduction <add>, %47, %cst_22 [1] : vector<16x1024xf32> to vector<16xf32>
    %64 = vector.shape_cast %63 : vector<16xf32> to vector<16x1xf32>
    %65 = arith.addf %58, %64 : vector<16x1xf32>
    %66 = arith.mulf %47, %47 : vector<16x1024xf32>
    %cst_23 = arith.constant dense<0.000000e+00> : vector<16xf32>
    %67 = vector.multi_reduction <add>, %66, %cst_23 [1] : vector<16x1024xf32> to vector<16xf32>
    %68 = vector.shape_cast %67 : vector<16xf32> to vector<16x1xf32>
    %69 = arith.addf %62, %68 : vector<16x1xf32>
    %cst_24 = arith.constant dense<0.000000e+00> : vector<16xf32>
    %70 = vector.multi_reduction <add>, %48, %cst_24 [1] : vector<16x1024xf32> to vector<16xf32>
    %71 = vector.shape_cast %70 : vector<16xf32> to vector<16x1xf32>
    %72 = arith.addf %65, %71 : vector<16x1xf32>
    %73 = arith.mulf %48, %48 : vector<16x1024xf32>
    %cst_25 = arith.constant dense<0.000000e+00> : vector<16xf32>
    %74 = vector.multi_reduction <add>, %73, %cst_25 [1] : vector<16x1024xf32> to vector<16xf32>
    %75 = vector.shape_cast %74 : vector<16xf32> to vector<16x1xf32>
    %76 = arith.addf %69, %75 : vector<16x1xf32>
    %77 = vector.extract_strided_slice %72 {offsets = [0, 0], sizes = [8, 1], strides = [1, 1]} : vector<16x1xf32> to vector<8x1xf32>
    %78 = vector.shape_cast %77 : vector<8x1xf32> to vector<1x8x1xf32>
    %cst_26 = arith.constant dense<0.000000e+00> : vector<1xf32>
    %79 = vector.multi_reduction <add>, %78, %cst_26 [1, 2] : vector<1x8x1xf32> to vector<1xf32>
    %80 = vector.shape_cast %79 : vector<1xf32> to vector<1x1x1xf32>
    %81 = vector.extract %80[0, 0, 0] : f32 from vector<1x1x1xf32>
    %cst_27 = arith.constant 3.05175781E-5 : f32
    %82 = arith.mulf %81, %cst_27 : f32
    %83 = vector.extract_strided_slice %72 {offsets = [8, 0], sizes = [8, 1], strides = [1, 1]} : vector<16x1xf32> to vector<8x1xf32>
    %84 = vector.shape_cast %83 : vector<8x1xf32> to vector<1x8x1xf32>
    %cst_28 = arith.constant dense<0.000000e+00> : vector<1xf32>
    %85 = vector.multi_reduction <add>, %84, %cst_28 [1, 2] : vector<1x8x1xf32> to vector<1xf32>
    %86 = vector.shape_cast %85 : vector<1xf32> to vector<1x1x1xf32>
    %87 = vector.extract %86[0, 0, 0] : f32 from vector<1x1x1xf32>
    %cst_29 = arith.constant 3.05175781E-5 : f32
    %88 = arith.mulf %87, %cst_29 : f32
    %89 = vector.extract_strided_slice %76 {offsets = [0, 0], sizes = [8, 1], strides = [1, 1]} : vector<16x1xf32> to vector<8x1xf32>
    %90 = vector.shape_cast %89 : vector<8x1xf32> to vector<1x8x1xf32>
    %cst_30 = arith.constant dense<0.000000e+00> : vector<1xf32>
    %91 = vector.multi_reduction <add>, %90, %cst_30 [1, 2] : vector<1x8x1xf32> to vector<1xf32>
    %92 = vector.shape_cast %91 : vector<1xf32> to vector<1x1x1xf32>
    %93 = vector.extract %92[0, 0, 0] : f32 from vector<1x1x1xf32>
    %cst_31 = arith.constant 3.05175781E-5 : f32
    %94 = arith.mulf %93, %cst_31 : f32
    %95 = arith.mulf %82, %82 : f32
    %96 = arith.subf %94, %95 : f32
    %97 = vector.extract_strided_slice %76 {offsets = [8, 0], sizes = [8, 1], strides = [1, 1]} : vector<16x1xf32> to vector<8x1xf32>
    %98 = vector.shape_cast %97 : vector<8x1xf32> to vector<1x8x1xf32>
    %cst_32 = arith.constant dense<0.000000e+00> : vector<1xf32>
    %99 = vector.multi_reduction <add>, %98, %cst_32 [1, 2] : vector<1x8x1xf32> to vector<1xf32>
    %100 = vector.shape_cast %99 : vector<1xf32> to vector<1x1x1xf32>
    %101 = vector.extract %100[0, 0, 0] : f32 from vector<1x1x1xf32>
    %cst_33 = arith.constant 3.05175781E-5 : f32
    %102 = arith.mulf %101, %cst_33 : f32
    %103 = arith.mulf %88, %88 : f32
    %104 = arith.subf %102, %103 : f32
    %cst_34 = arith.constant 9.99999974E-6 : f32
    %105 = arith.addf %96, %cst_34 : f32
    %106 = math.rsqrt %105 : f32
    %cst_35 = arith.constant 9.99999974E-6 : f32
    %107 = arith.addf %104, %cst_35 : f32
    %108 = math.rsqrt %107 : f32
    %109 = vector.broadcast %106 : f32 to vector<8x1xf32>
    %110 = vector.broadcast %108 : f32 to vector<8x1xf32>
    %111 = tpu.concatenate %109, %110 in 0 : vector<8x1xf32>, vector<8x1xf32> -> vector<16x1xf32>
    %112 = vector.broadcast %82 : f32 to vector<8x1xf32>
    %113 = vector.broadcast %88 : f32 to vector<8x1xf32>
    %114 = tpu.concatenate %112, %113 in 0 : vector<8x1xf32>, vector<8x1xf32> -> vector<16x1xf32>
    %115 = arith.mulf %49, %111 : vector<16x1xf32>
    %116 = arith.mulf %114, %115 : vector<16x1xf32>
    %117 = arith.subf %50, %116 : vector<16x1xf32>
    %118 = tpu.concatenate %115, %115, %115, %115 in 0 : vector<16x1xf32>, vector<16x1xf32>, vector<16x1xf32>, vector<16x1xf32> -> vector<64x1xf32>
    %119 = tpu.concatenate %117, %117, %117, %117 in 0 : vector<16x1xf32>, vector<16x1xf32>, vector<16x1xf32>, vector<16x1xf32> -> vector<64x1xf32>
    %120 = vector.broadcast %118 : vector<64x1xf32> to vector<64x1024xf32>
    %121 = arith.mulf %44, %120 : vector<64x1024xf32>
    %122 = vector.broadcast %119 : vector<64x1xf32> to vector<64x1024xf32>
    %123 = arith.addf %121, %122 : vector<64x1024xf32>
    %cst_36 = arith.constant 2.000000e-01 : f32
    %124 = vector.broadcast %cst_36 : f32 to vector<64x1024xf32>
    %125 = arith.mulf %124, %123 : vector<64x1024xf32>
    %126 = arith.maximumf %123, %125 : vector<64x1024xf32>
    %127 = arith.truncf %126 : vector<64x1024xf32> to vector<64x1024xbf16>
    %c0_37 = arith.constant 0 : index
    %c0_38 = arith.constant 0 : index
    %c0_39 = arith.constant 0 : index
    %128 = vector.load %arg6[%c0_37, %c0_38, %c0_39] : memref<1x64x1024xbf16, #tpu.memory_space<vmem>>, vector<1x64x1024xbf16>
    %129 = vector.shape_cast %128 : vector<1x64x1024xbf16> to vector<64x1024xbf16>
    %130 = vector.shape_cast %127 : vector<64x1024xbf16> to vector<1x64x1024xbf16>
    tpu.vector_store %arg6[%c0_37, %c0_38, %c0_39], %130 {strides = array<i32>} : memref<1x64x1024xbf16, #tpu.memory_space<vmem>>, vector<1x64x1024xbf16>,
    return
  }
  func.func @transform_0(%arg0: i32) -> (i32, i32, i32) {
    %c0_i32 = arith.constant 0 : i32
    %c0_i32_0 = arith.constant 0 : i32
    %c0_i32_1 = arith.constant 0 : i32
    return %arg0, %c0_i32, %c0_i32_0 : i32, i32, i32
  }
  func.func @transform_1(%arg0: i32) -> (i32, i32) {
    %c0_i32 = arith.constant 0 : i32
    %c0_i32_0 = arith.constant 0 : i32
    %c0_i32_1 = arith.constant 0 : i32
    return %c0_i32, %c0_i32_0 : i32, i32
  }
  func.func @transform_2(%arg0: i32) -> (i32, i32) {
    %c0_i32 = arith.constant 0 : i32
    %c0_i32_0 = arith.constant 0 : i32
    %c0_i32_1 = arith.constant 0 : i32
    return %c0_i32, %c0_i32_0 : i32, i32
  }
  func.func @transform_3(%arg0: i32) -> (i32, i32) {
    %c0_i32 = arith.constant 0 : i32
    %c0_i32_0 = arith.constant 0 : i32
    %c0_i32_1 = arith.constant 0 : i32
    return %c0_i32, %c0_i32_0 : i32, i32
  }
  func.func @transform_4(%arg0: i32) -> (i32, i32) {
    %c0_i32 = arith.constant 0 : i32
    %c0_i32_0 = arith.constant 0 : i32
    %c0_i32_1 = arith.constant 0 : i32
    return %c0_i32, %c0_i32_0 : i32, i32
  }
  func.func @transform_5(%arg0: i32) -> (i32, i32, i32) {
    %c0_i32 = arith.constant 0 : i32
    %c0_i32_0 = arith.constant 0 : i32
    %c0_i32_1 = arith.constant 0 : i32
    return %arg0, %c0_i32, %c0_i32_0 : i32, i32, i32
  }
}

module attributes {stable_mosaic.version = 11 : i64} {
  func.func @_conv3x3_gn_lrelu_kernel(%arg0: i32, %arg1: memref<1x16x1024xbf16, #tpu.memory_space<vmem>>, %arg2: memref<16x144xbf16, #tpu.memory_space<vmem>>, %arg3: memref<16x1xf32, #tpu.memory_space<vmem>>, %arg4: memref<16x1xf32, #tpu.memory_space<vmem>>, %arg5: memref<16x1xf32, #tpu.memory_space<vmem>>, %arg6: memref<1x16x1024xbf16, #tpu.memory_space<vmem>>) attributes {dimension_semantics = [#tpu.dimension_semantics<parallel>], iteration_bounds = array<i64: 2>, scalar_prefetch = 0 : i64, scratch_operands = 0 : i64, tpu.core_type = #tpu.core_type<tc>, window_params = [{transform_indices = @transform_0, window_bounds = array<i64: 1, 16, 1024>}, {pipeline_mode = #tpu.pipeline_mode<synchronous>, transform_indices = @transform_1, window_bounds = array<i64: 16, 144>}, {pipeline_mode = #tpu.pipeline_mode<synchronous>, transform_indices = @transform_2, window_bounds = array<i64: 16, 1>}, {pipeline_mode = #tpu.pipeline_mode<synchronous>, transform_indices = @transform_3, window_bounds = array<i64: 16, 1>}, {pipeline_mode = #tpu.pipeline_mode<synchronous>, transform_indices = @transform_4, window_bounds = array<i64: 16, 1>}, {transform_indices = @transform_5, window_bounds = array<i64: 1, 16, 1024>}]} {
    %c0 = arith.constant 0 : index
    %c0_0 = arith.constant 0 : index
    %c0_1 = arith.constant 0 : index
    %0 = vector.load %arg1[%c0, %c0_0, %c0_1] : memref<1x16x1024xbf16, #tpu.memory_space<vmem>>, vector<1x16x1024xbf16>
    %1 = vector.shape_cast %0 : vector<1x16x1024xbf16> to vector<16x1024xbf16>
    %2 = tpu.iota {dimensions = array<i32: 1>} : vector<1x1024xi32>
    %c32_i32 = arith.constant 32 : i32
    %c0_i32 = arith.constant 0 : i32
    %3 = arith.cmpi eq, %c32_i32, %c0_i32 : i32
    %c1_i32 = arith.constant 1 : i32
    %4 = arith.select %3, %c1_i32, %c32_i32 : i32
    %5 = vector.broadcast %4 : i32 to vector<1x1024xi32>
    %6 = arith.remsi %2, %5 : vector<1x1024xi32>
    %c0_i32_2 = arith.constant 0 : i32
    %7 = vector.broadcast %c0_i32_2 : i32 to vector<1x1024xi32>
    %8 = arith.cmpi ne, %6, %7 : vector<1x1024xi32>
    %c0_i32_3 = arith.constant 0 : i32
    %9 = vector.broadcast %c0_i32_3 : i32 to vector<1x1024xi32>
    %10 = arith.cmpi slt, %6, %9 : vector<1x1024xi32>
    %c0_i32_4 = arith.constant 0 : i32
    %11 = arith.cmpi slt, %4, %c0_i32_4 : i32
    %12 = vector.broadcast %11 : i1 to vector<1x1024xi1>
    %13 = vector.broadcast %12 : vector<1x1024xi1> to vector<1x1024xi1>
    %14 = arith.xori %10, %13 : vector<1x1024xi1>
    %15 = arith.andi %14, %8 : vector<1x1024xi1>
    %16 = vector.broadcast %4 : i32 to vector<1x1024xi32>
    %17 = arith.addi %6, %16 : vector<1x1024xi32>
    %18 = arith.select %15, %17, %6 : vector<1x1024xi1>, vector<1x1024xi32>
    %c0_i32_5 = arith.constant 0 : i32
    %19 = vector.broadcast %c0_i32_5 : i32 to vector<1x1024xi32>
    %20 = arith.cmpi sgt, %18, %19 : vector<1x1024xi32>
    %c31_i32 = arith.constant 31 : i32
    %21 = vector.broadcast %c31_i32 : i32 to vector<1x1024xi32>
    %22 = arith.cmpi slt, %18, %21 : vector<1x1024xi32>
    %cst = arith.constant 0.000000e+00 : bf16
    %23 = vector.broadcast %cst : bf16 to vector<16x33xbf16>
    %24 = vector.extract_strided_slice %1 {offsets = [0, 0], sizes = [16, 991], strides = [1, 1]} : vector<16x1024xbf16> to vector<16x991xbf16>
    %25 = tpu.concatenate %23, %24 in 1 : vector<16x33xbf16>, vector<16x991xbf16> -> vector<16x1024xbf16>
    %cst_6 = arith.constant 0.000000e+00 : bf16
    %26 = vector.shape_cast %20 : vector<1x1024xi1> to vector<1x1024xi1>
    %27 = vector.broadcast %26 : vector<1x1024xi1> to vector<16x1024xi1>
    %28 = vector.broadcast %cst_6 : bf16 to vector<16x1024xbf16>
    %29 = arith.select %27, %25, %28 : vector<16x1024xi1>, vector<16x1024xbf16>
    %cst_7 = arith.constant 0.000000e+00 : bf16
    %30 = vector.broadcast %cst_7 : bf16 to vector<16x32xbf16>
    %31 = vector.extract_strided_slice %1 {offsets = [0, 0], sizes = [16, 992], strides = [1, 1]} : vector<16x1024xbf16> to vector<16x992xbf16>
    %32 = tpu.concatenate %30, %31 in 1 : vector<16x32xbf16>, vector<16x992xbf16> -> vector<16x1024xbf16>
    %cst_8 = arith.constant 0.000000e+00 : bf16
    %33 = vector.broadcast %cst_8 : bf16 to vector<16x31xbf16>
    %34 = vector.extract_strided_slice %1 {offsets = [0, 0], sizes = [16, 993], strides = [1, 1]} : vector<16x1024xbf16> to vector<16x993xbf16>
    %35 = tpu.concatenate %33, %34 in 1 : vector<16x31xbf16>, vector<16x993xbf16> -> vector<16x1024xbf16>
    %cst_9 = arith.constant 0.000000e+00 : bf16
    %36 = vector.shape_cast %22 : vector<1x1024xi1> to vector<1x1024xi1>
    %37 = vector.broadcast %36 : vector<1x1024xi1> to vector<16x1024xi1>
    %38 = vector.broadcast %cst_9 : bf16 to vector<16x1024xbf16>
    %39 = arith.select %37, %35, %38 : vector<16x1024xi1>, vector<16x1024xbf16>
    %cst_10 = arith.constant 0.000000e+00 : bf16
    %40 = vector.broadcast %cst_10 : bf16 to vector<16x1xbf16>
    %41 = vector.extract_strided_slice %1 {offsets = [0, 0], sizes = [16, 1023], strides = [1, 1]} : vector<16x1024xbf16> to vector<16x1023xbf16>
    %42 = tpu.concatenate %40, %41 in 1 : vector<16x1xbf16>, vector<16x1023xbf16> -> vector<16x1024xbf16>
    %cst_11 = arith.constant 0.000000e+00 : bf16
    %43 = vector.shape_cast %20 : vector<1x1024xi1> to vector<1x1024xi1>
    %44 = vector.broadcast %43 : vector<1x1024xi1> to vector<16x1024xi1>
    %45 = vector.broadcast %cst_11 : bf16 to vector<16x1024xbf16>
    %46 = arith.select %44, %42, %45 : vector<16x1024xi1>, vector<16x1024xbf16>
    %47 = vector.extract_strided_slice %1 {offsets = [0, 1], sizes = [16, 1023], strides = [1, 1]} : vector<16x1024xbf16> to vector<16x1023xbf16>
    %cst_12 = arith.constant 0.000000e+00 : bf16
    %48 = vector.broadcast %cst_12 : bf16 to vector<16x1xbf16>
    %49 = tpu.concatenate %47, %48 in 1 : vector<16x1023xbf16>, vector<16x1xbf16> -> vector<16x1024xbf16>
    %cst_13 = arith.constant 0.000000e+00 : bf16
    %50 = vector.shape_cast %22 : vector<1x1024xi1> to vector<1x1024xi1>
    %51 = vector.broadcast %50 : vector<1x1024xi1> to vector<16x1024xi1>
    %52 = vector.broadcast %cst_13 : bf16 to vector<16x1024xbf16>
    %53 = arith.select %51, %49, %52 : vector<16x1024xi1>, vector<16x1024xbf16>
    %54 = vector.extract_strided_slice %1 {offsets = [0, 31], sizes = [16, 993], strides = [1, 1]} : vector<16x1024xbf16> to vector<16x993xbf16>
    %cst_14 = arith.constant 0.000000e+00 : bf16
    %55 = vector.broadcast %cst_14 : bf16 to vector<16x31xbf16>
    %56 = tpu.concatenate %54, %55 in 1 : vector<16x993xbf16>, vector<16x31xbf16> -> vector<16x1024xbf16>
    %cst_15 = arith.constant 0.000000e+00 : bf16
    %57 = vector.shape_cast %20 : vector<1x1024xi1> to vector<1x1024xi1>
    %58 = vector.broadcast %57 : vector<1x1024xi1> to vector<16x1024xi1>
    %59 = vector.broadcast %cst_15 : bf16 to vector<16x1024xbf16>
    %60 = arith.select %58, %56, %59 : vector<16x1024xi1>, vector<16x1024xbf16>
    %61 = vector.extract_strided_slice %1 {offsets = [0, 32], sizes = [16, 992], strides = [1, 1]} : vector<16x1024xbf16> to vector<16x992xbf16>
    %cst_16 = arith.constant 0.000000e+00 : bf16
    %62 = vector.broadcast %cst_16 : bf16 to vector<16x32xbf16>
    %63 = tpu.concatenate %61, %62 in 1 : vector<16x992xbf16>, vector<16x32xbf16> -> vector<16x1024xbf16>
    %64 = vector.extract_strided_slice %1 {offsets = [0, 33], sizes = [16, 991], strides = [1, 1]} : vector<16x1024xbf16> to vector<16x991xbf16>
    %cst_17 = arith.constant 0.000000e+00 : bf16
    %65 = vector.broadcast %cst_17 : bf16 to vector<16x33xbf16>
    %66 = tpu.concatenate %64, %65 in 1 : vector<16x991xbf16>, vector<16x33xbf16> -> vector<16x1024xbf16>
    %cst_18 = arith.constant 0.000000e+00 : bf16
    %67 = vector.shape_cast %22 : vector<1x1024xi1> to vector<1x1024xi1>
    %68 = vector.broadcast %67 : vector<1x1024xi1> to vector<16x1024xi1>
    %69 = vector.broadcast %cst_18 : bf16 to vector<16x1024xbf16>
    %70 = arith.select %68, %66, %69 : vector<16x1024xi1>, vector<16x1024xbf16>
    %71 = tpu.concatenate %29, %32, %39, %46, %1, %53, %60, %63, %70 in 0 : vector<16x1024xbf16>, vector<16x1024xbf16>, vector<16x1024xbf16>, vector<16x1024xbf16>, vector<16x1024xbf16>, vector<16x1024xbf16>, vector<16x1024xbf16>, vector<16x1024xbf16>, vector<16x1024xbf16> -> vector<144x1024xbf16>
    %c0_19 = arith.constant 0 : index
    %c0_20 = arith.constant 0 : index
    %72 = vector.load %arg2[%c0_19, %c0_20] : memref<16x144xbf16, #tpu.memory_space<vmem>>, vector<16x144xbf16>
    %cst_21 = arith.constant dense<0.000000e+00> : vector<16x1024xf32>
    %73 = tpu.matmul %72, %71, %cst_21 {dimension_numbers = #tpu.dot_dimension_numbers<[1], [0], [0], [1], [0, 0, 1, 1], [], []>} : vector<16x144xbf16>, vector<144x1024xbf16>, vector<16x1024xf32> -> vector<16x1024xf32>
    %c0_22 = arith.constant 0 : index
    %c0_23 = arith.constant 0 : index
    %74 = vector.load %arg3[%c0_22, %c0_23] : memref<16x1xf32, #tpu.memory_space<vmem>>, vector<16x1xf32>
    %75 = vector.broadcast %74 : vector<16x1xf32> to vector<16x1024xf32>
    %76 = arith.addf %73, %75 : vector<16x1024xf32>
    %c0_24 = arith.constant 0 : index
    %c0_25 = arith.constant 0 : index
    %77 = vector.load %arg4[%c0_24, %c0_25] : memref<16x1xf32, #tpu.memory_space<vmem>>, vector<16x1xf32>
    %c0_26 = arith.constant 0 : index
    %c0_27 = arith.constant 0 : index
    %78 = vector.load %arg5[%c0_26, %c0_27] : memref<16x1xf32, #tpu.memory_space<vmem>>, vector<16x1xf32>
    %cst_28 = arith.constant dense<0.000000e+00> : vector<16xf32>
    %79 = vector.multi_reduction <add>, %76, %cst_28 [1] : vector<16x1024xf32> to vector<16xf32>
    %80 = vector.shape_cast %79 : vector<16xf32> to vector<16x1xf32>
    %81 = arith.mulf %76, %76 : vector<16x1024xf32>
    %cst_29 = arith.constant dense<0.000000e+00> : vector<16xf32>
    %82 = vector.multi_reduction <add>, %81, %cst_29 [1] : vector<16x1024xf32> to vector<16xf32>
    %83 = vector.shape_cast %82 : vector<16xf32> to vector<16x1xf32>
    %84 = vector.extract_strided_slice %80 {offsets = [0, 0], sizes = [8, 1], strides = [1, 1]} : vector<16x1xf32> to vector<8x1xf32>
    %85 = vector.shape_cast %84 : vector<8x1xf32> to vector<1x8x1xf32>
    %cst_30 = arith.constant dense<0.000000e+00> : vector<1xf32>
    %86 = vector.multi_reduction <add>, %85, %cst_30 [1, 2] : vector<1x8x1xf32> to vector<1xf32>
    %87 = vector.shape_cast %86 : vector<1xf32> to vector<1x1x1xf32>
    %88 = vector.extract %87[0, 0, 0] : f32 from vector<1x1x1xf32>
    %cst_31 = arith.constant 1.22070313E-4 : f32
    %89 = arith.mulf %88, %cst_31 : f32
    %90 = vector.extract_strided_slice %80 {offsets = [8, 0], sizes = [8, 1], strides = [1, 1]} : vector<16x1xf32> to vector<8x1xf32>
    %91 = vector.shape_cast %90 : vector<8x1xf32> to vector<1x8x1xf32>
    %cst_32 = arith.constant dense<0.000000e+00> : vector<1xf32>
    %92 = vector.multi_reduction <add>, %91, %cst_32 [1, 2] : vector<1x8x1xf32> to vector<1xf32>
    %93 = vector.shape_cast %92 : vector<1xf32> to vector<1x1x1xf32>
    %94 = vector.extract %93[0, 0, 0] : f32 from vector<1x1x1xf32>
    %cst_33 = arith.constant 1.22070313E-4 : f32
    %95 = arith.mulf %94, %cst_33 : f32
    %96 = vector.extract_strided_slice %83 {offsets = [0, 0], sizes = [8, 1], strides = [1, 1]} : vector<16x1xf32> to vector<8x1xf32>
    %97 = vector.shape_cast %96 : vector<8x1xf32> to vector<1x8x1xf32>
    %cst_34 = arith.constant dense<0.000000e+00> : vector<1xf32>
    %98 = vector.multi_reduction <add>, %97, %cst_34 [1, 2] : vector<1x8x1xf32> to vector<1xf32>
    %99 = vector.shape_cast %98 : vector<1xf32> to vector<1x1x1xf32>
    %100 = vector.extract %99[0, 0, 0] : f32 from vector<1x1x1xf32>
    %cst_35 = arith.constant 1.22070313E-4 : f32
    %101 = arith.mulf %100, %cst_35 : f32
    %102 = arith.mulf %89, %89 : f32
    %103 = arith.subf %101, %102 : f32
    %104 = vector.extract_strided_slice %83 {offsets = [8, 0], sizes = [8, 1], strides = [1, 1]} : vector<16x1xf32> to vector<8x1xf32>
    %105 = vector.shape_cast %104 : vector<8x1xf32> to vector<1x8x1xf32>
    %cst_36 = arith.constant dense<0.000000e+00> : vector<1xf32>
    %106 = vector.multi_reduction <add>, %105, %cst_36 [1, 2] : vector<1x8x1xf32> to vector<1xf32>
    %107 = vector.shape_cast %106 : vector<1xf32> to vector<1x1x1xf32>
    %108 = vector.extract %107[0, 0, 0] : f32 from vector<1x1x1xf32>
    %cst_37 = arith.constant 1.22070313E-4 : f32
    %109 = arith.mulf %108, %cst_37 : f32
    %110 = arith.mulf %95, %95 : f32
    %111 = arith.subf %109, %110 : f32
    %cst_38 = arith.constant 9.99999974E-6 : f32
    %112 = arith.addf %103, %cst_38 : f32
    %113 = math.rsqrt %112 : f32
    %cst_39 = arith.constant 9.99999974E-6 : f32
    %114 = arith.addf %111, %cst_39 : f32
    %115 = math.rsqrt %114 : f32
    %116 = vector.broadcast %113 : f32 to vector<8x1xf32>
    %117 = vector.broadcast %115 : f32 to vector<8x1xf32>
    %118 = tpu.concatenate %116, %117 in 0 : vector<8x1xf32>, vector<8x1xf32> -> vector<16x1xf32>
    %119 = vector.broadcast %89 : f32 to vector<8x1xf32>
    %120 = vector.broadcast %95 : f32 to vector<8x1xf32>
    %121 = tpu.concatenate %119, %120 in 0 : vector<8x1xf32>, vector<8x1xf32> -> vector<16x1xf32>
    %122 = arith.mulf %77, %118 : vector<16x1xf32>
    %123 = arith.mulf %121, %122 : vector<16x1xf32>
    %124 = arith.subf %78, %123 : vector<16x1xf32>
    %125 = vector.broadcast %122 : vector<16x1xf32> to vector<16x1024xf32>
    %126 = arith.mulf %76, %125 : vector<16x1024xf32>
    %127 = vector.broadcast %124 : vector<16x1xf32> to vector<16x1024xf32>
    %128 = arith.addf %126, %127 : vector<16x1024xf32>
    %cst_40 = arith.constant 2.000000e-01 : f32
    %129 = vector.broadcast %cst_40 : f32 to vector<16x1024xf32>
    %130 = arith.mulf %129, %128 : vector<16x1024xf32>
    %131 = arith.maximumf %128, %130 : vector<16x1024xf32>
    %132 = arith.truncf %131 : vector<16x1024xf32> to vector<16x1024xbf16>
    %c0_41 = arith.constant 0 : index
    %c0_42 = arith.constant 0 : index
    %c0_43 = arith.constant 0 : index
    %133 = vector.load %arg6[%c0_41, %c0_42, %c0_43] : memref<1x16x1024xbf16, #tpu.memory_space<vmem>>, vector<1x16x1024xbf16>
    %134 = vector.shape_cast %133 : vector<1x16x1024xbf16> to vector<16x1024xbf16>
    %135 = vector.shape_cast %132 : vector<16x1024xbf16> to vector<1x16x1024xbf16>
    tpu.vector_store %arg6[%c0_41, %c0_42, %c0_43], %135 {strides = array<i32>} : memref<1x16x1024xbf16, #tpu.memory_space<vmem>>, vector<1x16x1024xbf16>,
    return
  }
  func.func @transform_0(%arg0: i32) -> (i32, i32, i32) {
    %c0_i32 = arith.constant 0 : i32
    %c0_i32_0 = arith.constant 0 : i32
    %c0_i32_1 = arith.constant 0 : i32
    return %arg0, %c0_i32, %c0_i32_0 : i32, i32, i32
  }
  func.func @transform_1(%arg0: i32) -> (i32, i32) {
    %c0_i32 = arith.constant 0 : i32
    %c0_i32_0 = arith.constant 0 : i32
    %c0_i32_1 = arith.constant 0 : i32
    return %c0_i32, %c0_i32_0 : i32, i32
  }
  func.func @transform_2(%arg0: i32) -> (i32, i32) {
    %c0_i32 = arith.constant 0 : i32
    %c0_i32_0 = arith.constant 0 : i32
    %c0_i32_1 = arith.constant 0 : i32
    return %c0_i32, %c0_i32_0 : i32, i32
  }
  func.func @transform_3(%arg0: i32) -> (i32, i32) {
    %c0_i32 = arith.constant 0 : i32
    %c0_i32_0 = arith.constant 0 : i32
    %c0_i32_1 = arith.constant 0 : i32
    return %c0_i32, %c0_i32_0 : i32, i32
  }
  func.func @transform_4(%arg0: i32) -> (i32, i32) {
    %c0_i32 = arith.constant 0 : i32
    %c0_i32_0 = arith.constant 0 : i32
    %c0_i32_1 = arith.constant 0 : i32
    return %c0_i32, %c0_i32_0 : i32, i32
  }
  func.func @transform_5(%arg0: i32) -> (i32, i32, i32) {
    %c0_i32 = arith.constant 0 : i32
    %c0_i32_0 = arith.constant 0 : i32
    %c0_i32_1 = arith.constant 0 : i32
    return %arg0, %c0_i32, %c0_i32_0 : i32, i32, i32
  }
}

module attributes {stable_mosaic.version = 11 : i64} {
  func.func @_conv3x3_dual_gn_lrelu_agg_kernel(%arg0: i32, %arg1: memref<1x16x4096xbf16, #tpu.memory_space<vmem>>, %arg2: memref<1x16x4096xbf16, #tpu.memory_space<vmem>>, %arg3: memref<16x288xbf16, #tpu.memory_space<vmem>>, %arg4: memref<16x1xf32, #tpu.memory_space<vmem>>, %arg5: memref<16x1xf32, #tpu.memory_space<vmem>>, %arg6: memref<16x1xf32, #tpu.memory_space<vmem>>, %arg7: memref<4x16xbf16, #tpu.memory_space<vmem>>, %arg8: memref<4x1xf32, #tpu.memory_space<vmem>>, %arg9: memref<1x4x4096xf32, #tpu.memory_space<vmem>>) attributes {dimension_semantics = [#tpu.dimension_semantics<parallel>], iteration_bounds = array<i64: 2>, scalar_prefetch = 0 : i64, scratch_operands = 0 : i64, tpu.core_type = #tpu.core_type<tc>, window_params = [{transform_indices = @transform_0, window_bounds = array<i64: 1, 16, 4096>}, {transform_indices = @transform_1, window_bounds = array<i64: 1, 16, 4096>}, {pipeline_mode = #tpu.pipeline_mode<synchronous>, transform_indices = @transform_2, window_bounds = array<i64: 16, 288>}, {pipeline_mode = #tpu.pipeline_mode<synchronous>, transform_indices = @transform_3, window_bounds = array<i64: 16, 1>}, {pipeline_mode = #tpu.pipeline_mode<synchronous>, transform_indices = @transform_4, window_bounds = array<i64: 16, 1>}, {pipeline_mode = #tpu.pipeline_mode<synchronous>, transform_indices = @transform_5, window_bounds = array<i64: 16, 1>}, {pipeline_mode = #tpu.pipeline_mode<synchronous>, transform_indices = @transform_6, window_bounds = array<i64: 4, 16>}, {pipeline_mode = #tpu.pipeline_mode<synchronous>, transform_indices = @transform_7, window_bounds = array<i64: 4, 1>}, {transform_indices = @transform_8, window_bounds = array<i64: 1, 4, 4096>}]} {
    %c0 = arith.constant 0 : index
    %c0_0 = arith.constant 0 : index
    %c0_1 = arith.constant 0 : index
    %0 = vector.load %arg1[%c0, %c0_0, %c0_1] : memref<1x16x4096xbf16, #tpu.memory_space<vmem>>, vector<1x16x4096xbf16>
    %1 = vector.shape_cast %0 : vector<1x16x4096xbf16> to vector<16x4096xbf16>
    %c0_2 = arith.constant 0 : index
    %c0_3 = arith.constant 0 : index
    %c0_4 = arith.constant 0 : index
    %2 = vector.load %arg2[%c0_2, %c0_3, %c0_4] : memref<1x16x4096xbf16, #tpu.memory_space<vmem>>, vector<1x16x4096xbf16>
    %3 = vector.shape_cast %2 : vector<1x16x4096xbf16> to vector<16x4096xbf16>
    %4 = tpu.iota {dimensions = array<i32: 1>} : vector<1x4096xi32>
    %c64_i32 = arith.constant 64 : i32
    %c0_i32 = arith.constant 0 : i32
    %5 = arith.cmpi eq, %c64_i32, %c0_i32 : i32
    %c1_i32 = arith.constant 1 : i32
    %6 = arith.select %5, %c1_i32, %c64_i32 : i32
    %7 = vector.broadcast %6 : i32 to vector<1x4096xi32>
    %8 = arith.remsi %4, %7 : vector<1x4096xi32>
    %c0_i32_5 = arith.constant 0 : i32
    %9 = vector.broadcast %c0_i32_5 : i32 to vector<1x4096xi32>
    %10 = arith.cmpi ne, %8, %9 : vector<1x4096xi32>
    %c0_i32_6 = arith.constant 0 : i32
    %11 = vector.broadcast %c0_i32_6 : i32 to vector<1x4096xi32>
    %12 = arith.cmpi slt, %8, %11 : vector<1x4096xi32>
    %c0_i32_7 = arith.constant 0 : i32
    %13 = arith.cmpi slt, %6, %c0_i32_7 : i32
    %14 = vector.broadcast %13 : i1 to vector<1x4096xi1>
    %15 = vector.broadcast %14 : vector<1x4096xi1> to vector<1x4096xi1>
    %16 = arith.xori %12, %15 : vector<1x4096xi1>
    %17 = arith.andi %16, %10 : vector<1x4096xi1>
    %18 = vector.broadcast %6 : i32 to vector<1x4096xi32>
    %19 = arith.addi %8, %18 : vector<1x4096xi32>
    %20 = arith.select %17, %19, %8 : vector<1x4096xi1>, vector<1x4096xi32>
    %c0_i32_8 = arith.constant 0 : i32
    %21 = vector.broadcast %c0_i32_8 : i32 to vector<1x4096xi32>
    %22 = arith.cmpi sgt, %20, %21 : vector<1x4096xi32>
    %c63_i32 = arith.constant 63 : i32
    %23 = vector.broadcast %c63_i32 : i32 to vector<1x4096xi32>
    %24 = arith.cmpi slt, %20, %23 : vector<1x4096xi32>
    %cst = arith.constant 0.000000e+00 : bf16
    %25 = vector.broadcast %cst : bf16 to vector<16x65xbf16>
    %26 = vector.extract_strided_slice %1 {offsets = [0, 0], sizes = [16, 4031], strides = [1, 1]} : vector<16x4096xbf16> to vector<16x4031xbf16>
    %27 = tpu.concatenate %25, %26 in 1 : vector<16x65xbf16>, vector<16x4031xbf16> -> vector<16x4096xbf16>
    %cst_9 = arith.constant 0.000000e+00 : bf16
    %28 = vector.shape_cast %22 : vector<1x4096xi1> to vector<1x4096xi1>
    %29 = vector.broadcast %28 : vector<1x4096xi1> to vector<16x4096xi1>
    %30 = vector.broadcast %cst_9 : bf16 to vector<16x4096xbf16>
    %31 = arith.select %29, %27, %30 : vector<16x4096xi1>, vector<16x4096xbf16>
    %cst_10 = arith.constant 0.000000e+00 : bf16
    %32 = vector.broadcast %cst_10 : bf16 to vector<16x64xbf16>
    %33 = vector.extract_strided_slice %1 {offsets = [0, 0], sizes = [16, 4032], strides = [1, 1]} : vector<16x4096xbf16> to vector<16x4032xbf16>
    %34 = tpu.concatenate %32, %33 in 1 : vector<16x64xbf16>, vector<16x4032xbf16> -> vector<16x4096xbf16>
    %cst_11 = arith.constant 0.000000e+00 : bf16
    %35 = vector.broadcast %cst_11 : bf16 to vector<16x63xbf16>
    %36 = vector.extract_strided_slice %1 {offsets = [0, 0], sizes = [16, 4033], strides = [1, 1]} : vector<16x4096xbf16> to vector<16x4033xbf16>
    %37 = tpu.concatenate %35, %36 in 1 : vector<16x63xbf16>, vector<16x4033xbf16> -> vector<16x4096xbf16>
    %cst_12 = arith.constant 0.000000e+00 : bf16
    %38 = vector.shape_cast %24 : vector<1x4096xi1> to vector<1x4096xi1>
    %39 = vector.broadcast %38 : vector<1x4096xi1> to vector<16x4096xi1>
    %40 = vector.broadcast %cst_12 : bf16 to vector<16x4096xbf16>
    %41 = arith.select %39, %37, %40 : vector<16x4096xi1>, vector<16x4096xbf16>
    %cst_13 = arith.constant 0.000000e+00 : bf16
    %42 = vector.broadcast %cst_13 : bf16 to vector<16x1xbf16>
    %43 = vector.extract_strided_slice %1 {offsets = [0, 0], sizes = [16, 4095], strides = [1, 1]} : vector<16x4096xbf16> to vector<16x4095xbf16>
    %44 = tpu.concatenate %42, %43 in 1 : vector<16x1xbf16>, vector<16x4095xbf16> -> vector<16x4096xbf16>
    %cst_14 = arith.constant 0.000000e+00 : bf16
    %45 = vector.shape_cast %22 : vector<1x4096xi1> to vector<1x4096xi1>
    %46 = vector.broadcast %45 : vector<1x4096xi1> to vector<16x4096xi1>
    %47 = vector.broadcast %cst_14 : bf16 to vector<16x4096xbf16>
    %48 = arith.select %46, %44, %47 : vector<16x4096xi1>, vector<16x4096xbf16>
    %49 = vector.extract_strided_slice %1 {offsets = [0, 1], sizes = [16, 4095], strides = [1, 1]} : vector<16x4096xbf16> to vector<16x4095xbf16>
    %cst_15 = arith.constant 0.000000e+00 : bf16
    %50 = vector.broadcast %cst_15 : bf16 to vector<16x1xbf16>
    %51 = tpu.concatenate %49, %50 in 1 : vector<16x4095xbf16>, vector<16x1xbf16> -> vector<16x4096xbf16>
    %cst_16 = arith.constant 0.000000e+00 : bf16
    %52 = vector.shape_cast %24 : vector<1x4096xi1> to vector<1x4096xi1>
    %53 = vector.broadcast %52 : vector<1x4096xi1> to vector<16x4096xi1>
    %54 = vector.broadcast %cst_16 : bf16 to vector<16x4096xbf16>
    %55 = arith.select %53, %51, %54 : vector<16x4096xi1>, vector<16x4096xbf16>
    %56 = vector.extract_strided_slice %1 {offsets = [0, 63], sizes = [16, 4033], strides = [1, 1]} : vector<16x4096xbf16> to vector<16x4033xbf16>
    %cst_17 = arith.constant 0.000000e+00 : bf16
    %57 = vector.broadcast %cst_17 : bf16 to vector<16x63xbf16>
    %58 = tpu.concatenate %56, %57 in 1 : vector<16x4033xbf16>, vector<16x63xbf16> -> vector<16x4096xbf16>
    %cst_18 = arith.constant 0.000000e+00 : bf16
    %59 = vector.shape_cast %22 : vector<1x4096xi1> to vector<1x4096xi1>
    %60 = vector.broadcast %59 : vector<1x4096xi1> to vector<16x4096xi1>
    %61 = vector.broadcast %cst_18 : bf16 to vector<16x4096xbf16>
    %62 = arith.select %60, %58, %61 : vector<16x4096xi1>, vector<16x4096xbf16>
    %63 = vector.extract_strided_slice %1 {offsets = [0, 64], sizes = [16, 4032], strides = [1, 1]} : vector<16x4096xbf16> to vector<16x4032xbf16>
    %cst_19 = arith.constant 0.000000e+00 : bf16
    %64 = vector.broadcast %cst_19 : bf16 to vector<16x64xbf16>
    %65 = tpu.concatenate %63, %64 in 1 : vector<16x4032xbf16>, vector<16x64xbf16> -> vector<16x4096xbf16>
    %66 = vector.extract_strided_slice %1 {offsets = [0, 65], sizes = [16, 4031], strides = [1, 1]} : vector<16x4096xbf16> to vector<16x4031xbf16>
    %cst_20 = arith.constant 0.000000e+00 : bf16
    %67 = vector.broadcast %cst_20 : bf16 to vector<16x65xbf16>
    %68 = tpu.concatenate %66, %67 in 1 : vector<16x4031xbf16>, vector<16x65xbf16> -> vector<16x4096xbf16>
    %cst_21 = arith.constant 0.000000e+00 : bf16
    %69 = vector.shape_cast %24 : vector<1x4096xi1> to vector<1x4096xi1>
    %70 = vector.broadcast %69 : vector<1x4096xi1> to vector<16x4096xi1>
    %71 = vector.broadcast %cst_21 : bf16 to vector<16x4096xbf16>
    %72 = arith.select %70, %68, %71 : vector<16x4096xi1>, vector<16x4096xbf16>
    %cst_22 = arith.constant 0.000000e+00 : bf16
    %73 = vector.broadcast %cst_22 : bf16 to vector<16x65xbf16>
    %74 = vector.extract_strided_slice %3 {offsets = [0, 0], sizes = [16, 4031], strides = [1, 1]} : vector<16x4096xbf16> to vector<16x4031xbf16>
    %75 = tpu.concatenate %73, %74 in 1 : vector<16x65xbf16>, vector<16x4031xbf16> -> vector<16x4096xbf16>
    %cst_23 = arith.constant 0.000000e+00 : bf16
    %76 = vector.shape_cast %22 : vector<1x4096xi1> to vector<1x4096xi1>
    %77 = vector.broadcast %76 : vector<1x4096xi1> to vector<16x4096xi1>
    %78 = vector.broadcast %cst_23 : bf16 to vector<16x4096xbf16>
    %79 = arith.select %77, %75, %78 : vector<16x4096xi1>, vector<16x4096xbf16>
    %cst_24 = arith.constant 0.000000e+00 : bf16
    %80 = vector.broadcast %cst_24 : bf16 to vector<16x64xbf16>
    %81 = vector.extract_strided_slice %3 {offsets = [0, 0], sizes = [16, 4032], strides = [1, 1]} : vector<16x4096xbf16> to vector<16x4032xbf16>
    %82 = tpu.concatenate %80, %81 in 1 : vector<16x64xbf16>, vector<16x4032xbf16> -> vector<16x4096xbf16>
    %cst_25 = arith.constant 0.000000e+00 : bf16
    %83 = vector.broadcast %cst_25 : bf16 to vector<16x63xbf16>
    %84 = vector.extract_strided_slice %3 {offsets = [0, 0], sizes = [16, 4033], strides = [1, 1]} : vector<16x4096xbf16> to vector<16x4033xbf16>
    %85 = tpu.concatenate %83, %84 in 1 : vector<16x63xbf16>, vector<16x4033xbf16> -> vector<16x4096xbf16>
    %cst_26 = arith.constant 0.000000e+00 : bf16
    %86 = vector.shape_cast %24 : vector<1x4096xi1> to vector<1x4096xi1>
    %87 = vector.broadcast %86 : vector<1x4096xi1> to vector<16x4096xi1>
    %88 = vector.broadcast %cst_26 : bf16 to vector<16x4096xbf16>
    %89 = arith.select %87, %85, %88 : vector<16x4096xi1>, vector<16x4096xbf16>
    %cst_27 = arith.constant 0.000000e+00 : bf16
    %90 = vector.broadcast %cst_27 : bf16 to vector<16x1xbf16>
    %91 = vector.extract_strided_slice %3 {offsets = [0, 0], sizes = [16, 4095], strides = [1, 1]} : vector<16x4096xbf16> to vector<16x4095xbf16>
    %92 = tpu.concatenate %90, %91 in 1 : vector<16x1xbf16>, vector<16x4095xbf16> -> vector<16x4096xbf16>
    %cst_28 = arith.constant 0.000000e+00 : bf16
    %93 = vector.shape_cast %22 : vector<1x4096xi1> to vector<1x4096xi1>
    %94 = vector.broadcast %93 : vector<1x4096xi1> to vector<16x4096xi1>
    %95 = vector.broadcast %cst_28 : bf16 to vector<16x4096xbf16>
    %96 = arith.select %94, %92, %95 : vector<16x4096xi1>, vector<16x4096xbf16>
    %97 = vector.extract_strided_slice %3 {offsets = [0, 1], sizes = [16, 4095], strides = [1, 1]} : vector<16x4096xbf16> to vector<16x4095xbf16>
    %cst_29 = arith.constant 0.000000e+00 : bf16
    %98 = vector.broadcast %cst_29 : bf16 to vector<16x1xbf16>
    %99 = tpu.concatenate %97, %98 in 1 : vector<16x4095xbf16>, vector<16x1xbf16> -> vector<16x4096xbf16>
    %cst_30 = arith.constant 0.000000e+00 : bf16
    %100 = vector.shape_cast %24 : vector<1x4096xi1> to vector<1x4096xi1>
    %101 = vector.broadcast %100 : vector<1x4096xi1> to vector<16x4096xi1>
    %102 = vector.broadcast %cst_30 : bf16 to vector<16x4096xbf16>
    %103 = arith.select %101, %99, %102 : vector<16x4096xi1>, vector<16x4096xbf16>
    %104 = vector.extract_strided_slice %3 {offsets = [0, 63], sizes = [16, 4033], strides = [1, 1]} : vector<16x4096xbf16> to vector<16x4033xbf16>
    %cst_31 = arith.constant 0.000000e+00 : bf16
    %105 = vector.broadcast %cst_31 : bf16 to vector<16x63xbf16>
    %106 = tpu.concatenate %104, %105 in 1 : vector<16x4033xbf16>, vector<16x63xbf16> -> vector<16x4096xbf16>
    %cst_32 = arith.constant 0.000000e+00 : bf16
    %107 = vector.shape_cast %22 : vector<1x4096xi1> to vector<1x4096xi1>
    %108 = vector.broadcast %107 : vector<1x4096xi1> to vector<16x4096xi1>
    %109 = vector.broadcast %cst_32 : bf16 to vector<16x4096xbf16>
    %110 = arith.select %108, %106, %109 : vector<16x4096xi1>, vector<16x4096xbf16>
    %111 = vector.extract_strided_slice %3 {offsets = [0, 64], sizes = [16, 4032], strides = [1, 1]} : vector<16x4096xbf16> to vector<16x4032xbf16>
    %cst_33 = arith.constant 0.000000e+00 : bf16
    %112 = vector.broadcast %cst_33 : bf16 to vector<16x64xbf16>
    %113 = tpu.concatenate %111, %112 in 1 : vector<16x4032xbf16>, vector<16x64xbf16> -> vector<16x4096xbf16>
    %114 = vector.extract_strided_slice %3 {offsets = [0, 65], sizes = [16, 4031], strides = [1, 1]} : vector<16x4096xbf16> to vector<16x4031xbf16>
    %cst_34 = arith.constant 0.000000e+00 : bf16
    %115 = vector.broadcast %cst_34 : bf16 to vector<16x65xbf16>
    %116 = tpu.concatenate %114, %115 in 1 : vector<16x4031xbf16>, vector<16x65xbf16> -> vector<16x4096xbf16>
    %cst_35 = arith.constant 0.000000e+00 : bf16
    %117 = vector.shape_cast %24 : vector<1x4096xi1> to vector<1x4096xi1>
    %118 = vector.broadcast %117 : vector<1x4096xi1> to vector<16x4096xi1>
    %119 = vector.broadcast %cst_35 : bf16 to vector<16x4096xbf16>
    %120 = arith.select %118, %116, %119 : vector<16x4096xi1>, vector<16x4096xbf16>
    %121 = tpu.concatenate %31, %34, %41, %48, %1, %55, %62, %65, %72, %79, %82, %89, %96, %3, %103, %110 in 0 : vector<16x4096xbf16>, vector<16x4096xbf16>, vector<16x4096xbf16>, vector<16x4096xbf16>, vector<16x4096xbf16>, vector<16x4096xbf16>, vector<16x4096xbf16>, vector<16x4096xbf16>, vector<16x4096xbf16>, vector<16x4096xbf16>, vector<16x4096xbf16>, vector<16x4096xbf16>, vector<16x4096xbf16>, vector<16x4096xbf16>, vector<16x4096xbf16>, vector<16x4096xbf16> -> vector<256x4096xbf16>
    %122 = tpu.concatenate %113, %120 in 0 : vector<16x4096xbf16>, vector<16x4096xbf16> -> vector<32x4096xbf16>
    %123 = tpu.concatenate %121, %122 in 0 : vector<256x4096xbf16>, vector<32x4096xbf16> -> vector<288x4096xbf16>
    %c0_36 = arith.constant 0 : index
    %c0_37 = arith.constant 0 : index
    %124 = vector.load %arg3[%c0_36, %c0_37] : memref<16x288xbf16, #tpu.memory_space<vmem>>, vector<16x288xbf16>
    %cst_38 = arith.constant dense<0.000000e+00> : vector<16x4096xf32>
    %125 = tpu.matmul %124, %123, %cst_38 {dimension_numbers = #tpu.dot_dimension_numbers<[1], [0], [0], [1], [0, 0, 1, 1], [], []>} : vector<16x288xbf16>, vector<288x4096xbf16>, vector<16x4096xf32> -> vector<16x4096xf32>
    %c0_39 = arith.constant 0 : index
    %c0_40 = arith.constant 0 : index
    %126 = vector.load %arg4[%c0_39, %c0_40] : memref<16x1xf32, #tpu.memory_space<vmem>>, vector<16x1xf32>
    %127 = vector.broadcast %126 : vector<16x1xf32> to vector<16x4096xf32>
    %128 = arith.addf %125, %127 : vector<16x4096xf32>
    %c0_41 = arith.constant 0 : index
    %c0_42 = arith.constant 0 : index
    %129 = vector.load %arg5[%c0_41, %c0_42] : memref<16x1xf32, #tpu.memory_space<vmem>>, vector<16x1xf32>
    %c0_43 = arith.constant 0 : index
    %c0_44 = arith.constant 0 : index
    %130 = vector.load %arg6[%c0_43, %c0_44] : memref<16x1xf32, #tpu.memory_space<vmem>>, vector<16x1xf32>
    %cst_45 = arith.constant dense<0.000000e+00> : vector<16xf32>
    %131 = vector.multi_reduction <add>, %128, %cst_45 [1] : vector<16x4096xf32> to vector<16xf32>
    %132 = vector.shape_cast %131 : vector<16xf32> to vector<16x1xf32>
    %133 = arith.mulf %128, %128 : vector<16x4096xf32>
    %cst_46 = arith.constant dense<0.000000e+00> : vector<16xf32>
    %134 = vector.multi_reduction <add>, %133, %cst_46 [1] : vector<16x4096xf32> to vector<16xf32>
    %135 = vector.shape_cast %134 : vector<16xf32> to vector<16x1xf32>
    %136 = vector.extract_strided_slice %132 {offsets = [0, 0], sizes = [8, 1], strides = [1, 1]} : vector<16x1xf32> to vector<8x1xf32>
    %137 = vector.shape_cast %136 : vector<8x1xf32> to vector<1x8x1xf32>
    %cst_47 = arith.constant dense<0.000000e+00> : vector<1xf32>
    %138 = vector.multi_reduction <add>, %137, %cst_47 [1, 2] : vector<1x8x1xf32> to vector<1xf32>
    %139 = vector.shape_cast %138 : vector<1xf32> to vector<1x1x1xf32>
    %140 = vector.extract %139[0, 0, 0] : f32 from vector<1x1x1xf32>
    %cst_48 = arith.constant 3.05175781E-5 : f32
    %141 = arith.mulf %140, %cst_48 : f32
    %142 = vector.extract_strided_slice %132 {offsets = [8, 0], sizes = [8, 1], strides = [1, 1]} : vector<16x1xf32> to vector<8x1xf32>
    %143 = vector.shape_cast %142 : vector<8x1xf32> to vector<1x8x1xf32>
    %cst_49 = arith.constant dense<0.000000e+00> : vector<1xf32>
    %144 = vector.multi_reduction <add>, %143, %cst_49 [1, 2] : vector<1x8x1xf32> to vector<1xf32>
    %145 = vector.shape_cast %144 : vector<1xf32> to vector<1x1x1xf32>
    %146 = vector.extract %145[0, 0, 0] : f32 from vector<1x1x1xf32>
    %cst_50 = arith.constant 3.05175781E-5 : f32
    %147 = arith.mulf %146, %cst_50 : f32
    %148 = vector.extract_strided_slice %135 {offsets = [0, 0], sizes = [8, 1], strides = [1, 1]} : vector<16x1xf32> to vector<8x1xf32>
    %149 = vector.shape_cast %148 : vector<8x1xf32> to vector<1x8x1xf32>
    %cst_51 = arith.constant dense<0.000000e+00> : vector<1xf32>
    %150 = vector.multi_reduction <add>, %149, %cst_51 [1, 2] : vector<1x8x1xf32> to vector<1xf32>
    %151 = vector.shape_cast %150 : vector<1xf32> to vector<1x1x1xf32>
    %152 = vector.extract %151[0, 0, 0] : f32 from vector<1x1x1xf32>
    %cst_52 = arith.constant 3.05175781E-5 : f32
    %153 = arith.mulf %152, %cst_52 : f32
    %154 = arith.mulf %141, %141 : f32
    %155 = arith.subf %153, %154 : f32
    %156 = vector.extract_strided_slice %135 {offsets = [8, 0], sizes = [8, 1], strides = [1, 1]} : vector<16x1xf32> to vector<8x1xf32>
    %157 = vector.shape_cast %156 : vector<8x1xf32> to vector<1x8x1xf32>
    %cst_53 = arith.constant dense<0.000000e+00> : vector<1xf32>
    %158 = vector.multi_reduction <add>, %157, %cst_53 [1, 2] : vector<1x8x1xf32> to vector<1xf32>
    %159 = vector.shape_cast %158 : vector<1xf32> to vector<1x1x1xf32>
    %160 = vector.extract %159[0, 0, 0] : f32 from vector<1x1x1xf32>
    %cst_54 = arith.constant 3.05175781E-5 : f32
    %161 = arith.mulf %160, %cst_54 : f32
    %162 = arith.mulf %147, %147 : f32
    %163 = arith.subf %161, %162 : f32
    %cst_55 = arith.constant 9.99999974E-6 : f32
    %164 = arith.addf %155, %cst_55 : f32
    %165 = math.rsqrt %164 : f32
    %cst_56 = arith.constant 9.99999974E-6 : f32
    %166 = arith.addf %163, %cst_56 : f32
    %167 = math.rsqrt %166 : f32
    %168 = vector.broadcast %165 : f32 to vector<8x1xf32>
    %169 = vector.broadcast %167 : f32 to vector<8x1xf32>
    %170 = tpu.concatenate %168, %169 in 0 : vector<8x1xf32>, vector<8x1xf32> -> vector<16x1xf32>
    %171 = vector.broadcast %141 : f32 to vector<8x1xf32>
    %172 = vector.broadcast %147 : f32 to vector<8x1xf32>
    %173 = tpu.concatenate %171, %172 in 0 : vector<8x1xf32>, vector<8x1xf32> -> vector<16x1xf32>
    %174 = arith.mulf %129, %170 : vector<16x1xf32>
    %175 = arith.mulf %173, %174 : vector<16x1xf32>
    %176 = arith.subf %130, %175 : vector<16x1xf32>
    %177 = vector.broadcast %174 : vector<16x1xf32> to vector<16x4096xf32>
    %178 = arith.mulf %128, %177 : vector<16x4096xf32>
    %179 = vector.broadcast %176 : vector<16x1xf32> to vector<16x4096xf32>
    %180 = arith.addf %178, %179 : vector<16x4096xf32>
    %cst_57 = arith.constant 2.000000e-01 : f32
    %181 = vector.broadcast %cst_57 : f32 to vector<16x4096xf32>
    %182 = arith.mulf %181, %180 : vector<16x4096xf32>
    %183 = arith.maximumf %180, %182 : vector<16x4096xf32>
    %c0_58 = arith.constant 0 : index
    %c0_59 = arith.constant 0 : index
    %184 = vector.load %arg7[%c0_58, %c0_59] : memref<4x16xbf16, #tpu.memory_space<vmem>>, vector<4x16xbf16>
    %185 = arith.truncf %183 : vector<16x4096xf32> to vector<16x4096xbf16>
    %cst_60 = arith.constant dense<0.000000e+00> : vector<4x4096xf32>
    %186 = tpu.matmul %184, %185, %cst_60 {dimension_numbers = #tpu.dot_dimension_numbers<[1], [0], [0], [1], [0, 0, 1, 1], [], []>} : vector<4x16xbf16>, vector<16x4096xbf16>, vector<4x4096xf32> -> vector<4x4096xf32>
    %c0_61 = arith.constant 0 : index
    %c0_62 = arith.constant 0 : index
    %187 = vector.load %arg8[%c0_61, %c0_62] : memref<4x1xf32, #tpu.memory_space<vmem>>, vector<4x1xf32>
    %188 = vector.broadcast %187 : vector<4x1xf32> to vector<4x4096xf32>
    %189 = arith.addf %186, %188 : vector<4x4096xf32>
    %c0_63 = arith.constant 0 : index
    %c0_64 = arith.constant 0 : index
    %c0_65 = arith.constant 0 : index
    %190 = vector.load %arg9[%c0_63, %c0_64, %c0_65] : memref<1x4x4096xf32, #tpu.memory_space<vmem>>, vector<1x4x4096xf32>
    %191 = vector.shape_cast %190 : vector<1x4x4096xf32> to vector<4x4096xf32>
    %192 = vector.shape_cast %189 : vector<4x4096xf32> to vector<1x4x4096xf32>
    tpu.vector_store %arg9[%c0_63, %c0_64, %c0_65], %192 {strides = array<i32>} : memref<1x4x4096xf32, #tpu.memory_space<vmem>>, vector<1x4x4096xf32>,
    return
  }
  func.func @transform_0(%arg0: i32) -> (i32, i32, i32) {
    %c0_i32 = arith.constant 0 : i32
    %c0_i32_0 = arith.constant 0 : i32
    %c0_i32_1 = arith.constant 0 : i32
    return %arg0, %c0_i32, %c0_i32_0 : i32, i32, i32
  }
  func.func @transform_1(%arg0: i32) -> (i32, i32, i32) {
    %c0_i32 = arith.constant 0 : i32
    %c0_i32_0 = arith.constant 0 : i32
    %c0_i32_1 = arith.constant 0 : i32
    return %arg0, %c0_i32, %c0_i32_0 : i32, i32, i32
  }
  func.func @transform_2(%arg0: i32) -> (i32, i32) {
    %c0_i32 = arith.constant 0 : i32
    %c0_i32_0 = arith.constant 0 : i32
    %c0_i32_1 = arith.constant 0 : i32
    return %c0_i32, %c0_i32_0 : i32, i32
  }
  func.func @transform_3(%arg0: i32) -> (i32, i32) {
    %c0_i32 = arith.constant 0 : i32
    %c0_i32_0 = arith.constant 0 : i32
    %c0_i32_1 = arith.constant 0 : i32
    return %c0_i32, %c0_i32_0 : i32, i32
  }
  func.func @transform_4(%arg0: i32) -> (i32, i32) {
    %c0_i32 = arith.constant 0 : i32
    %c0_i32_0 = arith.constant 0 : i32
    %c0_i32_1 = arith.constant 0 : i32
    return %c0_i32, %c0_i32_0 : i32, i32
  }
  func.func @transform_5(%arg0: i32) -> (i32, i32) {
    %c0_i32 = arith.constant 0 : i32
    %c0_i32_0 = arith.constant 0 : i32
    %c0_i32_1 = arith.constant 0 : i32
    return %c0_i32, %c0_i32_0 : i32, i32
  }
  func.func @transform_6(%arg0: i32) -> (i32, i32) {
    %c0_i32 = arith.constant 0 : i32
    %c0_i32_0 = arith.constant 0 : i32
    %c0_i32_1 = arith.constant 0 : i32
    return %c0_i32, %c0_i32_0 : i32, i32
  }
  func.func @transform_7(%arg0: i32) -> (i32, i32) {
    %c0_i32 = arith.constant 0 : i32
    %c0_i32_0 = arith.constant 0 : i32
    %c0_i32_1 = arith.constant 0 : i32
    return %c0_i32, %c0_i32_0 : i32, i32
  }
  func.func @transform_8(%arg0: i32) -> (i32, i32, i32) {
    %c0_i32 = arith.constant 0 : i32
    %c0_i32_0 = arith.constant 0 : i32
    %c0_i32_1 = arith.constant 0 : i32
    return %arg0, %c0_i32, %c0_i32_0 : i32, i32, i32
  }
}

</mosaic_0001>

<bundles_post_ra>
// kernel: multigrid_decoder_forward.4
= control target key start
LH: loop header
LB: loop body
LE: loop exit
PB: predicated region body
PF: predicated region fallthrough
CT: control target
= control target key end

     0   :  { %s920_s18 = smov 0   ;;  %s1111_s0 = inlined_call_operand.vmem [shape: bf16[2,16,256], index: 0, kind: input, shape index: {}]   ;;  %s1112_s1 = inlined_call_operand.vmem [shape: bf16[64,64], index: 1, kind: input, shape index: {}]   ;;  %s1113_s2 = inlined_call_operand.vmem [shape: f32[16,1], index: 2, kind: input, shape index: {}]   ;;  %s1114_s3 = inlined_call_operand.vmem [shape: f32[16,1], index: 3, kind: input, shape index: {}]   ;;  %s1115_s4 = inlined_call_operand.vmem [shape: f32[16,1], index: 4, kind: input, shape index: {}]   ;;  %s1116_s5 = inlined_call_operand.vmem [shape: bf16[2,64,256], index: 5, kind: output, shape index: {}]  }
   0x1 LB: > { %s791_s19 = sadd.s32 4294967295, %s884_s18   ;;  %p795_p0 = scmp.ge.s32.totalorder %s884_s18, 1  ;;  %s884_s18 = sphi %s920_s18, %s15_s18  }
   0x2   : > { %p187_p1 = scmp.lt.s32.totalorder %s884_s18, 3 }
   0x4   : > { %p188_p2 = pnand %p795_p0, %p187_p1 }
   0x5   : > { %p215_p3 = scmp.lt.s32.totalorder (!%p188_p2), %s791_s19, 1  ;;  %s887_s24 = smov (!%p188_p2), 112  }
   0x6   : > { %191 = sbr.rel (%p188_p2) target bundleno = 941 (0x3ad), region = 40  ;;  %s888_s25 = smov (!%p188_p2), 111  }
   0x7   : > { %s889_s26 = smov (!%p188_p2), 127  }
   0xb   : > { %v886_v0 = vmov 0   ;;  %s1118_s19 = smov (!%p215_p3, %s791_s19), 1  ;;  %v323_v3 = vld [vmem:[%s1113_s2] sm:$0xff]  ;;  %v324_v4 = vld [vmem:[%s1113_s2 + $0x8] sm:$0xff]  ;;  %v230_v5 = vlaneseq  ;;  %vm312_vm3 = vcmask 908288   ;;  %vm271_vm6 = vcmask 1039360  }
   0xc   : > { %408 = vmatprep.mubr.bf16.mxu0 %v886_v0  ;;  %428 = vmatprep.mubr.bf16.mxu1 %v886_v0  ;;  %s823_s20 = sshll.u32 %s1118_s19, 4  ;;  %vm301_vm7 = vcmask 916480   ;;  %v870_v29 = vld [vmem:[%s1112_s1] sm:$0xff]   ;;  %v871_v30 = vld [vmem:[%s1112_s1 + $0x10] sm:$0xff]   ;;  %vm363_vm8 = vcmask 523264   ;;  %v872_v31 = vld [vmem:[%s1112_s1 + $0x8] sm:$0xff]  }
   0xd   : > { %865 = vset.pattern.permute.xlu0 %v886_v0  ;;  %866 = vset.pattern.permute.xlu1 %v886_v0  ;;  %s219_s23 = scalar_lea.vmem %s1111_s0, %s823_s20  ;;  %v231_v6 = vand.u32 127, %v230_v5  ;;  %v286_v10 = vshrl.u32 %v230_v5, 7  ;;  %v873_v32 = vld [vmem:[%s1112_s1 + $0x18] sm:$0xff]   ;;  %vm529_vm9 = vcmask 7168  }
   0xe   : > { %v938_v1 = vld [vmem:[%s219_s23] ss:$8 sps:$4 sm:$0xff]   ;;  %v869_v2 = vld [vmem:[%s219_s23 + $0x4] ss:$8 sps:$4 sm:$0xff]  }
   0xf   : > { %297 = vrot.lane.b32.xlu1 %v938_v1, %s887_s24  ;;  %308 = vrot.lane.b32.xlu0 %v938_v1, %s888_s25  ;;  %v232_v7 = vadd.s32 128, %v231_v6  ;;  %v237_v8 = vand.u32 15, %v231_v6  ;;  %v291_v11 = vsub.s32 4, %v286_v10  ;;  %v287_v12 = vsub.s32 0, %v286_v10 }
  0x11   : > { %v244_v9 = vand.u32 15, %v232_v7  ;;  %vm257_vm0 = vcmp.lt.s32.totalorder %v237_v8, 15 }
  0x13   : > { %299 = vrot.lane.b32.xlu1 %v869_v2, %s887_s24  ;;  %310 = vrot.lane.b32.xlu0 %v869_v2, %s888_s25  ;;  %vm258_vm1 = vcmp.lt.s32.totalorder %v244_v9, 15 }
  0x14   : > { %vm283_vm2 = vmpackc.low %vm258_vm1, %vm257_vm0 }
  0x15   : > { %v284_v13 = vsel %vm283_vm2, 65537, %v886_v0 }
  0x16   : > { %v292_v14 = vrot.slane %v284_v13, %v291_v11  ;;  %v288_v15 = vrot.slane %v284_v13, %v287_v12 }
  0x17   : > { %269 = vrot.lane.b32.xlu1 %v869_v2, %s889_s26  ;;  %267 = vrot.lane.b32.xlu0 %v938_v1, %s889_s26 }
  0x18   : > { %vm294_vm4 = vcmp.ne.s16.totalorder %v292_v14, 0  ;;  %vm293_vm5 = vcmp.ne.s16.totalorder %v288_v15, 0 }
  0x1b   : > { %335 = vperm.xlu0 %865, %v323_v3   ;;  %340 = vperm.xlu1 %866, %v324_v4  }
  0x81   : > { %v298_v16 = vpop.permute.xlu1 %297  ;;  %v309_v17 = vpop.permute.xlu0 %308 }
  0x85   : > { %v300_v18 = vpop.permute.xlu1 %299  ;;  %v311_v19 = vpop.permute.xlu0 %310 }
  0x86   : > { %v317_v20 = vsel %vm312_vm3, %v311_v19, 0  ;;  %v313_v21 = vsel %vm312_vm3, %v309_v17, %v311_v19  ;;  %v302_v27 = vsel %vm301_vm7, %v298_v16, %v300_v18 }
  0x87   : > { %806 = vmatprep.subr.msk.bf16.mxu0 %vm294_vm4, %v317_v20  ;;  %833 = vmatprep.subr.msk.bf16.mxu1 %vm294_vm4, %v317_v20  ;;  %v319_v22 = vsel %vm293_vm5, %v313_v21, 0 }
  0x88   : > { %385 = vmatpush1.bf16.msra.mxu0 %v319_v22  ;;  %837 = vmatpush1.bf16.msra.mxu1 %v319_v22 }
  0x89   : > { %807 = vmatprep.subr.msk.bf16.mxu0 %vm301_vm7, %v300_v18  ;;  %834 = vmatprep.subr.msk.bf16.mxu1 %vm301_vm7, %v300_v18  ;;  %v270_v23 = vpop.permute.xlu1 %269  ;;  %v268_v24 = vpop.permute.xlu0 %267 }
  0x8a   : > { %v277_v25 = vsel %vm271_vm6, %v270_v23, 0  ;;  %v272_v26 = vsel %vm271_vm6, %v268_v24, %v270_v23 }
  0x8b   : > { %v295_v28 = vsel %vm293_vm5, %v272_v26, 0 }
  0x8c   : > { %387 = vmatpush1.bf16.msra.mxu0 %v302_v27  ;;  %838 = vmatpush1.bf16.msra.mxu1 %v302_v27 }
  0x8d   : > { %808 = vmatprep.subr.msk.bf16.mxu0 %vm294_vm4, %v277_v25  ;;  %835 = vmatprep.subr.msk.bf16.mxu1 %vm294_vm4, %v277_v25 }
  0x90   : > { %389 = vmatpush1.bf16.msra.mxu0 %v295_v28  ;;  %839 = vmatpush1.bf16.msra.mxu1 %v295_v28 }
  0x91   : > { %390 = vmatprep.subr.bf16.mxu0 %v869_v2  ;;  %836 = vmatprep.subr.bf16.mxu1 %v869_v2 }
  0x94   : > { %391 = vmatpush1.bf16.msra.mxu0 %v938_v1  ;;  %840 = vmatpush1.bf16.msra.mxu1 %v938_v1 }
  0x96   : > { %v336_v33 = vpop.permute.xlu0 %335  ;;  %v341_v41 = vpop.permute.xlu1 %340 }
  0x97   : > { %809 = vmatmul.mubr.msk.bf16.vlgmr.msra.gmra.mxu0 %vm363_vm8, %v870_v29  ;;  %811 = vmatmul.mubr.msk.bf16.vlgmr.msra.gmra.mxu1 %vm363_vm8, %v871_v30 }
  0x98   : > { %418 = vmatprep.mubr.bf16.mxu0 %v886_v0  ;;  %438 = vmatprep.mubr.bf16.mxu1 %v886_v0 }
  0x9f   : > { %810 = vmatmul.mubr.msk.bf16.gmra.mxu0 %vm363_vm8, %v872_v31  ;;  %812 = vmatmul.mubr.msk.bf16.gmra.mxu1 %vm363_vm8, %v873_v32 }
 0x157   : > { %v410_v34 = vpop.f32.mrf.mxu0  ;;  %v430_v35 = vpop.f32.mrf.mxu1 }
 0x158   : > { %v972_v38 = vadd.f32 %v410_v34, %v336_v33  ;;  %v978_v42 = vadd.f32 %v430_v35, %v336_v33 }
 0x159   : > { %v412_v36 = vpop.f32.mrf.mxu0  ;;  %v432_v37 = vpop.f32.mrf.mxu1 }
 0x15a   : > { %v974_v39 = vadd.f32 %v412_v36, %v336_v33  ;;  %v976_v40 = vadd.f32 %v432_v37, %v336_v33  ;;  %v459_v50 = vmul.f32 %v972_v38, %v972_v38  ;;  %v497_v63 = vmul.f32 %v978_v42, %v978_v42 }
 0x15b   : > { %v414_v43 = vpop.f32.mrf.mxu0  ;;  %v434_v44 = vpop.f32.mrf.mxu1 }
 0x15c   : > { %v489_v45 = vadd.f32 %v976_v40, %v978_v42  ;;  %v453_v46 = vadd.f32 %v974_v39, %v972_v38  ;;  %v984_v47 = vadd.f32 %v414_v43, %v341_v41  ;;  %v460_v51 = vmul.f32 %v974_v39, %v974_v39 }
 0x15d   : > { %v416_v48 = vpop.f32.mrf.mxu0  ;;  %v436_v49 = vpop.f32.mrf.mxu1  ;;  %v990_v52 = vadd.f32 %v434_v44, %v341_v41  ;;  %v498_v59 = vmul.f32 %v976_v40, %v976_v40 }
 0x15e   : > { %v992_v53 = vadd.f32 %v416_v48, %v341_v41  ;;  %v994_v54 = vadd.f32 %v436_v49, %v341_v41  ;;  %490 = vadd.xlane.f32.xlu0 %v489_v45  ;;  %454 = vadd.xlane.f32.xlu1 %v453_v46  ;;  %v463_v57 = vadd.f32 %v460_v51, %v459_v50 }
 0x15f   : > { %v420_v55 = vpop.f32.mrf.mxu0  ;;  %v440_v56 = vpop.f32.mrf.mxu1  ;;  %v461_v0 = vmul.f32 %v984_v47, %v984_v47  ;;  %v501_v2 = vadd.f32 %v498_v59, %v497_v63  ;;  %v499_v7 = vmul.f32 %v990_v52, %v990_v52 }
 0x160   : > { %v492_v58 = vadd.f32 %v994_v54, %v990_v52  ;;  %v462_v60 = vmul.f32 %v992_v53, %v992_v53  ;;  %v500_v4 = vmul.f32 %v994_v54, %v994_v54  ;;  %v456_v10 = vadd.f32 %v992_v53, %v984_v47 }
 0x161   : > { %v422_v61 = vpop.f32.mrf.mxu0  ;;  %v442_v62 = vpop.f32.mrf.mxu1  ;;  %v1016_v13 = vadd.f32 %v420_v55, %v336_v33  ;;  %v1028_v19 = vadd.f32 %v440_v56, %v336_v33 }
 0x162   : > { %464 = vadd.xlane.f32.xlu0 %v463_v57  ;;  %493 = vadd.xlane.f32.xlu1 %v492_v58  ;;  %v466_v3 = vadd.f32 %v462_v60, %v461_v0  ;;  %v1010_v8 = vadd.f32 %v422_v61, %v336_v33  ;;  %v504_v11 = vadd.f32 %v500_v4, %v499_v7 }
 0x163   : > { %v424_v1 = vpop.f32.mrf.mxu0  ;;  %v444_v5 = vpop.f32.mrf.mxu1  ;;  %v1020_v15 = vadd.f32 %v442_v62, %v336_v33  ;;  %v477_v25 = vmul.f32 %v1016_v13, %v1016_v13  ;;  %v517_v31 = vmul.f32 %v1028_v19, %v1028_v19 }
 0x164   : > { %v1018_v14 = vadd.f32 %v424_v1, %v341_v41  ;;  %v469_v17 = vadd.f32 %v1010_v8, %v1016_v13  ;;  %v1030_v20 = vadd.f32 %v444_v5, %v341_v41  ;;  %v478_v23 = vmul.f32 %v1010_v8, %v1010_v8 }
 0x165   : > { %v426_v6 = vpop.f32.mrf.mxu0  ;;  %v446_v12 = vpop.f32.mrf.mxu1  ;;  %v509_v21 = vadd.f32 %v1020_v15, %v1028_v19  ;;  %v518_v29 = vmul.f32 %v1020_v15, %v1020_v15 }
 0x166   : > { %502 = vadd.xlane.f32.xlu0 %v501_v2  ;;  %467 = vadd.xlane.f32.xlu1 %v466_v3  ;;  %v1012_v9 = vadd.f32 %v426_v6, %v341_v41  ;;  %v1022_v16 = vadd.f32 %v446_v12, %v341_v41  ;;  %v479_v26 = vmul.f32 %v1018_v14, %v1018_v14 }
 0x167   : > { %v481_v27 = vadd.f32 %v478_v23, %v477_v25  ;;  %v519_v32 = vmul.f32 %v1030_v20, %v1030_v20  ;;  %v521_v33 = vadd.f32 %v518_v29, %v517_v31 }
 0x168   : > { %v472_v18 = vadd.f32 %v1012_v9, %v1018_v14  ;;  %v512_v22 = vadd.f32 %v1022_v16, %v1030_v20  ;;  %v480_v24 = vmul.f32 %v1012_v9, %v1012_v9  ;;  %v520_v30 = vmul.f32 %v1022_v16, %v1022_v16 }
 0x16a   : > { %457 = vadd.xlane.f32.xlu0 %v456_v10  ;;  %505 = vadd.xlane.f32.xlu1 %v504_v11  ;;  %v484_v28 = vadd.f32 %v480_v24, %v479_v26  ;;  %v524_v34 = vadd.f32 %v520_v30, %v519_v32 }
 0x16e   : > { %470 = vadd.xlane.f32.xlu0 %v469_v17  ;;  %473 = vadd.xlane.f32.xlu1 %v472_v18 }
 0x172   : > { %510 = vadd.xlane.f32.xlu0 %v509_v21  ;;  %513 = vadd.xlane.f32.xlu1 %v512_v22 }
 0x176   : > { %482 = vadd.xlane.f32.xlu0 %v481_v27  ;;  %485 = vadd.xlane.f32.xlu1 %v484_v28 }
 0x17a   : > { %522 = vadd.xlane.f32.xlu0 %v521_v33  ;;  %525 = vadd.xlane.f32.xlu1 %v524_v34 }
 0x1e7   : > { %v491_v35 = vpop.xlane.xlu0 %490  ;;  %v455_v36 = vpop.xlane.xlu1 %454 }
 0x1eb   : > { %v465_v37 = vpop.xlane.xlu0 %464  ;;  %v494_v41 = vpop.xlane.xlu1 %493 }
 0x1ef   : > { %v503_v43 = vpop.xlane.xlu0 %502  ;;  %v468_v44 = vpop.xlane.xlu1 %467 }
 0x1f3   : > { %v458_v45 = vpop.xlane.xlu0 %457  ;;  %v506_v46 = vpop.xlane.xlu1 %505 }
 0x1f7   : > { %v471_v48 = vpop.xlane.xlu0 %470  ;;  %v474_v49 = vpop.xlane.xlu1 %473 }
 0x1f8   : > { %v475_v50 = vadd.f32 %v471_v48, %v455_v36  ;;  %v476_v51 = vadd.f32 %v474_v49, %v458_v45 }
 0x1fa   : > { %v495_v55 = vadd.f32 %v491_v35, %v475_v50  ;;  %v496_v56 = vadd.f32 %v494_v41, %v476_v51 }
 0x1fb   : > { %v511_v57 = vpop.xlane.xlu0 %510  ;;  %v514_v58 = vpop.xlane.xlu1 %513 }
 0x1fc   : > { %v515_v59 = vadd.f32 %v511_v57, %v495_v55  ;;  %v516_v60 = vadd.f32 %v514_v58, %v496_v56 }
 0x1fe   : > { %v530_v61 = vsel %vm529_vm9, %v515_v59, 0.0  ;;  %v541_v62 = vsel %vm529_vm9, %v516_v60, 0.0  ;;  %v449_v59 = vld [vmem:[%s1114_s3] sm:$0xff]  ;;  %v450_v60 = vld [vmem:[%s1114_s3 + $0x8] sm:$0xff] }
 0x1ff   : > { %v483_v63 = vpop.xlane.xlu0 %482  ;;  %531 = vadd.xlane.f32.xlu0 %v530_v61  ;;  %542 = vadd.xlane.f32.xlu1 %v541_v62  ;;  %v486_v0 = vpop.xlane.xlu1 %485 }
 0x200   : > { %v487_v1 = vadd.f32 %v483_v63, %v465_v37  ;;  %v488_v2 = vadd.f32 %v486_v0, %v468_v44 }
 0x202   : > { %v507_v3 = vadd.f32 %v503_v43, %v487_v1  ;;  %v508_v4 = vadd.f32 %v506_v46, %v488_v2  ;;  %v451_v2 = vld [vmem:[%s1115_s4] sm:$0xff] }
 0x203   : > { %v523_v5 = vpop.xlane.xlu0 %522  ;;  %v526_v6 = vpop.xlane.xlu1 %525 }
 0x204   : > { %v527_v7 = vadd.f32 %v523_v5, %v507_v3  ;;  %v528_v10 = vadd.f32 %v526_v6, %v508_v4  ;;  %v452_v5 = vld [vmem:[%s1115_s4 + $0x8] sm:$0xff] }
 0x206   : > { %v552_v11 = vsel %vm529_vm9, %v527_v7, 0.0  ;;  %v565_v12 = vsel %vm529_vm9, %v528_v10, 0.0 }
 0x207   : > { %553 = vadd.xlane.f32.xlu0 %v552_v11  ;;  %566 = vadd.xlane.f32.xlu1 %v565_v12 }
 0x288   : > { %v532_v17 = vpop.xlane.xlu0 %531  ;;  %v543_v18 = vpop.xlane.xlu1 %542 }
 0x289   : > { %v533_v21 = vrot.slane %v532_v17, 4  ;;  %v544_v22 = vrot.slane %v543_v18, 4 }
 0x28b   : > { %v534_v23 = vadd.f32 %v533_v21, %v532_v17  ;;  %v545_v24 = vadd.f32 %v544_v22, %v543_v18 }
 0x28d   : > { %v535_v25 = vrot.slane %v534_v23, 2  ;;  %v546_v26 = vrot.slane %v545_v24, 2 }
 0x28f   : > { %v536_v27 = vadd.f32 %v535_v25, %v534_v23  ;;  %v547_v28 = vadd.f32 %v546_v26, %v545_v24 }
 0x290   : > { %v554_v29 = vpop.xlane.xlu0 %553  ;;  %v567_v30 = vpop.xlane.xlu1 %566 }
 0x291   : > { %v555_v31 = vrot.slane %v554_v29, 4  ;;  %v568_v32 = vrot.slane %v567_v30, 4  ;;  %v537_v33 = vrot.slane %v536_v27, 1  ;;  %v548_v34 = vrot.slane %v547_v28, 1 }
 0x293   : > { %v556_v35 = vadd.f32 %v555_v31, %v554_v29  ;;  %v569_v36 = vadd.f32 %v568_v32, %v567_v30  ;;  %v538_v37 = vadd.f32 %v537_v33, %v536_v27  ;;  %v549_v41 = vadd.f32 %v548_v34, %v547_v28 }
 0x295   : > { %v557_v43 = vrot.slane %v556_v35, 2  ;;  %v570_v44 = vrot.slane %v569_v36, 2  ;;  %841 = vpush %v538_v37 }
 0x296   : > { %843 = vpush %v549_v41 }
 0x297   : > { %v558_v45 = vadd.f32 %v557_v43, %v556_v35  ;;  %v571_v46 = vadd.f32 %v570_v44, %v569_v36 }
 0x299   : > { %v559_v48 = vrot.slane %v558_v45, 1  ;;  %v572_v49 = vrot.slane %v571_v46, 1 }
 0x29b   : > { %v560_v50 = vadd.f32 %v559_v48, %v558_v45  ;;  %v573_v51 = vadd.f32 %v572_v49, %v571_v46 }
 0x29d   : > { %845 = vpush %v560_v50 }
 0x29e   : > { %847 = vpush %v573_v51 }
 0x2c6   : > { %s842_s14 = spop %841 }
 0x2c7   : > { %s844_s15 = spop %843  ;;  %s1056_s16 = smul.f32 0.00012207031, %s842_s14 }
 0x2c8   : > { %s1058_s17 = smul.f32 0.00012207031, %s844_s15  ;;  %s824_s15 = sshll.u32 %s1118_s19, 6 }
 0x2c9   : > { %s563_s20 = smul.f32 %s1056_s16, %s1056_s16  ;;  %v588_v0 = vstv %s1056_s16  ;;  %s1098_s19 = scalar_lea.vmem %s1116_s5, %s824_s15 }
 0x2ca   : > { %s576_s21 = smul.f32 %s1058_s17, %s1058_s17  ;;  %v589_v3 = vstv %s1058_s17 }
 0x2ce   : > { %s846_s22 = spop %845 }
 0x2cf   : > { %s562_s23 = smul.f32 0.00012207031, %s846_s22  ;;  %s848_s24 = spop %847 }
 0x2d0   : > { %s575_s25 = smul.f32 0.00012207031, %s848_s24 }
 0x2d1   : > { %s564_s26 = ssub.f32 %s562_s23, %s563_s20 }
 0x2d2   : > { %s577_s27 = ssub.f32 %s575_s25, %s576_s21 }
 0x2d3   : > { %s578_s28 = sadd.f32 1e-05, %s564_s26 }
 0x2d4   : > { %s582_s29 = sadd.f32 1e-05, %s577_s27 }
 0x2d5   : > { %v579_v55 = vstv %s578_s28 }
 0x2d6   : > { %874 = vrsqrt.f32 %v579_v55  ;;  %v583_v56 = vstv %s582_s29 }
 0x2d7   : > { %876 = vrsqrt.f32 %v583_v56 }
 0x2e3   : > { %v875_v57 = vpop.eup %874 }
 0x2e4   : > { %v877_v58 = vpop.eup %876  ;;  %849 = vpush %v875_v57 }
 0x2e5   : > { %851 = vpush %v877_v58 }
 0x315   : > { %s850_s7 = spop %849 }
 0x316   : > { %v586_v61 = vstv %s850_s7  ;;  %s852_s10 = spop %851 }
 0x317   : > { %v590_v62 = vmul.f32 %v586_v61, %v449_v59  ;;  %v587_v63 = vstv %s852_s10 }
 0x318   : > { %v591_v1 = vmul.f32 %v587_v63, %v450_v60 }
 0x319   : > { %v592_v4 = vmul.f32 %v590_v62, %v588_v0  ;;  %598 = vperm.xlu0 %865, %v590_v62  }
 0x31a   : > { %v593_v6 = vmul.f32 %v591_v1, %v589_v3  ;;  %603 = vperm.xlu1 %866, %v591_v1  }
 0x31b   : > { %v594_v7 = vsub.f32 %v451_v2, %v592_v4 }
 0x31c   : > { %v595_v10 = vsub.f32 %v452_v5, %v593_v6 }
 0x31e   : > { %624 = vperm.xlu1 %866, %v594_v7   ;;  %629 = vperm.xlu0 %865, %v595_v10  }
 0x394   : > { %v599_v11 = vpop.permute.xlu0 %598 }
 0x395   : > { %v604_v12 = vpop.permute.xlu1 %603  ;;  %v606_v17 = vmul.f32 %v599_v11, %v972_v38  ;;  %v607_v18 = vmul.f32 %v599_v11, %v974_v39  ;;  %v610_v21 = vmul.f32 %v599_v11, %v1016_v13  ;;  %v611_v22 = vmul.f32 %v599_v11, %v1010_v8 }
 0x396   : > { %v614_v23 = vmul.f32 %v599_v11, %v978_v42  ;;  %v615_v24 = vmul.f32 %v599_v11, %v976_v40  ;;  %v618_v25 = vmul.f32 %v599_v11, %v1028_v19  ;;  %v619_v26 = vmul.f32 %v599_v11, %v1020_v15 }
 0x397   : > { %v608_v27 = vmul.f32 %v604_v12, %v984_v47  ;;  %v609_v28 = vmul.f32 %v604_v12, %v992_v53  ;;  %v612_v38 = vmul.f32 %v604_v12, %v1018_v14  ;;  %v613_v39 = vmul.f32 %v604_v12, %v1012_v9 }
 0x398   : > { %v616_v8 = vmul.f32 %v604_v12, %v990_v52  ;;  %v617_v42 = vmul.f32 %v604_v12, %v994_v54  ;;  %v620_v40 = vmul.f32 %v604_v12, %v1030_v20  ;;  %v621_v19 = vmul.f32 %v604_v12, %v1022_v16 }
 0x399   : > { %v625_v13 = vpop.permute.xlu1 %624  ;;  %v630_v29 = vpop.permute.xlu0 %629 }
 0x39a   : > { %v632_v30 = vadd.f32 %v625_v13, %v606_v17  ;;  %v633_v15 = vadd.f32 %v625_v13, %v607_v18  ;;  %v636_v31 = vadd.f32 %v625_v13, %v610_v21  ;;  %v637_v47 = vadd.f32 %v625_v13, %v611_v22 }
 0x39b   : > { %v640_v53 = vadd.f32 %v625_v13, %v614_v23  ;;  %v641_v32 = vadd.f32 %v625_v13, %v615_v24  ;;  %v644_v14 = vadd.f32 %v625_v13, %v618_v25  ;;  %v645_v33 = vadd.f32 %v625_v13, %v619_v26 }
 0x39c   : > { %v648_v9 = vmul.f32 0.2, %v632_v30  ;;  %v649_v34 = vmul.f32 0.2, %v633_v15  ;;  %v652_v35 = vmul.f32 0.2, %v636_v31  ;;  %v634_v52 = vadd.f32 %v630_v29, %v608_v27 }
 0x39d   : > { %v653_v36 = vmul.f32 0.2, %v637_v47  ;;  %v656_v54 = vmul.f32 0.2, %v640_v53  ;;  %v657_v37 = vmul.f32 0.2, %v641_v32  ;;  %v635_v20 = vadd.f32 %v630_v29, %v609_v28 }
 0x39e   : > { %v660_v41 = vmul.f32 0.2, %v644_v14  ;;  %v661_v16 = vmul.f32 0.2, %v645_v33  ;;  %v664_v43 = vmax.f32 %v632_v30, %v648_v9  ;;  %v665_v44 = vmax.f32 %v633_v15, %v649_v34 }
 0x39f   : > { %v668_v45 = vmax.f32 %v636_v31, %v652_v35  ;;  %v669_v46 = vmax.f32 %v637_v47, %v653_v36  ;;  %v672_v48 = vmax.f32 %v640_v53, %v656_v54  ;;  %v673_v49 = vmax.f32 %v641_v32, %v657_v37 }
 0x3a0   : > { %v676_v50 = vmax.f32 %v644_v14, %v660_v41  ;;  %v677_v51 = vmax.f32 %v645_v33, %v661_v16  ;;  %v825_v55 = vpack.c.bf16 %v665_v44, %v664_v43  ;;  %v638_v56 = vadd.f32 %v630_v29, %v612_v38 }
 0x3a1   : > { %v827_v57 = vpack.c.bf16 %v669_v46, %v668_v45  ;;  %v829_v58 = vpack.c.bf16 %v673_v49, %v672_v48  ;;  %v639_v59 = vadd.f32 %v630_v29, %v613_v39  ;;  %v642_v60 = vadd.f32 %v630_v29, %v616_v8 }
 0x3a2   : > { %v831_v61 = vpack.c.bf16 %v677_v51, %v676_v50  ;;  %728 = vst [vmem:[%s1098_s19] sm:$0xff] %v825_v55  ;;  %v643_v62 = vadd.f32 %v630_v29, %v617_v42  ;;  %v646_v63 = vadd.f32 %v630_v29, %v620_v40  ;;  %v647_v0 = vadd.f32 %v630_v29, %v621_v19 }
 0x3a3   : > { %730 = vst [vmem:[%s1098_s19 + $0x10] sm:$0xff] %v827_v57  ;;  %732 = vst [vmem:[%s1098_s19 + $0x20] sm:$0xff] %v829_v58  ;;  %v650_v1 = vmul.f32 0.2, %v634_v52  ;;  %v651_v2 = vmul.f32 0.2, %v635_v20 }
 0x3a4   : > { %v654_v3 = vmul.f32 0.2, %v638_v56  ;;  %734 = vst [vmem:[%s1098_s19 + $0x30] sm:$0xff] %v831_v61  ;;  %v655_v4 = vmul.f32 0.2, %v639_v59 }
 0x3a5   : > { %v658_v5 = vmul.f32 0.2, %v642_v60  ;;  %v659_v6 = vmul.f32 0.2, %v643_v62  ;;  %v662_v7 = vmul.f32 0.2, %v646_v63  ;;  %v666_v11 = vmax.f32 %v634_v52, %v650_v1 }
 0x3a6   : > { %v663_v10 = vmul.f32 0.2, %v647_v0  ;;  %v667_v12 = vmax.f32 %v635_v20, %v651_v2  ;;  %v670_v17 = vmax.f32 %v638_v56, %v654_v3  ;;  %v671_v18 = vmax.f32 %v639_v59, %v655_v4 }
 0x3a7   : > { %v674_v21 = vmax.f32 %v642_v60, %v658_v5  ;;  %v675_v22 = vmax.f32 %v643_v62, %v659_v6  ;;  %v678_v23 = vmax.f32 %v646_v63, %v662_v7 }
 0x3a8   : > { %v679_v24 = vmax.f32 %v647_v0, %v663_v10  ;;  %v826_v25 = vpack.c.bf16 %v667_v12, %v666_v11  ;;  %v828_v26 = vpack.c.bf16 %v671_v18, %v670_v17 }
 0x3a9   : > { %v830_v27 = vpack.c.bf16 %v675_v22, %v674_v21 }
 0x3aa   : > { %v832_v28 = vpack.c.bf16 %v679_v24, %v678_v23  ;;  %729 = vst [vmem:[%s1098_s19 + $0x8] sm:$0xff] %v826_v25  ;;  %731 = vst [vmem:[%s1098_s19 + $0x18] sm:$0xff] %v828_v26 }
 0x3ab   : > { %733 = vst [vmem:[%s1098_s19 + $0x28] sm:$0xff] %v830_v27 }
 0x3ac   : > { %735 = vst [vmem:[%s1098_s19 + $0x38] sm:$0xff] %v832_v28 }
 0x3ad PF: > { %s15_s18 = sadd.s32 1, %s884_s18  }
 0x3ae   : > { %p12_p4 = scmp.ge.s32.totalorder %s15_s18, 4  }
 0x3b0   :  { %14 = sbr.rel (!%p12_p4) target bundleno = 1 (0x1), region = 70 }

// kernel: multigrid_decoder_forward.6
= control target key start
LH: loop header
LB: loop body
LE: loop exit
PB: predicated region body
PF: predicated region fallthrough
CT: control target
= control target key end

     0   :  { %s1956_s18 = smov 0   ;;  %s3121_s0 = inlined_call_operand.vmem [shape: bf16[2,16,1024], index: 0, kind: input, shape index: {}]   ;;  %s3122_s1 = inlined_call_operand.vmem [shape: bf16[64,64], index: 1, kind: input, shape index: {}]   ;;  %s3123_s2 = inlined_call_operand.vmem [shape: f32[16,1], index: 2, kind: input, shape index: {}]   ;;  %s3124_s3 = inlined_call_operand.vmem [shape: f32[16,1], index: 3, kind: input, shape index: {}]   ;;  %s3125_s4 = inlined_call_operand.vmem [shape: f32[16,1], index: 4, kind: input, shape index: {}]   ;;  %s3126_s5 = inlined_call_operand.vmem [shape: bf16[2,64,1024], index: 5, kind: output, shape index: {}]  }
   0x1 LB: > { %s1766_s19 = sadd.s32 4294967295, %s1920_s18   ;;  %p1770_p0 = scmp.ge.s32.totalorder %s1920_s18, 1  ;;  %s1920_s18 = sphi %s1956_s18, %s15_s18  }
   0x2   : > { %p187_p1 = scmp.lt.s32.totalorder %s1920_s18, 3 }
   0x4   : > { %p188_p2 = pnand %p1770_p0, %p187_p1 }
   0x6   : > { %191 = sbr.rel (%p188_p2) target bundleno = 1054 (0x41e), region = 40 }
   0xb   : > { %p215_p3 = scmp.lt.s32.totalorder %s1766_s19, 1  ;;  %v1922_v0 = vmov 0   ;;  %s1923_s24 = smov 95   ;;  %v576_v17 = vld [vmem:[%s3123_s2 + $0x8] sm:$0xff]  ;;  %v575_v18 = vld [vmem:[%s3123_s2] sm:$0xff]  ;;  %v236_v19 = vlaneseq  ;;  %vm540_vm6 = vcmask 777216  }
   0xc   : > { %660 = vmatprep.mubr.bf16.mxu0 %v1922_v0  ;;  %733 = vmatprep.mubr.bf16.mxu1 %v1922_v0  ;;  %s1924_s25 = smov 96   ;;  %s1925_s26 = smov 127   ;;  %vm505_vm9 = vcmask 785408   ;;  %vm397_vm12 = vcmask 1039360  }
   0xd   : > { %s3261_s19 = smov (!%p215_p3, %s1766_s19), 1  ;;  %1905 = vset.pattern.permute.xlu1 %v1922_v0  ;;  %1904 = vset.pattern.permute.xlu0 %v1922_v0  ;;  %v237_v20 = vand.u32 127, %v236_v19  ;;  %v442_v26 = vshrl.u32 %v236_v19, 7 }
   0xe   : > { %s1846_s20 = sshll.u32 %s3261_s19, 6 }
   0xf   : > { %s1974_s23 = scalar_lea.vmem %s3121_s0, %s1846_s20  ;;  %v238_v21 = vadd.s32 128, %v237_v20  ;;  %v249_v22 = vand.u32 31, %v237_v20  ;;  %v239_v24 = vadd.s32 256, %v237_v20  ;;  %v240_v25 = vadd.s32 384, %v237_v20 }
  0x10   : > { %v229_v1 = vld [vmem:[%s1974_s23 + $0x8] sm:$0xff]  ;;  %v228_v3 = vld [vmem:[%s1974_s23] sm:$0xff]  ;;  %v230_v9 = vld [vmem:[%s1974_s23 + $0x10] sm:$0xff]  ;;  %v2046_v29 = vsub.s32 4, %v442_v26  ;;  %v2048_v30 = vsub.s32 0, %v442_v26  ;;  %v241_v48 = vadd.s32 512, %v237_v20 }
  0x11   : > { %v233_v2 = vld [vmem:[%s1974_s23 + $0x28] sm:$0xff]  ;;  %v232_v5 = vld [vmem:[%s1974_s23 + $0x20] sm:$0xff]  ;;  %v234_v10 = vld [vmem:[%s1974_s23 + $0x30] sm:$0xff]  ;;  %v256_v23 = vand.u32 31, %v238_v21  ;;  %vm341_vm0 = vcmp.lt.s32.totalorder %v249_v22, 31  ;;  %v263_v27 = vand.u32 31, %v239_v24 }
  0x12   : > { %v1979_v4 = vcombine.low %v229_v1, %v233_v2  ;;  %v1982_v6 = vcombine.low %v228_v3, %v232_v5  ;;  %v1986_v7 = vcombine.high %v228_v3, %v232_v5  ;;  %v1992_v8 = vcombine.high %v229_v1, %v233_v2  ;;  %v231_v13 = vld [vmem:[%s1974_s23 + $0x18] sm:$0xff]  ;;  %v2118_v26 = vld [vmem:[%s3122_s1] sm:$0xff]  }
  0x13   : > { %v2002_v11 = vcombine.low %v230_v9, %v234_v10  ;;  %v2014_v12 = vcombine.high %v230_v9, %v234_v10  ;;  %v235_v14 = vld [vmem:[%s1974_s23 + $0x38] sm:$0xff]  ;;  %vm342_vm1 = vcmp.lt.s32.totalorder %v256_v23, 31  ;;  %v270_v28 = vand.u32 31, %v240_v25 }
  0x14   : > { %528 = vrot.lane.b32.xlu1 %v1979_v4, %s1923_s24  ;;  %524 = vrot.lane.b32.xlu0 %v1982_v6, %s1923_s24  ;;  %v2023_v15 = vcombine.low %v231_v13, %v235_v14  ;;  %v2027_v16 = vcombine.high %v231_v13, %v235_v14  ;;  %vm433_vm2 = vmpackc.low %vm342_vm1, %vm341_vm0  ;;  %vm343_vm3 = vcmp.lt.s32.totalorder %v263_v27, 31  ;;  %v242_v50 = vadd.s32 640, %v237_v20 }
  0x15   : > { %v437_v31 = vsel %vm433_vm2, 65537, %v1922_v0  ;;  %vm344_vm4 = vcmp.lt.s32.totalorder %v270_v28, 31  ;;  %v277_v57 = vand.u32 31, %v241_v48  ;;  %v243_v60 = vadd.s32 768, %v237_v20 }
  0x16   : > { %v448_v33 = vrot.slane %v437_v31, %v2046_v29  ;;  %v444_v34 = vrot.slane %v437_v31, %v2048_v30  ;;  %vm434_vm5 = vmpackc.low %vm344_vm4, %vm343_vm3  ;;  %v284_v59 = vand.u32 31, %v242_v50  ;;  %v244_v61 = vadd.s32 896, %v237_v20 }
  0x17   : > { %v438_v40 = vsel %vm434_vm5, 65537, %v1922_v0  ;;  %vm2086_vm13 = vcmp.lt.s32.totalorder %v277_v57, 31  ;;  %v291_v3 = vand.u32 31, %v243_v60  ;;  %vm615_vm3 = vcmask 523264  }
  0x18   : > { %491 = vrot.lane.b32.xlu1 %v1986_v7, %s1924_s25  ;;  %526 = vrot.lane.b32.xlu0 %v1986_v7, %s1923_s24  ;;  %vm2053_vm7 = vcmp.ne.s16.totalorder %v448_v33, 0  ;;  %vm2057_vm8 = vcmp.ne.s16.totalorder %v444_v34, 0  ;;  %v456_v45 = vrot.slane %v438_v40, %v2046_v29  ;;  %v452_v46 = vrot.slane %v438_v40, %v2048_v30 }
  0x19   : > { %vm346_vm14 = vcmp.lt.s32.totalorder %v284_v59, 31  ;;  %v298_v5 = vand.u32 31, %v244_v61  ;;  %vm2094_vm0 = vcmp.lt.s32.totalorder %v291_v3, 31 }
  0x1a   : > { %vm2071_vm10 = vcmp.ne.s16.totalorder %v456_v45, 0  ;;  %vm2075_vm11 = vcmp.ne.s16.totalorder %v452_v46, 0  ;;  %vm435_vm15 = vmpackc.low %vm346_vm14, %vm2086_vm13 }
  0x1b   : > { %vm2098_vm1 = vcmp.lt.s32.totalorder %v298_v5, 31  ;;  %v439_v21 = vsel %vm435_vm15, 65537, %v1922_v0 }
  0x1c   : > { %530 = vrot.lane.b32.xlu1 %v1992_v8, %s1923_s24  ;;  %493 = vrot.lane.b32.xlu0 %v1979_v4, %s1924_s25  ;;  %vm436_vm2 = vmpackc.low %vm2098_vm1, %vm2094_vm0  ;;  %v460_v25 = vrot.slane %v439_v21, %v2048_v30  ;;  %v464_v28 = vrot.slane %v439_v21, %v2046_v29 }
  0x1d   : > { %v440_v31 = vsel %vm436_vm2, 65537, %v1922_v0 }
  0x1e   : > { %vm2133_vm4 = vcmp.ne.s16.totalorder %v460_v25, 0  ;;  %vm2138_vm5 = vcmp.ne.s16.totalorder %v464_v28, 0 }
  0x20   : > { %489 = vrot.lane.b32.xlu1 %v1982_v6, %s1924_s25  ;;  %532 = vrot.lane.b32.xlu0 %v2002_v11, %s1923_s24 }
  0x24   : > { %383 = vrot.lane.b32.xlu1 %v1986_v7, %s1925_s26  ;;  %381 = vrot.lane.b32.xlu0 %v1982_v6, %s1925_s26 }
  0x28   : > { %495 = vrot.lane.b32.xlu1 %v1992_v8, %s1924_s25  ;;  %385 = vrot.lane.b32.xlu0 %v1979_v4, %s1925_s26 }
  0x2c   : > { %387 = vrot.lane.b32.xlu1 %v1992_v8, %s1925_s26  ;;  %497 = vrot.lane.b32.xlu0 %v2002_v11, %s1924_s25 }
  0x30   : > { %534 = vrot.lane.b32.xlu1 %v2014_v12, %s1923_s24  ;;  %389 = vrot.lane.b32.xlu0 %v2002_v11, %s1925_s26 }
  0x34   : > { %499 = vrot.lane.b32.xlu1 %v2014_v12, %s1924_s25  ;;  %536 = vrot.lane.b32.xlu0 %v2023_v15, %s1923_s24 }
  0x38   : > { %538 = vrot.lane.b32.xlu1 %v2027_v16, %s1923_s24  ;;  %501 = vrot.lane.b32.xlu0 %v2023_v15, %s1924_s25 }
  0x3c   : > { %393 = vrot.lane.b32.xlu1 %v2023_v15, %s1925_s26  ;;  %391 = vrot.lane.b32.xlu0 %v2014_v12, %s1925_s26 }
  0x40   : > { %395 = vrot.lane.b32.xlu1 %v2027_v16, %s1925_s26  ;;  %503 = vrot.lane.b32.xlu0 %v2027_v16, %s1924_s25 }
  0x44   : > { %592 = vperm.xlu1 %1905, %v576_v17   ;;  %587 = vperm.xlu0 %1904, %v575_v18  }
  0x86   : > { %v529_v32 = vpop.permute.xlu1 %528  ;;  %v525_v35 = vpop.permute.xlu0 %524 }
  0x8a   : > { %v492_v36 = vpop.permute.xlu1 %491  ;;  %v527_v39 = vpop.permute.xlu0 %526 }
  0x8b   : > { %v542_v41 = vsel %vm540_vm6, %v527_v39, %v529_v32  ;;  %v541_v42 = vsel %vm540_vm6, %v525_v35, %v527_v39  ;;  %v472_v35 = vrot.slane %v440_v31, %v2046_v29 }
  0x8c   : > { %1787 = vmatprep.subr.msk.bf16.mxu0 %vm2053_vm7, %v542_v41  ;;  %v559_v43 = vsel %vm2057_vm8, %v541_v42, 0  ;;  %v1907_v42 = vld [vmem:[%s3122_s1 + $0x8] sm:$0xff]  }
  0x8d   : > { %637 = vmatpush1.bf16.msra.mxu0 %v559_v43 }
  0x8e   : > { %v531_v44 = vpop.permute.xlu1 %530  ;;  %v494_v47 = vpop.permute.xlu0 %493 }
  0x8f   : > { %v507_v49 = vsel %vm505_vm9, %v492_v36, %v494_v47  ;;  %v543_v54 = vsel %vm540_vm6, %v529_v32, %v531_v44 }
  0x90   : > { %638 = vmatprep.subr.bf16.mxu0 %v507_v49  ;;  %v561_v62 = vsel %vm2075_vm11, %v543_v54, 0  ;;  %v1908_v54 = vld [vmem:[%s3122_s1 + $0x10] sm:$0xff]  }
  0x92   : > { %v490_v51 = vpop.permute.xlu1 %489  ;;  %v533_v55 = vpop.permute.xlu0 %532 }
  0x93   : > { %v506_v56 = vsel %vm505_vm9, %v490_v51, %v492_v36  ;;  %v544_v58 = vsel %vm540_vm6, %v531_v44, %v533_v55 }
  0x94   : > { %639 = vmatpush1.bf16.msra.mxu0 %v506_v56  ;;  %1793 = vmatprep.subr.msk.bf16.mxu1 %vm2071_vm10, %v544_v58 }
  0x95   : > { %710 = vmatpush1.bf16.msra.mxu1 %v561_v62 }
  0x96   : > { %v384_v63 = vpop.permute.xlu1 %383  ;;  %v382_v1 = vpop.permute.xlu0 %381 }
  0x97   : > { %v398_v9 = vsel %vm397_vm12, %v382_v1, %v384_v63 }
  0x98   : > { %v481_v19 = vsel %vm2057_vm8, %v398_v9, 0  ;;  %vm2156_vm8 = vcmp.ne.s16.totalorder %v472_v35, 0 }
  0x9a   : > { %v496_v10 = vpop.permute.xlu1 %495  ;;  %v386_v13 = vpop.permute.xlu0 %385 }
  0x9b   : > { %v399_v14 = vsel %vm397_vm12, %v384_v63, %v386_v13  ;;  %v508_v24 = vsel %vm505_vm9, %v494_v47, %v496_v10 }
  0x9c   : > { %1788 = vmatprep.subr.msk.bf16.mxu0 %vm2053_vm7, %v399_v14 }
  0x9d   : > { %641 = vmatpush1.bf16.msra.mxu0 %v481_v19 }
  0x9e   : > { %v388_v20 = vpop.permute.xlu1 %387  ;;  %v498_v22 = vpop.permute.xlu0 %497  ;;  %642 = vmatprep.subr.bf16.mxu0 %v1986_v7 }
  0x9f   : > { %v509_v23 = vsel %vm505_vm9, %v496_v10, %v498_v22  ;;  %v400_v27 = vsel %vm397_vm12, %v386_v13, %v388_v20 }
  0xa0   : > { %711 = vmatprep.subr.bf16.mxu1 %v509_v23  ;;  %v483_v34 = vsel %vm2075_vm11, %v400_v27, 0 }
  0xa1   : > { %643 = vmatpush1.bf16.msra.mxu0 %v1982_v6  ;;  %712 = vmatpush1.bf16.msra.mxu1 %v508_v24  ;;  %v468_v6 = vrot.slane %v440_v31, %v2048_v30 }
  0xa2   : > { %v535_v7 = vpop.permute.xlu1 %534  ;;  %v390_v32 = vpop.permute.xlu0 %389 }
  0xa3   : > { %v401_v33 = vsel %vm397_vm12, %v388_v20, %v390_v32  ;;  %v545_v37 = vsel %vm540_vm6, %v533_v55, %v535_v7  ;;  %vm2149_vm7 = vcmp.ne.s16.totalorder %v468_v6, 0 }
  0xa4   : > { %1789 = vmatmul.mubr.msk.bf16.vlgmr.msra.gmra.mxu0 %vm615_vm3, %v2118_v26  ;;  %1794 = vmatprep.subr.msk.bf16.mxu1 %vm2071_vm10, %v401_v33  ;;  %v563_v29 = vsel %vm2133_vm4, %v545_v37, 0 }
  0xa5   : > { %714 = vmatpush1.bf16.msra.mxu1 %v483_v34  ;;  %670 = vmatprep.mubr.bf16.mxu0 %v1922_v0 }
  0xa6   : > { %v500_v38 = vpop.permute.xlu1 %499  ;;  %v537_v40 = vpop.permute.xlu0 %536  ;;  %715 = vmatprep.subr.bf16.mxu1 %v1992_v8 }
  0xa7   : > { %v546_v30 = vsel %vm540_vm6, %v535_v7, %v537_v40 }
  0xa8   : > { %1799 = vmatprep.subr.msk.bf16.mxu0 %vm2138_vm5, %v546_v30 }
  0xa9   : > { %716 = vmatpush1.bf16.msra.mxu1 %v1979_v4  ;;  %783 = vmatpush1.bf16.msra.mxu0 %v563_v29  ;;  %v510_v4 = vsel %vm505_vm9, %v498_v22, %v500_v38 }
  0xaa   : > { %v539_v8 = vpop.permute.xlu1 %538  ;;  %v502_v46 = vpop.permute.xlu0 %501 }
  0xab   : > { %v547_v44 = vsel %vm540_vm6, %v537_v40, %v539_v8  ;;  %v557_v45 = vsel %vm540_vm6, %v539_v8, 0  ;;  %v511_v48 = vsel %vm505_vm9, %v500_v38, %v502_v46  ;;  %vm1144_vm6 = vcmask 7168  }
  0xac   : > { %v565_v47 = vsel %vm2149_vm7, %v547_v44, 0  ;;  %1805 = vmatprep.subr.msk.bf16.mxu1 %vm2156_vm8, %v557_v45  ;;  %1790 = vmatmul.mubr.msk.bf16.gmra.mxu0 %vm615_vm3, %v1907_v42 }
  0xad   : > { %1795 = vmatmul.mubr.msk.bf16.vlgmr.msra.gmra.mxu1 %vm615_vm3, %v2118_v26  ;;  %784 = vmatprep.subr.bf16.mxu0 %v511_v48 }
  0xae   : > { %856 = vmatpush1.bf16.msra.mxu1 %v565_v47  ;;  %v394_v49 = vpop.permute.xlu1 %393  ;;  %785 = vmatpush1.bf16.msra.mxu0 %v510_v4  ;;  %v392_v50 = vpop.permute.xlu0 %391 }
  0xaf   : > { %680 = vmatprep.mubr.bf16.mxu0 %v1922_v0  ;;  %v402_v51 = vsel %vm397_vm12, %v390_v32, %v392_v50  ;;  %v403_v52 = vsel %vm397_vm12, %v392_v50, %v394_v49  ;;  %743 = vmatprep.mubr.bf16.mxu1 %v1922_v0 }
  0xb0   : > { %v485_v53 = vsel %vm2133_vm4, %v402_v51, 0  ;;  %1800 = vmatprep.subr.msk.bf16.mxu0 %vm2138_vm5, %v403_v52 }
  0xb2   : > { %v396_v55 = vpop.permute.xlu1 %395  ;;  %787 = vmatpush1.bf16.msra.mxu0 %v485_v53  ;;  %v504_v56 = vpop.permute.xlu0 %503 }
  0xb3   : > { %v512_v57 = vsel %vm505_vm9, %v502_v46, %v504_v56  ;;  %1806 = vmatprep.subr.msk.bf16.mxu1 %vm505_vm9, %v504_v56  ;;  %v404_v58 = vsel %vm397_vm12, %v394_v49, %v396_v55  ;;  %v415_v59 = vsel %vm397_vm12, %v396_v55, 0  ;;  %788 = vmatprep.subr.bf16.mxu0 %v2014_v12  ;;  %v1909_v12 = vld [vmem:[%s3122_s1 + $0x18] sm:$0xff]  }
  0xb4   : > { %1791 = vmatmul.mubr.msk.bf16.gmra.mxu0 %vm615_vm3, %v1908_v54  ;;  %858 = vmatpush1.bf16.msra.mxu1 %v512_v57  ;;  %v487_v60 = vsel %vm2149_vm7, %v404_v58, 0 }
  0xb5   : > { %1796 = vmatmul.mubr.msk.bf16.gmra.mxu1 %vm615_vm3, %v1907_v42  ;;  %690 = vmatprep.mubr.bf16.mxu0 %v1922_v0 }
  0xb6   : > { %1807 = vmatprep.subr.msk.bf16.mxu1 %vm2156_vm8, %v415_v59  ;;  %753 = vmatprep.mubr.bf16.mxu1 %v1922_v0 }
  0xb7   : > { %789 = vmatpush1.bf16.msra.mxu0 %v2002_v11 }
  0xb8   : > { %860 = vmatpush1.bf16.msra.mxu1 %v487_v60 }
  0xb9   : > { %861 = vmatprep.subr.bf16.mxu1 %v2027_v16 }
  0xbc   : > { %1792 = vmatmul.mubr.msk.bf16.gmra.mxu0 %vm615_vm3, %v1909_v12  ;;  %862 = vmatpush1.bf16.msra.mxu1 %v2023_v15 }
  0xbd   : > { %1797 = vmatmul.mubr.msk.bf16.gmra.mxu1 %vm615_vm3, %v1908_v54  ;;  %806 = vmatprep.mubr.bf16.mxu0 %v1922_v0 }
  0xbe   : > { %763 = vmatprep.mubr.bf16.mxu1 %v1922_v0 }
  0xbf   : > { %v2224_v16 = vpop.permute.xlu0 %587  ;;  %v2232_v2 = vpop.permute.xlu1 %592 }
  0xc4   : > { %1801 = vmatmul.mubr.msk.bf16.vlgmr.msra.gmra.mxu0 %vm615_vm3, %v2118_v26 }
  0xc5   : > { %1798 = vmatmul.mubr.msk.bf16.gmra.mxu1 %vm615_vm3, %v1909_v12  ;;  %816 = vmatprep.mubr.bf16.mxu0 %v1922_v0 }
  0xc6   : > { %879 = vmatprep.mubr.bf16.mxu1 %v1922_v0 }
  0xcc   : > { %1802 = vmatmul.mubr.msk.bf16.gmra.mxu0 %vm615_vm3, %v1907_v42 }
  0xcd   : > { %1808 = vmatmul.mubr.msk.bf16.vlgmr.msra.gmra.mxu1 %vm615_vm3, %v2118_v26  ;;  %826 = vmatprep.mubr.bf16.mxu0 %v1922_v0 }
  0xce   : > { %889 = vmatprep.mubr.bf16.mxu1 %v1922_v0 }
  0xd4   : > { %1803 = vmatmul.mubr.msk.bf16.gmra.mxu0 %vm615_vm3, %v1908_v54 }
  0xd5   : > { %1809 = vmatmul.mubr.msk.bf16.gmra.mxu1 %vm615_vm3, %v1907_v42  ;;  %836 = vmatprep.mubr.bf16.mxu0 %v1922_v0 }
  0xd6   : > { %899 = vmatprep.mubr.bf16.mxu1 %v1922_v0 }
  0xdc   : > { %1804 = vmatmul.mubr.msk.bf16.gmra.mxu0 %vm615_vm3, %v1909_v12 }
  0xdd   : > { %1810 = vmatmul.mubr.msk.bf16.gmra.mxu1 %vm615_vm3, %v1908_v54 }
  0xde   : > { %909 = vmatprep.mubr.bf16.mxu1 %v1922_v0 }
  0xe5   : > { %1811 = vmatmul.mubr.msk.bf16.gmra.mxu1 %vm615_vm3, %v1909_v12 }
 0x164   : > { %v662_v11 = vpop.f32.mrf.mxu0 }
 0x165   : > { %v2227_v63 = vadd.f32 %v662_v11, %v2224_v16 }
 0x166   : > { %v664_v15 = vpop.f32.mrf.mxu0 }
 0x167   : > { %v2230_v1 = vadd.f32 %v664_v15, %v2224_v16  ;;  %v942_v9 = vmul.f32 %v2227_v63, %v2227_v63 }
 0x168   : > { %v666_v61 = vpop.f32.mrf.mxu0 }
 0x169   : > { %v943_v10 = vmul.f32 %v2230_v1, %v2230_v1  ;;  %v2242_v17 = vadd.f32 %v666_v61, %v2232_v2  ;;  %v924_v26 = vadd.f32 %v2230_v1, %v2227_v63 }
 0x16a   : > { %v668_v62 = vpop.f32.mrf.mxu0 }
 0x16b   : > { %3186 = vst [vmem:[#allocation2_spill] sm:$0xff] %v2242_v17  ;;  %v2245_v18 = vadd.f32 %v668_v62, %v2232_v2  ;;  %v958_v27 = vadd.f32 %v943_v10, %v942_v9  ;;  %v950_v32 = vmul.f32 %v2242_v17, %v2242_v17 }
 0x16c   : > { %v672_v3 = vpop.f32.mrf.mxu0 }
 0x16d   : > { %v735_v5 = vpop.f32.mrf.mxu1  ;;  %3187 = vst [vmem:[#allocation3_spill] sm:$0xff] %v2245_v18  ;;  %v2248_v19 = vadd.f32 %v672_v3, %v2224_v16  ;;  %v933_v31 = vadd.f32 %v2245_v18, %v2242_v17  ;;  %v951_v33 = vmul.f32 %v2245_v18, %v2245_v18 }
 0x16e   : > { %v2235_v0 = vadd.f32 %v735_v5, %v2224_v16  ;;  %v674_v13 = vpop.f32.mrf.mxu0 }
 0x16f   : > { %v737_v14 = vpop.f32.mrf.mxu1  ;;  %v2253_v23 = vadd.f32 %v674_v13, %v2224_v16  ;;  %v996_v34 = vmul.f32 %v2248_v19, %v2248_v19  ;;  %v967_v44 = vadd.f32 %v951_v33, %v950_v32 }
 0x170   : > { %v944_v20 = vmul.f32 %v2235_v0, %v2235_v0  ;;  %v676_v21 = vpop.f32.mrf.mxu0  ;;  %v2256_v24 = vadd.f32 %v737_v14, %v2224_v16  ;;  %v925_v6 = vadd.f32 %v924_v26, %v2235_v0 }
 0x171   : > { %v739_v22 = vpop.f32.mrf.mxu1  ;;  %v2273_v36 = vadd.f32 %v676_v21, %v2232_v2  ;;  %v997_v40 = vmul.f32 %v2253_v23, %v2253_v23  ;;  %v976_v48 = vadd.f32 %v2253_v23, %v2248_v19 }
 0x172   : > { %v2259_v25 = vadd.f32 %v739_v22, %v2232_v2  ;;  %v678_v7 = vpop.f32.mrf.mxu0  ;;  %v959_v35 = vadd.f32 %v958_v27, %v944_v20  ;;  %v945_v30 = vmul.f32 %v2256_v24, %v2256_v24  ;;  %v2300_v4 = vadd.f32 %v925_v6, %v2256_v24 }
 0x173   : > { %v741_v28 = vpop.f32.mrf.mxu1  ;;  %3189 = vst [vmem:[#allocation5_spill] sm:$0xff] %v2273_v36  ;;  %v2276_v37 = vadd.f32 %v678_v7, %v2232_v2  ;;  %v1004_v49 = vmul.f32 %v2273_v36, %v2273_v36  ;;  %v1012_v53 = vadd.f32 %v997_v40, %v996_v34 }
 0x174   : > { %3188 = vst [vmem:[#allocation4_spill] sm:$0xff] %v2259_v25  ;;  %v682_v38 = vpop.f32.mrf.mxu0  ;;  %v952_v29 = vmul.f32 %v2259_v25, %v2259_v25  ;;  %v2285_v41 = vadd.f32 %v741_v28, %v2232_v2  ;;  %v934_v45 = vadd.f32 %v933_v31, %v2259_v25  ;;  %v2306_v54 = vadd.f32 %v959_v35, %v945_v30 }
 0x175   : > { %3190 = vst [vmem:[#allocation6_spill] sm:$0xff] %v2276_v37  ;;  %v745_v39 = vpop.f32.mrf.mxu1  ;;  %v2292_v46 = vadd.f32 %v682_v38, %v2224_v16  ;;  %v1005_v50 = vmul.f32 %v2276_v37, %v2276_v37  ;;  %v985_v15 = vadd.f32 %v2276_v37, %v2273_v36 }
 0x176   : > { %3191 = vst [vmem:[#allocation7_spill] sm:$0xff] %v2285_v41  ;;  %v2288_v42 = vadd.f32 %v745_v39, %v2224_v16  ;;  %v684_v43 = vpop.f32.mrf.mxu0  ;;  %v968_v55 = vadd.f32 %v967_v44, %v952_v29  ;;  %v953_v56 = vmul.f32 %v2285_v41, %v2285_v41  ;;  %v2322_v61 = vadd.f32 %v934_v45, %v2285_v41 }
 0x177   : > { %v747_v8 = vpop.f32.mrf.mxu1  ;;  %v2295_v47 = vadd.f32 %v684_v43, %v2224_v16  ;;  %v1052_v62 = vmul.f32 %v2292_v46, %v2292_v46  ;;  %v1021_v5 = vadd.f32 %v1005_v50, %v1004_v49 }
 0x178   : > { %v686_v51 = vpop.f32.mrf.mxu0  ;;  %v977_v57 = vadd.f32 %v976_v48, %v2288_v42  ;;  %v998_v58 = vmul.f32 %v2288_v42, %v2288_v42  ;;  %v2314_v59 = vadd.f32 %v747_v8, %v2224_v16  ;;  %v2336_v21 = vadd.f32 %v968_v55, %v953_v56 }
 0x179   : > { %v749_v52 = vpop.f32.mrf.mxu1  ;;  %v1053_v3 = vmul.f32 %v2295_v47, %v2295_v47  ;;  %v1032_v22 = vadd.f32 %v2295_v47, %v2292_v46  ;;  %v2341_v26 = vadd.f32 %v686_v51, %v2232_v2 }
 0x17a   : > { %v2317_v60 = vadd.f32 %v749_v52, %v2232_v2  ;;  %v688_v12 = vpop.f32.mrf.mxu0  ;;  %v1013_v7 = vadd.f32 %v1012_v53, %v998_v58  ;;  %v2347_v28 = vadd.f32 %v977_v57, %v2314_v59  ;;  %v999_v31 = vmul.f32 %v2314_v59, %v2314_v59 }
 0x17b   : > { %v751_v11 = vpop.f32.mrf.mxu1  ;;  %v2331_v10 = vadd.f32 %v688_v12, %v2232_v2  ;;  %3195 = vst [vmem:[#allocation11_spill] sm:$0xff] %v2341_v26  ;;  %v1068_v6 = vadd.f32 %v1053_v3, %v1052_v62  ;;  %v1060_v45 = vmul.f32 %v2341_v26, %v2341_v26 }
 0x17c   : > { %3192 = vst [vmem:[#allocation8_spill] sm:$0xff] %v2317_v60  ;;  %v1006_v9 = vmul.f32 %v2317_v60, %v2317_v60  ;;  %v2334_v13 = vadd.f32 %v751_v11, %v2232_v2  ;;  %v692_v14 = vpop.f32.mrf.mxu0  ;;  %v986_v35 = vadd.f32 %v985_v15, %v2317_v60  ;;  %v2382_v58 = vadd.f32 %v1013_v7, %v999_v31 }
 0x17d   : > { %3193 = vst [vmem:[#allocation9_spill] sm:$0xff] %v2331_v10  ;;  %v755_v20 = vpop.f32.mrf.mxu1  ;;  %v2344_v27 = vadd.f32 %v692_v14, %v2224_v16  ;;  %v1061_v30 = vmul.f32 %v2331_v10, %v2331_v10  ;;  %v1041_v12 = vadd.f32 %v2331_v10, %v2341_v26 }
 0x17e   : > { %3194 = vst [vmem:[#allocation10_spill] sm:$0xff] %v2334_v13  ;;  %v2352_v32 = vadd.f32 %v755_v20, %v2224_v16  ;;  %v694_v33 = vpop.f32.mrf.mxu0  ;;  %v1022_v40 = vadd.f32 %v1021_v5, %v1006_v9  ;;  %v1007_v29 = vmul.f32 %v2334_v13, %v2334_v13  ;;  %v2393_v3 = vadd.f32 %v986_v35, %v2334_v13 }
 0x17f   : > { %v757_v34 = vpop.f32.mrf.mxu1  ;;  %v2356_v38 = vadd.f32 %v694_v33, %v2224_v16  ;;  %v1108_v48 = vmul.f32 %v2344_v27, %v2344_v27  ;;  %v1077_v62 = vadd.f32 %v1061_v30, %v1060_v45 }
 0x180   : > { %v2359_v39 = vadd.f32 %v757_v34, %v2224_v16  ;;  %v1054_v43 = vmul.f32 %v2352_v32, %v2352_v32  ;;  %v696_v8 = vpop.f32.mrf.mxu0  ;;  %v1033_v49 = vadd.f32 %v1032_v22, %v2352_v32  ;;  %v2395_v5 = vadd.f32 %v1022_v40, %v1007_v29 }
 0x181   : > { %v759_v44 = vpop.f32.mrf.mxu1  ;;  %v1109_v50 = vmul.f32 %v2356_v38, %v2356_v38  ;;  %v2377_v53 = vadd.f32 %v696_v8, %v2232_v2  ;;  %v1088_v22 = vadd.f32 %v2356_v38, %v2344_v27 }
 0x182   : > { %v1069_v51 = vadd.f32 %v1068_v6, %v1054_v43  ;;  %v1055_v52 = vmul.f32 %v2359_v39, %v2359_v39  ;;  %v2380_v55 = vadd.f32 %v759_v44, %v2232_v2  ;;  %v698_v56 = vpop.f32.mrf.mxu0  ;;  %v2402_v31 = vadd.f32 %v1033_v49, %v2359_v39 }
 0x183   : > { %3196 = vst [vmem:[#allocation12_spill] sm:$0xff] %v2377_v53  ;;  %v761_v57 = vpop.f32.mrf.mxu1  ;;  %v2387_v11 = vadd.f32 %v698_v56, %v2232_v2  ;;  %v1124_v7 = vadd.f32 %v1109_v50, %v1108_v48  ;;  %v1116_v6 = vmul.f32 %v2377_v53, %v2377_v53 }
 0x184   : > { %3197 = vst [vmem:[#allocation13_spill] sm:$0xff] %v2380_v55  ;;  %v2390_v15 = vadd.f32 %v761_v57, %v2232_v2  ;;  %v1062_v9 = vmul.f32 %v2380_v55, %v2380_v55  ;;  %v808_v20 = vpop.f32.mrf.mxu0  ;;  %v2407_v34 = vadd.f32 %v1069_v51, %v1055_v52  ;;  %v1042_v35 = vadd.f32 %v1041_v12, %v2380_v55 }
 0x185   : > { %3198 = vst [vmem:[#allocation14_spill] sm:$0xff] %v2387_v11  ;;  %v765_v14 = vpop.f32.mrf.mxu1  ;;  %v2413_v40 = vadd.f32 %v808_v20, %v2224_v16  ;;  %v1117_v43 = vmul.f32 %v2387_v11, %v2387_v11 }
 0x186   : > { %3199 = vst [vmem:[#allocation15_spill] sm:$0xff] %v2390_v15  ;;  %v2405_v33 = vadd.f32 %v765_v14, %v2224_v16  ;;  %v810_v29 = vpop.f32.mrf.mxu0  ;;  %v1063_v8 = vmul.f32 %v2390_v15, %v2390_v15  ;;  %v1078_v48 = vadd.f32 %v1077_v62, %v1062_v9  ;;  %v1097_v62 = vadd.f32 %v2387_v11, %v2377_v53 }
 0x187   : > { %v767_v30 = vpop.f32.mrf.mxu1  ;;  %v946_v50 = vmul.f32 %v2413_v40, %v2413_v40  ;;  %v2428_v51 = vadd.f32 %v810_v29, %v2224_v16  ;;  %v927_v12 = vadd.f32 %v2300_v4, %v2413_v40  ;;  %v1133_v4 = vadd.f32 %v1117_v43, %v1116_v6 }
 0x188   : > { %v1110_v44 = vmul.f32 %v2405_v33, %v2405_v33  ;;  %v2422_v45 = vadd.f32 %v767_v30, %v2224_v16  ;;  %v1089_v49 = vadd.f32 %v1088_v22, %v2405_v33  ;;  %v812_v56 = vpop.f32.mrf.mxu0  ;;  %v2453_v11 = vadd.f32 %v1078_v48, %v1063_v8 }
 0x189   : > { %v769_v52 = vpop.f32.mrf.mxu1  ;;  %v961_v9 = vadd.f32 %v2306_v54, %v946_v50  ;;  %v947_v22 = vmul.f32 %v2428_v51, %v2428_v51  ;;  %v2443_v30 = vadd.f32 %v812_v56, %v2232_v2  ;;  %v928_v53 = vadd.f32 %v927_v12, %v2428_v51 }
 0x18a   : > { %v1125_v57 = vadd.f32 %v1124_v7, %v1110_v44  ;;  %v1111_v14 = vmul.f32 %v2422_v45, %v2422_v45  ;;  %v2435_v20 = vadd.f32 %v769_v52, %v2232_v2  ;;  %v814_v29 = vpop.f32.mrf.mxu0  ;;  %v2446_v44 = vadd.f32 %v1042_v35, %v2390_v15 }
 0x18b   : > { %3201 = vst [vmem:[#allocation17_spill] sm:$0xff] %v2443_v30  ;;  %v771_v7 = vpop.f32.mrf.mxu1  ;;  %v2456_v54 = vadd.f32 %v1089_v49, %v2422_v45  ;;  %v954_v50 = vmul.f32 %v2443_v30, %v2443_v30  ;;  %v2461_v56 = vadd.f32 %v814_v29, %v2232_v2 }
 0x18c   : > { %3200 = vst [vmem:[#allocation16_spill] sm:$0xff] %v2435_v20  ;;  %v1118_v52 = vmul.f32 %v2435_v20, %v2435_v20  ;;  %v2451_v55 = vadd.f32 %v771_v7, %v2232_v2  ;;  %v818_v6 = vpop.f32.mrf.mxu0  ;;  %v2463_v43 = vadd.f32 %v1125_v57, %v1111_v14  ;;  %v936_v7 = vadd.f32 %v2322_v61, %v2443_v30 }
 0x18d   : > { %3203 = vst [vmem:[#allocation19_spill] sm:$0xff] %v2461_v56  ;;  %v881_v35 = vpop.f32.mrf.mxu1  ;;  %v2469_v8 = vadd.f32 %v818_v6, %v2224_v16  ;;  %v2472_v48 = vadd.f32 %v1097_v62, %v2435_v20  ;;  %v962_v57 = vadd.f32 %v961_v9, %v947_v22  ;;  %v970_v14 = vadd.f32 %v2336_v21, %v954_v50 }
 0x18e   : > { %3202 = vst [vmem:[#allocation18_spill] sm:$0xff] %v2451_v55  ;;  %v2474_v49 = vadd.f32 %v1133_v4, %v1118_v52  ;;  %v2477_v29 = vadd.f32 %v881_v35, %v2224_v16  ;;  %v820_v15 = vpop.f32.mrf.mxu0  ;;  %v2482_v12 = vmul.f32 %v2451_v55, %v2451_v55  ;;  %v955_v4 = vmul.f32 %v2461_v56, %v2461_v56 }
 0x18f   : > { %v883_v10 = vpop.f32.mrf.mxu1  ;;  %v1000_v61 = vmul.f32 %v2469_v8, %v2469_v8  ;;  %v2487_v62 = vadd.f32 %v820_v15, %v2224_v16  ;;  %v937_v6 = vadd.f32 %v936_v7, %v2461_v56  ;;  %v979_v35 = vadd.f32 %v2347_v28, %v2469_v8 }
 0x190   : > { %v948_v52 = vmul.f32 %v2477_v29, %v2477_v29  ;;  %v2494_v9 = vadd.f32 %v883_v10, %v2224_v16  ;;  %v822_v21 = vpop.f32.mrf.mxu0  ;;  %v929_v50 = vadd.f32 %v928_v53, %v2477_v29 }
 0x191   : > { %v885_v22 = vpop.f32.mrf.mxu1  ;;  %v1015_v15 = vadd.f32 %v2382_v58, %v1000_v61  ;;  %v2502_v20 = vadd.f32 %v822_v21, %v2232_v2  ;;  %v1001_v7 = vmul.f32 %v2487_v62, %v2487_v62  ;;  %v980_v41 = vadd.f32 %v979_v35, %v2487_v62 }
 0x192   : > { %v2505_v26 = vadd.f32 %v885_v22, %v2232_v2  ;;  %v824_v13 = vpop.f32.mrf.mxu0  ;;  %v930_v60 = vadd.f32 %v929_v50, %v2494_v9  ;;  %v949_v53 = vmul.f32 %v2494_v9, %v2494_v9  ;;  %v963_v37 = vadd.f32 %v962_v57, %v948_v52 }
 0x193   : > { %3204 = vst [vmem:[#allocation20_spill] sm:$0xff] %v2502_v20  ;;  %v887_v10 = vpop.f32.mrf.mxu1  ;;  %v1008_v28 = vmul.f32 %v2502_v20, %v2502_v20  ;;  %v2515_v58 = vadd.f32 %v824_v13, %v2232_v2  ;;  %v971_v52 = vadd.f32 %v970_v14, %v955_v4  ;;  %v988_v56 = vadd.f32 %v2393_v3, %v2502_v20 }
 0x194   : > { %3205 = vst [vmem:[#allocation21_spill] sm:$0xff] %v2505_v26  ;;  %v2518_v61 = vadd.f32 %v887_v10, %v2232_v2  ;;  %v956_v21 = vmul.f32 %v2505_v26, %v2505_v26  ;;  %931 = vadd.xlane.f32.xlu1 %v930_v60  ;;  %v828_v22 = vpop.f32.mrf.mxu0  ;;  %v964_v36 = vadd.f32 %v963_v37, %v949_v53 }
 0x195   : > { %3206 = vst [vmem:[#allocation22_spill] sm:$0xff] %v2515_v58  ;;  %v891_v50 = vpop.f32.mrf.mxu1  ;;  %v938_v57 = vadd.f32 %v937_v6, %v2505_v26  ;;  %v1024_v30 = vadd.f32 %v2395_v5, %v1008_v28  ;;  %v1009_v13 = vmul.f32 %v2515_v58, %v2515_v58  ;;  %v2529_v10 = vadd.f32 %v828_v22, %v2224_v16 }
 0x196   : > { %3207 = vst [vmem:[#allocation23_spill] sm:$0xff] %v2518_v61  ;;  %v2533_v60 = vadd.f32 %v891_v50, %v2224_v16  ;;  %965 = vadd.xlane.f32.xlu0 %v964_v36  ;;  %v830_v37 = vpop.f32.mrf.mxu0  ;;  %v957_v14 = vmul.f32 %v2518_v61, %v2518_v61  ;;  %v972_v3 = vadd.f32 %v971_v52, %v956_v21 }
 0x197   : > { %v893_v6 = vpop.f32.mrf.mxu1  ;;  %v1056_v5 = vmul.f32 %v2529_v10, %v2529_v10  ;;  %v2540_v4 = vadd.f32 %v830_v37, %v2224_v16  ;;  %v1016_v35 = vadd.f32 %v1015_v15, %v1001_v7  ;;  %v939_v50 = vadd.f32 %v938_v57, %v2518_v61 }
 0x198   : > { %v2543_v53 = vadd.f32 %v893_v6, %v2224_v16  ;;  %v1002_v28 = vmul.f32 %v2533_v60, %v2533_v60  ;;  %v832_v36 = vpop.f32.mrf.mxu0  ;;  %v973_v20 = vadd.f32 %v972_v3, %v957_v14  ;;  %v981_v21 = vadd.f32 %v980_v41, %v2533_v60 }
 0x199   : > { %v895_v22 = vpop.f32.mrf.mxu1  ;;  %v989_v52 = vadd.f32 %v988_v56, %v2515_v58  ;;  %v1035_v37 = vadd.f32 %v2402_v31, %v2529_v10  ;;  %v2553_v26 = vadd.f32 %v832_v36, %v2232_v2  ;;  %v1025_v6 = vadd.f32 %v1024_v30, %v1009_v13 }
 0x19a   : > { %v1071_v15 = vadd.f32 %v2407_v34, %v1056_v5  ;;  %v1057_v7 = vmul.f32 %v2540_v4, %v2540_v4  ;;  %v2559_v25 = vadd.f32 %v895_v22, %v2232_v2  ;;  %940 = vadd.xlane.f32.xlu0 %v939_v50  ;;  %974 = vadd.xlane.f32.xlu1 %v973_v20  ;;  %v834_v41 = vpop.f32.mrf.mxu0 }
 0x19b   : > { %3208 = vst [vmem:[#allocation24_spill] sm:$0xff] %v2553_v26  ;;  %v897_v57 = vpop.f32.mrf.mxu1  ;;  %v1064_v56 = vmul.f32 %v2553_v26, %v2553_v26  ;;  %v2564_v31 = vadd.f32 %v834_v41, %v2232_v2  ;;  %v982_v34 = vadd.f32 %v981_v21, %v2543_v53  ;;  %v1003_v5 = vmul.f32 %v2543_v53, %v2543_v53 }
 0x19c   : > { %3209 = vst [vmem:[#allocation25_spill] sm:$0xff] %v2559_v25  ;;  %v2567_v30 = vadd.f32 %v897_v57, %v2232_v2  ;;  %v1010_v13 = vmul.f32 %v2559_v25, %v2559_v25  ;;  %v838_v14 = vpop.f32.mrf.mxu0  ;;  %v990_v20 = vadd.f32 %v989_v52, %v2559_v25  ;;  %v1017_v36 = vadd.f32 %v1016_v35, %v1002_v28 }
 0x19d   : > { %3210 = vst [vmem:[#allocation26_spill] sm:$0xff] %v2564_v31  ;;  %v901_v3 = vpop.f32.mrf.mxu1  ;;  %v1036_v22 = vadd.f32 %v1035_v37, %v2540_v4  ;;  %v1044_v50 = vadd.f32 %v2446_v44, %v2553_v26  ;;  %v1080_v41 = vadd.f32 %v2453_v11, %v1064_v56  ;;  %v2580_v21 = vadd.f32 %v838_v14, %v2224_v16 }
 0x19e   : > { %3211 = vst [vmem:[#allocation27_spill] sm:$0xff] %v2567_v30  ;;  %v1065_v57 = vmul.f32 %v2564_v31, %v2564_v31  ;;  %v2585_v58 = vadd.f32 %v901_v3, %v2224_v16  ;;  %983 = vadd.xlane.f32.xlu0 %v982_v34  ;;  %v840_v52 = vpop.f32.mrf.mxu0  ;;  %v991_v35 = vadd.f32 %v990_v20, %v2567_v30 }
 0x19f   : > { %v903_v25 = vpop.f32.mrf.mxu1  ;;  %v1011_v28 = vmul.f32 %v2567_v30, %v2567_v30  ;;  %v1099_v11 = vadd.f32 %v2472_v48, %v2451_v55  ;;  %v1135_v44 = vadd.f32 %v2474_v49, %v2482_v12  ;;  %v1072_v56 = vadd.f32 %v1071_v15, %v1057_v7 }
 0x1a0   : > { %v2595_v37 = vadd.f32 %v903_v25, %v2224_v16  ;;  %v1058_v34 = vmul.f32 %v2585_v58, %v2585_v58  ;;  %992 = vadd.xlane.f32.xlu1 %v991_v35  ;;  %v842_v14 = vpop.f32.mrf.mxu0  ;;  %v1018_v20 = vadd.f32 %v1017_v36, %v1003_v5  ;;  %v1026_v26 = vadd.f32 %v1025_v6, %v1010_v13 }
 0x1a1   : > { %v905_v3 = vpop.f32.mrf.mxu1  ;;  %v1037_v30 = vadd.f32 %v1036_v22, %v2585_v58  ;;  %v1091_v48 = vadd.f32 %v2456_v54, %v2580_v21  ;;  %v1112_v49 = vmul.f32 %v2580_v21, %v2580_v21  ;;  %v2605_v25 = vadd.f32 %v840_v52, %v2224_v16 }
 0x1a2   : > { %v2608_v12 = vadd.f32 %v842_v14, %v2232_v2  ;;  %v1045_v15 = vadd.f32 %v1044_v50, %v2564_v31  ;;  %v2612_v7 = vadd.f32 %v905_v3, %v2232_v2  ;;  %1019 = vadd.xlane.f32.xlu0 %v1018_v20  ;;  %v844_v6 = vpop.f32.mrf.mxu0  ;;  %v1027_v5 = vadd.f32 %v1026_v26, %v1011_v28 }
 0x1a3   : > { %v907_v13 = vpop.f32.mrf.mxu1  ;;  %v1081_v36 = vadd.f32 %v1080_v41, %v1065_v57  ;;  %v2617_v22 = vadd.f32 %v844_v6, %v2232_v2  ;;  %v1038_v35 = vadd.f32 %v1037_v30, %v2595_v37  ;;  %v1059_v26 = vmul.f32 %v2595_v37, %v2595_v37 }
 0x1a4   : > { %3212 = vst [vmem:[#allocation28_spill] sm:$0xff] %v2608_v12  ;;  %3213 = vst [vmem:[#allocation29_spill] sm:$0xff] %v2612_v7  ;;  %v1120_v54 = vmul.f32 %v2608_v12, %v2608_v12  ;;  %v2620_v52 = vadd.f32 %v907_v13, %v2232_v2  ;;  %v1066_v50 = vmul.f32 %v2612_v7, %v2612_v7  ;;  %1028 = vadd.xlane.f32.xlu1 %v1027_v5 }
 0x1a5   : > { %3214 = vst [vmem:[#allocation30_spill] sm:$0xff] %v2617_v22  ;;  %v911_v14 = vpop.f32.mrf.mxu1  ;;  %v1046_v3 = vadd.f32 %v1045_v15, %v2612_v7  ;;  %v1073_v41 = vadd.f32 %v1072_v56, %v1058_v34  ;;  %v1127_v57 = vadd.f32 %v2463_v43, %v1112_v49  ;;  %v1092_v28 = vadd.f32 %v1091_v48, %v2605_v25 }
 0x1a6   : > { %3215 = vst [vmem:[#allocation31_spill] sm:$0xff] %v2620_v52  ;;  %v1100_v20 = vadd.f32 %v1099_v11, %v2608_v12  ;;  %v2632_v6 = vadd.f32 %v911_v14, %v2224_v16  ;;  %v1113_v30 = vmul.f32 %v2605_v25, %v2605_v25  ;;  %1039 = vadd.xlane.f32.xlu0 %v1038_v35 }
 0x1a7   : > { %v913_v13 = vpop.f32.mrf.mxu1  ;;  %v1047_v15 = vadd.f32 %v1046_v3, %v2620_v52  ;;  %v1067_v5 = vmul.f32 %v2620_v52, %v2620_v52  ;;  %v1082_v56 = vadd.f32 %v1081_v36, %v1066_v50  ;;  %v1136_v34 = vadd.f32 %v1135_v44, %v1120_v54 }
 0x1a8   : > { %v1121_v43 = vmul.f32 %v2617_v22, %v2617_v22  ;;  %v1114_v11 = vmul.f32 %v2632_v6, %v2632_v6  ;;  %v2644_v48 = vadd.f32 %v913_v13, %v2224_v16  ;;  %v1074_v35 = vadd.f32 %v1073_v41, %v1059_v26 }
 0x1a9   : > { %1048 = vadd.xlane.f32.xlu1 %v1047_v15  ;;  %v915_v49 = vpop.f32.mrf.mxu1  ;;  %v1093_v14 = vadd.f32 %v1092_v28, %v2632_v6  ;;  %v1101_v3 = vadd.f32 %v1100_v20, %v2617_v22  ;;  %v1083_v36 = vadd.f32 %v1082_v56, %v1067_v5  ;;  %v1128_v54 = vadd.f32 %v1127_v57, %v1113_v30 }
 0x1aa   : > { %v2649_v12 = vadd.f32 %v915_v49, %v2232_v2  ;;  %1075 = vadd.xlane.f32.xlu0 %v1074_v35  ;;  %v1115_v41 = vmul.f32 %v2644_v48, %v2644_v48  ;;  %v1137_v20 = vadd.f32 %v1136_v34, %v1121_v43 }
 0x1ab   : > { %v917_v44 = vpop.f32.mrf.mxu1  ;;  %v1094_v26 = vadd.f32 %v1093_v14, %v2644_v48  ;;  %v1129_v28 = vadd.f32 %v1128_v54, %v1114_v11 }
 0x1ac   : > { %3216 = vst [vmem:[#allocation32_spill] sm:$0xff] %v2649_v12  ;;  %v1122_v50 = vmul.f32 %v2649_v12, %v2649_v12  ;;  %v2654_v16 = vadd.f32 %v917_v44, %v2232_v2  ;;  %v1102_v13 = vadd.f32 %v1101_v3, %v2649_v12 }
 0x1ad   : > { %1084 = vadd.xlane.f32.xlu1 %v1083_v36  ;;  %v1130_v2 = vadd.f32 %v1129_v28, %v1115_v41 }
 0x1ae   : > { %3217 = vst [vmem:[#allocation33_spill] sm:$0xff] %v2654_v16  ;;  %v1103_v15 = vadd.f32 %v1102_v13, %v2654_v16  ;;  %1095 = vadd.xlane.f32.xlu0 %v1094_v26  ;;  %v1123_v57 = vmul.f32 %v2654_v16, %v2654_v16  ;;  %v1138_v30 = vadd.f32 %v1137_v20, %v1122_v50 }
 0x1b0   : > { %v1139_v5 = vadd.f32 %v1138_v30, %v1123_v57 }
 0x1b1   : > { %1104 = vadd.xlane.f32.xlu1 %v1103_v15 }
 0x1b2   : > { %1131 = vadd.xlane.f32.xlu0 %v1130_v2 }
 0x1b5   : > { %1140 = vadd.xlane.f32.xlu1 %v1139_v5 }
 0x21d   : > { %v932_v49 = vpop.xlane.xlu1 %931 }
 0x21f   : > { %v966_v56 = vpop.xlane.xlu0 %965 }
 0x223   : > { %v941_v35 = vpop.xlane.xlu0 %940  ;;  %v975_v14 = vpop.xlane.xlu1 %974 }
 0x227   : > { %v984_v3 = vpop.xlane.xlu0 %983 }
 0x228   : > { %v994_v13 = vadd.f32 %v984_v3, %v932_v49 }
 0x229   : > { %v993_v44 = vpop.xlane.xlu1 %992 }
 0x22a   : > { %v995_v16 = vadd.f32 %v993_v44, %v941_v35 }
 0x22b   : > { %v1020_v11 = vpop.xlane.xlu0 %1019 }
 0x22c   : > { %v1030_v41 = vadd.f32 %v1020_v11, %v966_v56 }
 0x22d   : > { %v1029_v34 = vpop.xlane.xlu1 %1028 }
 0x22e   : > { %v1031_v30 = vadd.f32 %v1029_v34, %v975_v14 }
 0x22f   : > { %v1040_v43 = vpop.xlane.xlu0 %1039 }
 0x230   : > { %v1050_v50 = vadd.f32 %v1040_v43, %v994_v13 }
 0x232   : > { %v1049_v36 = vpop.xlane.xlu1 %1048 }
 0x233   : > { %v1076_v54 = vpop.xlane.xlu0 %1075  ;;  %v1051_v28 = vadd.f32 %v1049_v36, %v995_v16 }
 0x234   : > { %v1086_v2 = vadd.f32 %v1076_v54, %v1030_v41 }
 0x236   : > { %v1085_v26 = vpop.xlane.xlu1 %1084 }
 0x237   : > { %v1096_v20 = vpop.xlane.xlu0 %1095  ;;  %v1087_v55 = vadd.f32 %v1085_v26, %v1031_v30 }
 0x238   : > { %v1106_v15 = vadd.f32 %v1096_v20, %v1050_v50 }
 0x23a   : > { %v1105_v57 = vpop.xlane.xlu1 %1104  ;;  %v1145_v12 = vsel %vm1144_vm6, %v1106_v15, 0.0 }
 0x23b   : > { %v1107_v5 = vadd.f32 %v1105_v57, %v1051_v28  ;;  %v1132_v22 = vpop.xlane.xlu0 %1131  ;;  %1146 = vadd.xlane.f32.xlu0 %v1145_v12 }
 0x23c   : > { %v1142_v52 = vadd.f32 %v1132_v22, %v1086_v2 }
 0x23d   : > { %v1156_v49 = vsel %vm1144_vm6, %v1107_v5, 0.0 }
 0x23e   : > { %1157 = vadd.xlane.f32.xlu1 %v1156_v49  ;;  %v1141_v35 = vpop.xlane.xlu1 %1140  ;;  %v1167_v44 = vsel %vm1144_vm6, %v1142_v52, 0.0 }
 0x23f   : > { %v1143_v3 = vadd.f32 %v1141_v35, %v1087_v55  ;;  %1168 = vadd.xlane.f32.xlu0 %v1167_v44 }
 0x241   : > { %v1180_v16 = vsel %vm1144_vm6, %v1143_v3, 0.0 }
 0x242   : > { %1181 = vadd.xlane.f32.xlu1 %v1180_v16 }
 0x2c4   : > { %v1147_v56 = vpop.xlane.xlu0 %1146 }
 0x2c5   : > { %v1148_v14 = vrot.slane %v1147_v56, 4 }
 0x2c7   : > { %v1158_v11 = vpop.xlane.xlu1 %1157  ;;  %v1149_v34 = vadd.f32 %v1148_v14, %v1147_v56 }
 0x2c8   : > { %v1159_v43 = vrot.slane %v1158_v11, 4  ;;  %v1169_v36 = vpop.xlane.xlu0 %1168 }
 0x2c9   : > { %v1150_v12 = vrot.slane %v1149_v34, 2  ;;  %v1170_v22 = vrot.slane %v1169_v36, 4 }
 0x2ca   : > { %v1160_v54 = vadd.f32 %v1159_v43, %v1158_v11 }
 0x2cb   : > { %v1182_v13 = vpop.xlane.xlu1 %1181  ;;  %v1171_v50 = vadd.f32 %v1170_v22, %v1169_v36  ;;  %v1151_v55 = vadd.f32 %v1150_v12, %v1149_v34  ;;  %v920_v36 = vld [vmem:[%s3124_s3] sm:$0xff]  ;;  %v921_v22 = vld [vmem:[%s3124_s3 + $0x8] sm:$0xff] }
 0x2cc   : > { %v1161_v26 = vrot.slane %v1160_v54, 2  ;;  %v1183_v20 = vrot.slane %v1182_v13, 4 }
 0x2cd   : > { %v1172_v41 = vrot.slane %v1171_v50, 2  ;;  %v1152_v28 = vrot.slane %v1151_v55, 1 }
 0x2ce   : > { %v1184_v52 = vadd.f32 %v1183_v20, %v1182_v13  ;;  %v1162_v15 = vadd.f32 %v1161_v26, %v1160_v54 }
 0x2cf   : > { %v1153_v30 = vadd.f32 %v1152_v28, %v1151_v55  ;;  %v1173_v5 = vadd.f32 %v1172_v41, %v1171_v50  ;;  %v922_v41 = vld [vmem:[%s3125_s4] sm:$0xff] }
 0x2d0   : > { %v1185_v57 = vrot.slane %v1184_v52, 2  ;;  %v1163_v2 = vrot.slane %v1162_v15, 1 }
 0x2d1   : > { %1880 = vpush %v1153_v30  ;;  %v1174_v35 = vrot.slane %v1173_v5, 1 }
 0x2d2   : > { %v1164_v49 = vadd.f32 %v1163_v2, %v1162_v15  ;;  %v1186_v3 = vadd.f32 %v1185_v57, %v1184_v52  ;;  %v923_v52 = vld [vmem:[%s3125_s4 + $0x8] sm:$0xff] }
 0x2d3   : > { %v1175_v44 = vadd.f32 %v1174_v35, %v1173_v5 }
 0x2d4   : > { %1882 = vpush %v1164_v49  ;;  %v1187_v16 = vrot.slane %v1186_v3, 1 }
 0x2d5   : > { %1884 = vpush %v1175_v44 }
 0x2d6   : > { %v1188_v56 = vadd.f32 %v1187_v16, %v1186_v3 }
 0x2d8   : > { %1886 = vpush %v1188_v56 }
 0x302   : > { %s1881_s14 = spop %1880 }
 0x303   : > { %s1155_s15 = smul.f32 3.0517578e-05, %s1881_s14 }
 0x305   : > { %s1883_s16 = spop %1882  ;;  %s1178_s17 = smul.f32 %s1155_s15, %s1155_s15  ;;  %v1203_v13 = vstv %s1155_s15 }
 0x306   : > { %s2667_s20 = smul.f32 3.0517578e-05, %s1883_s16  ;;  %s1885_s21 = spop %1884 }
 0x307   : > { %s1177_s22 = smul.f32 3.0517578e-05, %s1885_s21  ;;  %s1847_s15 = sshll.u32 %s3261_s19, 8 }
 0x308   : > { %s1191_s26 = smul.f32 %s2667_s20, %s2667_s20  ;;  %v1204_v55 = vstv %s2667_s20 }
 0x309   : > { %s1887_s23 = spop %1886  ;;  %s1179_s24 = ssub.f32 %s1177_s22, %s1178_s17 }
 0x30a   : > { %s1190_s25 = smul.f32 3.0517578e-05, %s1887_s23  ;;  %s2871_s17 = scalar_lea.vmem %s3126_s5, %s1847_s15 }
 0x30b   : > { %s1193_s27 = sadd.f32 1e-05, %s1179_s24 }
 0x30c   : > { %s1192_s28 = ssub.f32 %s1190_s25, %s1191_s26 }
 0x30d   : > { %v1194_v14 = vstv %s1193_s27 }
 0x30e   : > { %1910 = vrsqrt.f32 %v1194_v14  ;;  %s1197_s29 = sadd.f32 1e-05, %s1192_s28 }
 0x310   : > { %v1198_v11 = vstv %s1197_s29 }
 0x311   : > { %1912 = vrsqrt.f32 %v1198_v11 }
 0x31b   : > { %v1911_v34 = vpop.eup %1910 }
 0x31c   : > { %1888 = vpush %v1911_v34 }
 0x31e   : > { %v1913_v43 = vpop.eup %1912 }
 0x31f   : > { %1890 = vpush %v1913_v43 }
 0x34d   : > { %s1889_s7 = spop %1888 }
 0x34e   : > { %v1201_v12 = vstv %s1889_s7 }
 0x34f   : > { %v1205_v54 = vmul.f32 %v1201_v12, %v920_v36 }
 0x350   : > { %s1891_s10 = spop %1890 }
 0x351   : > { %v1202_v26 = vstv %s1891_s10  ;;  %1213 = vperm.xlu0 %1904, %v1205_v54   ;;  %v1207_v50 = vmul.f32 %v1205_v54, %v1203_v13 }
 0x352   : > { %v1206_v20 = vmul.f32 %v1202_v26, %v921_v22 }
 0x353   : > { %v1209_v15 = vsub.f32 %v922_v41, %v1207_v50 }
 0x354   : > { %v1208_v28 = vmul.f32 %v1206_v20, %v1204_v55  ;;  %1218 = vperm.xlu1 %1905, %v1206_v20  }
 0x356   : > { %v1210_v57 = vsub.f32 %v923_v52, %v1208_v28 }
 0x358   : > { %1287 = vperm.xlu1 %1905, %v1209_v15   ;;  %1292 = vperm.xlu0 %1904, %v1210_v57  }
 0x3cc   : > { %v1214_v30 = vpop.permute.xlu0 %1213 }
 0x3cd   : > { %v1221_v2 = vmul.f32 %v1214_v30, %v2227_v63  ;;  %v1222_v5 = vmul.f32 %v1214_v30, %v2230_v1  ;;  %v1223_v49 = vmul.f32 %v1214_v30, %v2235_v0  ;;  %v1224_v35 = vmul.f32 %v1214_v30, %v2256_v24 }
 0x3ce   : > { %v1225_v3 = vmul.f32 %v1214_v30, %v2413_v40  ;;  %v1226_v44 = vmul.f32 %v1214_v30, %v2428_v51  ;;  %v1227_v56 = vmul.f32 %v1214_v30, %v2477_v29  ;;  %v1228_v14 = vmul.f32 %v1214_v30, %v2494_v9 }
 0x3cf   : > { %v2690_v16 = vpop.permute.xlu1 %1218  ;;  %v1237_v11 = vmul.f32 %v1214_v30, %v2248_v19  ;;  %v1238_v63 = vmul.f32 %v1214_v30, %v2253_v23  ;;  %v1239_v1 = vmul.f32 %v1214_v30, %v2288_v42  ;;  %v1240_v0 = vmul.f32 %v1214_v30, %v2314_v59 }
 0x3d0   : > { %3218 = vst [vmem:[#allocation34_spill] sm:$0xff] %v2690_v16  ;;  %v1241_v24 = vmul.f32 %v1214_v30, %v2469_v8  ;;  %v1242_v40 = vmul.f32 %v1214_v30, %v2487_v62  ;;  %v1243_v51 = vmul.f32 %v1214_v30, %v2533_v60  ;;  %v1244_v34 = vmul.f32 %v1214_v30, %v2543_v53 }
 0x3d1   : > { %v1253_v29 = vmul.f32 %v1214_v30, %v2292_v46  ;;  %v1254_v9 = vmul.f32 %v1214_v30, %v2295_v47  ;;  %v1255_v19 = vmul.f32 %v1214_v30, %v2352_v32  ;;  %v1256_v23 = vmul.f32 %v1214_v30, %v2359_v39 }
 0x3d2   : > { %v1257_v42 = vmul.f32 %v1214_v30, %v2529_v10  ;;  %v1258_v59 = vmul.f32 %v1214_v30, %v2540_v4  ;;  %v1259_v8 = vmul.f32 %v1214_v30, %v2585_v58  ;;  %v1260_v62 = vmul.f32 %v1214_v30, %v2595_v37 }
 0x3d3   : > { %v1269_v60 = vmul.f32 %v1214_v30, %v2344_v27  ;;  %v1270_v53 = vmul.f32 %v1214_v30, %v2356_v38  ;;  %v1288_v43 = vpop.permute.xlu1 %1287  ;;  %v1271_v46 = vmul.f32 %v1214_v30, %v2405_v33  ;;  %v1272_v47 = vmul.f32 %v1214_v30, %v2422_v45 }
 0x3d4   : > { %v1273_v32 = vmul.f32 %v1214_v30, %v2580_v21  ;;  %v1274_v39 = vmul.f32 %v1214_v30, %v2605_v25  ;;  %v1275_v10 = vmul.f32 %v1214_v30, %v2632_v6  ;;  %v1276_v4 = vmul.f32 %v1214_v30, %v2644_v48 }
 0x3d5   : > { %v2718_v58 = vadd.f32 %v1288_v43, %v1221_v2  ;;  %v2720_v37 = vadd.f32 %v1288_v43, %v1222_v5  ;;  %v2722_v27 = vadd.f32 %v1288_v43, %v1223_v49  ;;  %v2724_v38 = vadd.f32 %v1288_v43, %v1224_v35 }
 0x3d6   : > { %v2726_v36 = vadd.f32 %v1288_v43, %v1225_v3  ;;  %v2728_v33 = vadd.f32 %v1288_v43, %v1226_v44  ;;  %v2730_v45 = vadd.f32 %v1288_v43, %v1227_v56  ;;  %v2732_v21 = vadd.f32 %v1288_v43, %v1228_v14 }
 0x3d7   : > { %v2734_v25 = vadd.f32 %v1288_v43, %v1237_v11  ;;  %v2736_v6 = vadd.f32 %v1288_v43, %v1238_v63  ;;  %v2738_v48 = vadd.f32 %v1288_v43, %v1239_v1  ;;  %v2740_v12 = vadd.f32 %v1288_v43, %v1240_v0 }
 0x3d8   : > { %v2742_v54 = vadd.f32 %v1288_v43, %v1241_v24  ;;  %v2744_v22 = vadd.f32 %v1288_v43, %v1242_v40  ;;  %v2746_v13 = vadd.f32 %v1288_v43, %v1243_v51  ;;  %v2748_v26 = vadd.f32 %v1288_v43, %v1244_v34 }
 0x3d9   : > { %v2750_v50 = vadd.f32 %v1288_v43, %v1253_v29  ;;  %v2752_v20 = vadd.f32 %v1288_v43, %v1254_v9  ;;  %v2754_v55 = vadd.f32 %v1288_v43, %v1255_v19  ;;  %v2756_v41 = vadd.f32 %v1288_v43, %v1256_v23 }
 0x3da   : > { %v2758_v52 = vadd.f32 %v1288_v43, %v1257_v42  ;;  %v2760_v28 = vadd.f32 %v1288_v43, %v1258_v59  ;;  %v2762_v15 = vadd.f32 %v1288_v43, %v1259_v8  ;;  %v2764_v57 = vadd.f32 %v1288_v43, %v1260_v62 }
 0x3db   : > { %v2766_v30 = vadd.f32 %v1288_v43, %v1269_v60  ;;  %v2768_v2 = vadd.f32 %v1288_v43, %v1270_v53  ;;  %v2770_v5 = vadd.f32 %v1288_v43, %v1271_v46  ;;  %v2772_v49 = vadd.f32 %v1288_v43, %v1272_v47 }
 0x3dc   : > { %v2774_v35 = vadd.f32 %v1288_v43, %v1273_v32  ;;  %v2776_v3 = vadd.f32 %v1288_v43, %v1274_v39  ;;  %v2778_v44 = vadd.f32 %v1288_v43, %v1275_v10  ;;  %v2781_v56 = vmul.f32 0.2, %v2718_v58 }
 0x3dd   : > { %v2784_v14 = vmul.f32 0.2, %v2720_v37  ;;  %v2787_v11 = vmul.f32 0.2, %v2722_v27  ;;  %v2789_v63 = vadd.f32 %v1288_v43, %v1276_v4  ;;  %v2792_v1 = vmul.f32 0.2, %v2724_v38 }
 0x3de   : > { %3219 = vst [vmem:[#allocation35_spill] sm:$0xff] %v2778_v44  ;;  %v2795_v0 = vmul.f32 0.2, %v2726_v36  ;;  %v2798_v24 = vmul.f32 0.2, %v2728_v33  ;;  %v1423_v29 = vmax.f32 %v2718_v58, %v2781_v56 }
 0x3df   : > { %3220 = vst [vmem:[#allocation36_spill] sm:$0xff] %v2789_v63  ;;  %v2801_v40 = vmul.f32 0.2, %v2730_v45  ;;  %v2804_v51 = vmul.f32 0.2, %v2732_v21  ;;  %v1424_v42 = vmax.f32 %v2720_v37, %v2784_v14  ;;  %v1425_v60 = vmax.f32 %v2722_v27, %v2787_v11 }
 0x3e0   : > { %v2807_v34 = vmul.f32 0.2, %v2734_v25  ;;  %v1376_v9 = vmul.f32 0.2, %v2736_v6  ;;  %v1377_v19 = vmul.f32 0.2, %v2738_v48  ;;  %v1426_v47 = vmax.f32 %v2724_v38, %v2792_v1 }
 0x3e1   : > { %v1378_v23 = vmul.f32 0.2, %v2740_v12  ;;  %v1379_v59 = vmul.f32 0.2, %v2742_v54  ;;  %v1380_v8 = vmul.f32 0.2, %v2744_v22  ;;  %v1427_v4 = vmax.f32 %v2726_v36, %v2795_v0 }
 0x3e2   : > { %v1381_v62 = vmul.f32 0.2, %v2746_v13  ;;  %v1382_v53 = vmul.f32 0.2, %v2748_v26  ;;  %v1391_v43 = vmul.f32 0.2, %v2750_v50  ;;  %v1428_v56 = vmax.f32 %v2728_v33, %v2798_v24 }
 0x3e3   : > { %v1392_v46 = vmul.f32 0.2, %v2752_v20  ;;  %v1393_v32 = vmul.f32 0.2, %v2754_v55  ;;  %v1394_v39 = vmul.f32 0.2, %v2756_v41  ;;  %v1429_v1 = vmax.f32 %v2730_v45, %v2801_v40 }
 0x3e4   : > { %v1395_v10 = vmul.f32 0.2, %v2758_v52  ;;  %v1396_v58 = vmul.f32 0.2, %v2760_v28  ;;  %v1397_v37 = vmul.f32 0.2, %v2762_v15  ;;  %v1430_v31 = vmax.f32 %v2732_v21, %v2804_v51 }
 0x3e5   : > { %v1398_v27 = vmul.f32 0.2, %v2764_v57  ;;  %v1407_v38 = vmul.f32 0.2, %v2766_v30  ;;  %v1408_v14 = vmul.f32 0.2, %v2768_v2  ;;  %v1439_v61 = vmax.f32 %v2734_v25, %v2807_v34 }
 0x3e6   : > { %v1409_v11 = vmul.f32 0.2, %v2770_v5  ;;  %v1410_v36 = vmul.f32 0.2, %v2772_v49  ;;  %v1411_v0 = vmul.f32 0.2, %v2774_v35  ;;  %v1440_v18 = vmax.f32 %v2736_v6, %v1376_v9 }
 0x3e7   : > { %v1412_v7 = vmul.f32 0.2, %v2776_v3  ;;  %v1413_v33 = vmul.f32 0.2, %v2778_v44  ;;  %v1414_v24 = vmul.f32 0.2, %v2789_v63  ;;  %v1441_v45 = vmax.f32 %v2738_v48, %v1377_v19 }
 0x3e8   : > { %v1442_v40 = vmax.f32 %v2740_v12, %v1378_v23  ;;  %v1443_v16 = vmax.f32 %v2742_v54, %v1379_v59  ;;  %v1444_v17 = vmax.f32 %v2744_v22, %v1380_v8  ;;  %v1445_v21 = vmax.f32 %v2746_v13, %v1381_v62  ;;  %v3226_v8 = vld [vmem:[#allocation4_spill] sm:$0xff] }
 0x3e9   : > { %v1446_v51 = vmax.f32 %v2748_v26, %v1382_v53  ;;  %v1455_v63 = vmax.f32 %v2750_v50, %v1391_v43  ;;  %v1456_v44 = vmax.f32 %v2752_v20, %v1392_v46  ;;  %v1457_v25 = vmax.f32 %v2754_v55, %v1393_v32  ;;  %v3228_v43 = vld [vmem:[#allocation17_spill] sm:$0xff] }
 0x3ea   : > { %v1458_v6 = vmax.f32 %v2756_v41, %v1394_v39  ;;  %v1459_v48 = vmax.f32 %v2758_v52, %v1395_v10  ;;  %v1460_v12 = vmax.f32 %v2760_v28, %v1396_v58  ;;  %v1461_v54 = vmax.f32 %v2762_v15, %v1397_v37  ;;  %v3221_v52 = vld [vmem:[#allocation35_spill] sm:$0xff]  ;;  %v3222_v15 = vld [vmem:[#allocation36_spill] sm:$0xff]  ;;  %v3230_v39 = vld [vmem:[#allocation21_spill] sm:$0xff] }
 0x3eb   : > { %v1462_v22 = vmax.f32 %v2764_v57, %v1398_v27  ;;  %v1471_v13 = vmax.f32 %v2766_v30, %v1407_v38  ;;  %v1472_v26 = vmax.f32 %v2768_v2, %v1408_v14  ;;  %v1473_v50 = vmax.f32 %v2770_v5, %v1409_v11  ;;  %v3232_v37 = vld [vmem:[#allocation5_spill] sm:$0xff]  ;;  %v3234_v14 = vld [vmem:[#allocation8_spill] sm:$0xff] }
 0x3ec   : > { %v1474_v20 = vmax.f32 %v2772_v49, %v1410_v36  ;;  %v1475_v55 = vmax.f32 %v2774_v35, %v1411_v0  ;;  %v1476_v41 = vmax.f32 %v2776_v3, %v1412_v7  ;;  %v1477_v28 = vmax.f32 %v3221_v52, %v1413_v33  ;;  %v3236_v0 = vld [vmem:[#allocation20_spill] sm:$0xff] }
 0x3ed   : > { %v1478_v57 = vmax.f32 %v3222_v15, %v1414_v24  ;;  %v1848_v30 = vpack.c.bf16 %v1424_v42, %v1423_v29  ;;  %v1849_v2 = vpack.c.bf16 %v1426_v47, %v1425_v60  ;;  %v1850_v34 = vpack.c.bf16 %v1428_v56, %v1427_v4  ;;  %v3227_v60 = vld [vmem:[#allocation7_spill] sm:$0xff]  ;;  %v3233_v56 = vld [vmem:[#allocation6_spill] sm:$0xff]  ;;  %v3246_v15 = vld [vmem:[#allocation29_spill] sm:$0xff] }
 0x3ee   : > { %v1851_v9 = vpack.c.bf16 %v1430_v31, %v1429_v1  ;;  %v1856_v5 = vpack.c.bf16 %v1440_v18, %v1439_v61  ;;  %v1857_v19 = vpack.c.bf16 %v1442_v40, %v1441_v45  ;;  %v1858_v49 = vpack.c.bf16 %v1444_v17, %v1443_v16  ;;  %v3223_v61 = vld [vmem:[#allocation2_spill] sm:$0xff]  ;;  %v3229_v47 = vld [vmem:[#allocation19_spill] sm:$0xff]  ;;  %v3238_v40 = vld [vmem:[#allocation25_spill] sm:$0xff] }
 0x3ef   : > { %v1859_v23 = vpack.c.bf16 %v1446_v51, %v1445_v21  ;;  %v1864_v35 = vpack.c.bf16 %v1456_v44, %v1455_v63  ;;  %v1865_v7 = vpack.c.bf16 %v1458_v6, %v1457_v25  ;;  %1679 = vst [vmem:[%s2871_s17] sm:$0xff] %v1848_v30  ;;  %1680 = vst [vmem:[%s2871_s17 + $0x8] sm:$0xff] %v1849_v2  ;;  %v3224_v16 = vld [vmem:[#allocation34_spill] sm:$0xff]  ;;  %v3225_v63 = vld [vmem:[#allocation3_spill] sm:$0xff] }
 0x3f0   : > { %v1866_v3 = vpack.c.bf16 %v1460_v12, %v1459_v48  ;;  %v1867_v29 = vpack.c.bf16 %v1462_v22, %v1461_v54  ;;  %v1872_v42 = vpack.c.bf16 %v1472_v26, %v1471_v13  ;;  %v1873_v31 = vpack.c.bf16 %v1474_v20, %v1473_v50  ;;  %1681 = vst [vmem:[%s2871_s17 + $0x10] sm:$0xff] %v1850_v34  ;;  %v3231_v4 = vld [vmem:[#allocation23_spill] sm:$0xff]  ;;  %v3235_v1 = vld [vmem:[#allocation10_spill] sm:$0xff]  ;;  %v3241_v12 = vld [vmem:[#allocation9_spill] sm:$0xff] }
 0x3f1   : > { %1682 = vst [vmem:[%s2871_s17 + $0x18] sm:$0xff] %v1851_v9  ;;  %1687 = vst [vmem:[%s2871_s17 + $0x40] sm:$0xff] %v1856_v5  ;;  %v1874_v17 = vpack.c.bf16 %v1476_v41, %v1475_v55  ;;  %v1875_v18 = vpack.c.bf16 %v1478_v57, %v1477_v28  ;;  %v1229_v44 = vmul.f32 %v3224_v16, %v3223_v61  ;;  %v3237_v24 = vld [vmem:[#allocation22_spill] sm:$0xff]  ;;  %v3239_v51 = vld [vmem:[#allocation27_spill] sm:$0xff]  ;;  %v1293_v28 = vpop.permute.xlu0 %1292 }
 0x3f2   : > { %1688 = vst [vmem:[%s2871_s17 + $0x48] sm:$0xff] %v1857_v19  ;;  %1689 = vst [vmem:[%s2871_s17 + $0x50] sm:$0xff] %v1858_v49  ;;  %v1230_v59 = vmul.f32 %v3224_v16, %v3225_v63  ;;  %v1231_v62 = vmul.f32 %v3224_v16, %v3226_v8  ;;  %v1232_v53 = vmul.f32 %v3224_v16, %v3227_v60  ;;  %v3240_v6 = vld [vmem:[#allocation11_spill] sm:$0xff]  ;;  %v3242_v22 = vld [vmem:[#allocation13_spill] sm:$0xff] }
 0x3f3   : > { %1690 = vst [vmem:[%s2871_s17 + $0x58] sm:$0xff] %v1859_v23  ;;  %1695 = vst [vmem:[%s2871_s17 + $0x80] sm:$0xff] %v1864_v35  ;;  %v1233_v46 = vmul.f32 %v3224_v16, %v3228_v43  ;;  %v1234_v32 = vmul.f32 %v3224_v16, %v3229_v47  ;;  %v1235_v10 = vmul.f32 %v3224_v16, %v3230_v39  ;;  %v3243_v26 = vld [vmem:[#allocation15_spill] sm:$0xff]  ;;  %v3244_v20 = vld [vmem:[#allocation24_spill] sm:$0xff] }
 0x3f4   : > { %1696 = vst [vmem:[%s2871_s17 + $0x88] sm:$0xff] %v1865_v7  ;;  %1697 = vst [vmem:[%s2871_s17 + $0x90] sm:$0xff] %v1866_v3  ;;  %v1236_v58 = vmul.f32 %v3224_v16, %v3231_v4  ;;  %v1245_v27 = vmul.f32 %v3224_v16, %v3232_v37  ;;  %v1246_v38 = vmul.f32 %v3224_v16, %v3233_v56  ;;  %v3245_v41 = vld [vmem:[#allocation26_spill] sm:$0xff]  ;;  %v3247_v30 = vld [vmem:[#allocation31_spill] sm:$0xff] }
 0x3f5   : > { %1698 = vst [vmem:[%s2871_s17 + $0x98] sm:$0xff] %v1867_v29  ;;  %1703 = vst [vmem:[%s2871_s17 + $0xc0] sm:$0xff] %v1872_v42  ;;  %v1247_v11 = vmul.f32 %v3224_v16, %v3234_v14  ;;  %v1248_v36 = vmul.f32 %v3224_v16, %v3235_v1  ;;  %v1249_v33 = vmul.f32 %v3224_v16, %v3236_v0  ;;  %v3248_v34 = vld [vmem:[#allocation12_spill] sm:$0xff]  ;;  %v3249_v5 = vld [vmem:[#allocation14_spill] sm:$0xff] }
 0x3f6   : > { %1704 = vst [vmem:[%s2871_s17 + $0xc8] sm:$0xff] %v1873_v31  ;;  %1705 = vst [vmem:[%s2871_s17 + $0xd0] sm:$0xff] %v1874_v17  ;;  %v1250_v45 = vmul.f32 %v3224_v16, %v3237_v24  ;;  %v1251_v21 = vmul.f32 %v3224_v16, %v3238_v40  ;;  %v1252_v25 = vmul.f32 %v3224_v16, %v3239_v51  ;;  %v3250_v49 = vld [vmem:[#allocation16_spill] sm:$0xff]  ;;  %v3251_v35 = vld [vmem:[#allocation18_spill] sm:$0xff] }
 0x3f7   : > { %1706 = vst [vmem:[%s2871_s17 + $0xd8] sm:$0xff] %v1875_v18  ;;  %v1261_v48 = vmul.f32 %v3224_v16, %v3240_v6  ;;  %v1262_v54 = vmul.f32 %v3224_v16, %v3241_v12  ;;  %v1263_v13 = vmul.f32 %v3224_v16, %v3242_v22  ;;  %v1264_v50 = vmul.f32 %v3224_v16, %v3243_v26  ;;  %v3252_v3 = vld [vmem:[#allocation28_spill] sm:$0xff]  ;;  %v3253_v42 = vld [vmem:[#allocation30_spill] sm:$0xff]  ;;  %v3255_v61 = vld [vmem:[#allocation33_spill] sm:$0xff] }
 0x3f8   : > { %v1265_v55 = vmul.f32 %v3224_v16, %v3244_v20  ;;  %v1266_v52 = vmul.f32 %v3224_v16, %v3245_v41  ;;  %v1267_v57 = vmul.f32 %v3224_v16, %v3246_v15  ;;  %v1268_v2 = vmul.f32 %v3224_v16, %v3247_v30  ;;  %v3254_v17 = vld [vmem:[#allocation32_spill] sm:$0xff] }
 0x3f9   : > { %v1277_v9 = vmul.f32 %v3224_v16, %v3248_v34  ;;  %v1278_v19 = vmul.f32 %v3224_v16, %v3249_v5  ;;  %v1279_v23 = vmul.f32 %v3224_v16, %v3250_v49  ;;  %v1280_v7 = vmul.f32 %v3224_v16, %v3251_v35 }
 0x3fa   : > { %v1281_v29 = vmul.f32 %v3224_v16, %v3252_v3  ;;  %v1282_v31 = vmul.f32 %v3224_v16, %v3253_v42  ;;  %v1283_v18 = vmul.f32 %v3224_v16, %v3254_v17  ;;  %v1284_v63 = vmul.f32 %v3224_v16, %v3255_v61 }
 0x3fb   : > { %v2959_v8 = vadd.f32 %v1293_v28, %v1229_v44  ;;  %v2961_v60 = vadd.f32 %v1293_v28, %v1230_v59  ;;  %v2963_v43 = vadd.f32 %v1293_v28, %v1231_v62  ;;  %v2965_v47 = vadd.f32 %v1293_v28, %v1232_v53 }
 0x3fc   : > { %v2967_v39 = vadd.f32 %v1293_v28, %v1233_v46  ;;  %v2969_v4 = vadd.f32 %v1293_v28, %v1234_v32  ;;  %v2971_v37 = vadd.f32 %v1293_v28, %v1235_v10  ;;  %v2973_v56 = vadd.f32 %v1293_v28, %v1236_v58 }
 0x3fd   : > { %v2975_v14 = vadd.f32 %v1293_v28, %v1245_v27  ;;  %v2977_v1 = vadd.f32 %v1293_v28, %v1246_v38  ;;  %v2979_v16 = vadd.f32 %v1293_v28, %v1247_v11  ;;  %v2981_v44 = vadd.f32 %v1293_v28, %v1248_v36 }
 0x3fe   : > { %v2983_v59 = vadd.f32 %v1293_v28, %v1249_v33  ;;  %v2985_v62 = vadd.f32 %v1293_v28, %v1250_v45  ;;  %v2987_v53 = vadd.f32 %v1293_v28, %v1251_v21  ;;  %v2989_v46 = vadd.f32 %v1293_v28, %v1252_v25 }
 0x3ff   : > { %v2991_v32 = vadd.f32 %v1293_v28, %v1261_v48  ;;  %v2993_v10 = vadd.f32 %v1293_v28, %v1262_v54  ;;  %v2995_v58 = vadd.f32 %v1293_v28, %v1263_v13  ;;  %v2997_v27 = vadd.f32 %v1293_v28, %v1264_v50 }
 0x400   : > { %v2999_v38 = vadd.f32 %v1293_v28, %v1265_v55  ;;  %v3001_v11 = vadd.f32 %v1293_v28, %v1266_v52  ;;  %v3003_v36 = vadd.f32 %v1293_v28, %v1267_v57  ;;  %v3005_v0 = vadd.f32 %v1293_v28, %v1268_v2 }
 0x401   : > { %v3007_v33 = vadd.f32 %v1293_v28, %v1277_v9  ;;  %v3009_v24 = vadd.f32 %v1293_v28, %v1278_v19  ;;  %v3011_v45 = vadd.f32 %v1293_v28, %v1279_v23  ;;  %v3013_v40 = vadd.f32 %v1293_v28, %v1280_v7 }
 0x402   : > { %v3015_v21 = vadd.f32 %v1293_v28, %v1281_v29  ;;  %v3017_v51 = vadd.f32 %v1293_v28, %v1282_v31  ;;  %v3019_v25 = vadd.f32 %v1293_v28, %v1283_v18  ;;  %v3022_v6 = vmul.f32 0.2, %v2959_v8 }
 0x403   : > { %v3025_v48 = vmul.f32 0.2, %v2961_v60  ;;  %v3028_v12 = vmul.f32 0.2, %v2963_v43  ;;  %v3030_v54 = vadd.f32 %v1293_v28, %v1284_v63  ;;  %v3033_v22 = vmul.f32 0.2, %v2965_v47 }
 0x404   : > { %3256 = vst [vmem:[#allocation35_spill] sm:$0xff] %v3017_v51  ;;  %v3036_v13 = vmul.f32 0.2, %v2967_v39  ;;  %v1372_v26 = vmul.f32 0.2, %v2969_v4  ;;  %v1431_v41 = vmax.f32 %v2959_v8, %v3022_v6 }
 0x405   : > { %3257 = vst [vmem:[#allocation36_spill] sm:$0xff] %v3030_v54  ;;  %v1373_v50 = vmul.f32 0.2, %v2971_v37  ;;  %v1374_v20 = vmul.f32 0.2, %v2973_v56  ;;  %v1432_v57 = vmax.f32 %v2961_v60, %v3025_v48  ;;  %v1433_v9 = vmax.f32 %v2963_v43, %v3028_v12 }
 0x406   : > { %v1383_v55 = vmul.f32 0.2, %v2975_v14  ;;  %v1384_v52 = vmul.f32 0.2, %v2977_v1  ;;  %v1385_v28 = vmul.f32 0.2, %v2979_v16  ;;  %v1434_v23 = vmax.f32 %v2965_v47, %v3033_v22 }
 0x407   : > { %v1386_v15 = vmul.f32 0.2, %v2981_v44  ;;  %v1387_v30 = vmul.f32 0.2, %v2983_v59  ;;  %v1388_v2 = vmul.f32 0.2, %v2985_v62  ;;  %v1435_v29 = vmax.f32 %v2967_v39, %v3036_v13 }
 0x408   : > { %v1389_v34 = vmul.f32 0.2, %v2987_v53  ;;  %v1390_v5 = vmul.f32 0.2, %v2989_v46  ;;  %v1399_v19 = vmul.f32 0.2, %v2991_v32  ;;  %v1436_v18 = vmax.f32 %v2969_v4, %v1372_v26 }
 0x409   : > { %v1400_v49 = vmul.f32 0.2, %v2993_v10  ;;  %v1401_v35 = vmul.f32 0.2, %v2995_v58  ;;  %v1402_v7 = vmul.f32 0.2, %v2997_v27  ;;  %v1437_v60 = vmax.f32 %v2971_v37, %v1373_v50 }
 0x40a   : > { %v1403_v3 = vmul.f32 0.2, %v2999_v38  ;;  %v1404_v42 = vmul.f32 0.2, %v3001_v11  ;;  %v1405_v31 = vmul.f32 0.2, %v3003_v36  ;;  %v1438_v6 = vmax.f32 %v2973_v56, %v1374_v20 }
 0x40b   : > { %v1406_v17 = vmul.f32 0.2, %v3005_v0  ;;  %v1415_v61 = vmul.f32 0.2, %v3007_v33  ;;  %v1416_v63 = vmul.f32 0.2, %v3009_v24  ;;  %v1447_v12 = vmax.f32 %v2975_v14, %v1383_v55 }
 0x40c   : > { %v1417_v8 = vmul.f32 0.2, %v3011_v45  ;;  %v1418_v43 = vmul.f32 0.2, %v3013_v40  ;;  %v1419_v47 = vmul.f32 0.2, %v3015_v21  ;;  %v1448_v22 = vmax.f32 %v2977_v1, %v1384_v52 }
 0x40d   : > { %v1420_v39 = vmul.f32 0.2, %v3017_v51  ;;  %v1421_v48 = vmul.f32 0.2, %v3019_v25  ;;  %v1422_v4 = vmul.f32 0.2, %v3030_v54  ;;  %v1449_v13 = vmax.f32 %v2979_v16, %v1385_v28 }
 0x40e   : > { %v1450_v37 = vmax.f32 %v2981_v44, %v1386_v15  ;;  %v1451_v26 = vmax.f32 %v2983_v59, %v1387_v30  ;;  %v1452_v50 = vmax.f32 %v2985_v62, %v1388_v2  ;;  %v1453_v51 = vmax.f32 %v2987_v53, %v1389_v34  ;;  %v3259_v55 = vld [vmem:[#allocation36_spill] sm:$0xff] }
 0x40f   : > { %v1454_v56 = vmax.f32 %v2989_v46, %v1390_v5  ;;  %v1463_v20 = vmax.f32 %v2991_v32, %v1399_v19  ;;  %v1464_v54 = vmax.f32 %v2993_v10, %v1400_v49  ;;  %v1465_v14 = vmax.f32 %v2995_v58, %v1401_v35 }
 0x410   : > { %v1466_v1 = vmax.f32 %v2997_v27, %v1402_v7  ;;  %v1467_v16 = vmax.f32 %v2999_v38, %v1403_v3  ;;  %v1468_v44 = vmax.f32 %v3001_v11, %v1404_v42  ;;  %v1469_v59 = vmax.f32 %v3003_v36, %v1405_v31  ;;  %v3258_v27 = vld [vmem:[#allocation35_spill] sm:$0xff] }
 0x411   : > { %v1470_v62 = vmax.f32 %v3005_v0, %v1406_v17  ;;  %v1479_v53 = vmax.f32 %v3007_v33, %v1415_v61  ;;  %v1480_v46 = vmax.f32 %v3009_v24, %v1416_v63  ;;  %v1481_v32 = vmax.f32 %v3011_v45, %v1417_v8 }
 0x412   : > { %v1482_v10 = vmax.f32 %v3013_v40, %v1418_v43  ;;  %v1483_v58 = vmax.f32 %v3015_v21, %v1419_v47  ;;  %v1484_v38 = vmax.f32 %v3258_v27, %v1420_v39  ;;  %v1485_v11 = vmax.f32 %v3019_v25, %v1421_v48 }
 0x413   : > { %v1486_v36 = vmax.f32 %v3259_v55, %v1422_v4  ;;  %v1852_v52 = vpack.c.bf16 %v1432_v57, %v1431_v41  ;;  %v1853_v0 = vpack.c.bf16 %v1434_v23, %v1433_v9  ;;  %v1854_v33 = vpack.c.bf16 %v1436_v18, %v1435_v29 }
 0x414   : > { %v1855_v24 = vpack.c.bf16 %v1438_v6, %v1437_v60  ;;  %v1860_v45 = vpack.c.bf16 %v1448_v22, %v1447_v12  ;;  %v1861_v28 = vpack.c.bf16 %v1450_v37, %v1449_v13  ;;  %v1862_v40 = vpack.c.bf16 %v1452_v50, %v1451_v26 }
 0x415   : > { %v1863_v15 = vpack.c.bf16 %v1454_v56, %v1453_v51  ;;  %v1868_v21 = vpack.c.bf16 %v1464_v54, %v1463_v20  ;;  %v1869_v30 = vpack.c.bf16 %v1466_v1, %v1465_v14  ;;  %1683 = vst [vmem:[%s2871_s17 + $0x20] sm:$0xff] %v1852_v52  ;;  %1684 = vst [vmem:[%s2871_s17 + $0x28] sm:$0xff] %v1853_v0 }
 0x416   : > { %v1870_v25 = vpack.c.bf16 %v1468_v44, %v1467_v16  ;;  %v1871_v41 = vpack.c.bf16 %v1470_v62, %v1469_v59  ;;  %v1876_v57 = vpack.c.bf16 %v1480_v46, %v1479_v53  ;;  %v1877_v2 = vpack.c.bf16 %v1482_v10, %v1481_v32  ;;  %1685 = vst [vmem:[%s2871_s17 + $0x30] sm:$0xff] %v1854_v33 }
 0x417   : > { %1686 = vst [vmem:[%s2871_s17 + $0x38] sm:$0xff] %v1855_v24  ;;  %1691 = vst [vmem:[%s2871_s17 + $0x60] sm:$0xff] %v1860_v45  ;;  %v1878_v51 = vpack.c.bf16 %v1484_v38, %v1483_v58  ;;  %v1879_v54 = vpack.c.bf16 %v1486_v36, %v1485_v11 }
 0x418   : > { %1692 = vst [vmem:[%s2871_s17 + $0x68] sm:$0xff] %v1861_v28  ;;  %1693 = vst [vmem:[%s2871_s17 + $0x70] sm:$0xff] %v1862_v40 }
 0x419   : > { %1694 = vst [vmem:[%s2871_s17 + $0x78] sm:$0xff] %v1863_v15  ;;  %1699 = vst [vmem:[%s2871_s17 + $0xa0] sm:$0xff] %v1868_v21 }
 0x41a   : > { %1700 = vst [vmem:[%s2871_s17 + $0xa8] sm:$0xff] %v1869_v30  ;;  %1701 = vst [vmem:[%s2871_s17 + $0xb0] sm:$0xff] %v1870_v25 }
 0x41b   : > { %1702 = vst [vmem:[%s2871_s17 + $0xb8] sm:$0xff] %v1871_v41  ;;  %1707 = vst [vmem:[%s2871_s17 + $0xe0] sm:$0xff] %v1876_v57 }
 0x41c   : > { %1708 = vst [vmem:[%s2871_s17 + $0xe8] sm:$0xff] %v1877_v2  ;;  %1709 = vst [vmem:[%s2871_s17 + $0xf0] sm:$0xff] %v1878_v51 }
 0x41d   : > { %1710 = vst [vmem:[%s2871_s17 + $0xf8] sm:$0xff] %v1879_v54 }
 0x41e PF: > { %s15_s18 = sadd.s32 1, %s1920_s18  }
 0x41f   : > { %p12_p4 = scmp.ge.s32.totalorder %s15_s18, 4  }
 0x421   :  { %14 = sbr.rel (!%p12_p4) target bundleno = 1 (0x1), region = 70 }

// kernel: multigrid_decoder_forward.5
= control target key start
LH: loop header
LB: loop body
LE: loop exit
PB: predicated region body
PF: predicated region fallthrough
CT: control target
= control target key end

     0   :  { %s1525_s18 = smov 0   ;;  %s2251_s0 = inlined_call_operand.vmem [shape: bf16[2,16,1024], index: 0, kind: input, shape index: {}]   ;;  %s2252_s1 = inlined_call_operand.vmem [shape: bf16[16,144], index: 1, kind: input, shape index: {}]   ;;  %s2253_s2 = inlined_call_operand.vmem [shape: f32[16,1], index: 2, kind: input, shape index: {}]   ;;  %s2254_s3 = inlined_call_operand.vmem [shape: f32[16,1], index: 3, kind: input, shape index: {}]   ;;  %s2255_s4 = inlined_call_operand.vmem [shape: f32[16,1], index: 4, kind: input, shape index: {}]   ;;  %s2256_s5 = inlined_call_operand.vmem [shape: bf16[2,16,1024], index: 5, kind: output, shape index: {}]  }
   0x1 LB: > { %s1370_s19 = sadd.s32 4294967295, %s1484_s18   ;;  %p1374_p0 = scmp.ge.s32.totalorder %s1484_s18, 1  ;;  %s1484_s18 = sphi %s1525_s18, %s15_s18  }
   0x2   : > { %p187_p1 = scmp.lt.s32.totalorder %s1484_s18, 3 }
   0x4   : > { %p188_p2 = pnand %p1374_p0, %p187_p1 }
   0x5   : > { %p215_p3 = scmp.lt.s32.totalorder (!%p188_p2), %s1370_s19, 1  ;;  %s1487_s24 = smov (!%p188_p2), 96  }
   0x6   : > { %191 = sbr.rel (%p188_p2) target bundleno = 1034 (0x40a), region = 40  ;;  %s1488_s25 = smov (!%p188_p2), 97  }
   0x7   : > { %s1489_s26 = smov (!%p188_p2), 127   ;;  %s1490_s27 = smov (!%p188_p2), 1  }
   0x8   : > { %s1491_s28 = smov (!%p188_p2), 31   ;;  %s1492_s29 = smov (!%p188_p2), 32  }
   0x9   : > { %s1493_s30 = smov (!%p188_p2), 33   ;;  %s1494_s8 = smov (!%p188_p2), 95  }
   0xb   : > { %s2322_s19 = smov (!%p215_p3, %s1370_s19), 1  ;;  %v1486_v0 = vmov 0   ;;  %v1620_v12 = vld [vmem:[%s2252_s1 + $0x4] ss:$8 sps:$4 sm:$0xff]   ;;  %vm877_vm0 = vcmask 130048   ;;  %v236_v18 = vlaneseq  ;;  %vm784_vm4 = vcmask 785408  }
   0xc   : > { %1470 = vset.pattern.permute.xlu1 %v1486_v0  ;;  %1469 = vset.pattern.permute.xlu0 %v1486_v0  ;;  %s1430_s20 = sshll.u32 %s2322_s19, 6  ;;  %vm741_vm7 = vcmask 793600   ;;  %v856_v51 = vld [vmem:[%s2253_s2] sm:$0xff]  ;;  %v857_v54 = vld [vmem:[%s2253_s2 + $0x8] sm:$0xff] }
   0xd   : > { %s1543_s23 = scalar_lea.vmem %s2251_s0, %s1430_s20  ;;  %1397 = vmatprep.mubr.msk.bf16.mxu0 %vm877_vm0, %v1620_v12  ;;  %1404 = vmatprep.mubr.msk.bf16.mxu1 %vm877_vm0, %v1620_v12  ;;  %v1678_v19 = vand.u32 127, %v236_v18  ;;  %v450_v23 = vshrl.u32 %v236_v18, 7 }
   0xe   : > { %v228_v1 = vld [vmem:[%s1543_s23] sm:$0xff]  ;;  %v229_v3 = vld [vmem:[%s1543_s23 + $0x8] sm:$0xff]  ;;  %v230_v8 = vld [vmem:[%s1543_s23 + $0x10] sm:$0xff] }
   0xf   : > { %v232_v2 = vld [vmem:[%s1543_s23 + $0x20] sm:$0xff]  ;;  %v233_v6 = vld [vmem:[%s1543_s23 + $0x28] sm:$0xff]  ;;  %v234_v9 = vld [vmem:[%s1543_s23 + $0x30] sm:$0xff]  ;;  %v238_v20 = vadd.s32 128, %v1678_v19  ;;  %v249_v21 = vand.u32 31, %v1678_v19  ;;  %v1698_v24 = vsub.s32 4, %v450_v23 }
  0x10   : > { %v1548_v4 = vcombine.high %v228_v1, %v232_v2  ;;  %v1550_v5 = vcombine.low %v228_v1, %v232_v2  ;;  %v1557_v7 = vcombine.low %v229_v3, %v233_v6  ;;  %v1569_v10 = vcombine.high %v229_v3, %v233_v6  ;;  %v231_v13 = vld [vmem:[%s1543_s23 + $0x18] sm:$0xff] }
  0x11   : > { %v1571_v11 = vcombine.low %v230_v8, %v234_v9  ;;  %v235_v14 = vld [vmem:[%s1543_s23 + $0x38] sm:$0xff]  ;;  %v1640_v15 = vcombine.high %v230_v8, %v234_v9  ;;  %v256_v22 = vand.u32 31, %v238_v20  ;;  %vm341_vm1 = vcmp.gt.s32.totalorder %v249_v21, 0 }
  0x12   : > { %770 = vrot.lane.b32.xlu0 %v1548_v4, %s1487_s24  ;;  %768 = vrot.lane.b32.xlu1 %v1550_v5, %s1487_s24  ;;  %v1642_v16 = vcombine.low %v231_v13, %v235_v14  ;;  %v1656_v17 = vcombine.high %v231_v13, %v235_v14  ;;  %v1700_v25 = vsub.s32 0, %v450_v23  ;;  %v239_v29 = vadd.s32 256, %v1678_v19 }
  0x13   : > { %vm342_vm2 = vcmp.gt.s32.totalorder %v256_v22, 0  ;;  %v240_v30 = vadd.s32 384, %v1678_v19  ;;  %vm1712_vm5 = vcmp.lt.s32.totalorder %v249_v21, 31  ;;  %vm1716_vm6 = vcmp.lt.s32.totalorder %v256_v22, 31 }
  0x14   : > { %vm441_vm3 = vmpackc.low %vm342_vm2, %vm341_vm1  ;;  %v263_v39 = vand.u32 31, %v239_v29  ;;  %vm2257_vm1 = vcmask 1039360  }
  0x15   : > { %v445_v28 = vsel %vm441_vm3, 65537, %v1486_v0  ;;  %v270_v40 = vand.u32 31, %v240_v30  ;;  %vm583_vm10 = vmpackc.low %vm1716_vm6, %vm1712_vm5 }
  0x16   : > { %772 = vrot.lane.b32.xlu0 %v1557_v7, %s1487_s24  ;;  %725 = vrot.lane.b32.xlu1 %v1550_v5, %s1488_s25  ;;  %v456_v31 = vrot.slane %v445_v28, %v1698_v24  ;;  %v452_v32 = vrot.slane %v445_v28, %v1700_v25  ;;  %vm1745_vm11 = vcmp.gt.s32.totalorder %v263_v39, 0  ;;  %v587_v50 = vsel %vm583_vm10, 65537, %v1486_v0 }
  0x17   : > { %vm1749_vm12 = vcmp.gt.s32.totalorder %v270_v40, 0  ;;  %vm1771_vm14 = vcmp.lt.s32.totalorder %v263_v39, 31  ;;  %vm1775_vm15 = vcmp.lt.s32.totalorder %v270_v40, 31  ;;  %v598_v59 = vrot.slane %v587_v50, %v1698_v24 }
  0x18   : > { %vm1725_vm8 = vcmp.ne.s16.totalorder %v456_v31, 0  ;;  %vm1729_vm9 = vcmp.ne.s16.totalorder %v452_v32, 0  ;;  %vm442_vm13 = vmpackc.low %vm1749_vm12, %vm1745_vm11  ;;  %v594_v60 = vrot.slane %v587_v50, %v1700_v25  ;;  %vm655_vm11 = vcmask 7168  }
  0x19   : > { %v446_v63 = vsel %vm442_vm13, 65537, %v1486_v0  ;;  %vm584_vm2 = vmpackc.low %vm1775_vm15, %vm1771_vm14  ;;  %vm1786_vm3 = vcmp.ne.s16.totalorder %v598_v59, 0  ;;  %vm548_vm14 = vcmask 252928   ;;  %vm513_vm15 = vcmask 261120  }
  0x1a   : > { %727 = vrot.lane.b32.xlu0 %v1548_v4, %s1488_s25  ;;  %729 = vrot.lane.b32.xlu1 %v1557_v7, %s1488_s25  ;;  %vm1790_vm5 = vcmp.ne.s16.totalorder %v594_v60, 0  ;;  %v464_v6 = vrot.slane %v446_v63, %v1698_v24  ;;  %v460_v8 = vrot.slane %v446_v63, %v1700_v25  ;;  %v588_v9 = vsel %vm584_vm2, 65537, %v1486_v0  ;;  %vm1393_vm2 = vmneg %vm513_vm15 }
  0x1b   : > { %v602_v21 = vrot.slane %v588_v9, %v1700_v25 }
  0x1c   : > { %vm1805_vm6 = vcmp.ne.s16.totalorder %v464_v6, 0  ;;  %vm1809_vm10 = vcmp.ne.s16.totalorder %v460_v8, 0  ;;  %v241_v8 = vadd.s32 512, %v1678_v19 }
  0x1d   : > { %vm1829_vm13 = vcmp.ne.s16.totalorder %v602_v21, 0 }
  0x1e   : > { %774 = vrot.lane.b32.xlu0 %v1569_v10, %s1487_s24  ;;  %776 = vrot.lane.b32.xlu1 %v1571_v11, %s1487_s24 }
  0x22   : > { %682 = vrot.lane.b32.xlu0 %v1550_v5, %s1489_s26  ;;  %684 = vrot.lane.b32.xlu1 %v1548_v4, %s1489_s26 }
  0x26   : > { %686 = vrot.lane.b32.xlu0 %v1557_v7, %s1489_s26  ;;  %731 = vrot.lane.b32.xlu1 %v1569_v10, %s1488_s25 }
  0x2a   : > { %733 = vrot.lane.b32.xlu0 %v1571_v11, %s1488_s25  ;;  %688 = vrot.lane.b32.xlu1 %v1569_v10, %s1489_s26 }
  0x2e   : > { %690 = vrot.lane.b32.xlu0 %v1571_v11, %s1489_s26  ;;  %639 = vrot.lane.b32.xlu1 %v1550_v5, %s1490_s27 }
  0x32   : > { %641 = vrot.lane.b32.xlu0 %v1548_v4, %s1490_s27  ;;  %532 = vrot.lane.b32.xlu1 %v1550_v5, %s1491_s28 }
  0x36   : > { %534 = vrot.lane.b32.xlu0 %v1548_v4, %s1491_s28  ;;  %643 = vrot.lane.b32.xlu1 %v1557_v7, %s1490_s27 }
  0x3a   : > { %645 = vrot.lane.b32.xlu0 %v1569_v10, %s1490_s27  ;;  %497 = vrot.lane.b32.xlu1 %v1550_v5, %s1492_s29 }
  0x3e   : > { %499 = vrot.lane.b32.xlu0 %v1548_v4, %s1492_s29  ;;  %536 = vrot.lane.b32.xlu1 %v1557_v7, %s1491_s28 }
  0x42   : > { %538 = vrot.lane.b32.xlu0 %v1569_v10, %s1491_s28  ;;  %389 = vrot.lane.b32.xlu1 %v1550_v5, %s1493_s30 }
  0x46   : > { %391 = vrot.lane.b32.xlu0 %v1548_v4, %s1493_s30  ;;  %501 = vrot.lane.b32.xlu1 %v1557_v7, %s1492_s29 }
  0x4a   : > { %503 = vrot.lane.b32.xlu0 %v1569_v10, %s1492_s29  ;;  %393 = vrot.lane.b32.xlu1 %v1557_v7, %s1493_s30 }
  0x4e   : > { %395 = vrot.lane.b32.xlu0 %v1569_v10, %s1493_s30  ;;  %803 = vrot.lane.b32.xlu1 %v1550_v5, %s1494_s8 }
  0x52   : > { %805 = vrot.lane.b32.xlu0 %v1548_v4, %s1494_s8  ;;  %807 = vrot.lane.b32.xlu1 %v1557_v7, %s1494_s8 }
  0x56   : > { %778 = vrot.lane.b32.xlu0 %v1640_v15, %s1487_s24  ;;  %780 = vrot.lane.b32.xlu1 %v1642_v16, %s1487_s24 }
  0x5a   : > { %809 = vrot.lane.b32.xlu0 %v1569_v10, %s1494_s8  ;;  %811 = vrot.lane.b32.xlu1 %v1571_v11, %s1494_s8 }
  0x5e   : > { %735 = vrot.lane.b32.xlu0 %v1640_v15, %s1488_s25  ;;  %737 = vrot.lane.b32.xlu1 %v1642_v16, %s1488_s25 }
  0x62   : > { %782 = vrot.lane.b32.xlu0 %v1656_v17, %s1487_s24  ;;  %692 = vrot.lane.b32.xlu1 %v1640_v15, %s1489_s26 }
  0x66   : > { %694 = vrot.lane.b32.xlu0 %v1642_v16, %s1489_s26  ;;  %739 = vrot.lane.b32.xlu1 %v1656_v17, %s1488_s25 }
  0x6a   : > { %696 = vrot.lane.b32.xlu0 %v1656_v17, %s1489_s26  ;;  %647 = vrot.lane.b32.xlu1 %v1571_v11, %s1490_s27 }
  0x6e   : > { %649 = vrot.lane.b32.xlu0 %v1640_v15, %s1490_s27  ;;  %540 = vrot.lane.b32.xlu1 %v1571_v11, %s1491_s28 }
  0x72   : > { %542 = vrot.lane.b32.xlu0 %v1640_v15, %s1491_s28  ;;  %651 = vrot.lane.b32.xlu1 %v1642_v16, %s1490_s27 }
  0x76   : > { %653 = vrot.lane.b32.xlu0 %v1656_v17, %s1490_s27  ;;  %505 = vrot.lane.b32.xlu1 %v1571_v11, %s1492_s29 }
  0x7a   : > { %507 = vrot.lane.b32.xlu0 %v1640_v15, %s1492_s29  ;;  %544 = vrot.lane.b32.xlu1 %v1642_v16, %s1491_s28 }
  0x7e   : > { %546 = vrot.lane.b32.xlu0 %v1656_v17, %s1491_s28  ;;  %397 = vrot.lane.b32.xlu1 %v1571_v11, %s1493_s30 }
  0x82   : > { %399 = vrot.lane.b32.xlu0 %v1640_v15, %s1493_s30  ;;  %509 = vrot.lane.b32.xlu1 %v1642_v16, %s1492_s29 }
  0x84   : > { %v771_v26 = vpop.permute.xlu0 %770  ;;  %v769_v27 = vpop.permute.xlu1 %768 }
  0x85   : > { %v785_v38 = vsel %vm784_vm4, %v769_v27, %v771_v26  ;;  %v606_v27 = vrot.slane %v588_v9, %v1698_v24  ;;  %v242_v9 = vadd.s32 640, %v1678_v19 }
  0x86   : > { %511 = vrot.lane.b32.xlu0 %v1656_v17, %s1492_s29  ;;  %401 = vrot.lane.b32.xlu1 %v1642_v16, %s1493_s30 }
  0x87   : > { %vm1824_vm12 = vcmp.ne.s16.totalorder %v606_v27, 0  ;;  %v284_v21 = vand.u32 31, %v242_v9 }
  0x88   : > { %v773_v33 = vpop.permute.xlu0 %772  ;;  %v726_v34 = vpop.permute.xlu1 %725 }
  0x89   : > { %v786_v35 = vsel %vm784_vm4, %v771_v26, %v773_v33 }
  0x8a   : > { %881 = vmatprep.subr.bf16.mxu0 %v786_v35  ;;  %403 = vrot.lane.b32.xlu0 %v1656_v17, %s1493_s30 }
  0x8b   : > { %813 = vrot.lane.b32.xlu1 %v1640_v15, %s1494_s8  ;;  %882 = vmatpush1.bf16.msra.mxu0 %v785_v38 }
  0x8c   : > { %v728_v43 = vpop.permute.xlu0 %727  ;;  %v730_v44 = vpop.permute.xlu1 %729 }
  0x8d   : > { %v742_v45 = vsel %vm741_vm7, %v726_v34, %v728_v43  ;;  %v743_v46 = vsel %vm741_vm7, %v728_v43, %v730_v44 }
  0x8e   : > { %815 = vrot.lane.b32.xlu0 %v1642_v16, %s1494_s8  ;;  %1389 = vmatprep.subr.msk.bf16.mxu0 %vm1725_vm8, %v743_v46  ;;  %v760_v47 = vsel %vm1729_vm9, %v742_v45, 0 }
  0x8f   : > { %817 = vrot.lane.b32.xlu1 %v1656_v17, %s1494_s8  ;;  %884 = vmatpush1.bf16.msra.mxu0 %v760_v47 }
  0x90   : > { %v775_v52 = vpop.permute.xlu0 %774  ;;  %v1759_v53 = vpop.permute.xlu1 %776 }
  0x91   : > { %v788_v55 = vsel %vm784_vm4, %v775_v52, %v1759_v53  ;;  %v787_v56 = vsel %vm784_vm4, %v773_v33, %v775_v52 }
  0x92   : > { %924 = vmatprep.subr.bf16.mxu1 %v788_v55  ;;  %860 = vperm.xlu0 %1469, %v856_v51  }
  0x93   : > { %925 = vmatpush1.bf16.msra.mxu1 %v787_v56  ;;  %865 = vperm.xlu1 %1470, %v857_v54  }
  0x94   : > { %v683_v61 = vpop.permute.xlu0 %682  ;;  %v685_v62 = vpop.permute.xlu1 %684 }
  0x95   : > { %v699_v3 = vsel %vm2257_vm1, %v683_v61, %v685_v62 }
  0x96   : > { %v717_v20 = vsel %vm1790_vm5, %v699_v3, 0 }
  0x98   : > { %v687_v13 = vpop.permute.xlu0 %686  ;;  %v732_v14 = vpop.permute.xlu1 %731 }
  0x99   : > { %v700_v18 = vsel %vm2257_vm1, %v685_v62, %v687_v13  ;;  %v744_v22 = vsel %vm741_vm7, %v730_v44, %v732_v14 }
  0x9a   : > { %1390 = vmatprep.subr.msk.bf16.mxu0 %vm1786_vm3, %v700_v18  ;;  %v762_v31 = vsel %vm1809_vm10, %v744_v22, 0 }
  0x9b   : > { %886 = vmatpush1.bf16.msra.mxu0 %v717_v20  ;;  %v277_v20 = vand.u32 31, %v241_v8 }
  0x9c   : > { %v1814_v28 = vpop.permute.xlu0 %733  ;;  %v689_v29 = vpop.permute.xlu1 %688  ;;  %887 = vmatprep.subr.bf16.mxu0 %v1548_v4 }
  0x9d   : > { %v745_v30 = vsel %vm741_vm7, %v732_v14, %v1814_v28  ;;  %v701_v32 = vsel %vm2257_vm1, %v687_v13, %v689_v29 }
  0x9e   : > { %1398 = vmatprep.subr.msk.bf16.mxu1 %vm1805_vm6, %v745_v30  ;;  %v719_v38 = vsel %vm1829_vm13, %v701_v32, 0  ;;  %v243_v30 = vadd.s32 768, %v1678_v19 }
  0x9f   : > { %927 = vmatpush1.bf16.msra.mxu1 %v762_v31  ;;  %888 = vmatpush1.bf16.msra.mxu0 %v1550_v5  ;;  %v244_v31 = vadd.s32 896, %v1678_v19 }
  0xa0   : > { %v1833_v34 = vpop.permute.xlu0 %690  ;;  %v640_v35 = vpop.permute.xlu1 %639  ;;  %v291_v26 = vand.u32 31, %v243_v30 }
  0xa1   : > { %v702_v36 = vsel %vm2257_vm1, %v689_v29, %v1833_v34  ;;  %v672_v37 = vsel %vm655_vm11, 0, %v640_v35  ;;  %vm405_vm1 = vcmask 269312  }
  0xa2   : > { %1399 = vmatprep.subr.msk.bf16.mxu1 %vm1824_vm12, %v702_v36  ;;  %v674_v40 = vsel %vm1729_vm9, %v672_v37, 0 }
  0xa3   : > { %929 = vmatpush1.bf16.msra.mxu1 %v719_v38 }
  0xa4   : > { %v642_v5 = vpop.permute.xlu0 %641  ;;  %v533_v39 = vpop.permute.xlu1 %532  ;;  %930 = vmatprep.subr.bf16.mxu1 %v1569_v10 }
  0xa5   : > { %v656_v43 = vsel %vm655_vm11, %v640_v35, %v642_v5  ;;  %v565_v44 = vsel %vm548_vm14, 0, %v533_v39 }
  0xa6   : > { %1391 = vmatprep.subr.msk.bf16.mxu0 %vm1725_vm8, %v656_v43  ;;  %v631_v47 = vsel %vm1790_vm5, %v565_v44, 0 }
  0xa7   : > { %890 = vmatpush1.bf16.msra.mxu0 %v674_v40  ;;  %931 = vmatpush1.bf16.msra.mxu1 %v1557_v7  ;;  %v1920_v40 = vld [vmem:[%s2252_s1] ss:$8 sps:$4 sm:$0xff]  }
  0xa8   : > { %v535_v45 = vpop.permute.xlu0 %534  ;;  %v644_v46 = vpop.permute.xlu1 %643 }
  0xa9   : > { %v549_v48 = vsel %vm548_vm14, %v533_v39, %v535_v45  ;;  %v657_v10 = vsel %vm655_vm11, %v642_v5, %v644_v46  ;;  %v298_v5 = vand.u32 31, %v244_v31 }
  0xaa   : > { %1392 = vmatprep.subr.msk.bf16.mxu0 %vm1786_vm3, %v549_v48  ;;  %v676_v7 = vsel %vm1809_vm10, %v657_v10, 0 }
  0xab   : > { %892 = vmatpush1.bf16.msra.mxu0 %v631_v47 }
  0xac   : > { %v1856_v49 = vpop.permute.xlu0 %645  ;;  %v498_v50 = vpop.permute.xlu1 %497 }
  0xad   : > { %v658_v51 = vsel %vm655_vm11, %v644_v46, %v1856_v49 }
  0xae   : > { %1400 = vmatprep.subr.msk.bf16.mxu1 %vm1805_vm6, %v658_v51 }
  0xaf   : > { %933 = vmatpush1.bf16.msra.mxu1 %v676_v7 }
  0xb0   : > { %v500_v52 = vpop.permute.xlu0 %499  ;;  %v537_v54 = vpop.permute.xlu1 %536 }
  0xb1   : > { %v514_v55 = vsel %vm513_vm15, %v498_v50, %v500_v52  ;;  %v550_v56 = vsel %vm548_vm14, %v535_v45, %v537_v54 }
  0xb2   : > { %893 = vmatprep.subr.bf16.mxu0 %v514_v55  ;;  %v633_v61 = vsel %vm1829_vm13, %v550_v56, 0 }
  0xb3   : > { %1394 = vmatpush1.bf16.msk.msra.mxu0 %vm1393_vm2, %v498_v50  ;;  %vm1903_vm2 = vcmp.gt.s32.totalorder %v284_v21, 0 }
  0xb4   : > { %v1867_v57 = vpop.permute.xlu0 %538  ;;  %v390_v58 = vpop.permute.xlu1 %389 }
  0xb5   : > { %v551_v59 = vsel %vm548_vm14, %v537_v54, %v1867_v57  ;;  %v423_v60 = vsel %vm405_vm1, 0, %v390_v58 }
  0xb6   : > { %1401 = vmatprep.subr.msk.bf16.mxu1 %vm1824_vm12, %v551_v59  ;;  %v489_v3 = vsel %vm1729_vm9, %v423_v60, 0  ;;  %vm1899_vm9 = vcmp.gt.s32.totalorder %v277_v20, 0 }
  0xb7   : > { %935 = vmatpush1.bf16.msra.mxu1 %v633_v61 }
  0xb8   : > { %v392_v62 = vpop.permute.xlu0 %391  ;;  %v502_v63 = vpop.permute.xlu1 %501 }
  0xb9   : > { %v406_v6 = vsel %vm405_vm1, %v390_v58, %v392_v62  ;;  %v515_v42 = vsel %vm513_vm15, %v500_v52, %v502_v63 }
  0xba   : > { %1395 = vmatprep.subr.msk.bf16.mxu0 %vm1725_vm8, %v406_v6  ;;  %vm819_vm8 = vcmask 777216  }
  0xbb   : > { %896 = vmatpush1.bf16.msra.mxu0 %v489_v3 }
  0xbc   : > { %v1883_v13 = vpop.permute.xlu0 %503  ;;  %v394_v14 = vpop.permute.xlu1 %393 }
  0xbd   : > { %v516_v18 = vsel %vm513_vm15, %v502_v63, %v1883_v13  ;;  %v407_v22 = vsel %vm405_vm1, %v392_v62, %v394_v14 }
  0xbe   : > { %936 = vmatprep.subr.bf16.mxu1 %v516_v18  ;;  %v491_v32 = vsel %vm1809_vm10, %v407_v22, 0  ;;  %vm1923_vm10 = vcmp.lt.s32.totalorder %v277_v20, 31 }
  0xbf   : > { %937 = vmatpush1.bf16.msra.mxu1 %v515_v42 }
  0xc0   : > { %v1889_v41 = vpop.permute.xlu0 %395  ;;  %v804_v27 = vpop.permute.xlu1 %803 }
  0xc1   : > { %v408_v29 = vsel %vm405_vm1, %v394_v14, %v1889_v41 }
  0xc2   : > { %1402 = vmatprep.subr.msk.bf16.mxu1 %vm1805_vm6, %v408_v29  ;;  %vm443_vm6 = vmpackc.low %vm1903_vm2, %vm1899_vm9  ;;  %vm1927_vm9 = vcmp.lt.s32.totalorder %v284_v21, 31 }
  0xc3   : > { %939 = vmatpush1.bf16.msra.mxu1 %v491_v32  ;;  %v447_v45 = vsel %vm443_vm6, 65537, %v1486_v0  ;;  %vm585_vm2 = vmpackc.low %vm1927_vm9, %vm1923_vm10  ;;  %vm1964_vm10 = vcmp.lt.s32.totalorder %v291_v26, 31  ;;  %vm1968_vm9 = vcmp.lt.s32.totalorder %v298_v5, 31 }
  0xc4   : > { %v806_v37 = vpop.permute.xlu0 %805  ;;  %v808_v38 = vpop.permute.xlu1 %807  ;;  %v468_v50 = vrot.slane %v447_v45, %v1700_v25  ;;  %v472_v51 = vrot.slane %v447_v45, %v1698_v24  ;;  %v589_v33 = vsel %vm585_vm2, 65537, %v1486_v0 }
  0xc5   : > { %v820_v19 = vsel %vm819_vm8, %v804_v27, %v806_v37  ;;  %v821_v23 = vsel %vm819_vm8, %v806_v37, %v808_v38  ;;  %v610_v8 = vrot.slane %v589_v33, %v1700_v25 }
  0xc6   : > { %1396 = vmatprep.subr.msk.bf16.mxu0 %vm1786_vm3, %v821_v23  ;;  %v838_v39 = vsel %vm1790_vm5, %v820_v19, 0  ;;  %vm1934_vm3 = vcmp.gt.s32.totalorder %v291_v26, 0  ;;  %vm1938_vm5 = vcmp.gt.s32.totalorder %v298_v5, 0 }
  0xc7   : > { %912 = vmatpush2.bf16.msra.mxu0 %v838_v39  ;;  %vm444_vm6 = vmpackc.low %vm1938_vm5, %vm1934_vm3  ;;  %vm1972_vm3 = vcmp.ne.s16.totalorder %v468_v50, 0  ;;  %vm1976_vm5 = vcmp.ne.s16.totalorder %v472_v51, 0 }
  0xc8   : > { %v779_v43 = vpop.permute.xlu0 %778  ;;  %v781_v44 = vpop.permute.xlu1 %780  ;;  %v448_v4 = vsel %vm444_vm6, 65537, %v1486_v0 }
  0xc9   : > { %v789_v2 = vsel %vm784_vm4, %v1759_v53, %v779_v43  ;;  %v790_v47 = vsel %vm784_vm4, %v779_v43, %v781_v44  ;;  %v476_v9 = vrot.slane %v448_v4, %v1700_v25  ;;  %v480_v14 = vrot.slane %v448_v4, %v1698_v24 }
  0xca   : > { %967 = vmatprep.subr.bf16.mxu0 %v790_v47  ;;  %914 = vmatmul.mubr.bf16.vlgmr.msra.gmra.mxu0 %v1920_v40 }
  0xcb   : > { %968 = vmatpush1.bf16.msra.mxu0 %v789_v2  ;;  %1411 = vmatprep.mubr.msk.bf16.mxu0 %vm877_vm0, %v1620_v12  ;;  %vm2007_vm2 = vcmp.ne.s16.totalorder %v476_v9, 0 }
  0xcc   : > { %v810_v53 = vpop.permute.xlu0 %809  ;;  %v1951_v7 = vpop.permute.xlu1 %811 }
  0xcd   : > { %v822_v52 = vsel %vm819_vm8, %v808_v38, %v810_v53  ;;  %v823_v54 = vsel %vm819_vm8, %v810_v53, %v1951_v7 }
  0xce   : > { %1403 = vmatprep.subr.msk.bf16.mxu1 %vm1824_vm12, %v823_v54  ;;  %v840_v55 = vsel %vm1829_vm13, %v822_v52, 0  ;;  %vm586_vm12 = vmpackc.low %vm1968_vm9, %vm1964_vm10  ;;  %vm2003_vm13 = vcmp.ne.s16.totalorder %v610_v8, 0  ;;  %vm2017_vm10 = vcmp.ne.s16.totalorder %v480_v14, 0 }
  0xcf   : > { %955 = vmatpush2.bf16.msra.mxu1 %v840_v55  ;;  %v590_v20 = vsel %vm586_vm12, 65537, %v1486_v0 }
  0xd0   : > { %v736_v61 = vpop.permute.xlu0 %735  ;;  %v738_v62 = vpop.permute.xlu1 %737  ;;  %v618_v30 = vrot.slane %v590_v20, %v1700_v25  ;;  %v622_v31 = vrot.slane %v590_v20, %v1698_v24 }
  0xd1   : > { %v746_v63 = vsel %vm741_vm7, %v1814_v28, %v736_v61  ;;  %v747_v3 = vsel %vm741_vm7, %v736_v61, %v738_v62  ;;  %v614_v28 = vrot.slane %v589_v33, %v1698_v24 }
  0xd2   : > { %v764_v6 = vsel %vm1972_vm3, %v746_v63, 0  ;;  %1405 = vmatprep.subr.msk.bf16.mxu0 %vm1976_vm5, %v747_v3  ;;  %957 = vmatmul.mubr.bf16.vlgmr.msra.gmra.mxu1 %v1920_v40  ;;  %vm2034_vm9 = vcmp.ne.s16.totalorder %v618_v30, 0  ;;  %vm2038_vm12 = vcmp.ne.s16.totalorder %v622_v31, 0 }
  0xd3   : > { %970 = vmatpush1.bf16.msra.mxu0 %v764_v6  ;;  %1419 = vmatprep.mubr.msk.bf16.mxu1 %vm877_vm0, %v1620_v12  ;;  %vm2011_vm6 = vcmp.ne.s16.totalorder %v614_v28, 0  ;;  %vm2312_vm0 = vcmask 1039360  }
  0xd4   : > { %v783_v18 = vpop.permute.xlu0 %782  ;;  %v693_v42 = vpop.permute.xlu1 %692 }
  0xd5   : > { %v791_v21 = vsel %vm784_vm4, %v781_v44, %v783_v18  ;;  %1412 = vmatprep.subr.msk.bf16.mxu1 %vm784_vm4, %v783_v18  ;;  %v703_v0 = vsel %vm2312_vm0, %v1833_v34, %v693_v42  ;;  %vm2315_vm4 = vmmov %vm2312_vm0 }
  0xd6   : > { %1011 = vmatpush1.bf16.msra.mxu1 %v791_v21  ;;  %v721_v19 = vsel %vm2003_vm13, %v703_v0, 0 }
  0xd8   : > { %v695_v32 = vpop.permute.xlu0 %694  ;;  %v740_v35 = vpop.permute.xlu1 %739 }
  0xd9   : > { %v704_v36 = vsel %vm2315_vm4, %v693_v42, %v695_v32  ;;  %v748_v37 = vsel %vm741_vm7, %v738_v62, %v740_v35  ;;  %v758_v38 = vsel %vm741_vm7, %v740_v35, 0  ;;  %vm2320_vm7 = vmmov %vm2312_vm0 }
  0xda   : > { %v766_v34 = vsel %vm2007_vm2, %v748_v37, 0  ;;  %1406 = vmatprep.subr.msk.bf16.mxu0 %vm2011_vm6, %v704_v36  ;;  %1413 = vmatprep.subr.msk.bf16.mxu1 %vm2017_vm10, %v758_v38 }
  0xdb   : > { %972 = vmatpush1.bf16.msra.mxu0 %v721_v19  ;;  %1013 = vmatpush1.bf16.msra.mxu1 %v766_v34 }
  0xdc   : > { %v697_v23 = vpop.permute.xlu0 %696  ;;  %v648_v26 = vpop.permute.xlu1 %647  ;;  %973 = vmatprep.subr.bf16.mxu0 %v1640_v15 }
  0xdd   : > { %v705_v5 = vsel %vm2320_vm7, %v695_v32, %v697_v23  ;;  %v715_v39 = vsel %vm2312_vm0, %v697_v23, 0  ;;  %v659_v44 = vsel %vm655_vm11, %v1856_v49, %v648_v26 }
  0xde   : > { %v723_v43 = vsel %vm2034_vm9, %v705_v5, 0  ;;  %1414 = vmatprep.subr.msk.bf16.mxu1 %vm2038_vm12, %v715_v39  ;;  %v678_v1 = vsel %vm1972_vm3, %v659_v44, 0 }
  0xdf   : > { %974 = vmatpush1.bf16.msra.mxu0 %v1571_v11  ;;  %1015 = vmatpush1.bf16.msra.mxu1 %v723_v43 }
  0xe0   : > { %v650_v45 = vpop.permute.xlu0 %649  ;;  %v541_v46 = vpop.permute.xlu1 %540  ;;  %1016 = vmatprep.subr.bf16.mxu1 %v1656_v17 }
  0xe1   : > { %v660_v15 = vsel %vm655_vm11, %v648_v26, %v650_v45  ;;  %v552_v2 = vsel %vm548_vm14, %v1867_v57, %v541_v46 }
  0xe2   : > { %1407 = vmatprep.subr.msk.bf16.mxu0 %vm1976_vm5, %v660_v15  ;;  %v635_v17 = vsel %vm2003_vm13, %v552_v2, 0 }
  0xe3   : > { %976 = vmatpush1.bf16.msra.mxu0 %v678_v1  ;;  %1017 = vmatpush1.bf16.msra.mxu1 %v1642_v16 }
  0xe4   : > { %v543_v11 = vpop.permute.xlu0 %542  ;;  %v652_v49 = vpop.permute.xlu1 %651 }
  0xe5   : > { %v553_v47 = vsel %vm548_vm14, %v541_v46, %v543_v11  ;;  %v661_v48 = vsel %vm655_vm11, %v650_v45, %v652_v49 }
  0xe6   : > { %1408 = vmatprep.subr.msk.bf16.mxu0 %vm2011_vm6, %v553_v47  ;;  %v680_v16 = vsel %vm2007_vm2, %v661_v48, 0 }
  0xe7   : > { %978 = vmatpush1.bf16.msra.mxu0 %v635_v17 }
  0xe8   : > { %v654_v10 = vpop.permute.xlu0 %653  ;;  %v506_v50 = vpop.permute.xlu1 %505 }
  0xe9   : > { %v662_v57 = vsel %vm655_vm11, %v652_v49, %v654_v10  ;;  %v517_v54 = vsel %vm513_vm15, %v1883_v13, %v506_v50 }
  0xea   : > { %1415 = vmatprep.subr.msk.bf16.mxu1 %vm2017_vm10, %v662_v57 }
  0xeb   : > { %1019 = vmatpush1.bf16.msra.mxu1 %v680_v16 }
  0xec   : > { %v508_v51 = vpop.permute.xlu0 %507  ;;  %v545_v53 = vpop.permute.xlu1 %544 }
  0xed   : > { %v518_v52 = vsel %vm513_vm15, %v506_v50, %v508_v51  ;;  %v554_v55 = vsel %vm548_vm14, %v543_v11, %v545_v53 }
  0xee   : > { %979 = vmatprep.subr.bf16.mxu0 %v518_v52  ;;  %v637_v4 = vsel %vm2034_vm9, %v554_v55, 0 }
  0xef   : > { %980 = vmatpush1.bf16.msra.mxu0 %v517_v54 }
  0xf0   : > { %v547_v56 = vpop.permute.xlu0 %546  ;;  %v398_v58 = vpop.permute.xlu1 %397 }
  0xf1   : > { %v555_v33 = vsel %vm548_vm14, %v545_v53, %v547_v56  ;;  %v409_v61 = vsel %vm405_vm1, %v1889_v41, %v398_v58 }
  0xf2   : > { %1416 = vmatprep.subr.msk.bf16.mxu1 %vm2038_vm12, %v555_v33  ;;  %v493_v3 = vsel %vm1972_vm3, %v409_v61, 0 }
  0xf3   : > { %1021 = vmatpush1.bf16.msra.mxu1 %v637_v4 }
  0xf4   : > { %v400_v62 = vpop.permute.xlu0 %399  ;;  %v510_v13 = vpop.permute.xlu1 %509 }
  0xf5   : > { %v410_v63 = vsel %vm405_vm1, %v398_v58, %v400_v62  ;;  %v519_v28 = vsel %vm513_vm15, %v508_v51, %v510_v13 }
  0xf6   : > { %1409 = vmatprep.subr.msk.bf16.mxu0 %vm1976_vm5, %v410_v63 }
  0xf7   : > { %982 = vmatpush1.bf16.msra.mxu0 %v493_v3 }
  0xf8   : > { %v512_v6 = vpop.permute.xlu0 %511  ;;  %v402_v8 = vpop.permute.xlu1 %401 }
  0xf9   : > { %v520_v9 = vsel %vm513_vm15, %v510_v13, %v512_v6  ;;  %v411_v41 = vsel %vm405_vm1, %v400_v62, %v402_v8 }
  0xfa   : > { %1022 = vmatprep.subr.bf16.mxu1 %v520_v9  ;;  %v495_v59 = vsel %vm2007_vm2, %v411_v41, 0 }
  0xfb   : > { %1023 = vmatpush1.bf16.msra.mxu1 %v519_v28 }
  0xfc   : > { %v404_v14 = vpop.permute.xlu0 %403 }
  0xfd   : > { %v412_v18 = vsel %vm405_vm1, %v402_v8, %v404_v14  ;;  %v814_v42 = vpop.permute.xlu1 %813 }
  0xfe   : > { %1417 = vmatprep.subr.msk.bf16.mxu1 %vm2017_vm10, %v412_v18  ;;  %v824_v60 = vsel %vm819_vm8, %v1951_v7, %v814_v42 }
  0xff   : > { %1025 = vmatpush1.bf16.msra.mxu1 %v495_v59  ;;  %v842_v30 = vsel %vm2003_vm13, %v824_v60, 0 }
 0x100   : > { %v816_v20 = vpop.permute.xlu0 %815 }
 0x101   : > { %v825_v21 = vsel %vm819_vm8, %v814_v42, %v816_v20  ;;  %v818_v0 = vpop.permute.xlu1 %817 }
 0x102   : > { %v826_v31 = vsel %vm819_vm8, %v816_v20, %v818_v0  ;;  %v836_v32 = vsel %vm819_vm8, %v818_v0, 0  ;;  %1410 = vmatprep.subr.msk.bf16.mxu0 %vm2011_vm6, %v825_v21 }
 0x103   : > { %v844_v27 = vsel %vm2034_vm9, %v826_v31, 0  ;;  %1418 = vmatprep.subr.msk.bf16.mxu1 %vm2038_vm12, %v836_v32  ;;  %998 = vmatpush2.bf16.msra.mxu0 %v842_v30 }
 0x104   : > { %1041 = vmatpush2.bf16.msra.mxu1 %v844_v27 }
 0x106   : > { %1000 = vmatmul.mubr.bf16.vlgmr.msra.gmra.mxu0 %v1920_v40 }
 0x107   : > { %1043 = vmatmul.mubr.bf16.vlgmr.msra.gmra.mxu1 %v1920_v40 }
 0x10d   : > { %v861_v36 = vpop.permute.xlu0 %860 }
 0x10e   : > { %v866_v37 = vpop.permute.xlu1 %865 }
 0x18a   : > { %v915_v7 = vpop.f32.mrf.mxu0 }
 0x18b   : > { %v2111_v38 = vadd.f32 %v915_v7, %v861_v36 }
 0x18c   : > { %v917_v22 = vpop.f32.mrf.mxu0 }
 0x18d   : > { %v2113_v19 = vadd.f32 %v917_v22, %v861_v36  ;;  %v1075_v40 = vmul.f32 %v2111_v38, %v2111_v38 }
 0x18e   : > { %v919_v12 = vpop.f32.mrf.mxu0 }
 0x18f   : > { %v2115_v24 = vadd.f32 %v919_v12, %v866_v37  ;;  %v1076_v26 = vmul.f32 %v2113_v19, %v2113_v19  ;;  %v1057_v39 = vadd.f32 %v2113_v19, %v2111_v38 }
 0x190   : > { %v921_v29 = vpop.f32.mrf.mxu0 }
 0x191   : > { %v2117_v25 = vadd.f32 %v921_v29, %v866_v37  ;;  %v1083_v44 = vmul.f32 %v2115_v24, %v2115_v24  ;;  %v1091_v1 = vadd.f32 %v1076_v26, %v1075_v40 }
 0x192   : > { %v958_v35 = vpop.f32.mrf.mxu1 }
 0x193   : > { %v2119_v23 = vadd.f32 %v958_v35, %v861_v36  ;;  %v1084_v45 = vmul.f32 %v2117_v25, %v2117_v25  ;;  %v1066_v11 = vadd.f32 %v2117_v25, %v2115_v24 }
 0x194   : > { %v960_v34 = vpop.f32.mrf.mxu1 }
 0x195   : > { %v2133_v46 = vadd.f32 %v960_v34, %v861_v36  ;;  %v1077_v15 = vmul.f32 %v2119_v23, %v2119_v23  ;;  %v1058_v49 = vadd.f32 %v1057_v39, %v2119_v23  ;;  %v1100_v17 = vadd.f32 %v1084_v45, %v1083_v44 }
 0x196   : > { %v962_v5 = vpop.f32.mrf.mxu1 }
 0x197   : > { %v2127_v43 = vadd.f32 %v962_v5, %v866_v37  ;;  %v1078_v10 = vmul.f32 %v2133_v46, %v2133_v46  ;;  %v1092_v50 = vadd.f32 %v1091_v1, %v1077_v15  ;;  %v1059_v51 = vadd.f32 %v1058_v49, %v2133_v46 }
 0x198   : > { %v964_v2 = vpop.f32.mrf.mxu1 }
 0x199   : > { %v1085_v47 = vmul.f32 %v2127_v43, %v2127_v43  ;;  %v2142_v48 = vadd.f32 %v964_v2, %v866_v37  ;;  %v1067_v57 = vadd.f32 %v1066_v11, %v2127_v43  ;;  %v1093_v58 = vadd.f32 %v1092_v50, %v1078_v10 }
 0x19b   : > { %v1101_v54 = vadd.f32 %v1100_v17, %v1085_v47  ;;  %v1086_v55 = vmul.f32 %v2142_v48, %v2142_v48  ;;  %v1068_v13 = vadd.f32 %v1067_v57, %v2142_v48 }
 0x19d   : > { %v1102_v14 = vadd.f32 %v1101_v54, %v1086_v55 }
 0x1c6   : > { %v1001_v16 = vpop.f32.mrf.mxu0 }
 0x1c7   : > { %v2148_v53 = vadd.f32 %v1001_v16, %v861_v36  ;;  %v1044_v52 = vpop.f32.mrf.mxu1 }
 0x1c8   : > { %v1003_v56 = vpop.f32.mrf.mxu0  ;;  %v2158_v63 = vadd.f32 %v1044_v52, %v861_v36 }
 0x1c9   : > { %v1060_v33 = vadd.f32 %v1059_v51, %v2148_v53  ;;  %v1079_v4 = vmul.f32 %v2148_v53, %v2148_v53  ;;  %v2155_v61 = vadd.f32 %v1003_v56, %v861_v36  ;;  %v1046_v62 = vpop.f32.mrf.mxu1 }
 0x1ca   : > { %v1005_v3 = vpop.f32.mrf.mxu0  ;;  %v2165_v18 = vadd.f32 %v1046_v62, %v861_v36  ;;  %v1081_v35 = vmul.f32 %v2158_v63, %v2158_v63 }
 0x1cb   : > { %v1094_v6 = vadd.f32 %v1093_v58, %v1079_v4  ;;  %v1061_v8 = vadd.f32 %v1060_v33, %v2155_v61  ;;  %v1080_v9 = vmul.f32 %v2155_v61, %v2155_v61  ;;  %v2163_v28 = vadd.f32 %v1005_v3, %v866_v37  ;;  %v1048_v41 = vpop.f32.mrf.mxu1 }
 0x1cc   : > { %v2167_v42 = vadd.f32 %v1048_v41, %v866_v37  ;;  %v1007_v59 = vpop.f32.mrf.mxu0  ;;  %v1082_v44 = vmul.f32 %v2165_v18, %v2165_v18 }
 0x1cd   : > { %v1069_v60 = vadd.f32 %v1068_v13, %v2163_v28  ;;  %v1087_v20 = vmul.f32 %v2163_v28, %v2163_v28  ;;  %v2172_v21 = vadd.f32 %v1007_v59, %v866_v37  ;;  %v1050_v0 = vpop.f32.mrf.mxu1  ;;  %v1062_v30 = vadd.f32 %v1061_v8, %v2158_v63 }
 0x1ce   : > { %v2175_v31 = vadd.f32 %v1050_v0, %v866_v37  ;;  %v1095_v32 = vadd.f32 %v1094_v6, %v1080_v9  ;;  %v1089_v36 = vmul.f32 %v2167_v42, %v2167_v42 }
 0x1cf   : > { %v1103_v27 = vadd.f32 %v1102_v14, %v1087_v20  ;;  %v1070_v7 = vadd.f32 %v1069_v60, %v2172_v21  ;;  %v1088_v22 = vmul.f32 %v2172_v21, %v2172_v21  ;;  %v1063_v12 = vadd.f32 %v1062_v30, %v2165_v18 }
 0x1d0   : > { %v1090_v40 = vmul.f32 %v2175_v31, %v2175_v31  ;;  %v1096_v5 = vadd.f32 %v1095_v32, %v1081_v35 }
 0x1d1   : > { %1064 = vadd.xlane.f32.xlu1 %v1063_v12  ;;  %v1071_v29 = vadd.f32 %v1070_v7, %v2167_v42  ;;  %v1104_v37 = vadd.f32 %v1103_v27, %v1088_v22 }
 0x1d2   : > { %v1097_v45 = vadd.f32 %v1096_v5, %v1082_v44 }
 0x1d3   : > { %v1072_v34 = vadd.f32 %v1071_v29, %v2175_v31  ;;  %v1105_v26 = vadd.f32 %v1104_v37, %v1089_v36  ;;  %v1053_v37 = vld [vmem:[%s2254_s3] sm:$0xff] }
 0x1d5   : > { %1073 = vadd.xlane.f32.xlu0 %v1072_v34  ;;  %v1106_v39 = vadd.f32 %v1105_v26, %v1090_v40  ;;  %v1054_v34 = vld [vmem:[%s2254_s3 + $0x8] sm:$0xff] }
 0x1d7   : > { %1107 = vadd.xlane.f32.xlu1 %v1106_v39 }
 0x1d9   : > { %1098 = vadd.xlane.f32.xlu0 %v1097_v45  ;;  %v1055_v45 = vld [vmem:[%s2255_s4] sm:$0xff] }
 0x25a   : > { %v1065_v15 = vpop.xlane.xlu1 %1064 }
 0x25b   : > { %v1109_v1 = vsel %vm655_vm11, %v1065_v15, 0.0 }
 0x25c   : > { %1110 = vadd.xlane.f32.xlu0 %v1109_v1 }
 0x25e   : > { %v1074_v2 = vpop.xlane.xlu0 %1073 }
 0x25f   : > { %v1120_v11 = vsel %vm655_vm11, %v1074_v2, 0.0  ;;  %v1056_v2 = vld [vmem:[%s2255_s4 + $0x8] sm:$0xff] }
 0x260   : > { %1121 = vadd.xlane.f32.xlu1 %v1120_v11  ;;  %v1108_v49 = vpop.xlane.xlu1 %1107 }
 0x261   : > { %v1144_v10 = vsel %vm655_vm11, %v1108_v49, 0.0 }
 0x262   : > { %v1099_v47 = vpop.xlane.xlu0 %1098 }
 0x263   : > { %v1131_v17 = vsel %vm655_vm11, %v1099_v47, 0.0 }
 0x264   : > { %1132 = vadd.xlane.f32.xlu0 %v1131_v17  ;;  %1145 = vadd.xlane.f32.xlu1 %v1144_v10 }
 0x2e5   : > { %v1111_v50 = vpop.xlane.xlu0 %1110 }
 0x2e6   : > { %v1112_v57 = vrot.slane %v1111_v50, 4 }
 0x2e8   : > { %v1113_v16 = vadd.f32 %v1112_v57, %v1111_v50 }
 0x2e9   : > { %v1122_v51 = vpop.xlane.xlu1 %1121 }
 0x2ea   : > { %v1114_v52 = vrot.slane %v1113_v16, 2  ;;  %v1123_v54 = vrot.slane %v1122_v51, 4 }
 0x2ec   : > { %v1124_v55 = vadd.f32 %v1123_v54, %v1122_v51  ;;  %v1115_v56 = vadd.f32 %v1114_v52, %v1113_v16 }
 0x2ed   : > { %v1133_v58 = vpop.xlane.xlu0 %1132  ;;  %v1146_v33 = vpop.xlane.xlu1 %1145 }
 0x2ee   : > { %v1125_v4 = vrot.slane %v1124_v55, 2  ;;  %v1134_v62 = vrot.slane %v1133_v58, 4  ;;  %v1147_v13 = vrot.slane %v1146_v33, 4  ;;  %v1116_v3 = vrot.slane %v1115_v56, 1 }
 0x2f0   : > { %v1135_v6 = vadd.f32 %v1134_v62, %v1133_v58  ;;  %v1148_v8 = vadd.f32 %v1147_v13, %v1146_v33  ;;  %v1117_v9 = vadd.f32 %v1116_v3, %v1115_v56  ;;  %v1126_v41 = vadd.f32 %v1125_v4, %v1124_v55 }
 0x2f2   : > { %v1136_v14 = vrot.slane %v1135_v6, 2  ;;  %v1149_v59 = vrot.slane %v1148_v8, 2  ;;  %1440 = vpush %v1117_v9  ;;  %v1127_v60 = vrot.slane %v1126_v41, 1 }
 0x2f4   : > { %v1128_v20 = vadd.f32 %v1127_v60, %v1126_v41  ;;  %v1137_v0 = vadd.f32 %v1136_v14, %v1135_v6  ;;  %v1150_v30 = vadd.f32 %v1149_v59, %v1148_v8 }
 0x2f6   : > { %1442 = vpush %v1128_v20  ;;  %v1138_v32 = vrot.slane %v1137_v0, 1  ;;  %v1151_v27 = vrot.slane %v1150_v30, 1 }
 0x2f8   : > { %v1139_v7 = vadd.f32 %v1138_v32, %v1137_v0  ;;  %v1152_v22 = vadd.f32 %v1151_v27, %v1150_v30 }
 0x2fa   : > { %1444 = vpush %v1139_v7 }
 0x2fb   : > { %1446 = vpush %v1152_v22 }
 0x323   : > { %s1441_s15 = spop %1440 }
 0x324   : > { %s2195_s16 = smul.f32 0.00012207031, %s1441_s15 }
 0x326   : > { %s1142_s22 = smul.f32 %s2195_s16, %s2195_s16  ;;  %v1167_v39 = vstv %s2195_s16 }
 0x327   : > { %s1443_s17 = spop %1442 }
 0x328   : > { %s2197_s21 = smul.f32 0.00012207031, %s1443_s17 }
 0x32a   : > { %s1155_s23 = smul.f32 %s2197_s21, %s2197_s21  ;;  %v1168_v15 = vstv %s2197_s21 }
 0x32b   : > { %s1445_s24 = spop %1444 }
 0x32c   : > { %s1141_s25 = smul.f32 0.00012207031, %s1445_s24  ;;  %s1447_s26 = spop %1446 }
 0x32d   : > { %s1154_s27 = smul.f32 0.00012207031, %s1447_s26 }
 0x32e   : > { %s1143_s28 = ssub.f32 %s1141_s25, %s1142_s22  ;;  %s2238_s22 = scalar_lea.vmem %s2256_s5, %s1430_s20 }
 0x32f   : > { %s1156_s29 = ssub.f32 %s1154_s27, %s1155_s23 }
 0x330   : > { %s1157_s30 = sadd.f32 1e-05, %s1143_s28 }
 0x331   : > { %s1161_s6 = sadd.f32 1e-05, %s1156_s29 }
 0x332   : > { %v1158_v12 = vstv %s1157_s30 }
 0x333   : > { %1474 = vrsqrt.f32 %v1158_v12  ;;  %v1162_v35 = vstv %s1161_s6 }
 0x334   : > { %1476 = vrsqrt.f32 %v1162_v35 }
 0x340   : > { %v1475_v36 = vpop.eup %1474 }
 0x341   : > { %v1477_v29 = vpop.eup %1476  ;;  %1448 = vpush %v1475_v36 }
 0x342   : > { %1450 = vpush %v1477_v29 }
 0x372   : > { %s1449_s9 = spop %1448 }
 0x373   : > { %v1165_v40 = vstv %s1449_s9  ;;  %s1451_s12 = spop %1450 }
 0x374   : > { %v1169_v26 = vmul.f32 %v1165_v40, %v1053_v37  ;;  %v1166_v5 = vstv %s1451_s12 }
 0x375   : > { %v1170_v44 = vmul.f32 %v1166_v5, %v1054_v34 }
 0x376   : > { %v1171_v1 = vmul.f32 %v1169_v26, %v1167_v39  ;;  %1177 = vperm.xlu0 %1469, %v1169_v26  }
 0x377   : > { %v1172_v11 = vmul.f32 %v1170_v44, %v1168_v15  ;;  %1182 = vperm.xlu1 %1470, %v1170_v44  }
 0x378   : > { %v1173_v49 = vsub.f32 %v1055_v45, %v1171_v1 }
 0x379   : > { %v1174_v47 = vsub.f32 %v1056_v2, %v1172_v11 }
 0x37b   : > { %1203 = vperm.xlu1 %1470, %v1173_v49   ;;  %1208 = vperm.xlu0 %1469, %v1174_v47  }
 0x3f1   : > { %v1178_v17 = vpop.permute.xlu0 %1177 }
 0x3f2   : > { %v1183_v10 = vpop.permute.xlu1 %1182  ;;  %v1185_v50 = vmul.f32 %v1178_v17, %v2111_v38  ;;  %v1186_v57 = vmul.f32 %v1178_v17, %v2113_v19  ;;  %v1187_v16 = vmul.f32 %v1178_v17, %v2119_v23  ;;  %v1188_v51 = vmul.f32 %v1178_v17, %v2133_v46 }
 0x3f3   : > { %v1189_v52 = vmul.f32 %v1178_v17, %v2148_v53  ;;  %v1190_v54 = vmul.f32 %v1178_v17, %v2155_v61  ;;  %v1191_v55 = vmul.f32 %v1178_v17, %v2158_v63  ;;  %v1192_v56 = vmul.f32 %v1178_v17, %v2165_v18 }
 0x3f4   : > { %v1193_v58 = vmul.f32 %v1183_v10, %v2115_v24  ;;  %v1194_v33 = vmul.f32 %v1183_v10, %v2117_v25  ;;  %v1195_v38 = vmul.f32 %v1183_v10, %v2127_v43  ;;  %v1196_v19 = vmul.f32 %v1183_v10, %v2142_v48 }
 0x3f5   : > { %v1197_v23 = vmul.f32 %v1183_v10, %v2163_v28  ;;  %v1198_v46 = vmul.f32 %v1183_v10, %v2172_v21  ;;  %v1199_v53 = vmul.f32 %v1183_v10, %v2167_v42  ;;  %v1200_v61 = vmul.f32 %v1183_v10, %v2175_v31 }
 0x3f6   : > { %v1204_v4 = vpop.permute.xlu1 %1203  ;;  %v1209_v63 = vpop.permute.xlu0 %1208 }
 0x3f7   : > { %v1211_v62 = vadd.f32 %v1204_v4, %v1185_v50  ;;  %v1212_v18 = vadd.f32 %v1204_v4, %v1186_v57  ;;  %v1213_v13 = vadd.f32 %v1204_v4, %v1187_v16  ;;  %v1214_v24 = vadd.f32 %v1204_v4, %v1188_v51 }
 0x3f8   : > { %v1215_v3 = vadd.f32 %v1204_v4, %v1189_v52  ;;  %v1216_v25 = vadd.f32 %v1204_v4, %v1190_v54  ;;  %v1217_v43 = vadd.f32 %v1204_v4, %v1191_v55  ;;  %v1218_v6 = vadd.f32 %v1204_v4, %v1192_v56 }
 0x3f9   : > { %v1227_v48 = vmul.f32 0.2, %v1211_v62  ;;  %v1228_v8 = vmul.f32 0.2, %v1212_v18  ;;  %v1229_v9 = vmul.f32 0.2, %v1213_v13  ;;  %v1219_v28 = vadd.f32 %v1209_v63, %v1193_v58 }
 0x3fa   : > { %v1230_v41 = vmul.f32 0.2, %v1214_v24  ;;  %v1231_v21 = vmul.f32 0.2, %v1215_v3  ;;  %v1232_v14 = vmul.f32 0.2, %v1216_v25  ;;  %v1220_v42 = vadd.f32 %v1209_v63, %v1194_v33 }
 0x3fb   : > { %v1233_v59 = vmul.f32 0.2, %v1217_v43  ;;  %v1234_v31 = vmul.f32 0.2, %v1218_v6  ;;  %v1243_v60 = vmax.f32 %v1211_v62, %v1227_v48  ;;  %v1244_v20 = vmax.f32 %v1212_v18, %v1228_v8 }
 0x3fc   : > { %v1245_v0 = vmax.f32 %v1213_v13, %v1229_v9  ;;  %v1246_v30 = vmax.f32 %v1214_v24, %v1230_v41  ;;  %v1247_v32 = vmax.f32 %v1215_v3, %v1231_v21  ;;  %v1248_v27 = vmax.f32 %v1216_v25, %v1232_v14 }
 0x3fd   : > { %v1249_v7 = vmax.f32 %v1217_v43, %v1233_v59  ;;  %v1250_v22 = vmax.f32 %v1218_v6, %v1234_v31  ;;  %v1432_v12 = vpack.c.bf16 %v1244_v20, %v1243_v60  ;;  %v1221_v35 = vadd.f32 %v1209_v63, %v1195_v38 }
 0x3fe   : > { %v1433_v36 = vpack.c.bf16 %v1246_v30, %v1245_v0  ;;  %v1434_v29 = vpack.c.bf16 %v1248_v27, %v1247_v32  ;;  %v1222_v37 = vadd.f32 %v1209_v63, %v1196_v19  ;;  %v1223_v34 = vadd.f32 %v1209_v63, %v1197_v23 }
 0x3ff   : > { %v1435_v40 = vpack.c.bf16 %v1250_v22, %v1249_v7  ;;  %1307 = vst [vmem:[%s2238_s22] sm:$0xff] %v1432_v12  ;;  %v1224_v26 = vadd.f32 %v1209_v63, %v1198_v46  ;;  %v1225_v5 = vadd.f32 %v1209_v63, %v1199_v53  ;;  %v1226_v39 = vadd.f32 %v1209_v63, %v1200_v61 }
 0x400   : > { %1308 = vst [vmem:[%s2238_s22 + $0x8] sm:$0xff] %v1433_v36  ;;  %1309 = vst [vmem:[%s2238_s22 + $0x10] sm:$0xff] %v1434_v29  ;;  %v1235_v44 = vmul.f32 0.2, %v1219_v28  ;;  %v1236_v45 = vmul.f32 0.2, %v1220_v42 }
 0x401   : > { %v1237_v15 = vmul.f32 0.2, %v1221_v35  ;;  %1310 = vst [vmem:[%s2238_s22 + $0x18] sm:$0xff] %v1435_v40  ;;  %v1238_v1 = vmul.f32 0.2, %v1222_v37 }
 0x402   : > { %v1239_v2 = vmul.f32 0.2, %v1223_v34  ;;  %v1240_v11 = vmul.f32 0.2, %v1224_v26  ;;  %v1241_v49 = vmul.f32 0.2, %v1225_v5  ;;  %v1251_v17 = vmax.f32 %v1219_v28, %v1235_v44 }
 0x403   : > { %v1242_v47 = vmul.f32 0.2, %v1226_v39  ;;  %v1252_v10 = vmax.f32 %v1220_v42, %v1236_v45  ;;  %v1253_v50 = vmax.f32 %v1221_v35, %v1237_v15  ;;  %v1254_v57 = vmax.f32 %v1222_v37, %v1238_v1 }
 0x404   : > { %v1255_v16 = vmax.f32 %v1223_v34, %v1239_v2  ;;  %v1256_v51 = vmax.f32 %v1224_v26, %v1240_v11  ;;  %v1257_v52 = vmax.f32 %v1225_v5, %v1241_v49 }
 0x405   : > { %v1258_v54 = vmax.f32 %v1226_v39, %v1242_v47  ;;  %v1436_v55 = vpack.c.bf16 %v1252_v10, %v1251_v17  ;;  %v1437_v56 = vpack.c.bf16 %v1254_v57, %v1253_v50 }
 0x406   : > { %v1438_v58 = vpack.c.bf16 %v1256_v51, %v1255_v16 }
 0x407   : > { %v1439_v33 = vpack.c.bf16 %v1258_v54, %v1257_v52  ;;  %1311 = vst [vmem:[%s2238_s22 + $0x20] sm:$0xff] %v1436_v55  ;;  %1312 = vst [vmem:[%s2238_s22 + $0x28] sm:$0xff] %v1437_v56 }
 0x408   : > { %1313 = vst [vmem:[%s2238_s22 + $0x30] sm:$0xff] %v1438_v58 }
 0x409   : > { %1314 = vst [vmem:[%s2238_s22 + $0x38] sm:$0xff] %v1439_v33 }
 0x40a PF: > { %s15_s18 = sadd.s32 1, %s1484_s18  }
 0x40b   : > { %p12_p4 = scmp.ge.s32.totalorder %s15_s18, 4  }
 0x40d   :  { %14 = sbr.rel (!%p12_p4) target bundleno = 1 (0x1), region = 70 }

// kernel: multigrid_decoder_forward.7
= control target key start
LH: loop header
LB: loop body
LE: loop exit
PB: predicated region body
PF: predicated region fallthrough
CT: control target
= control target key end

     0   :  { %s6625_s27 = smov 0   ;;  %s11822_s0 = inlined_call_operand.vmem [shape: bf16[2,16,4096], index: 0, kind: input, shape index: {}]   ;;  %s11823_s1 = inlined_call_operand.vmem [shape: bf16[2,16,4096], index: 1, kind: input, shape index: {}]   ;;  %s11824_s2 = inlined_call_operand.vmem [shape: bf16[16,288], index: 2, kind: input, shape index: {}]   ;;  %s11825_s3 = inlined_call_operand.vmem [shape: f32[16,1], index: 3, kind: input, shape index: {}]   ;;  %s11826_s4 = inlined_call_operand.vmem [shape: f32[16,1], index: 4, kind: input, shape index: {}]   ;;  %s11827_s5 = inlined_call_operand.vmem [shape: f32[16,1], index: 5, kind: input, shape index: {}]   ;;  %s11828_s6 = inlined_call_operand.vmem [shape: bf16[4,16], index: 6, kind: input, shape index: {}]   ;;  %s11829_s7 = inlined_call_operand.vmem [shape: f32[4,1], index: 7, kind: input, shape index: {}]   ;;  %s11830_s8 = inlined_call_operand.vmem [shape: f32[2,4,4096], index: 8, kind: output, shape index: {}]  }
   0x1 LB: > { %s6208_s28 = sadd.s32 4294967295, %s6572_s27   ;;  %p6212_p0 = scmp.ge.s32.totalorder %s6572_s27, 1  ;;  %s6572_s27 = sphi %s6625_s27, %s18_s27  }
   0x2   : > { %p272_p1 = scmp.lt.s32.totalorder %s6572_s27, 3 }
   0x4   : > { %p273_p2 = pnand %p6212_p0, %p272_p1 }
   0x6   : > { %276 = sbr.rel (%p273_p2) target bundleno = 1821 (0x71d), region = 52 }
   0xb   : > { %p311_p3 = scmp.lt.s32.totalorder %s6208_s28, 1  ;;  %v11831_v0 = vmov 0   ;;  %s6575_s14 = smov 63   ;;  %v6778_v27 = vld [vmem:[%s11824_s2 + $0x4] ss:$12 sps:$4 sm:$0xff]   ;;  %v393_v30 = vlaneseq  ;;  %vm1617_vm4 = vcmask 515072  }
   0xc   : > { %3519 = vmatprep.mubr.bf16.mxu1 %v11831_v0  ;;  %6548 = vset.pattern.permute.xlu1 %v11831_v0  ;;  %s6576_s15 = smov 64   ;;  %s6577_s16 = smov 65   ;;  %vm1486_vm6 = vcmask 523264   ;;  %vm3440_vm10 = vcmask 261120   ;;  %vm1066_vm12 = vcmask 531456  }
   0xd   : > { %s12348_s28 = smov (!%p311_p3, %s6208_s28), 1  ;;  %6547 = vset.pattern.permute.xlu0 %v11831_v0  ;;  %s6578_s17 = smov 127   ;;  %3476 = vmatprep.mubr.bf16.mxu0 %v6778_v27  ;;  %v6803_v35 = vand.u32 127, %v393_v30  ;;  %v1231_v41 = vshrl.u32 %v393_v30, 7 }
   0xe   : > { %s6518_s29 = sshll.u32 %s12348_s28, 8  ;;  %s6579_s18 = smov 1  }
   0xf   : > { %s6642_s10 = scalar_lea.vmem %s11823_s1, %s6518_s29  ;;  %s6647_s13 = scalar_lea.vmem %s11822_s0, %s6518_s29  ;;  %v395_v37 = vadd.s32 128, %v6803_v35  ;;  %v430_v38 = vand.u32 63, %v6803_v35  ;;  %v6829_v43 = vsub.s32 4, %v1231_v41  ;;  %v6833_v44 = vsub.s32 0, %v1231_v41 }
  0x10   : > { %v362_v1 = vld [vmem:[%s6642_s10 + $0x8] sm:$0xff]  ;;  %v361_v3 = vld [vmem:[%s6642_s10] sm:$0xff]  ;;  %v331_v11 = vld [vmem:[%s6647_s13 + $0x10] sm:$0xff] }
  0x11   : > { %v378_v2 = vld [vmem:[%s6642_s10 + $0x88] sm:$0xff]  ;;  %v377_v5 = vld [vmem:[%s6642_s10 + $0x80] sm:$0xff]  ;;  %v347_v12 = vld [vmem:[%s6647_s13 + $0x90] sm:$0xff]  ;;  %v437_v39 = vand.u32 63, %v395_v37  ;;  %vm842_vm0 = vcmp.lt.s32.totalorder %v430_v38, 63  ;;  %vm810_vm7 = vcmp.gt.s32.totalorder %v430_v38, 0 }
  0x12   : > { %v6652_v4 = vcombine.low %v362_v1, %v378_v2  ;;  %v329_v6 = vld [vmem:[%s6647_s13] sm:$0xff]  ;;  %v6657_v8 = vcombine.high %v362_v1, %v378_v2  ;;  %v6659_v9 = vcombine.low %v361_v3, %v377_v5  ;;  %v6669_v13 = vcombine.high %v361_v3, %v377_v5  ;;  %v330_v15 = vld [vmem:[%s6647_s13 + $0x8] sm:$0xff]  ;;  %v363_v24 = vld [vmem:[%s6642_s10 + $0x10] sm:$0xff] }
  0x13   : > { %v345_v7 = vld [vmem:[%s6647_s13 + $0x80] sm:$0xff]  ;;  %v6671_v14 = vcombine.high %v331_v11, %v347_v12  ;;  %v346_v16 = vld [vmem:[%s6647_s13 + $0x88] sm:$0xff]  ;;  %v6697_v19 = vcombine.low %v331_v11, %v347_v12  ;;  %v379_v25 = vld [vmem:[%s6642_s10 + $0x90] sm:$0xff]  ;;  %vm843_vm1 = vcmp.lt.s32.totalorder %v437_v39, 63  ;;  %vm811_vm8 = vcmp.gt.s32.totalorder %v437_v39, 0 }
  0x14   : > { %2793 = vrot.lane.b32.xlu1 %v6652_v4, %s6575_s14  ;;  %v6663_v10 = vcombine.high %v329_v6, %v345_v7  ;;  %2789 = vrot.lane.b32.xlu0 %v6659_v9, %s6575_s14  ;;  %v6677_v17 = vcombine.low %v329_v6, %v345_v7  ;;  %v6681_v18 = vcombine.low %v330_v15, %v346_v16  ;;  %v333_v21 = vld [vmem:[%s6647_s13 + $0x20] sm:$0xff]  ;;  %v6785_v28 = vld [vmem:[%s6642_s10 + $0x18] sm:$0xff]  ;;  %vm1748_vm2 = vmpackc.low %vm843_vm1, %vm842_vm0  ;;  %v396_v12 = vadd.s32 256, %v6803_v35 }
  0x15   : > { %v6701_v20 = vcombine.high %v330_v15, %v346_v16  ;;  %v349_v22 = vld [vmem:[%s6647_s13 + $0xa0] sm:$0xff]  ;;  %v6757_v26 = vcombine.low %v363_v24, %v379_v25  ;;  %v6788_v29 = vld [vmem:[%s6642_s10 + $0x98] sm:$0xff]  ;;  %v6799_v32 = vcombine.high %v363_v24, %v379_v25  ;;  %v1764_v45 = vsel %vm1748_vm2, 65537, %v11831_v0  ;;  %vm1198_vm9 = vmpackc.low %vm811_vm8, %vm810_vm7 }
  0x16   : > { %v6733_v23 = vcombine.high %v333_v21, %v349_v22  ;;  %v6795_v31 = vcombine.low %v6785_v28, %v6788_v29  ;;  %v332_v33 = vld [vmem:[%s6647_s13 + $0x18] sm:$0xff]  ;;  %v6823_v40 = vcombine.low %v333_v21, %v349_v22  ;;  %v1787_v47 = vrot.slane %v1764_v45, %v6829_v43  ;;  %v6916_v11 = vld [vmem:[%s11824_s2 + $0x8] ss:$12 sps:$4 sm:$0xff]  }
  0x17   : > { %11897 = vst [vmem:[#allocation2_spill] sm:$0xff] %v6757_v26  ;;  %11899 = vst [vmem:[#allocation4_spill] sm:$0xff] %v6799_v32  ;;  %v348_v34 = vld [vmem:[%s6647_s13 + $0x98] sm:$0xff]  ;;  %v1783_v49 = vrot.slane %v1764_v45, %v6833_v44  ;;  %v1214_v1 = vsel %vm1198_vm9, 65537, %v11831_v0  ;;  %v397_v15 = vadd.s32 384, %v6803_v35  ;;  %vm2199_vm7 = vcmask 1039360  }
  0x18   : > { %1424 = vrot.lane.b32.xlu1 %v6663_v10, %s6576_s15  ;;  %2791 = vrot.lane.b32.xlu0 %v6669_v13, %s6575_s14  ;;  %11898 = vst [vmem:[#allocation3_spill] sm:$0xff] %v6795_v31  ;;  %v6807_v36 = vcombine.low %v332_v33, %v348_v34  ;;  %v6827_v42 = vcombine.high %v332_v33, %v348_v34  ;;  %vm6848_vm3 = vcmp.ne.s16.totalorder %v1787_v47, 0  ;;  %v444_v33 = vand.u32 63, %v396_v12  ;;  %v7001_v12 = vld [vmem:[%s6642_s10 + $0x20] sm:$0xff] }
  0x19   : > { %vm6858_vm5 = vcmp.ne.s16.totalorder %v1783_v49, 0  ;;  %v1237_v3 = vrot.slane %v1214_v1, %v6829_v43  ;;  %v1233_v7 = vrot.slane %v1214_v1, %v6833_v44  ;;  %v451_v34 = vand.u32 63, %v397_v15  ;;  %v7004_v15 = vld [vmem:[%s6642_s10 + $0xa0] sm:$0xff] }
  0x1a   : > { %vm6953_vm14 = vcmp.gt.s32.totalorder %v444_v33, 0  ;;  %vm6978_vm1 = vcmp.lt.s32.totalorder %v444_v33, 63 }
  0x1b   : > { %vm6923_vm11 = vcmp.ne.s16.totalorder %v1237_v3, 0  ;;  %vm6936_vm13 = vcmp.ne.s16.totalorder %v1233_v7, 0  ;;  %vm6957_vm15 = vcmp.gt.s32.totalorder %v451_v34, 0  ;;  %vm6982_vm2 = vcmp.lt.s32.totalorder %v451_v34, 63 }
  0x1c   : > { %1422 = vrot.lane.b32.xlu1 %v6677_v17, %s6576_s15  ;;  %1426 = vrot.lane.b32.xlu0 %v6681_v18, %s6576_s15  ;;  %vm1199_vm0 = vmpackc.low %vm6957_vm15, %vm6953_vm14 }
  0x1d   : > { %v1215_v1 = vsel %vm1199_vm0, 65537, %v11831_v0  ;;  %vm1749_vm8 = vmpackc.low %vm6982_vm2, %vm6978_vm1  ;;  %vm11839_vm0 = vcmask 7168  }
  0x1e   : > { %v1241_v33 = vrot.slane %v1215_v1, %v6833_v44  ;;  %v1765_v34 = vsel %vm1749_vm8, 65537, %v11831_v0  ;;  %vm7104_vm2 = vmneg %vm1486_vm6 }
  0x20   : > { %2664 = vrot.lane.b32.xlu1 %v6652_v4, %s6576_s15  ;;  %2662 = vrot.lane.b32.xlu0 %v6669_v13, %s6576_s15  ;;  %vm7040_vm14 = vcmp.ne.s16.totalorder %v1241_v33, 0 }
  0x24   : > { %1002 = vrot.lane.b32.xlu1 %v6677_v17, %s6577_s16  ;;  %2660 = vrot.lane.b32.xlu0 %v6659_v9, %s6576_s15 }
  0x28   : > { %1006 = vrot.lane.b32.xlu1 %v6681_v18, %s6577_s16  ;;  %1004 = vrot.lane.b32.xlu0 %v6663_v10, %s6577_s16 }
  0x2c   : > { %1430 = vrot.lane.b32.xlu1 %v6697_v19, %s6576_s15  ;;  %1428 = vrot.lane.b32.xlu0 %v6701_v20, %s6576_s15 }
  0x30   : > { %2137 = vrot.lane.b32.xlu1 %v6663_v10, %s6578_s17  ;;  %2135 = vrot.lane.b32.xlu0 %v6677_v17, %s6578_s17 }
  0x34   : > { %1008 = vrot.lane.b32.xlu1 %v6701_v20, %s6577_s16  ;;  %2139 = vrot.lane.b32.xlu0 %v6681_v18, %s6578_s17 }
  0x38   : > { %2141 = vrot.lane.b32.xlu1 %v6701_v20, %s6578_s17  ;;  %1010 = vrot.lane.b32.xlu0 %v6697_v19, %s6577_s16 }
  0x3c   : > { %1972 = vrot.lane.b32.xlu1 %v6677_v17, %s6579_s18  ;;  %2143 = vrot.lane.b32.xlu0 %v6697_v19, %s6578_s17 }
  0x40   : > { %1553 = vrot.lane.b32.xlu1 %v6677_v17, %s6575_s14  ;;  %1974 = vrot.lane.b32.xlu0 %v6663_v10, %s6579_s18 }
  0x44   : > { %1976 = vrot.lane.b32.xlu1 %v6681_v18, %s6579_s18  ;;  %1555 = vrot.lane.b32.xlu0 %v6663_v10, %s6575_s14 }
  0x48   : > { %1557 = vrot.lane.b32.xlu1 %v6681_v18, %s6575_s14  ;;  %1978 = vrot.lane.b32.xlu0 %v6701_v20, %s6579_s18 }
  0x4c   : > { %2499 = vrot.lane.b32.xlu1 %v6659_v9, %s6577_s16  ;;  %1559 = vrot.lane.b32.xlu0 %v6701_v20, %s6575_s14 }
  0x50   : > { %2503 = vrot.lane.b32.xlu1 %v6652_v4, %s6577_s16  ;;  %2501 = vrot.lane.b32.xlu0 %v6669_v13, %s6577_s16 }
  0x54   : > { %3113 = vrot.lane.b32.xlu1 %v6669_v13, %s6578_s17  ;;  %3111 = vrot.lane.b32.xlu0 %v6659_v9, %s6578_s17 }
  0x58   : > { %2505 = vrot.lane.b32.xlu1 %v6657_v8, %s6577_s16  ;;  %3115 = vrot.lane.b32.xlu0 %v6652_v4, %s6578_s17 }
  0x5c   : > { %3117 = vrot.lane.b32.xlu1 %v6657_v8, %s6578_s17  ;;  %2507 = vrot.lane.b32.xlu0 %v6757_v26, %s6577_s16 }
  0x60   : > { %2950 = vrot.lane.b32.xlu1 %v6659_v9, %s6579_s18  ;;  %3119 = vrot.lane.b32.xlu0 %v6757_v26, %s6578_s17 }
  0x64   : > { %2954 = vrot.lane.b32.xlu1 %v6652_v4, %s6579_s18  ;;  %2952 = vrot.lane.b32.xlu0 %v6669_v13, %s6579_s18 }
  0x68   : > { %2795 = vrot.lane.b32.xlu1 %v6657_v8, %s6575_s14  ;;  %2956 = vrot.lane.b32.xlu0 %v6657_v8, %s6579_s18 }
  0x6c   : > { %2797 = vrot.lane.b32.xlu1 %v6757_v26, %s6575_s14  ;;  %2666 = vrot.lane.b32.xlu0 %v6657_v8, %s6576_s15 }
  0x70   : > { %2668 = vrot.lane.b32.xlu1 %v6757_v26, %s6576_s15  ;;  %1561 = vrot.lane.b32.xlu0 %v6697_v19, %s6575_s14 }
  0x74   : > { %2801 = vrot.lane.b32.xlu1 %v6795_v31, %s6575_s14  ;;  %2799 = vrot.lane.b32.xlu0 %v6799_v32, %s6575_s14 }
  0x78   : > { %1434 = vrot.lane.b32.xlu1 %v6807_v36, %s6576_s15  ;;  %1432 = vrot.lane.b32.xlu0 %v6671_v14, %s6576_s15 }
  0x7c   : > { %2672 = vrot.lane.b32.xlu1 %v6795_v31, %s6576_s15  ;;  %2670 = vrot.lane.b32.xlu0 %v6799_v32, %s6576_s15 }
  0x80   : > { %1014 = vrot.lane.b32.xlu1 %v6807_v36, %s6577_s16  ;;  %1012 = vrot.lane.b32.xlu0 %v6671_v14, %s6577_s16 }
  0x84   : > { %1438 = vrot.lane.b32.xlu1 %v6823_v40, %s6576_s15  ;;  %1436 = vrot.lane.b32.xlu0 %v6827_v42, %s6576_s15 }
  0x86   : > { %v6838_v46 = vpop.permute.xlu1 %2793  ;;  %v6841_v48 = vpop.permute.xlu0 %2789 }
  0x88   : > { %2147 = vrot.lane.b32.xlu1 %v6807_v36, %s6578_s17  ;;  %2145 = vrot.lane.b32.xlu0 %v6671_v14, %s6578_s17 }
  0x8a   : > { %v1425_v50 = vpop.permute.xlu1 %1424  ;;  %v2792_v52 = vpop.permute.xlu0 %2791 }
  0x8b   : > { %v6854_v53 = vsel %vm1617_vm4, %v2792_v52, %v6838_v46  ;;  %v6864_v55 = vsel %vm1617_vm4, %v6841_v48, %v2792_v52  ;;  %v1795_v52 = vrot.slane %v1765_v34, %v6829_v43 }
  0x8c   : > { %1018 = vrot.lane.b32.xlu1 %v6823_v40, %s6577_s16  ;;  %6301 = vmatprep.subr.msk.bf16.mxu1 %vm6848_vm3, %v6854_v53  ;;  %v3313_v56 = vsel %vm6858_vm5, %v6864_v55, 0 }
  0x8d   : > { %1016 = vrot.lane.b32.xlu0 %v6827_v42, %s6577_s16  ;;  %3500 = vmatpush1.bf16.msra.mxu1 %v3313_v56  ;;  %vm7053_vm15 = vcmp.ne.s16.totalorder %v1795_v52, 0 }
  0x8e   : > { %v6874_v57 = vpop.permute.xlu1 %1422  ;;  %v1427_v58 = vpop.permute.xlu0 %1426 }
  0x8f   : > { %v6878_v59 = vsel %vm1486_vm6, %v6874_v57, %v1425_v50  ;;  %v6881_v60 = vsel %vm1486_vm6, %v1425_v50, %v1427_v58 }
  0x90   : > { %2151 = vrot.lane.b32.xlu1 %v6823_v40, %s6578_s17  ;;  %3444 = vmatprep.subr.bf16.mxu0 %v6881_v60 }
  0x91   : > { %2149 = vrot.lane.b32.xlu0 %v6827_v42, %s6578_s17  ;;  %3445 = vmatpush1.bf16.msra.mxu0 %v6878_v59 }
  0x92   : > { %v6889_v61 = vpop.permute.xlu1 %2664  ;;  %v2663_v62 = vpop.permute.xlu0 %2662 }
  0x93   : > { %v6895_v63 = vsel %vm1486_vm6, %v2663_v62, %v6889_v61 }
  0x94   : > { %1982 = vrot.lane.b32.xlu1 %v6671_v14, %s6579_s18  ;;  %3501 = vmatprep.subr.bf16.mxu1 %v6895_v63 }
  0x95   : > { %1980 = vrot.lane.b32.xlu0 %v6697_v19, %s6579_s18 }
  0x96   : > { %v6901_v2 = vpop.permute.xlu1 %1002  ;;  %v6904_v5 = vpop.permute.xlu0 %2660 }
  0x97   : > { %v6910_v6 = vsel %vm1486_vm6, %v6904_v5, %v2663_v62  ;;  %v6990_v62 = vcombine.high %v6785_v28, %v6788_v29  ;;  %v1245_v28 = vrot.slane %v1215_v1, %v6829_v43 }
  0x98   : > { %1984 = vrot.lane.b32.xlu1 %v6807_v36, %s6579_s18  ;;  %3502 = vmatpush1.bf16.msra.mxu1 %v6910_v6 }
  0x99   : > { %1563 = vrot.lane.b32.xlu0 %v6671_v14, %s6575_s14  ;;  %11916 = vst [vmem:[#allocation5_spill] sm:$0xff] %v6990_v62  ;;  %vm7025_vm9 = vcmp.ne.s16.totalorder %v1245_v28, 0 }
  0x9a   : > { %v1007_v16 = vpop.permute.xlu1 %1006  ;;  %v1005_v22 = vpop.permute.xlu0 %1004 }
  0x9b   : > { %v6930_v24 = vsel %vm1066_vm12, %v1005_v22, %v1007_v16  ;;  %v6934_v25 = vsel %vm1066_vm12, %v6901_v2, %v1005_v22  ;;  %6302 = vmatmul.mubr.msk.bf16.vlgmr.msra.gmra.mxu1 %vm3440_vm10, %v6916_v11 }
  0x9c   : > { %1565 = vrot.lane.b32.xlu1 %v6807_v36, %s6575_s14  ;;  %6286 = vmatprep.subr.msk.bf16.mxu0 %vm6923_vm11, %v6930_v24  ;;  %v2301_v37 = vsel %vm6936_vm13, %v6934_v25, 0 }
  0x9d   : > { %1986 = vrot.lane.b32.xlu0 %v6827_v42, %s6579_s18  ;;  %3447 = vmatpush1.bf16.msra.mxu0 %v2301_v37 }
  0x9e   : > { %v6950_v38 = vpop.permute.xlu1 %1430  ;;  %3562 = vmatprep.mubr.bf16.mxu1 %v6778_v27  ;;  %v1429_v39 = vpop.permute.xlu0 %1428 }
  0x9f   : > { %v6965_v47 = vsel %vm1486_vm6, %v1429_v39, %v6950_v38  ;;  %v6968_v49 = vsel %vm1486_vm6, %v1427_v58, %v1429_v39  ;;  %v7020_v39 = vcombine.low %v7001_v12, %v7004_v15 }
  0xa0   : > { %2509 = vrot.lane.b32.xlu1 %v6799_v32, %s6577_s16  ;;  %3530 = vmatprep.subr.bf16.mxu1 %v6965_v47 }
  0xa1   : > { %1567 = vrot.lane.b32.xlu0 %v6827_v42, %s6575_s14  ;;  %3531 = vmatpush1.bf16.msra.mxu1 %v6968_v49  ;;  %11917 = vst [vmem:[#allocation6_spill] sm:$0xff] %v7020_v39 }
  0xa2   : > { %v2138_v50 = vpop.permute.xlu1 %2137  ;;  %v2136_v58 = vpop.permute.xlu0 %2135 }
  0xa3   : > { %v2200_v7 = vsel %vm2199_vm7, %v2136_v58, %v2138_v50  ;;  %v1791_v58 = vrot.slane %v1765_v34, %v6833_v44 }
  0xa4   : > { %3121 = vrot.lane.b32.xlu1 %v6799_v32, %s6578_s17  ;;  %v2266_v37 = vsel %vm6858_vm5, %v2200_v7, 0 }
  0xa5   : > { %2511 = vrot.lane.b32.xlu0 %v6795_v31, %s6577_s16  ;;  %vm7060_vm1 = vcmp.ne.s16.totalorder %v1791_v58, 0 }
  0xa6   : > { %v1009_v3 = vpop.permute.xlu1 %1008  ;;  %v2140_v29 = vpop.permute.xlu0 %2139 }
  0xa7   : > { %v2201_v22 = vsel %vm2199_vm7, %v2138_v50, %v2140_v29  ;;  %v7023_v41 = vsel %vm1066_vm12, %v1007_v16, %v1009_v3  ;;  %v7354_v50 = vld [vmem:[%s11824_s2] ss:$12 sps:$4 sm:$0xff]  }
  0xa8   : > { %2513 = vrot.lane.b32.xlu1 %v6990_v62, %s6577_s16  ;;  %6287 = vmatprep.subr.msk.bf16.mxu0 %vm6848_vm3, %v2201_v22 }
  0xa9   : > { %3123 = vrot.lane.b32.xlu0 %v6795_v31, %s6578_s17  ;;  %3449 = vmatpush1.bf16.msra.mxu0 %v2266_v37 }
  0xaa   : > { %v2142_v45 = vpop.permute.xlu1 %2141  ;;  %v7030_v56 = vpop.permute.xlu0 %1010  ;;  %3450 = vmatprep.subr.bf16.mxu0 %v6663_v10  ;;  %v2303_v10 = vsel %vm7040_vm14, %v7023_v41, 0 }
  0xab   : > { %v7038_v16 = vsel %vm1066_vm12, %v1009_v3, %v7030_v56  ;;  %v2202_v7 = vsel %vm2199_vm7, %v2140_v29, %v2142_v45 }
  0xac   : > { %3125 = vrot.lane.b32.xlu1 %v6990_v62, %s6578_s17  ;;  %11920 = vst [vmem:[#allocation7_spill] sm:$0xff] %v7038_v16  ;;  %6303 = vmatprep.subr.msk.bf16.mxu1 %vm7025_vm9, %v7038_v16 }
  0xad   : > { %2515 = vrot.lane.b32.xlu0 %v7020_v39, %s6577_s16  ;;  %3533 = vmatpush1.bf16.msra.mxu1 %v2303_v10 }
  0xae   : > { %v1973_v3 = vpop.permute.xlu1 %1972  ;;  %3451 = vmatpush1.bf16.msra.mxu0 %v6677_v17  ;;  %v7058_v22 = vpop.permute.xlu0 %2143  ;;  %v2268_v17 = vsel %vm7060_vm1, %v2202_v7, 0 }
  0xaf   : > { %v2203_v29 = vsel %vm2199_vm7, %v2142_v45, %v7058_v22  ;;  %v2101_v37 = vsel %vm11839_vm0, 0, %v1973_v3 }
  0xb0   : > { %2958 = vrot.lane.b32.xlu1 %v6757_v26, %s6579_s18  ;;  %6304 = vmatprep.subr.msk.bf16.mxu1 %vm7053_vm15, %v2203_v29  ;;  %v2103_v58 = vsel %vm6936_vm13, %v2101_v37, 0 }
  0xb1   : > { %3127 = vrot.lane.b32.xlu0 %v7020_v39, %s6578_s17  ;;  %3535 = vmatpush1.bf16.msra.mxu1 %v2268_v17 }
  0xb2   : > { %v1554_v34 = vpop.permute.xlu1 %1553  ;;  %v1975_v52 = vpop.permute.xlu0 %1974  ;;  %3536 = vmatprep.subr.bf16.mxu1 %v6701_v20 }
  0xb3   : > { %v2037_v45 = vsel %vm11839_vm0, %v1973_v3, %v1975_v52  ;;  %v1682_v7 = vsel %vm1617_vm4, 0, %v1554_v34 }
  0xb4   : > { %2962 = vrot.lane.b32.xlu1 %v6795_v31, %s6579_s18  ;;  %6288 = vmatprep.subr.msk.bf16.mxu0 %vm6923_vm11, %v2037_v45  ;;  %v1940_v29 = vsel %vm6858_vm5, %v1682_v7, 0 }
  0xb5   : > { %2960 = vrot.lane.b32.xlu0 %v6799_v32, %s6579_s18  ;;  %3453 = vmatpush1.bf16.msra.mxu0 %v2103_v58  ;;  %v7122_v58 = vld [vmem:[%s6642_s10 + $0xa8] sm:$0xff] }
  0xb6   : > { %v1977_v10 = vpop.permute.xlu1 %1976  ;;  %3537 = vmatpush1.bf16.msra.mxu1 %v6681_v18  ;;  %v1556_v20 = vpop.permute.xlu0 %1555 }
  0xb7   : > { %v7090_v3 = vsel %vm1617_vm4, %v1554_v34, %v1556_v20  ;;  %v2038_v18 = vsel %vm11839_vm0, %v1975_v52, %v1977_v10  ;;  %v7119_v52 = vld [vmem:[%s6642_s10 + $0x28] sm:$0xff] }
  0xb8   : > { %2803 = vrot.lane.b32.xlu1 %v6990_v62, %s6575_s14  ;;  %6289 = vmatprep.subr.msk.bf16.mxu0 %vm6848_vm3, %v7090_v3 }
  0xb9   : > { %2964 = vrot.lane.b32.xlu0 %v6990_v62, %s6579_s18  ;;  %3455 = vmatpush1.bf16.msra.mxu0 %v1940_v29  ;;  %v1132_v29 = vsel %vm1066_vm12, 0, %v6901_v2 }
  0xba   : > { %v1558_v17 = vpop.permute.xlu1 %1557  ;;  %v7100_v37 = vpop.permute.xlu0 %1978  ;;  %3456 = vmatprep.subr.bf16.mxu0 %v6878_v59  ;;  %v2105_v59 = vsel %vm7040_vm14, %v2038_v18, 0  ;;  %v1390_v2 = vsel %vm6936_vm13, %v1132_v29, 0 }
  0xbb   : > { %v2039_v45 = vsel %vm11839_vm0, %v1977_v10, %v7100_v37  ;;  %v7125_v7 = vsel %vm1617_vm4, %v1556_v20, %v1558_v17 }
  0xbc   : > { %2805 = vrot.lane.b32.xlu1 %v7020_v39, %s6575_s14  ;;  %6305 = vmatprep.subr.msk.bf16.mxu1 %vm7025_vm9, %v2039_v45  ;;  %v334_v45 = vld [vmem:[%s6647_s13 + $0x28] sm:$0xff] }
  0xbd   : > { %2674 = vrot.lane.b32.xlu0 %v6990_v62, %s6576_s15  ;;  %6291 = vmatpush1.bf16.msk.msra.mxu0 %vm7104_vm2, %v6874_v57  ;;  %v7147_v57 = vcombine.low %v7119_v52, %v7122_v58 }
  0xbe   : > { %3539 = vmatpush1.bf16.msra.mxu1 %v2105_v59  ;;  %v7130_v10 = vpop.permute.xlu1 %2499  ;;  %v7134_v18 = vpop.permute.xlu0 %1559  ;;  %6292 = vmatprep.subr.msk.bf16.mxu0 %vm6923_vm11, %v6934_v25  ;;  %v1942_v25 = vsel %vm7060_vm1, %v7125_v7, 0  ;;  %v350_v59 = vld [vmem:[%s6647_s13 + $0xa8] sm:$0xff] }
  0xbf   : > { %v7143_v20 = vsel %vm1617_vm4, %v1558_v17, %v7134_v18  ;;  %11929 = vst [vmem:[#allocation8_spill] sm:$0xff] %v7147_v57  ;;  %v7161_v17 = vcombine.high %v7001_v12, %v7004_v15  ;;  %v7175_v12 = vcombine.low %v334_v45, %v350_v59 }
  0xc0   : > { %2676 = vrot.lane.b32.xlu1 %v7020_v39, %s6576_s15  ;;  %6306 = vmatprep.subr.msk.bf16.mxu1 %vm7053_vm15, %v7143_v20  ;;  %v2341_v28 = vsel %vm7060_vm1, %v7143_v20, 0 }
  0xc1   : > { %1569 = vrot.lane.b32.xlu0 %v6823_v40, %s6575_s14  ;;  %3459 = vmatpush1.bf16.msra.mxu0 %v1390_v2  ;;  %v1392_v2 = vsel %vm7040_vm14, %v6930_v24, 0  ;;  %v7207_v24 = vld [vmem:[%s6647_s13 + $0x30] sm:$0xff] }
  0xc2   : > { %3541 = vmatpush1.bf16.msra.mxu1 %v1942_v25  ;;  %v2504_v0 = vpop.permute.xlu1 %2503  ;;  %v2502_v31 = vpop.permute.xlu0 %2501 }
  0xc3   : > { %3542 = vmatprep.subr.bf16.mxu1 %v6968_v49  ;;  %v7169_v29 = vsel %vm1066_vm12, %v2502_v31, %v2504_v0  ;;  %v7173_v62 = vsel %vm1066_vm12, %v7130_v10, %v2502_v31 }
  0xc4   : > { %2809 = vrot.lane.b32.xlu1 %v7147_v57, %s6575_s14  ;;  %6293 = vmatprep.subr.msk.bf16.mxu0 %vm6923_vm11, %v7169_v29  ;;  %v3275_v49 = vsel %vm6936_vm13, %v7173_v62, 0  ;;  %v2630_v51 = vsel %vm7040_vm14, %v7169_v29, 0 }
  0xc5   : > { %2807 = vrot.lane.b32.xlu0 %v7161_v17, %s6575_s14  ;;  %3461 = vmatpush2.bf16.msra.mxu0 %v3275_v49 }
  0xc6   : > { %3543 = vmatpush1.bf16.msra.mxu1 %v6881_v60  ;;  %v3114_v15 = vpop.permute.xlu1 %3113  ;;  %v3112_v31 = vpop.permute.xlu0 %3111 }
  0xc7   : > { %6307 = vmatprep.subr.msk.bf16.mxu1 %vm7025_vm9, %v7023_v41  ;;  %v3175_v25 = vsel %vm2199_vm7, %v3112_v31, %v3114_v15 }
  0xc8   : > { %1442 = vrot.lane.b32.xlu1 %v7175_v12, %s6576_s15  ;;  %v3240_v26 = vsel %vm6858_vm5, %v3175_v25, 0 }
  0xc9   : > { %1440 = vrot.lane.b32.xlu0 %v6733_v23, %s6576_s15 }
  0xca   : > { %3545 = vmatpush1.bf16.msra.mxu1 %v1392_v2  ;;  %v2506_v60 = vpop.permute.xlu1 %2505  ;;  %v3116_v49 = vpop.permute.xlu0 %3115  ;;  %v7210_v2 = vld [vmem:[%s6647_s13 + $0xb0] sm:$0xff] }
  0xcb   : > { %v3176_v41 = vsel %vm2199_vm7, %v3114_v15, %v3116_v49  ;;  %v7213_v31 = vsel %vm1066_vm12, %v2504_v0, %v2506_v60  ;;  %v7226_v25 = vcombine.low %v7207_v24, %v7210_v2 }
  0xcc   : > { %2680 = vrot.lane.b32.xlu1 %v7147_v57, %s6576_s15  ;;  %6294 = vmatprep.subr.msk.bf16.mxu0 %vm6848_vm3, %v3176_v41  ;;  %v3277_v0 = vsel %vm7040_vm14, %v7213_v31, 0 }
  0xcd   : > { %2678 = vrot.lane.b32.xlu0 %v7161_v17, %s6576_s15  ;;  %3463 = vmatpush2.bf16.msra.mxu0 %v3240_v26 }
  0xce   : > { %v3118_v32 = vpop.permute.xlu1 %3117  ;;  %v7215_v16 = vpop.permute.xlu0 %2507  ;;  %3464 = vmatprep.subr.bf16.mxu0 %v6669_v13  ;;  %v7236_v13 = vcombine.high %v334_v45, %v350_v59 }
  0xcf   : > { %v7222_v15 = vsel %vm1066_vm12, %v2506_v60, %v7215_v16  ;;  %v3177_v26 = vsel %vm2199_vm7, %v3116_v49, %v3118_v32 }
  0xd0   : > { %1022 = vrot.lane.b32.xlu1 %v7175_v12, %s6577_s16  ;;  %11930 = vst [vmem:[#allocation9_spill] sm:$0xff] %v7222_v15  ;;  %6308 = vmatprep.subr.msk.bf16.mxu1 %vm7025_vm9, %v7222_v15  ;;  %v3242_v45 = vsel %vm7060_vm1, %v3177_v26, 0  ;;  %v2916_v26 = vsel %vm1617_vm4, 0, %v6841_v48 }
  0xd1   : > { %1020 = vrot.lane.b32.xlu0 %v6733_v23, %s6577_s16  ;;  %3547 = vmatpush2.bf16.msra.mxu1 %v3277_v0  ;;  %v2918_v48 = vsel %vm6858_vm5, %v2916_v26, 0 }
  0xd2   : > { %v2951_v60 = vpop.permute.xlu1 %2950  ;;  %3465 = vmatpush2.bf16.msra.mxu0 %v6659_v9  ;;  %v7240_v41 = vpop.permute.xlu0 %3119 }
  0xd3   : > { %v3178_v15 = vsel %vm2199_vm7, %v3118_v32, %v7240_v41  ;;  %v3077_v9 = vsel %vm11839_vm0, 0, %v2951_v60 }
  0xd4   : > { %1446 = vrot.lane.b32.xlu1 %v7226_v25, %s6576_s15  ;;  %6309 = vmatprep.subr.msk.bf16.mxu1 %vm7053_vm15, %v3178_v15  ;;  %v3079_v15 = vsel %vm6936_vm13, %v3077_v9, 0 }
  0xd5   : > { %1444 = vrot.lane.b32.xlu0 %v7236_v13, %s6576_s15  ;;  %3549 = vmatpush2.bf16.msra.mxu1 %v3242_v45 }
  0xd6   : > { %v2955_v59 = vpop.permute.xlu1 %2954  ;;  %v2953_v49 = vpop.permute.xlu0 %2952  ;;  %3550 = vmatprep.subr.bf16.mxu1 %v6657_v8 }
  0xd7   : > { %v3014_v32 = vsel %vm11839_vm0, %v2951_v60, %v2953_v49  ;;  %v3015_v0 = vsel %vm11839_vm0, %v2953_v49, %v2955_v59  ;;  %v398_v60 = vadd.s32 512, %v6803_v35 }
  0xd8   : > { %2155 = vrot.lane.b32.xlu1 %v7175_v12, %s6578_s17  ;;  %6295 = vmatprep.subr.msk.bf16.mxu0 %vm6923_vm11, %v3014_v32  ;;  %v399_v32 = vadd.s32 640, %v6803_v35 }
  0xd9   : > { %2153 = vrot.lane.b32.xlu0 %v6733_v23, %s6578_s17  ;;  %3467 = vmatpush2.bf16.msra.mxu0 %v3079_v15 }
  0xda   : > { %3551 = vmatpush2.bf16.msra.mxu1 %v6652_v4  ;;  %v2796_v8 = vpop.permute.xlu1 %2795  ;;  %v7267_v45 = vpop.permute.xlu0 %2956  ;;  %6296 = vmatprep.subr.msk.bf16.mxu0 %vm6848_vm3, %v6864_v55  ;;  %v3081_v55 = vsel %vm7040_vm14, %v3015_v0, 0  ;;  %v2920_v0 = vsel %vm7060_vm1, %v6854_v53, 0 }
  0xdb   : > { %v3016_v4 = vsel %vm11839_vm0, %v2955_v59, %v7267_v45  ;;  %v2855_v9 = vsel %vm1617_vm4, %v6838_v46, %v2796_v8  ;;  %v458_v59 = vand.u32 63, %v398_v60  ;;  %v2626_v60 = vsel %vm1066_vm12, 0, %v7130_v10 }
  0xdc   : > { %1026 = vrot.lane.b32.xlu1 %v7226_v25, %s6577_s16  ;;  %6310 = vmatprep.subr.msk.bf16.mxu1 %vm7025_vm9, %v3016_v4  ;;  %v465_v4 = vand.u32 63, %v399_v32  ;;  %v7465_v10 = vcombine.high %v7119_v52, %v7122_v58 }
  0xdd   : > { %1024 = vrot.lane.b32.xlu0 %v7236_v13, %s6577_s16  ;;  %3469 = vmatpush2.bf16.msra.mxu0 %v2918_v48  ;;  %vm7298_vm8 = vcmp.lt.s32.totalorder %v458_v59, 63  ;;  %v400_v48 = vadd.s32 768, %v6803_v35 }
  0xde   : > { %3553 = vmatpush2.bf16.msra.mxu1 %v3081_v55  ;;  %v2798_v49 = vpop.permute.xlu1 %2797  ;;  %v2667_v15 = vpop.permute.xlu0 %2666  ;;  %3470 = vmatprep.subr.bf16.mxu0 %v6910_v6  ;;  %vm7302_vm0 = vcmp.lt.s32.totalorder %v465_v4, 63  ;;  %v401_v55 = vadd.s32 896, %v6803_v35  ;;  %11950 = vst [vmem:[#allocation10_spill] sm:$0xff] %v7465_v10 }
  0xdf   : > { %6311 = vmatprep.subr.msk.bf16.mxu1 %vm7053_vm15, %v2855_v9  ;;  %v2726_v26 = vsel %vm1486_vm6, %v6889_v61, %v2667_v15  ;;  %v2628_v61 = vsel %vm6936_vm13, %v2626_v60, 0  ;;  %v7370_v1 = vsel %vm1617_vm4, %v2796_v8, %v2798_v49  ;;  %v3315_v8 = vsel %vm7060_vm1, %v2855_v9, 0 }
  0xe0   : > { %2159 = vrot.lane.b32.xlu1 %v7226_v25, %s6578_s17  ;;  %v472_v6 = vand.u32 63, %v400_v48  ;;  %v479_v60 = vand.u32 63, %v401_v55  ;;  %v7492_v48 = vld [vmem:[%s6642_s10 + $0x30] sm:$0xff] }
  0xe1   : > { %2157 = vrot.lane.b32.xlu0 %v7236_v13, %s6578_s17  ;;  %6298 = vmatpush2.bf16.msk.msra.mxu0 %vm7104_vm2, %v6904_v5  ;;  %vm1750_vm2 = vmpackc.low %vm7302_vm0, %vm7298_vm8 }
  0xe2   : > { %3555 = vmatpush2.bf16.msra.mxu1 %v2920_v0  ;;  %v7311_v53 = vpop.permute.xlu1 %2668  ;;  %v7315_v32 = vpop.permute.xlu0 %1561  ;;  %6299 = vmatprep.subr.msk.bf16.mxu0 %vm6923_vm11, %v7173_v62  ;;  %v11935_v62 = vmov 0   ;;  %vm7360_vm11 = vcmp.gt.s32.totalorder %v465_v4, 0  ;;  %vm7448_vm14 = vcmp.gt.s32.totalorder %v472_v6, 0  ;;  %vm7504_vm8 = vcmp.lt.s32.totalorder %v472_v6, 63 }
  0xe3   : > { %3556 = vmatprep.subr.bf16.mxu1 %v2726_v26  ;;  %v1766_v34 = vsel %vm1750_vm2, 65537, %v11935_v62  ;;  %v7367_v54 = vsel %vm1617_vm4, %v7134_v18, %v7315_v32  ;;  %v7406_v4 = vsel %vm1486_vm6, %v2667_v15, %v7311_v53  ;;  %vm7508_vm2 = vcmp.lt.s32.totalorder %v479_v60, 63 }
  0xe4   : > { %1990 = vrot.lane.b32.xlu1 %v6733_v23, %s6579_s18  ;;  %v1803_v30 = vrot.slane %v1766_v34, %v6829_v43  ;;  %v1799_v18 = vrot.slane %v1766_v34, %v6833_v44 }
  0xe5   : > { %1988 = vrot.lane.b32.xlu0 %v6823_v40, %s6579_s18  ;;  %3473 = vmatpush2.bf16.msra.mxu0 %v2628_v61 }
  0xe6   : > { %3557 = vmatpush2.bf16.msra.mxu1 %v6895_v63  ;;  %v7331_v5 = vpop.permute.xlu1 %2801  ;;  %v2800_v21 = vpop.permute.xlu0 %2799  ;;  %6300 = vmatprep.subr.msk.bf16.mxu0 %vm6848_vm3, %v7125_v7  ;;  %v2339_v63 = vsel %vm6858_vm5, %v7090_v3, 0  ;;  %vm7356_vm3 = vcmp.gt.s32.totalorder %v458_v59, 0  ;;  %vm7383_vm5 = vcmp.ne.s16.totalorder %v1803_v30, 0 }
  0xe7   : > { %6312 = vmatprep.subr.msk.bf16.mxu1 %vm7025_vm9, %v7213_v31  ;;  %vm1200_vm13 = vmpackc.low %vm7360_vm11, %vm7356_vm3  ;;  %v7402_v59 = vsel %vm1617_vm4, %v2798_v49, %v2800_v21  ;;  %v7410_v0 = vsel %vm1617_vm4, %v2800_v21, %v7331_v5  ;;  %vm7424_vm9 = vcmp.ne.s16.totalorder %v1799_v18, 0 }
  0xe8   : > { %1992 = vrot.lane.b32.xlu1 %v7175_v12, %s6579_s18  ;;  %v1216_v9 = vsel %vm1200_vm13, 65537, %v11935_v62  ;;  %v3317_v46 = vsel %vm7424_vm9, %v7402_v59, 0  ;;  %vm1751_vm11 = vmpackc.low %vm7508_vm2, %vm7504_vm8  ;;  %vm11966_vm8 = vcmask 7168  }
  0xe9   : > { %1571 = vrot.lane.b32.xlu0 %v6733_v23, %s6575_s14  ;;  %3475 = vmatpush2.bf16.msra.mxu0 %v2339_v63  ;;  %v1253_v15 = vrot.slane %v1216_v9, %v6829_v43  ;;  %vm11967_vm2 = vmmov %vm11966_vm8 }
  0xea   : > { %3559 = vmatpush2.bf16.msra.mxu1 %v2630_v51  ;;  %v7372_v3 = vpop.permute.xlu1 %1434  ;;  %v1433_v29 = vpop.permute.xlu0 %1432  ;;  %6314 = vmatprep.subr.msk.bf16.mxu0 %vm7053_vm15, %v7370_v1  ;;  %v1249_v51 = vrot.slane %v1216_v9, %v6833_v44 }
  0xeb   : > { %6313 = vmatprep.subr.msk.bf16.mxu1 %vm7053_vm15, %v7367_v54  ;;  %v7440_v61 = vsel %vm1486_vm6, %v1433_v29, %v7372_v3  ;;  %vm7452_vm15 = vcmp.gt.s32.totalorder %v479_v60, 0  ;;  %vm7459_vm0 = vcmp.ne.s16.totalorder %v1253_v15, 0  ;;  %v7474_v18 = vsel %vm1486_vm6, %v6950_v38, %v1433_v29  ;;  %v7495_v38 = vld [vmem:[%s6642_s10 + $0xb0] sm:$0xff] }
  0xec   : > { %1573 = vrot.lane.b32.xlu1 %v7175_v12, %s6575_s14  ;;  %3477 = vmatmul.mubr.bf16.vlgmr.msra.gmra.mxu0 %v7354_v50  ;;  %vm1201_vm1 = vmpackc.low %vm7452_vm15, %vm7448_vm14  ;;  %vm7513_vm3 = vcmp.ne.s16.totalorder %v1249_v51, 0 }
  0xed   : > { %1994 = vrot.lane.b32.xlu0 %v7236_v13, %s6579_s18  ;;  %3586 = vmatpush1.bf16.msra.mxu0 %v3315_v8  ;;  %v1217_v6 = vsel %vm1201_vm1, 65537, %v11935_v62 }
  0xee   : > { %3561 = vmatpush2.bf16.msra.mxu1 %v2341_v28  ;;  %v7412_v20 = vpop.permute.xlu1 %2672  ;;  %v2671_v33 = vpop.permute.xlu0 %2670  ;;  %3587 = vmatprep.subr.bf16.mxu0 %v7406_v4  ;;  %v1261_v60 = vrot.slane %v1217_v6, %v6829_v43 }
  0xef   : > { %6327 = vmatprep.subr.msk.bf16.mxu1 %vm7383_vm5, %v7410_v0  ;;  %3605 = vmatprep.mubr.bf16.mxu0 %v11935_v62  ;;  %v7444_v21 = vsel %vm1486_vm6, %v2671_v33, %v7412_v20  ;;  %v7478_v28 = vsel %vm1486_vm6, %v7311_v53, %v2671_v33 }
  0xf0   : > { %2517 = vrot.lane.b32.xlu1 %v7161_v17, %s6577_s16  ;;  %vm7562_vm13 = vcmp.ne.s16.totalorder %v1261_v60, 0 }
  0xf1   : > { %1575 = vrot.lane.b32.xlu0 %v7236_v13, %s6575_s14  ;;  %3563 = vmatmul.mubr.bf16.vlgmr.msra.gmra.mxu1 %v7354_v50 }
  0xf2   : > { %3588 = vmatpush1.bf16.msra.mxu0 %v2726_v26  ;;  %3672 = vmatpush1.bf16.msra.mxu1 %v3317_v46  ;;  %v1015_v34 = vpop.permute.xlu1 %1014  ;;  %v1013_v30 = vpop.permute.xlu0 %1012  ;;  %v7535_v46 = vcombine.low %v7492_v48, %v7495_v38  ;;  %v1257_v26 = vrot.slane %v1217_v6, %v6833_v44 }
  0xf3   : > { %3616 = vmatprep.subr.bf16.mxu0 %v7440_v61  ;;  %3673 = vmatprep.subr.bf16.mxu1 %v7444_v21  ;;  %v7482_v52 = vsel %vm1066_vm12, %v7030_v56, %v1013_v30  ;;  %v7487_v58 = vsel %vm1066_vm12, %v1013_v30, %v1015_v34 }
  0xf4   : > { %3129 = vrot.lane.b32.xlu1 %v7161_v17, %s6578_s17  ;;  %3691 = vmatprep.mubr.bf16.mxu1 %v11935_v62  ;;  %v2305_v15 = vsel %vm7513_vm3, %v7482_v52, 0  ;;  %11957 = vst [vmem:[#allocation11_spill] sm:$0xff] %v7535_v46  ;;  %vm7577_vm14 = vcmp.ne.s16.totalorder %v1257_v26, 0 }
  0xf5   : > { %2519 = vrot.lane.b32.xlu0 %v7147_v57, %s6577_s16  ;;  %6315 = vmatmul.mubr.msk.bf16.vlgmr.msra.gmra.mxu0 %vm3440_vm10, %v6916_v11 }
  0xf6   : > { %3617 = vmatpush1.bf16.msra.mxu0 %v7474_v18  ;;  %3674 = vmatpush1.bf16.msra.mxu1 %v7478_v28  ;;  %v7489_v8 = vpop.permute.xlu1 %1438  ;;  %v1437_v56 = vpop.permute.xlu0 %1436 }
  0xf7   : > { %6316 = vmatprep.subr.msk.bf16.mxu0 %vm7459_vm0, %v7487_v58  ;;  %3648 = vmatprep.mubr.bf16.mxu0 %v6778_v27  ;;  %v7521_v33 = vsel %vm1486_vm6, %v1437_v56, %v7489_v8  ;;  %v7525_v9 = vsel %vm1486_vm6, %v7372_v3, %v1437_v56 }
  0xf8   : > { %2521 = vrot.lane.b32.xlu1 %v7465_v10, %s6577_s16  ;;  %3702 = vmatprep.subr.bf16.mxu1 %v7521_v33 }
  0xf9   : > { %3131 = vrot.lane.b32.xlu0 %v7147_v57, %s6578_s17  ;;  %6328 = vmatmul.mubr.msk.bf16.vlgmr.msra.gmra.mxu1 %vm3440_vm10, %v6916_v11 }
  0xfa   : > { %3619 = vmatpush1.bf16.msra.mxu0 %v2305_v15  ;;  %v2148_v3 = vpop.permute.xlu1 %2147  ;;  %3703 = vmatpush1.bf16.msra.mxu1 %v7525_v9  ;;  %v2146_v30 = vpop.permute.xlu0 %2145 }
  0xfb   : > { %3734 = vmatprep.mubr.bf16.mxu1 %v6778_v27  ;;  %v2204_v63 = vsel %vm2199_vm7, %v7058_v22, %v2146_v30  ;;  %v2205_v11 = vsel %vm2199_vm7, %v2146_v30, %v2148_v3  ;;  %v1767_v27 = vsel %vm1751_vm11, 65537, %v11935_v62  ;;  %vm11968_vm11 = vmmov %vm11967_vm2 }
  0xfc   : > { %3133 = vrot.lane.b32.xlu1 %v7465_v10, %s6578_s17  ;;  %6317 = vmatprep.subr.msk.bf16.mxu0 %vm7383_vm5, %v2205_v11  ;;  %v2270_v51 = vsel %vm7424_vm9, %v2204_v63, 0  ;;  %v1811_v53 = vrot.slane %v1767_v27, %v6829_v43  ;;  %v1807_v30 = vrot.slane %v1767_v27, %v6833_v44 }
  0xfd   : > { %2523 = vrot.lane.b32.xlu0 %v7535_v46, %s6577_s16 }
  0xfe   : > { %3621 = vmatpush1.bf16.msra.mxu0 %v2270_v51  ;;  %v7560_v22 = vpop.permute.xlu1 %1018  ;;  %vm7592_vm15 = vcmp.ne.s16.totalorder %v1811_v53, 0  ;;  %vm7600_vm1 = vcmp.ne.s16.totalorder %v1807_v30, 0 }
  0xff   : > { %v1017_v29 = vpop.permute.xlu0 %1016  ;;  %3622 = vmatprep.subr.bf16.mxu0 %v6671_v14 }
 0x100   : > { %v7569_v15 = vsel %vm1066_vm12, %v1015_v34, %v1017_v29  ;;  %2966 = vrot.lane.b32.xlu1 %v7020_v39, %s6579_s18  ;;  %v7575_v6 = vsel %vm1066_vm12, %v1017_v29, %v7560_v22  ;;  %v403_v39 = vadd.s32 1152, %v6803_v35 }
 0x101   : > { %3135 = vrot.lane.b32.xlu0 %v7535_v46, %s6578_s17  ;;  %6329 = vmatprep.subr.msk.bf16.mxu1 %vm7562_vm13, %v7575_v6  ;;  %v2307_v14 = vsel %vm7577_vm14, %v7569_v15, 0 }
 0x102   : > { %3705 = vmatpush1.bf16.msra.mxu1 %v2307_v14  ;;  %v7590_v34 = vpop.permute.xlu1 %2151  ;;  %3623 = vmatpush1.bf16.msra.mxu0 %v6697_v19 }
 0x103   : > { %v2150_v11 = vpop.permute.xlu0 %2149 }
 0x104   : > { %v2206_v26 = vsel %vm2199_vm7, %v2148_v3, %v2150_v11  ;;  %2970 = vrot.lane.b32.xlu1 %v7147_v57, %s6579_s18  ;;  %v2207_v27 = vsel %vm2199_vm7, %v2150_v11, %v7590_v34 }
 0x105   : > { %2968 = vrot.lane.b32.xlu0 %v7161_v17, %s6579_s18  ;;  %6330 = vmatprep.subr.msk.bf16.mxu1 %vm7592_vm15, %v2207_v27  ;;  %v2272_v19 = vsel %vm7600_vm1, %v2206_v26, 0  ;;  %v7640_v26 = vld [vmem:[%s6642_s10 + $0x38] sm:$0xff] }
 0x106   : > { %3707 = vmatpush1.bf16.msra.mxu1 %v2272_v19  ;;  %v1983_v3 = vpop.permute.xlu1 %1982  ;;  %v7643_v27 = vld [vmem:[%s6642_s10 + $0xb8] sm:$0xff] }
 0x107   : > { %v1981_v53 = vpop.permute.xlu0 %1980  ;;  %3708 = vmatprep.subr.bf16.mxu1 %v6827_v42  ;;  %v7988_v56 = vcombine.high %v7640_v26, %v7643_v27 }
 0x108   : > { %v2040_v29 = vsel %vm11966_vm8, %v7100_v37, %v1981_v53  ;;  %2811 = vrot.lane.b32.xlu1 %v7465_v10, %s6575_s14  ;;  %v2041_v30 = vsel %vm11967_vm2, %v1981_v53, %v1983_v3  ;;  %vm11969_vm8 = vmmov %vm11967_vm2 }
 0x109   : > { %2972 = vrot.lane.b32.xlu0 %v7465_v10, %s6579_s18  ;;  %6318 = vmatprep.subr.msk.bf16.mxu0 %vm7459_vm0, %v2041_v30  ;;  %v2107_v14 = vsel %vm7513_vm3, %v2040_v29, 0  ;;  %v336_v30 = vld [vmem:[%s6647_s13 + $0x38] sm:$0xff] }
 0x10a   : > { %3625 = vmatpush1.bf16.msra.mxu0 %v2107_v14  ;;  %v1985_v42 = vpop.permute.xlu1 %1984  ;;  %3709 = vmatpush1.bf16.msra.mxu1 %v6807_v36  ;;  %v1944_v36 = vsel %vm7424_vm9, %v7367_v54, 0  ;;  %v7655_v54 = vcombine.low %v7640_v26, %v7643_v27  ;;  %v352_v14 = vld [vmem:[%s6647_s13 + $0xb8] sm:$0xff] }
 0x10b   : > { %v1564_v37 = vpop.permute.xlu0 %1563 }
 0x10c   : > { %2813 = vrot.lane.b32.xlu1 %v7535_v46, %s6575_s14  ;;  %v7629_v11 = vsel %vm1617_vm4, %v7315_v32, %v1564_v37  ;;  %v2042_v32 = vsel %vm11968_vm11, %v1983_v3, %v1985_v42  ;;  %11970 = vst [vmem:[#allocation12_spill] sm:$0xff] %v7655_v54  ;;  %vm11976_vm11 = vmmov %vm11967_vm2 }
 0x10d   : > { %2682 = vrot.lane.b32.xlu0 %v7465_v10, %s6576_s15  ;;  %6319 = vmatprep.subr.msk.bf16.mxu0 %vm7383_vm5, %v7629_v11  ;;  %v2109_v3 = vsel %vm7577_vm14, %v2042_v32, 0  ;;  %v7699_v32 = vcombine.high %v7207_v24, %v7210_v2 }
 0x10e   : > { %3627 = vmatpush1.bf16.msra.mxu0 %v1944_v36  ;;  %v1566_v19 = vpop.permute.xlu1 %1565 }
 0x10f   : > { %v7646_v53 = vpop.permute.xlu0 %1986  ;;  %3628 = vmatprep.subr.bf16.mxu0 %v7474_v18  ;;  %v7665_v18 = vcombine.high %v7492_v48, %v7495_v38  ;;  %v7684_v38 = vcombine.low %v336_v30, %v352_v14 }
 0x110   : > { %2684 = vrot.lane.b32.xlu1 %v7535_v46, %s6576_s15  ;;  %v2043_v29 = vsel %vm11969_vm8, %v1985_v42, %v7646_v53  ;;  %v7670_v42 = vsel %vm1617_vm4, %v1564_v37, %v1566_v19  ;;  %vm11977_vm8 = vmmov %vm11967_vm2 }
 0x111   : > { %1577 = vrot.lane.b32.xlu0 %v7226_v25, %s6575_s14  ;;  %6331 = vmatprep.subr.msk.bf16.mxu1 %vm7562_vm13, %v2043_v29  ;;  %v1946_v37 = vsel %vm7600_vm1, %v7670_v42, 0 }
 0x112   : > { %3629 = vmatpush1.bf16.msra.mxu0 %v6965_v47  ;;  %3711 = vmatpush1.bf16.msra.mxu1 %v2109_v3  ;;  %v2510_v36 = vpop.permute.xlu1 %2509  ;;  %v11971_v47 = vld [vmem:[#allocation7_spill] sm:$0xff] }
 0x113   : > { %v7673_v57 = vpop.permute.xlu0 %1567  ;;  %6320 = vmatprep.subr.msk.bf16.mxu0 %vm7459_vm0, %v7482_v52  ;;  %v1394_v52 = vsel %vm7513_vm3, %v11971_v47, 0 }
 0x114   : > { %2817 = vrot.lane.b32.xlu1 %v7655_v54, %s6575_s14  ;;  %v7682_v48 = vsel %vm1617_vm4, %v1566_v19, %v7673_v57  ;;  %v7703_v19 = vsel %vm1066_vm12, %v7215_v16, %v2510_v36 }
 0x115   : > { %2815 = vrot.lane.b32.xlu0 %v7665_v18, %s6575_s14  ;;  %6332 = vmatprep.subr.msk.bf16.mxu1 %vm7592_vm15, %v7682_v48  ;;  %v3279_v16 = vsel %vm7513_vm3, %v7703_v19, 0  ;;  %v2345_v63 = vsel %vm7600_vm1, %v7682_v48, 0 }
 0x116   : > { %3631 = vmatpush1.bf16.msra.mxu0 %v1394_v52  ;;  %3713 = vmatpush1.bf16.msra.mxu1 %v1946_v37  ;;  %v3122_v29 = vpop.permute.xlu1 %3121  ;;  %v7738_v52 = vld [vmem:[%s6647_s13 + $0x40] sm:$0xff] }
 0x117   : > { %v2512_v3 = vpop.permute.xlu0 %2511  ;;  %3714 = vmatprep.subr.bf16.mxu1 %v7525_v9  ;;  %v3179_v24 = vsel %vm2199_vm7, %v7240_v41, %v3122_v29 }
 0x118   : > { %1450 = vrot.lane.b32.xlu1 %v7684_v38, %s6576_s15  ;;  %v7709_v47 = vsel %vm1066_vm12, %v2510_v36, %v2512_v3  ;;  %v3244_v41 = vsel %vm7424_vm9, %v3179_v24, 0 }
 0x119   : > { %1448 = vrot.lane.b32.xlu0 %v7699_v32, %s6576_s15  ;;  %6321 = vmatprep.subr.msk.bf16.mxu0 %vm7459_vm0, %v7709_v47  ;;  %v2634_v31 = vsel %vm7577_vm14, %v7709_v47, 0 }
 0x11a   : > { %3633 = vmatpush2.bf16.msra.mxu0 %v3279_v16  ;;  %3715 = vmatpush1.bf16.msra.mxu1 %v7440_v61  ;;  %v2514_v2 = vpop.permute.xlu1 %2513  ;;  %v1396_v61 = vsel %vm7577_vm14, %v7487_v58, 0 }
 0x11b   : > { %v3124_v9 = vpop.permute.xlu0 %3123  ;;  %6333 = vmatprep.subr.msk.bf16.mxu1 %vm7562_vm13, %v7569_v15  ;;  %v7741_v15 = vld [vmem:[%s6647_s13 + $0xc0] sm:$0xff]  ;;  %v7744_v37 = vsel %vm1066_vm12, %v2512_v3, %v2514_v2 }
 0x11c   : > { %2688 = vrot.lane.b32.xlu1 %v7655_v54, %s6576_s15  ;;  %v3180_v36 = vsel %vm2199_vm7, %v3122_v29, %v3124_v9  ;;  %v7757_v24 = vcombine.low %v7738_v52, %v7741_v15  ;;  %v3281_v3 = vsel %vm7577_vm14, %v7744_v37, 0 }
 0x11d   : > { %2686 = vrot.lane.b32.xlu0 %v7665_v18, %s6576_s15  ;;  %6322 = vmatprep.subr.msk.bf16.mxu0 %vm7383_vm5, %v3180_v36  ;;  %v11972_v36 = vld [vmem:[#allocation4_spill] sm:$0xff] }
 0x11e   : > { %3635 = vmatpush2.bf16.msra.mxu0 %v3244_v41  ;;  %3717 = vmatpush1.bf16.msra.mxu1 %v1396_v61  ;;  %v3126_v29 = vpop.permute.xlu1 %3125  ;;  %v7767_v41 = vcombine.high %v336_v30, %v352_v14  ;;  %11998 = vst [vmem:[#allocation4_spill] sm:$0xff] %v7988_v56 }
 0x11f   : > { %v7746_v16 = vpop.permute.xlu0 %2515  ;;  %3636 = vmatprep.subr.bf16.mxu0 %v11972_v36  ;;  %v11974_v36 = vld [vmem:[#allocation2_spill] sm:$0xff] }
 0x120   : > { %1030 = vrot.lane.b32.xlu1 %v7684_v38, %s6577_s16  ;;  %v7753_v58 = vsel %vm1066_vm12, %v2514_v2, %v7746_v16  ;;  %v3181_v2 = vsel %vm2199_vm7, %v3124_v9, %v3126_v29 }
 0x121   : > { %11973 = vst [vmem:[#allocation7_spill] sm:$0xff] %v7753_v58  ;;  %1028 = vrot.lane.b32.xlu0 %v7699_v32, %s6577_s16  ;;  %6334 = vmatprep.subr.msk.bf16.mxu1 %vm7562_vm13, %v7753_v58  ;;  %v3246_v30 = vsel %vm7600_vm1, %v3181_v2, 0  ;;  %v11978_v2 = vld [vmem:[#allocation3_spill] sm:$0xff] }
 0x122   : > { %3719 = vmatpush2.bf16.msra.mxu1 %v3281_v3  ;;  %v2959_v61 = vpop.permute.xlu1 %2958  ;;  %3637 = vmatpush2.bf16.msra.mxu0 %v11974_v36  ;;  %v11975_v36 = vld [vmem:[#allocation5_spill] sm:$0xff] }
 0x123   : > { %v7771_v10 = vpop.permute.xlu0 %3127  ;;  %v3017_v14 = vsel %vm11967_vm2, %v7267_v45, %v2959_v61 }
 0x124   : > { %1454 = vrot.lane.b32.xlu1 %v7757_v24, %s6576_s15  ;;  %v3182_v58 = vsel %vm2199_vm7, %v3126_v29, %v7771_v10 }
 0x125   : > { %1452 = vrot.lane.b32.xlu0 %v7767_v41, %s6576_s15  ;;  %6335 = vmatprep.subr.msk.bf16.mxu1 %vm7592_vm15, %v3182_v58  ;;  %v3083_v58 = vsel %vm7513_vm3, %v3017_v14, 0 }
 0x126   : > { %3721 = vmatpush2.bf16.msra.mxu1 %v3246_v30  ;;  %v2963_v9 = vpop.permute.xlu1 %2962 }
 0x127   : > { %v2961_v3 = vpop.permute.xlu0 %2960  ;;  %3722 = vmatprep.subr.bf16.mxu1 %v11975_v36 }
 0x128   : > { %2163 = vrot.lane.b32.xlu1 %v7684_v38, %s6578_s17  ;;  %v3018_v29 = vsel %vm11976_vm11, %v2959_v61, %v2961_v3  ;;  %v3019_v45 = vsel %vm11977_vm8, %v2961_v3, %v2963_v9  ;;  %v402_v61 = vadd.s32 1024, %v6803_v35 }
 0x129   : > { %2161 = vrot.lane.b32.xlu0 %v7699_v32, %s6578_s17  ;;  %6323 = vmatprep.subr.msk.bf16.mxu0 %vm7459_vm0, %v3018_v29  ;;  %v3085_v3 = vsel %vm7577_vm14, %v3019_v45, 0 }
 0x12a   : > { %3639 = vmatpush2.bf16.msra.mxu0 %v3083_v58  ;;  %3723 = vmatpush2.bf16.msra.mxu1 %v11978_v2  ;;  %v2804_v30 = vpop.permute.xlu1 %2803  ;;  %v486_v2 = vand.u32 63, %v402_v61 }
 0x12b   : > { %v7797_v36 = vpop.permute.xlu0 %2964  ;;  %6324 = vmatprep.subr.msk.bf16.mxu0 %vm7383_vm5, %v7402_v59  ;;  %v2922_v59 = vsel %vm7424_vm9, %v7370_v1, 0  ;;  %v2859_v29 = vsel %vm1617_vm4, %v7331_v5, %v2804_v30  ;;  %v2924_v1 = vsel %vm7600_vm1, %v7410_v0, 0 }
 0x12c   : > { %1034 = vrot.lane.b32.xlu1 %v7757_v24, %s6577_s16  ;;  %v3020_v14 = vsel %vm11967_vm2, %v2963_v9, %v7797_v36  ;;  %vm7829_vm11 = vcmp.lt.s32.totalorder %v486_v2, 63 }
 0x12d   : > { %1032 = vrot.lane.b32.xlu0 %v7767_v41, %s6577_s16  ;;  %6336 = vmatprep.subr.msk.bf16.mxu1 %vm7562_vm13, %v3020_v14  ;;  %v493_v14 = vand.u32 63, %v403_v39 }
 0x12e   : > { %3641 = vmatpush2.bf16.msra.mxu0 %v2922_v59  ;;  %3725 = vmatpush2.bf16.msra.mxu1 %v3085_v3  ;;  %v2806_v58 = vpop.permute.xlu1 %2805  ;;  %v404_v59 = vadd.s32 1280, %v6803_v35  ;;  %v405_v3 = vadd.s32 1408, %v6803_v35 }
 0x12f   : > { %v2675_v9 = vpop.permute.xlu0 %2674  ;;  %3642 = vmatprep.subr.bf16.mxu0 %v7478_v28  ;;  %6337 = vmatprep.subr.msk.bf16.mxu1 %vm7592_vm15, %v2859_v29  ;;  %vm7833_vm8 = vcmp.lt.s32.totalorder %v493_v14, 63  ;;  %v7893_v49 = vsel %vm1617_vm4, %v2804_v30, %v2806_v58  ;;  %v3319_v30 = vsel %vm7600_vm1, %v2859_v29, 0 }
 0x130   : > { %2167 = vrot.lane.b32.xlu1 %v7757_v24, %s6578_s17  ;;  %v2730_v39 = vsel %vm1486_vm6, %v7412_v20, %v2675_v9  ;;  %vm1752_vm2 = vmpackc.low %vm7833_vm8, %vm7829_vm11  ;;  %v500_v28 = vand.u32 63, %v404_v59  ;;  %v8020_v59 = vld [vmem:[%s6642_s10 + $0x40] sm:$0xff] }
 0x131   : > { %2165 = vrot.lane.b32.xlu0 %v7767_v41, %s6578_s17 }
 0x132   : > { %3643 = vmatpush2.bf16.msra.mxu0 %v7406_v4  ;;  %3727 = vmatpush2.bf16.msra.mxu1 %v2924_v1  ;;  %v7840_v45 = vpop.permute.xlu1 %2676  ;;  %v11983_v4 = vld [vmem:[#allocation9_spill] sm:$0xff]  ;;  %vm7971_vm14 = vcmp.gt.s32.totalorder %v500_v28, 0  ;;  %vm8032_vm8 = vcmp.lt.s32.totalorder %v500_v28, 63 }
 0x133   : > { %v7842_v61 = vpop.permute.xlu0 %1569  ;;  %6325 = vmatprep.subr.msk.bf16.mxu0 %vm7459_vm0, %v7703_v19  ;;  %3728 = vmatprep.subr.bf16.mxu1 %v2730_v39  ;;  %v2632_v0 = vsel %vm7513_vm3, %v11983_v4, 0  ;;  %v1768_v19 = vsel %vm1752_vm2, 65537, %v11935_v62  ;;  %vm7883_vm0 = vcmp.gt.s32.totalorder %v493_v14, 0  ;;  %v7929_v14 = vsel %vm1486_vm6, %v2675_v9, %v7840_v45 }
 0x134   : > { %1998 = vrot.lane.b32.xlu1 %v7699_v32, %s6579_s18  ;;  %v1819_v55 = vrot.slane %v1768_v19, %v6829_v43  ;;  %v507_v4 = vand.u32 63, %v405_v3  ;;  %v8043_v3 = vld [vmem:[%s11824_s2 + $0x4] ss:$12 sps:$4 sm:$0xff]  }
 0x135   : > { %1996 = vrot.lane.b32.xlu0 %v7226_v25, %s6579_s18 }
 0x136   : > { %3645 = vmatpush2.bf16.msra.mxu0 %v2632_v0  ;;  %3729 = vmatpush2.bf16.msra.mxu1 %v7444_v21  ;;  %v7859_v20 = vpop.permute.xlu1 %2809  ;;  %v2343_v21 = vsel %vm7424_vm9, %v7629_v11, 0  ;;  %vm7906_vm9 = vcmp.ne.s16.totalorder %v1819_v55, 0  ;;  %vm8036_vm2 = vcmp.lt.s32.totalorder %v507_v4, 63 }
 0x137   : > { %v2808_v7 = vpop.permute.xlu0 %2807  ;;  %6326 = vmatprep.subr.msk.bf16.mxu0 %vm7383_vm5, %v7670_v42  ;;  %6338 = vmatprep.subr.msk.bf16.mxu1 %vm7562_vm13, %v7744_v37  ;;  %vm7879_vm5 = vcmp.gt.s32.totalorder %v486_v2, 0  ;;  %v7890_v37 = vsel %vm1617_vm4, %v7673_v57, %v7842_v61  ;;  %v1815_v57 = vrot.slane %v1768_v19, %v6833_v44  ;;  %v7996_v42 = vld [vmem:[%s11824_s2 + $0x8] ss:$12 sps:$4 sm:$0xff]  }
 0x138   : > { %2000 = vrot.lane.b32.xlu1 %v7684_v38, %s6579_s18  ;;  %vm1202_vm3 = vmpackc.low %vm7883_vm0, %vm7879_vm5  ;;  %v7925_v2 = vsel %vm1617_vm4, %v2806_v58, %v2808_v7  ;;  %v7933_v1 = vsel %vm1617_vm4, %v2808_v7, %v7859_v20 }
 0x139   : > { %1579 = vrot.lane.b32.xlu0 %v7699_v32, %s6575_s14  ;;  %v1218_v29 = vsel %vm1202_vm3, 65537, %v11935_v62  ;;  %vm7947_vm13 = vcmp.ne.s16.totalorder %v1815_v57, 0  ;;  %vm1753_vm0 = vmpackc.low %vm8036_vm2, %vm8032_vm8  ;;  %vm12015_vm8 = vcmask 7168  }
 0x13a   : > { %3647 = vmatpush2.bf16.msra.mxu0 %v2343_v21  ;;  %3731 = vmatpush2.bf16.msra.mxu1 %v2634_v31  ;;  %v7895_v60 = vpop.permute.xlu1 %1442  ;;  %v1269_v9 = vrot.slane %v1218_v29, %v6829_v43  ;;  %v3321_v5 = vsel %vm7947_vm13, %v7925_v2, 0  ;;  %v1265_v21 = vrot.slane %v1218_v29, %v6833_v44  ;;  %vm12016_vm2 = vmmov %vm12015_vm8 }
 0x13b   : > { %v1441_v11 = vpop.permute.xlu0 %1440  ;;  %6339 = vmatprep.subr.msk.bf16.mxu1 %vm7592_vm15, %v7890_v37  ;;  %6340 = vmatprep.subr.msk.bf16.mxu0 %vm7592_vm15, %v7893_v49  ;;  %vm7975_vm15 = vcmp.gt.s32.totalorder %v507_v4, 0 }
 0x13c   : > { %1581 = vrot.lane.b32.xlu1 %v7684_v38, %s6575_s14  ;;  %v7963_v0 = vsel %vm1486_vm6, %v1441_v11, %v7895_v60  ;;  %vm7982_vm1 = vcmp.ne.s16.totalorder %v1269_v9, 0  ;;  %v8002_v57 = vsel %vm1486_vm6, %v7489_v8, %v1441_v11  ;;  %v8023_v8 = vld [vmem:[%s6642_s10 + $0xc0] sm:$0xff]  ;;  %vm1203_vm11 = vmpackc.low %vm7975_vm15, %vm7971_vm14  ;;  %vm8046_vm5 = vcmp.ne.s16.totalorder %v1265_v21, 0 }
 0x13d   : > { %2002 = vrot.lane.b32.xlu0 %v7767_v41, %s6579_s18  ;;  %3649 = vmatmul.mubr.bf16.vlgmr.msra.gmra.mxu0 %v7354_v50  ;;  %v8068_v28 = vcombine.low %v8020_v59, %v8023_v8  ;;  %v1219_v4 = vsel %vm1203_vm11, 65537, %v11935_v62  ;;  %v1769_v11 = vsel %vm1753_vm0, 65537, %v11935_v62  ;;  %vm12017_vm0 = vmmov %vm12016_vm2 }
 0x13e   : > { %3733 = vmatpush2.bf16.msra.mxu1 %v2345_v63  ;;  %3758 = vmatpush1.bf16.msra.mxu0 %v3319_v30  ;;  %v7935_v48 = vpop.permute.xlu1 %2680 }
 0x13f   : > { %v2679_v51 = vpop.permute.xlu0 %2678  ;;  %3759 = vmatprep.subr.bf16.mxu0 %v7929_v14  ;;  %6353 = vmatprep.subr.msk.bf16.mxu1 %vm7906_vm9, %v7933_v1  ;;  %12006 = vst [vmem:[#allocation5_spill] sm:$0xff] %v8068_v28 }
 0x140   : > { %2525 = vrot.lane.b32.xlu1 %v7665_v18, %s6577_s16  ;;  %3777 = vmatprep.mubr.bf16.mxu0 %v11935_v62  ;;  %v7967_v7 = vsel %vm1486_vm6, %v2679_v51, %v7935_v48  ;;  %v8006_v26 = vsel %vm1486_vm6, %v7840_v45, %v2679_v51 }
 0x141   : > { %1583 = vrot.lane.b32.xlu0 %v7767_v41, %s6575_s14  ;;  %3735 = vmatmul.mubr.bf16.vlgmr.msra.gmra.mxu1 %v7354_v50 }
 0x142   : > { %3760 = vmatpush1.bf16.msra.mxu0 %v2730_v39  ;;  %3844 = vmatpush1.bf16.msra.mxu1 %v3321_v5  ;;  %v1023_v19 = vpop.permute.xlu1 %1022 }
 0x143   : > { %v1021_v55 = vpop.permute.xlu0 %1020  ;;  %3788 = vmatprep.subr.bf16.mxu0 %v7963_v0  ;;  %3845 = vmatprep.subr.bf16.mxu1 %v7967_v7 }
 0x144   : > { %3137 = vrot.lane.b32.xlu1 %v7665_v18, %s6578_s17  ;;  %3863 = vmatprep.mubr.bf16.mxu1 %v11935_v62  ;;  %v8010_v27 = vsel %vm1066_vm12, %v7560_v22, %v1021_v55  ;;  %v8015_v63 = vsel %vm1066_vm12, %v1021_v55, %v1023_v19  ;;  %v1277_v55 = vrot.slane %v1219_v4, %v6829_v43 }
 0x145   : > { %2527 = vrot.lane.b32.xlu0 %v7655_v54, %s6577_s16  ;;  %6341 = vmatmul.mubr.msk.bf16.vlgmr.msra.gmra.mxu0 %vm3440_vm10, %v7996_v42  ;;  %v2309_v5 = vsel %vm8046_vm5, %v8010_v27, 0 }
 0x146   : > { %3789 = vmatpush1.bf16.msra.mxu0 %v8002_v57  ;;  %3846 = vmatpush1.bf16.msra.mxu1 %v8006_v26  ;;  %v8017_v30 = vpop.permute.xlu1 %1446  ;;  %vm8095_vm3 = vcmp.ne.s16.totalorder %v1277_v55, 0 }
 0x147   : > { %v1445_v22 = vpop.permute.xlu0 %1444  ;;  %6342 = vmatprep.subr.msk.bf16.mxu0 %vm7982_vm1, %v8015_v63  ;;  %3820 = vmatprep.mubr.bf16.mxu0 %v8043_v3 }
 0x148   : > { %2529 = vrot.lane.b32.xlu1 %v7988_v56, %s6577_s16  ;;  %v8054_v29 = vsel %vm1486_vm6, %v1445_v22, %v8017_v30  ;;  %v8058_v9 = vsel %vm1486_vm6, %v7895_v60, %v1445_v22  ;;  %v1273_v22 = vrot.slane %v1219_v4, %v6833_v44  ;;  %v1827_v4 = vrot.slane %v1769_v11, %v6829_v43 }
 0x149   : > { %12005 = vst [vmem:[#allocation2_spill] sm:$0xff] %v8054_v29  ;;  %3139 = vrot.lane.b32.xlu0 %v7655_v54, %s6578_s17  ;;  %3874 = vmatprep.subr.bf16.mxu1 %v8054_v29 }
 0x14a   : > { %3791 = vmatpush1.bf16.msra.mxu0 %v2309_v5  ;;  %6354 = vmatmul.mubr.msk.bf16.vlgmr.msra.gmra.mxu1 %vm3440_vm10, %v7996_v42  ;;  %v2156_v60 = vpop.permute.xlu1 %2155  ;;  %vm8110_vm14 = vcmp.ne.s16.totalorder %v1273_v22, 0  ;;  %vm8125_vm15 = vcmp.ne.s16.totalorder %v1827_v4, 0  ;;  %v8452_v22 = vld [vmem:[%s11824_s2] ss:$12 sps:$4 sm:$0xff]  }
 0x14b   : > { %3875 = vmatpush1.bf16.msra.mxu1 %v8058_v9  ;;  %v2154_v50 = vpop.permute.xlu0 %2153  ;;  %3906 = vmatprep.mubr.bf16.mxu1 %v8043_v3 }
 0x14c   : > { %v2208_v39 = vsel %vm2199_vm7, %v7590_v34, %v2154_v50  ;;  %3141 = vrot.lane.b32.xlu1 %v7988_v56, %s6578_s17  ;;  %v2209_v21 = vsel %vm2199_vm7, %v2154_v50, %v2156_v60 }
 0x14d   : > { %2531 = vrot.lane.b32.xlu0 %v8068_v28, %s6577_s16  ;;  %6343 = vmatprep.subr.msk.bf16.mxu0 %vm7906_vm9, %v2209_v21  ;;  %v2274_v45 = vsel %vm7947_vm13, %v2208_v39, 0  ;;  %v1823_v21 = vrot.slane %v1769_v11, %v6833_v44 }
 0x14e   : > { %3793 = vmatpush1.bf16.msra.mxu0 %v2274_v45  ;;  %v8093_v34 = vpop.permute.xlu1 %1026 }
 0x14f   : > { %v1025_v50 = vpop.permute.xlu0 %1024  ;;  %3794 = vmatprep.subr.bf16.mxu0 %v6733_v23  ;;  %vm8133_vm11 = vcmp.ne.s16.totalorder %v1823_v21, 0 }
 0x150   : > { %v8102_v29 = vsel %vm1066_vm12, %v1023_v19, %v1025_v50  ;;  %2974 = vrot.lane.b32.xlu1 %v7535_v46, %s6579_s18  ;;  %v8108_v39 = vsel %vm1066_vm12, %v1025_v50, %v8093_v34 }
 0x151   : > { %3143 = vrot.lane.b32.xlu0 %v8068_v28, %s6578_s17  ;;  %6355 = vmatprep.subr.msk.bf16.mxu1 %vm8095_vm3, %v8108_v39  ;;  %v2311_v23 = vsel %vm8110_vm14, %v8102_v29, 0 }
 0x152   : > { %3877 = vmatpush1.bf16.msra.mxu1 %v2311_v23  ;;  %v8123_v19 = vpop.permute.xlu1 %2159  ;;  %3795 = vmatpush1.bf16.msra.mxu0 %v6823_v40 }
 0x153   : > { %v2158_v45 = vpop.permute.xlu0 %2157 }
 0x154   : > { %v2210_v11 = vsel %vm2199_vm7, %v2156_v60, %v2158_v45  ;;  %2978 = vrot.lane.b32.xlu1 %v7655_v54, %s6579_s18  ;;  %v2211_v23 = vsel %vm2199_vm7, %v2158_v45, %v8123_v19  ;;  %v354_v54 = vld [vmem:[%s6647_s13 + $0xc8] sm:$0xff] }
 0x155   : > { %2976 = vrot.lane.b32.xlu0 %v7665_v18, %s6579_s18  ;;  %6356 = vmatprep.subr.msk.bf16.mxu1 %vm8125_vm15, %v2211_v23  ;;  %v2276_v40 = vsel %vm8133_vm11, %v2210_v11, 0 }
 0x156   : > { %3879 = vmatpush1.bf16.msra.mxu1 %v2276_v40  ;;  %v1991_v60 = vpop.permute.xlu1 %1990  ;;  %v8173_v40 = vld [vmem:[%s6642_s10 + $0x48] sm:$0xff] }
 0x157   : > { %v1989_v4 = vpop.permute.xlu0 %1988  ;;  %3880 = vmatprep.subr.bf16.mxu1 %v7236_v13 }
 0x158   : > { %v2044_v21 = vsel %vm12015_vm8, %v7646_v53, %v1989_v4  ;;  %2819 = vrot.lane.b32.xlu1 %v7988_v56, %s6575_s14  ;;  %v2045_v45 = vsel %vm12016_vm2, %v1989_v4, %v1991_v60  ;;  %v8176_v4 = vld [vmem:[%s6642_s10 + $0xc8] sm:$0xff]  ;;  %vm12018_vm8 = vmmov %vm12017_vm0 }
 0x159   : > { %2980 = vrot.lane.b32.xlu0 %v7988_v56, %s6579_s18  ;;  %6344 = vmatprep.subr.msk.bf16.mxu0 %vm7982_vm1, %v2045_v45  ;;  %v2111_v11 = vsel %vm8046_vm5, %v2044_v21, 0  ;;  %vm12022_vm2 = vmmov %vm12017_vm0 }
 0x15a   : > { %3797 = vmatpush1.bf16.msra.mxu0 %v2111_v11  ;;  %v1993_v13 = vpop.permute.xlu1 %1992  ;;  %3881 = vmatpush1.bf16.msra.mxu1 %v7175_v12  ;;  %v1948_v12 = vsel %vm7947_vm13, %v7890_v37, 0  ;;  %v8188_v37 = vcombine.low %v8173_v40, %v8176_v4 }
 0x15b   : > { %v1572_v53 = vpop.permute.xlu0 %1571 }
 0x15c   : > { %2821 = vrot.lane.b32.xlu1 %v8068_v28, %s6575_s14  ;;  %v8162_v23 = vsel %vm1617_vm4, %v7842_v61, %v1572_v53  ;;  %v2046_v61 = vsel %vm12017_vm0, %v1991_v60, %v1993_v13  ;;  %12019 = vst [vmem:[#allocation3_spill] sm:$0xff] %v8188_v37 }
 0x15d   : > { %2690 = vrot.lane.b32.xlu0 %v7988_v56, %s6576_s15  ;;  %6345 = vmatprep.subr.msk.bf16.mxu0 %vm7906_vm9, %v8162_v23  ;;  %v2113_v60 = vsel %vm8110_vm14, %v2046_v61, 0 }
 0x15e   : > { %3799 = vmatpush1.bf16.msra.mxu0 %v1948_v12  ;;  %v1574_v21 = vpop.permute.xlu1 %1573  ;;  %v338_v12 = vld [vmem:[%s6647_s13 + $0x48] sm:$0xff] }
 0x15f   : > { %v8179_v45 = vpop.permute.xlu0 %1994  ;;  %3800 = vmatprep.subr.bf16.mxu0 %v8002_v57  ;;  %v8198_v57 = vcombine.high %v8020_v59, %v8023_v8  ;;  %v8217_v8 = vcombine.low %v338_v12, %v354_v54 }
 0x160   : > { %2692 = vrot.lane.b32.xlu1 %v8068_v28, %s6576_s15  ;;  %v2047_v11 = vsel %vm12018_vm8, %v1993_v13, %v8179_v45  ;;  %v8203_v13 = vsel %vm1617_vm4, %v1572_v53, %v1574_v21  ;;  %v8232_v53 = vcombine.high %v7738_v52, %v7741_v15  ;;  %vm12024_vm8 = vmmov %vm12017_vm0 }
 0x161   : > { %1585 = vrot.lane.b32.xlu0 %v7757_v24, %s6575_s14  ;;  %6357 = vmatprep.subr.msk.bf16.mxu1 %vm8095_vm3, %v2047_v11 }
 0x162   : > { %3801 = vmatpush1.bf16.msra.mxu0 %v7521_v33  ;;  %3883 = vmatpush1.bf16.msra.mxu1 %v2113_v60  ;;  %v2518_v56 = vpop.permute.xlu1 %2517  ;;  %v1398_v33 = vsel %vm8046_vm5, %v7575_v6, 0  ;;  %v8271_v60 = vld [vmem:[%s6647_s13 + $0x50] sm:$0xff] }
 0x163   : > { %v8206_v46 = vpop.permute.xlu0 %1575  ;;  %6346 = vmatprep.subr.msk.bf16.mxu0 %vm7982_vm1, %v8010_v27  ;;  %v1950_v27 = vsel %vm8133_vm11, %v8203_v13, 0  ;;  %v8236_v61 = vsel %vm1066_vm12, %v7746_v16, %v2518_v56 }
 0x164   : > { %2825 = vrot.lane.b32.xlu1 %v8188_v37, %s6575_s14  ;;  %v8215_v59 = vsel %vm1617_vm4, %v1574_v21, %v8206_v46  ;;  %v3283_v52 = vsel %vm8046_vm5, %v8236_v61, 0 }
 0x165   : > { %2823 = vrot.lane.b32.xlu0 %v8198_v57, %s6575_s14  ;;  %6358 = vmatprep.subr.msk.bf16.mxu1 %vm8125_vm15, %v8215_v59 }
 0x166   : > { %3803 = vmatpush1.bf16.msra.mxu0 %v1398_v33  ;;  %3885 = vmatpush1.bf16.msra.mxu1 %v1950_v27  ;;  %v3130_v21 = vpop.permute.xlu1 %3129 }
 0x167   : > { %v2520_v11 = vpop.permute.xlu0 %2519  ;;  %3886 = vmatprep.subr.bf16.mxu1 %v8058_v9  ;;  %v3183_v15 = vsel %vm2199_vm7, %v7771_v10, %v3130_v21 }
 0x168   : > { %1458 = vrot.lane.b32.xlu1 %v8217_v8, %s6576_s15  ;;  %v8242_v6 = vsel %vm1066_vm12, %v2518_v56, %v2520_v11  ;;  %v3248_v10 = vsel %vm7947_vm13, %v3183_v15, 0 }
 0x169   : > { %1456 = vrot.lane.b32.xlu0 %v8232_v53, %s6576_s15  ;;  %6347 = vmatprep.subr.msk.bf16.mxu0 %vm7982_vm1, %v8242_v6  ;;  %v2638_v47 = vsel %vm8110_vm14, %v8242_v6, 0 }
 0x16a   : > { %3805 = vmatpush2.bf16.msra.mxu0 %v3283_v52  ;;  %3887 = vmatpush1.bf16.msra.mxu1 %v7963_v0  ;;  %v2522_v16 = vpop.permute.xlu1 %2521  ;;  %v1400_v0 = vsel %vm8110_vm14, %v8015_v63, 0 }
 0x16b   : > { %v3132_v56 = vpop.permute.xlu0 %3131  ;;  %6359 = vmatprep.subr.msk.bf16.mxu1 %vm8095_vm3, %v8102_v29  ;;  %v8274_v29 = vld [vmem:[%s6647_s13 + $0xd0] sm:$0xff]  ;;  %v8277_v33 = vsel %vm1066_vm12, %v2520_v11, %v2522_v16  ;;  %v8300_v11 = vcombine.high %v338_v12, %v354_v54 }
 0x16c   : > { %2696 = vrot.lane.b32.xlu1 %v8188_v37, %s6576_s15  ;;  %v3184_v9 = vsel %vm2199_vm7, %v3130_v21, %v3132_v56  ;;  %v8290_v52 = vcombine.low %v8271_v60, %v8274_v29 }
 0x16d   : > { %2694 = vrot.lane.b32.xlu0 %v8198_v57, %s6576_s15  ;;  %6348 = vmatprep.subr.msk.bf16.mxu0 %vm7906_vm9, %v3184_v9  ;;  %v12021_v9 = vld [vmem:[#allocation6_spill] sm:$0xff] }
 0x16e   : > { %3807 = vmatpush2.bf16.msra.mxu0 %v3248_v10  ;;  %3889 = vmatpush1.bf16.msra.mxu1 %v1400_v0  ;;  %v3134_v27 = vpop.permute.xlu1 %3133 }
 0x16f   : > { %v8279_v21 = vpop.permute.xlu0 %2523  ;;  %3808 = vmatprep.subr.bf16.mxu0 %v7161_v17  ;;  %v3285_v17 = vsel %vm8110_vm14, %v8277_v33, 0  ;;  %v3185_v15 = vsel %vm2199_vm7, %v3132_v56, %v3134_v27 }
 0x170   : > { %1038 = vrot.lane.b32.xlu1 %v8217_v8, %s6577_s16  ;;  %v8286_v63 = vsel %vm1066_vm12, %v2522_v16, %v8279_v21  ;;  %v3250_v54 = vsel %vm8133_vm11, %v3185_v15, 0 }
 0x171   : > { %12020 = vst [vmem:[#allocation9_spill] sm:$0xff] %v8286_v63  ;;  %1036 = vrot.lane.b32.xlu0 %v8232_v53, %s6577_s16  ;;  %6360 = vmatprep.subr.msk.bf16.mxu1 %vm8095_vm3, %v8286_v63  ;;  %v407_v63 = vadd.s32 1664, %v6803_v35 }
 0x172   : > { %3891 = vmatpush2.bf16.msra.mxu1 %v3285_v17  ;;  %v2967_v16 = vpop.permute.xlu1 %2966  ;;  %3809 = vmatpush2.bf16.msra.mxu0 %v12021_v9  ;;  %v12023_v9 = vld [vmem:[#allocation10_spill] sm:$0xff] }
 0x173   : > { %v8304_v10 = vpop.permute.xlu0 %3135  ;;  %v3021_v12 = vsel %vm12022_vm2, %v7797_v36, %v2967_v16  ;;  %vm12026_vm2 = vmmov %vm12017_vm0 }
 0x174   : > { %1462 = vrot.lane.b32.xlu1 %v8290_v52, %s6576_s15  ;;  %v3186_v0 = vsel %vm2199_vm7, %v3134_v27, %v8304_v10  ;;  %v3087_v15 = vsel %vm8046_vm5, %v3021_v12, 0 }
 0x175   : > { %1460 = vrot.lane.b32.xlu0 %v8300_v11, %s6576_s15  ;;  %6361 = vmatprep.subr.msk.bf16.mxu1 %vm8125_vm15, %v3186_v0  ;;  %v12025_v0 = vld [vmem:[#allocation8_spill] sm:$0xff] }
 0x176   : > { %3893 = vmatpush2.bf16.msra.mxu1 %v3250_v54  ;;  %v2971_v56 = vpop.permute.xlu1 %2970 }
 0x177   : > { %v2969_v17 = vpop.permute.xlu0 %2968  ;;  %3894 = vmatprep.subr.bf16.mxu1 %v12023_v9 }
 0x178   : > { %2171 = vrot.lane.b32.xlu1 %v8217_v8, %s6578_s17  ;;  %v3022_v27 = vsel %vm12017_vm0, %v2967_v16, %v2969_v17  ;;  %v3023_v36 = vsel %vm12024_vm8, %v2969_v17, %v2971_v56  ;;  %v406_v16 = vadd.s32 1536, %v6803_v35 }
 0x179   : > { %2169 = vrot.lane.b32.xlu0 %v8232_v53, %s6578_s17  ;;  %6349 = vmatprep.subr.msk.bf16.mxu0 %vm7982_vm1, %v3022_v27  ;;  %v3089_v17 = vsel %vm8110_vm14, %v3023_v36, 0 }
 0x17a   : > { %3811 = vmatpush2.bf16.msra.mxu0 %v3087_v15  ;;  %3895 = vmatpush2.bf16.msra.mxu1 %v12025_v0  ;;  %v2812_v54 = vpop.permute.xlu1 %2811  ;;  %v514_v0 = vand.u32 63, %v406_v16 }
 0x17b   : > { %v8330_v9 = vpop.permute.xlu0 %2972  ;;  %6350 = vmatprep.subr.msk.bf16.mxu0 %vm7906_vm9, %v7925_v2  ;;  %v2926_v2 = vsel %vm7947_vm13, %v7893_v49, 0  ;;  %v2863_v27 = vsel %vm1617_vm4, %v7859_v20, %v2812_v54  ;;  %v2928_v49 = vsel %vm8133_vm11, %v7933_v1, 0 }
 0x17c   : > { %1042 = vrot.lane.b32.xlu1 %v8290_v52, %s6577_s16  ;;  %v3024_v12 = vsel %vm12026_vm2, %v2971_v56, %v8330_v9  ;;  %vm8362_vm0 = vcmp.lt.s32.totalorder %v514_v0, 63 }
 0x17d   : > { %1040 = vrot.lane.b32.xlu0 %v8300_v11, %s6577_s16  ;;  %6362 = vmatprep.subr.msk.bf16.mxu1 %vm8095_vm3, %v3024_v12  ;;  %v521_v12 = vand.u32 63, %v407_v63 }
 0x17e   : > { %3813 = vmatpush2.bf16.msra.mxu0 %v2926_v2  ;;  %3897 = vmatpush2.bf16.msra.mxu1 %v3089_v17  ;;  %v2814_v15 = vpop.permute.xlu1 %2813  ;;  %v3323_v2 = vsel %vm8133_vm11, %v2863_v27, 0  ;;  %v408_v17 = vadd.s32 1792, %v6803_v35 }
 0x17f   : > { %v2683_v56 = vpop.permute.xlu0 %2682  ;;  %3814 = vmatprep.subr.bf16.mxu0 %v8006_v26  ;;  %6363 = vmatprep.subr.msk.bf16.mxu1 %vm8125_vm15, %v2863_v27  ;;  %vm8366_vm8 = vcmp.lt.s32.totalorder %v521_v12, 63  ;;  %v8426_v58 = vsel %vm1617_vm4, %v2812_v54, %v2814_v15  ;;  %v2349_v54 = vsel %vm8133_vm11, %v8215_v59, 0 }
 0x180   : > { %2175 = vrot.lane.b32.xlu1 %v8290_v52, %s6578_s17  ;;  %v2734_v63 = vsel %vm1486_vm6, %v7935_v48, %v2683_v56  ;;  %vm1754_vm2 = vmpackc.low %vm8366_vm8, %vm8362_vm0 }
 0x181   : > { %2173 = vrot.lane.b32.xlu0 %v8300_v11, %s6578_s17 }
 0x182   : > { %3815 = vmatpush2.bf16.msra.mxu0 %v7929_v14  ;;  %3899 = vmatpush2.bf16.msra.mxu1 %v2928_v49  ;;  %v8373_v36 = vpop.permute.xlu1 %2684  ;;  %v12031_v14 = vld [vmem:[#allocation7_spill] sm:$0xff] }
 0x183   : > { %v8375_v16 = vpop.permute.xlu0 %1577  ;;  %6351 = vmatprep.subr.msk.bf16.mxu0 %vm7982_vm1, %v8236_v61  ;;  %3900 = vmatprep.subr.bf16.mxu1 %v2734_v63  ;;  %v2636_v1 = vsel %vm8046_vm5, %v12031_v14, 0  ;;  %v1770_v61 = vsel %vm1754_vm2, 65537, %v11935_v62  ;;  %vm8416_vm1 = vcmp.gt.s32.totalorder %v521_v12, 0  ;;  %v8467_v49 = vsel %vm1486_vm6, %v2683_v56, %v8373_v36 }
 0x184   : > { %2006 = vrot.lane.b32.xlu1 %v8232_v53, %s6579_s18  ;;  %v1835_v51 = vrot.slane %v1770_v61, %v6829_v43  ;;  %v528_v14 = vand.u32 63, %v408_v17 }
 0x185   : > { %2004 = vrot.lane.b32.xlu0 %v7757_v24, %s6579_s18 }
 0x186   : > { %3817 = vmatpush2.bf16.msra.mxu0 %v2636_v1  ;;  %3901 = vmatpush2.bf16.msra.mxu1 %v7967_v7  ;;  %v8392_v48 = vpop.permute.xlu1 %2817  ;;  %v2347_v7 = vsel %vm7947_vm13, %v8162_v23, 0  ;;  %vm8439_vm13 = vcmp.ne.s16.totalorder %v1835_v51, 0  ;;  %vm8509_vm14 = vcmp.gt.s32.totalorder %v528_v14, 0  ;;  %vm8565_vm8 = vcmp.lt.s32.totalorder %v528_v14, 63 }
 0x187   : > { %v2816_v31 = vpop.permute.xlu0 %2815  ;;  %6352 = vmatprep.subr.msk.bf16.mxu0 %vm7906_vm9, %v8203_v13  ;;  %6364 = vmatprep.subr.msk.bf16.mxu1 %vm8095_vm3, %v8277_v33  ;;  %vm8412_vm9 = vcmp.gt.s32.totalorder %v514_v0, 0  ;;  %v8423_v33 = vsel %vm1617_vm4, %v8206_v46, %v8375_v16  ;;  %v1831_v46 = vrot.slane %v1770_v61, %v6833_v44  ;;  %v409_v0 = vadd.s32 1920, %v6803_v35 }
 0x188   : > { %2008 = vrot.lane.b32.xlu1 %v8217_v8, %s6579_s18  ;;  %vm1204_vm5 = vmpackc.low %vm8416_vm1, %vm8412_vm9  ;;  %v8463_v12 = vsel %vm1617_vm4, %v2814_v15, %v2816_v31  ;;  %v8471_v20 = vsel %vm1617_vm4, %v2816_v31, %v8392_v48 }
 0x189   : > { %1587 = vrot.lane.b32.xlu0 %v8232_v53, %s6575_s14  ;;  %v1220_v27 = vsel %vm1204_vm5, 65537, %v11935_v62  ;;  %vm8485_vm3 = vcmp.ne.s16.totalorder %v1831_v46, 0  ;;  %v535_v1 = vand.u32 63, %v409_v0  ;;  %v8526_v46 = vcombine.high %v8173_v40, %v8176_v4  ;;  %v8553_v0 = vld [vmem:[%s6642_s10 + $0x50] sm:$0xff] }
 0x18a   : > { %3819 = vmatpush2.bf16.msra.mxu0 %v2347_v7  ;;  %3903 = vmatpush2.bf16.msra.mxu1 %v2638_v47  ;;  %v8428_v55 = vpop.permute.xlu1 %1450  ;;  %v1285_v56 = vrot.slane %v1220_v27, %v6829_v43  ;;  %v3325_v26 = vsel %vm8485_vm3, %v8463_v12, 0  ;;  %v1281_v5 = vrot.slane %v1220_v27, %v6833_v44 }
 0x18b   : > { %v1449_v23 = vpop.permute.xlu0 %1448  ;;  %6365 = vmatprep.subr.msk.bf16.mxu1 %vm8125_vm15, %v8423_v33  ;;  %6366 = vmatprep.subr.msk.bf16.mxu0 %vm8125_vm15, %v8426_v58  ;;  %vm8513_vm15 = vcmp.gt.s32.totalorder %v535_v1, 0  ;;  %12046 = vst [vmem:[#allocation6_spill] sm:$0xff] %v8526_v46  ;;  %vm8569_vm2 = vcmp.lt.s32.totalorder %v535_v1, 63 }
 0x18c   : > { %1589 = vrot.lane.b32.xlu1 %v8217_v8, %s6575_s14  ;;  %v8501_v31 = vsel %vm1486_vm6, %v1449_v23, %v8428_v55  ;;  %vm8520_vm11 = vcmp.ne.s16.totalorder %v1285_v56, 0  ;;  %vm1205_vm0 = vmpackc.low %vm8513_vm15, %vm8509_vm14  ;;  %vm8574_vm9 = vcmp.ne.s16.totalorder %v1281_v5, 0 }
 0x18d   : > { %2010 = vrot.lane.b32.xlu0 %v8300_v11, %s6579_s18  ;;  %3821 = vmatmul.mubr.bf16.vlgmr.msra.gmra.mxu0 %v8452_v22  ;;  %v1221_v1 = vsel %vm1205_vm0, 65537, %v11935_v62  ;;  %vm1755_vm1 = vmpackc.low %vm8569_vm2, %vm8565_vm8  ;;  %vm12062_vm8 = vcmask 7168  }
 0x18e   : > { %3905 = vmatpush2.bf16.msra.mxu1 %v2349_v54  ;;  %3930 = vmatpush1.bf16.msra.mxu0 %v3323_v2  ;;  %v8473_v59 = vpop.permute.xlu1 %2688  ;;  %v8535_v54 = vsel %vm1486_vm6, %v8017_v30, %v1449_v23  ;;  %v8556_v30 = vld [vmem:[%s6642_s10 + $0xd0] sm:$0xff]  ;;  %v1289_v5 = vrot.slane %v1221_v1, %v6833_v44  ;;  %vm12063_vm2 = vmmov %vm12062_vm8 }
 0x18f   : > { %v2687_v50 = vpop.permute.xlu0 %2686  ;;  %3931 = vmatprep.subr.bf16.mxu0 %v8467_v49  ;;  %6379 = vmatprep.subr.msk.bf16.mxu1 %vm8439_vm13, %v8471_v20  ;;  %v8596_v14 = vcombine.low %v8553_v0, %v8556_v30 }
 0x190   : > { %2533 = vrot.lane.b32.xlu1 %v8198_v57, %s6577_s16  ;;  %3949 = vmatprep.mubr.bf16.mxu0 %v11935_v62  ;;  %v8505_v61 = vsel %vm1486_vm6, %v2687_v50, %v8473_v59  ;;  %v8539_v2 = vsel %vm1486_vm6, %v8373_v36, %v2687_v50  ;;  %vm8638_vm14 = vcmp.ne.s16.totalorder %v1289_v5, 0 }
 0x191   : > { %1591 = vrot.lane.b32.xlu0 %v8300_v11, %s6575_s14  ;;  %3907 = vmatmul.mubr.bf16.vlgmr.msra.gmra.mxu1 %v8452_v22  ;;  %12053 = vst [vmem:[#allocation10_spill] sm:$0xff] %v8596_v14 }
 0x192   : > { %3932 = vmatpush1.bf16.msra.mxu0 %v2734_v63  ;;  %4016 = vmatpush1.bf16.msra.mxu1 %v3325_v26  ;;  %v1031_v51 = vpop.permute.xlu1 %1030 }
 0x193   : > { %v1029_v7 = vpop.permute.xlu0 %1028  ;;  %3960 = vmatprep.subr.bf16.mxu0 %v8501_v31  ;;  %4017 = vmatprep.subr.bf16.mxu1 %v8505_v61 }
 0x194   : > { %3145 = vrot.lane.b32.xlu1 %v8198_v57, %s6578_s17  ;;  %4035 = vmatprep.mubr.bf16.mxu1 %v11935_v62  ;;  %v8543_v40 = vsel %vm1066_vm12, %v8093_v34, %v1029_v7  ;;  %v8548_v4 = vsel %vm1066_vm12, %v1029_v7, %v1031_v51  ;;  %v1293_v7 = vrot.slane %v1221_v1, %v6829_v43 }
 0x195   : > { %2535 = vrot.lane.b32.xlu0 %v8188_v37, %s6577_s16  ;;  %6367 = vmatmul.mubr.msk.bf16.vlgmr.msra.gmra.mxu0 %vm3440_vm10, %v7996_v42  ;;  %v2313_v26 = vsel %vm8574_vm9, %v8543_v40, 0 }
 0x196   : > { %3961 = vmatpush1.bf16.msra.mxu0 %v8535_v54  ;;  %4018 = vmatpush1.bf16.msra.mxu1 %v8539_v2  ;;  %v8550_v17 = vpop.permute.xlu1 %1454  ;;  %vm8623_vm5 = vcmp.ne.s16.totalorder %v1293_v7, 0 }
 0x197   : > { %v1453_v34 = vpop.permute.xlu0 %1452  ;;  %6368 = vmatprep.subr.msk.bf16.mxu0 %vm8520_vm11, %v8548_v4  ;;  %3992 = vmatprep.mubr.bf16.mxu0 %v8043_v3 }
 0x198   : > { %2537 = vrot.lane.b32.xlu1 %v8526_v46, %s6577_s16  ;;  %v8582_v27 = vsel %vm1486_vm6, %v1453_v34, %v8550_v17  ;;  %v8586_v56 = vsel %vm1486_vm6, %v8428_v55, %v1453_v34 }
 0x199   : > { %3147 = vrot.lane.b32.xlu0 %v8188_v37, %s6578_s17  ;;  %4046 = vmatprep.subr.bf16.mxu1 %v8582_v27 }
 0x19a   : > { %3963 = vmatpush1.bf16.msra.mxu0 %v2313_v26  ;;  %6380 = vmatmul.mubr.msk.bf16.vlgmr.msra.gmra.mxu1 %vm3440_vm10, %v7996_v42  ;;  %v2164_v55 = vpop.permute.xlu1 %2163 }
 0x19b   : > { %4047 = vmatpush1.bf16.msra.mxu1 %v8586_v56  ;;  %v2162_v47 = vpop.permute.xlu0 %2161  ;;  %4078 = vmatprep.mubr.bf16.mxu1 %v8043_v3  ;;  %v1771_v3 = vsel %vm1755_vm1, 65537, %v11935_v62  ;;  %vm12064_vm1 = vmmov %vm12063_vm2 }
 0x19c   : > { %v2212_v63 = vsel %vm2199_vm7, %v8123_v19, %v2162_v47  ;;  %3149 = vrot.lane.b32.xlu1 %v8526_v46, %s6578_s17  ;;  %v2213_v42 = vsel %vm2199_vm7, %v2162_v47, %v2164_v55  ;;  %v1843_v23 = vrot.slane %v1771_v3, %v6829_v43 }
 0x19d   : > { %2539 = vrot.lane.b32.xlu0 %v8596_v14, %s6577_s16  ;;  %6369 = vmatprep.subr.msk.bf16.mxu0 %vm8439_vm13, %v2213_v42  ;;  %v2278_v34 = vsel %vm8485_vm3, %v2212_v63, 0  ;;  %v1839_v63 = vrot.slane %v1771_v3, %v6833_v44 }
 0x19e   : > { %3965 = vmatpush1.bf16.msra.mxu0 %v2278_v34  ;;  %v8621_v19 = vpop.permute.xlu1 %1034  ;;  %vm8653_vm15 = vcmp.ne.s16.totalorder %v1843_v23, 0 }
 0x19f   : > { %v1033_v26 = vpop.permute.xlu0 %1032  ;;  %3966 = vmatprep.subr.bf16.mxu0 %v7699_v32  ;;  %vm8661_vm0 = vcmp.ne.s16.totalorder %v1839_v63, 0 }
 0x1a0   : > { %v8630_v1 = vsel %vm1066_vm12, %v1031_v51, %v1033_v26  ;;  %2982 = vrot.lane.b32.xlu1 %v8068_v28, %s6579_s18  ;;  %v8636_v47 = vsel %vm1066_vm12, %v1033_v26, %v8621_v19 }
 0x1a1   : > { %3151 = vrot.lane.b32.xlu0 %v8596_v14, %s6578_s17  ;;  %6381 = vmatprep.subr.msk.bf16.mxu1 %vm8623_vm5, %v8636_v47  ;;  %v2315_v32 = vsel %vm8638_vm14, %v8630_v1, 0 }
 0x1a2   : > { %4049 = vmatpush1.bf16.msra.mxu1 %v2315_v32  ;;  %v8651_v51 = vpop.permute.xlu1 %2167  ;;  %3967 = vmatpush1.bf16.msra.mxu0 %v7226_v25 }
 0x1a3   : > { %v2166_v5 = vpop.permute.xlu0 %2165 }
 0x1a4   : > { %v2214_v34 = vsel %vm2199_vm7, %v2164_v55, %v2166_v5  ;;  %2986 = vrot.lane.b32.xlu1 %v8188_v37, %s6579_s18  ;;  %v2215_v26 = vsel %vm2199_vm7, %v2166_v5, %v8651_v51  ;;  %v12067_v37 = vld [vmem:[#allocation2_spill] sm:$0xff] }
 0x1a5   : > { %2984 = vrot.lane.b32.xlu0 %v8198_v57, %s6579_s18  ;;  %6382 = vmatprep.subr.msk.bf16.mxu1 %vm8653_vm15, %v2215_v26  ;;  %v2280_v25 = vsel %vm8661_vm0, %v2214_v34, 0  ;;  %v8701_v26 = vld [vmem:[%s6642_s10 + $0x58] sm:$0xff] }
 0x1a6   : > { %4051 = vmatpush1.bf16.msra.mxu1 %v2280_v25  ;;  %v1999_v55 = vpop.permute.xlu1 %1998  ;;  %v8704_v25 = vld [vmem:[%s6642_s10 + $0xd8] sm:$0xff] }
 0x1a7   : > { %v1997_v23 = vpop.permute.xlu0 %1996  ;;  %4052 = vmatprep.subr.bf16.mxu1 %v7767_v41  ;;  %v9049_v36 = vcombine.high %v8701_v26, %v8704_v25 }
 0x1a8   : > { %v2048_v63 = vsel %vm12062_vm8, %v8179_v45, %v1997_v23  ;;  %2827 = vrot.lane.b32.xlu1 %v8526_v46, %s6575_s14  ;;  %v2049_v32 = vsel %vm12063_vm2, %v1997_v23, %v1999_v55  ;;  %vm12065_vm8 = vmmov %vm12064_vm1 }
 0x1a9   : > { %2988 = vrot.lane.b32.xlu0 %v8526_v46, %s6579_s18  ;;  %6370 = vmatprep.subr.msk.bf16.mxu0 %vm8520_vm11, %v2049_v32  ;;  %v2115_v5 = vsel %vm8574_vm9, %v2048_v63, 0  ;;  %vm12070_vm2 = vmmov %vm12064_vm1  ;;  %12094 = vst [vmem:[#allocation2_spill] sm:$0xff] %v9049_v36 }
 0x1aa   : > { %3969 = vmatpush1.bf16.msra.mxu0 %v2115_v5  ;;  %v2001_v41 = vpop.permute.xlu1 %2000  ;;  %4053 = vmatpush1.bf16.msra.mxu1 %v7684_v38  ;;  %v1952_v38 = vsel %vm8485_vm3, %v8423_v33, 0  ;;  %v8716_v33 = vcombine.low %v8701_v26, %v8704_v25  ;;  %v340_v5 = vld [vmem:[%s6647_s13 + $0x58] sm:$0xff] }
 0x1ab   : > { %v1580_v45 = vpop.permute.xlu0 %1579 }
 0x1ac   : > { %2829 = vrot.lane.b32.xlu1 %v8596_v14, %s6575_s14  ;;  %v8690_v34 = vsel %vm1617_vm4, %v8375_v16, %v1580_v45  ;;  %v2050_v16 = vsel %vm12064_vm1, %v1999_v55, %v2001_v41  ;;  %12066 = vst [vmem:[#allocation8_spill] sm:$0xff] %v8716_v33 }
 0x1ad   : > { %2698 = vrot.lane.b32.xlu0 %v8526_v46, %s6576_s15  ;;  %6371 = vmatprep.subr.msk.bf16.mxu0 %vm8439_vm13, %v8690_v34  ;;  %v2117_v55 = vsel %vm8638_vm14, %v2050_v16, 0 }
 0x1ae   : > { %3971 = vmatpush1.bf16.msra.mxu0 %v1952_v38  ;;  %v1582_v23 = vpop.permute.xlu1 %1581  ;;  %v356_v38 = vld [vmem:[%s6647_s13 + $0xd8] sm:$0xff] }
 0x1af   : > { %v8707_v63 = vpop.permute.xlu0 %2002  ;;  %3972 = vmatprep.subr.bf16.mxu0 %v8535_v54  ;;  %v8726_v54 = vcombine.high %v8553_v0, %v8556_v30  ;;  %v8745_v30 = vcombine.low %v340_v5, %v356_v38 }
 0x1b0   : > { %2700 = vrot.lane.b32.xlu1 %v8596_v14, %s6576_s15  ;;  %v2051_v32 = vsel %vm12065_vm8, %v2001_v41, %v8707_v63  ;;  %v8731_v41 = vsel %vm1617_vm4, %v1580_v45, %v1582_v23  ;;  %v8760_v45 = vcombine.high %v8271_v60, %v8274_v29  ;;  %vm12072_vm8 = vmmov %vm12064_vm1 }
 0x1b1   : > { %1593 = vrot.lane.b32.xlu0 %v8290_v52, %s6575_s14  ;;  %6383 = vmatprep.subr.msk.bf16.mxu1 %vm8623_vm5, %v2051_v32 }
 0x1b2   : > { %3973 = vmatpush1.bf16.msra.mxu0 %v12067_v37  ;;  %4055 = vmatpush1.bf16.msra.mxu1 %v2117_v55  ;;  %v2526_v46 = vpop.permute.xlu1 %2525  ;;  %v1402_v37 = vsel %vm8574_vm9, %v8108_v39, 0  ;;  %v8799_v55 = vld [vmem:[%s6647_s13 + $0x60] sm:$0xff] }
 0x1b3   : > { %v8734_v28 = vpop.permute.xlu0 %1583  ;;  %6372 = vmatprep.subr.msk.bf16.mxu0 %vm8520_vm11, %v8543_v40  ;;  %v1954_v40 = vsel %vm8661_vm0, %v8731_v41, 0  ;;  %v8764_v16 = vsel %vm1066_vm12, %v8279_v21, %v2526_v46 }
 0x1b4   : > { %2833 = vrot.lane.b32.xlu1 %v8716_v33, %s6575_s14  ;;  %v8743_v0 = vsel %vm1617_vm4, %v1582_v23, %v8734_v28  ;;  %v3287_v60 = vsel %vm8574_vm9, %v8764_v16, 0 }
 0x1b5   : > { %2831 = vrot.lane.b32.xlu0 %v8726_v54, %s6575_s14  ;;  %6384 = vmatprep.subr.msk.bf16.mxu1 %vm8653_vm15, %v8743_v0  ;;  %v2353_v42 = vsel %vm8661_vm0, %v8743_v0, 0 }
 0x1b6   : > { %3975 = vmatpush1.bf16.msra.mxu0 %v1402_v37  ;;  %4057 = vmatpush1.bf16.msra.mxu1 %v1954_v40  ;;  %v3138_v23 = vpop.permute.xlu1 %3137 }
 0x1b7   : > { %v2528_v32 = vpop.permute.xlu0 %2527  ;;  %4058 = vmatprep.subr.bf16.mxu1 %v8586_v56  ;;  %v3187_v29 = vsel %vm2199_vm7, %v8304_v10, %v3138_v23 }
 0x1b8   : > { %1466 = vrot.lane.b32.xlu1 %v8745_v30, %s6576_s15  ;;  %v8770_v39 = vsel %vm1066_vm12, %v2526_v46, %v2528_v32  ;;  %v3252_v10 = vsel %vm8485_vm3, %v3187_v29, 0 }
 0x1b9   : > { %1464 = vrot.lane.b32.xlu0 %v8760_v45, %s6576_s15  ;;  %6373 = vmatprep.subr.msk.bf16.mxu0 %vm8520_vm11, %v8770_v39  ;;  %v2642_v6 = vsel %vm8638_vm14, %v8770_v39, 0 }
 0x1ba   : > { %3977 = vmatpush2.bf16.msra.mxu0 %v3287_v60  ;;  %4059 = vmatpush1.bf16.msra.mxu1 %v8501_v31  ;;  %v2530_v21 = vpop.permute.xlu1 %2529  ;;  %v1404_v31 = vsel %vm8638_vm14, %v8548_v4, 0 }
 0x1bb   : > { %v3140_v46 = vpop.permute.xlu0 %3139  ;;  %6385 = vmatprep.subr.msk.bf16.mxu1 %vm8623_vm5, %v8630_v1  ;;  %v8802_v1 = vld [vmem:[%s6647_s13 + $0xe0] sm:$0xff]  ;;  %v8805_v37 = vsel %vm1066_vm12, %v2528_v32, %v2530_v21  ;;  %v8828_v32 = vcombine.high %v340_v5, %v356_v38 }
 0x1bc   : > { %2704 = vrot.lane.b32.xlu1 %v8716_v33, %s6576_s15  ;;  %v3188_v56 = vsel %vm2199_vm7, %v3138_v23, %v3140_v46  ;;  %v8818_v60 = vcombine.low %v8799_v55, %v8802_v1 }
 0x1bd   : > { %2702 = vrot.lane.b32.xlu0 %v8726_v54, %s6576_s15  ;;  %6374 = vmatprep.subr.msk.bf16.mxu0 %vm8439_vm13, %v3188_v56  ;;  %v12069_v56 = vld [vmem:[#allocation11_spill] sm:$0xff] }
 0x1be   : > { %3979 = vmatpush2.bf16.msra.mxu0 %v3252_v10  ;;  %4061 = vmatpush1.bf16.msra.mxu1 %v1404_v31  ;;  %v3142_v40 = vpop.permute.xlu1 %3141 }
 0x1bf   : > { %v8807_v23 = vpop.permute.xlu0 %2531  ;;  %3980 = vmatprep.subr.bf16.mxu0 %v7665_v18  ;;  %v3289_v18 = vsel %vm8638_vm14, %v8805_v37, 0  ;;  %v3189_v29 = vsel %vm2199_vm7, %v3140_v46, %v3142_v40 }
 0x1c0   : > { %1046 = vrot.lane.b32.xlu1 %v8745_v30, %s6577_s16  ;;  %v8814_v4 = vsel %vm1066_vm12, %v2530_v21, %v8807_v23  ;;  %v3254_v5 = vsel %vm8661_vm0, %v3189_v29, 0 }
 0x1c1   : > { %12068 = vst [vmem:[#allocation7_spill] sm:$0xff] %v8814_v4  ;;  %1044 = vrot.lane.b32.xlu0 %v8760_v45, %s6577_s16  ;;  %6386 = vmatprep.subr.msk.bf16.mxu1 %vm8623_vm5, %v8814_v4  ;;  %v411_v4 = vadd.s32 2176, %v6803_v35 }
 0x1c2   : > { %4063 = vmatpush2.bf16.msra.mxu1 %v3289_v18  ;;  %v2975_v21 = vpop.permute.xlu1 %2974  ;;  %3981 = vmatpush2.bf16.msra.mxu0 %v12069_v56  ;;  %v12071_v56 = vld [vmem:[#allocation4_spill] sm:$0xff] }
 0x1c3   : > { %v8832_v10 = vpop.permute.xlu0 %3143  ;;  %v3025_v38 = vsel %vm12070_vm2, %v8330_v9, %v2975_v21  ;;  %vm12074_vm2 = vmmov %vm12064_vm1 }
 0x1c4   : > { %1470 = vrot.lane.b32.xlu1 %v8818_v60, %s6576_s15  ;;  %v3190_v31 = vsel %vm2199_vm7, %v3142_v40, %v8832_v10  ;;  %v3091_v29 = vsel %vm8574_vm9, %v3025_v38, 0 }
 0x1c5   : > { %1468 = vrot.lane.b32.xlu0 %v8828_v32, %s6576_s15  ;;  %6387 = vmatprep.subr.msk.bf16.mxu1 %vm8653_vm15, %v3190_v31  ;;  %v12073_v31 = vld [vmem:[#allocation12_spill] sm:$0xff] }
 0x1c6   : > { %4065 = vmatpush2.bf16.msra.mxu1 %v3254_v5  ;;  %v2979_v46 = vpop.permute.xlu1 %2978 }
 0x1c7   : > { %v2977_v18 = vpop.permute.xlu0 %2976  ;;  %4066 = vmatprep.subr.bf16.mxu1 %v12071_v56 }
 0x1c8   : > { %2179 = vrot.lane.b32.xlu1 %v8745_v30, %s6578_s17  ;;  %v3026_v40 = vsel %vm12064_vm1, %v2975_v21, %v2977_v18  ;;  %v3027_v9 = vsel %vm12072_vm8, %v2977_v18, %v2979_v46  ;;  %v410_v21 = vadd.s32 2048, %v6803_v35 }
 0x1c9   : > { %2177 = vrot.lane.b32.xlu0 %v8760_v45, %s6578_s17  ;;  %6375 = vmatprep.subr.msk.bf16.mxu0 %vm8520_vm11, %v3026_v40  ;;  %v3093_v18 = vsel %vm8638_vm14, %v3027_v9, 0 }
 0x1ca   : > { %3983 = vmatpush2.bf16.msra.mxu0 %v3091_v29  ;;  %4067 = vmatpush2.bf16.msra.mxu1 %v12073_v31  ;;  %v2820_v5 = vpop.permute.xlu1 %2819  ;;  %v542_v31 = vand.u32 63, %v410_v21 }
 0x1cb   : > { %v8858_v56 = vpop.permute.xlu0 %2980  ;;  %6376 = vmatprep.subr.msk.bf16.mxu0 %vm8439_vm13, %v8463_v12  ;;  %v2930_v12 = vsel %vm8485_vm3, %v8426_v58, 0  ;;  %v2867_v40 = vsel %vm1617_vm4, %v8392_v48, %v2820_v5  ;;  %v2932_v58 = vsel %vm8661_vm0, %v8471_v20, 0 }
 0x1cc   : > { %1050 = vrot.lane.b32.xlu1 %v8818_v60, %s6577_s16  ;;  %v3028_v38 = vsel %vm12074_vm2, %v2979_v46, %v8858_v56  ;;  %vm8890_vm1 = vcmp.lt.s32.totalorder %v542_v31, 63 }
 0x1cd   : > { %1048 = vrot.lane.b32.xlu0 %v8828_v32, %s6577_s16  ;;  %6388 = vmatprep.subr.msk.bf16.mxu1 %vm8623_vm5, %v3028_v38  ;;  %v549_v38 = vand.u32 63, %v411_v4 }
 0x1ce   : > { %3985 = vmatpush2.bf16.msra.mxu0 %v2930_v12  ;;  %4069 = vmatpush2.bf16.msra.mxu1 %v3093_v18  ;;  %v2822_v29 = vpop.permute.xlu1 %2821  ;;  %v412_v12 = vadd.s32 2304, %v6803_v35  ;;  %v413_v18 = vadd.s32 2432, %v6803_v35 }
 0x1cf   : > { %v2691_v46 = vpop.permute.xlu0 %2690  ;;  %3986 = vmatprep.subr.bf16.mxu0 %v8539_v2  ;;  %6389 = vmatprep.subr.msk.bf16.mxu1 %vm8653_vm15, %v2867_v40  ;;  %vm8894_vm8 = vcmp.lt.s32.totalorder %v549_v38, 63  ;;  %v8954_v15 = vsel %vm1617_vm4, %v2820_v5, %v2822_v29  ;;  %v3327_v5 = vsel %vm8661_vm0, %v2867_v40, 0 }
 0x1d0   : > { %2183 = vrot.lane.b32.xlu1 %v8818_v60, %s6578_s17  ;;  %v2738_v4 = vsel %vm1486_vm6, %v8473_v59, %v2691_v46  ;;  %vm1756_vm2 = vmpackc.low %vm8894_vm8, %vm8890_vm1  ;;  %v556_v2 = vand.u32 63, %v412_v12  ;;  %v9081_v12 = vld [vmem:[%s6642_s10 + $0x60] sm:$0xff] }
 0x1d1   : > { %2181 = vrot.lane.b32.xlu0 %v8828_v32, %s6578_s17 }
 0x1d2   : > { %3987 = vmatpush2.bf16.msra.mxu0 %v8467_v49  ;;  %4071 = vmatpush2.bf16.msra.mxu1 %v2932_v58  ;;  %v8901_v9 = vpop.permute.xlu1 %2692  ;;  %v12079_v49 = vld [vmem:[#allocation9_spill] sm:$0xff]  ;;  %vm9032_vm14 = vcmp.gt.s32.totalorder %v556_v2, 0  ;;  %vm9093_vm8 = vcmp.lt.s32.totalorder %v556_v2, 63 }
 0x1d3   : > { %v8903_v21 = vpop.permute.xlu0 %1585  ;;  %6377 = vmatprep.subr.msk.bf16.mxu0 %vm8520_vm11, %v8764_v16  ;;  %4072 = vmatprep.subr.bf16.mxu1 %v2738_v4  ;;  %v2640_v20 = vsel %vm8574_vm9, %v12079_v49, 0  ;;  %v1772_v16 = vsel %vm1756_vm2, 65537, %v11935_v62  ;;  %vm8944_vm11 = vcmp.gt.s32.totalorder %v549_v38, 0  ;;  %v8990_v38 = vsel %vm1486_vm6, %v2691_v46, %v8901_v9 }
 0x1d4   : > { %2014 = vrot.lane.b32.xlu1 %v8760_v45, %s6579_s18  ;;  %v1851_v50 = vrot.slane %v1772_v16, %v6829_v43  ;;  %v563_v49 = vand.u32 63, %v413_v18  ;;  %v9104_v18 = vld [vmem:[%s11824_s2 + $0x4] ss:$12 sps:$4 sm:$0xff]  }
 0x1d5   : > { %2012 = vrot.lane.b32.xlu0 %v8290_v52, %s6579_s18 }
 0x1d6   : > { %3989 = vmatpush2.bf16.msra.mxu0 %v2640_v20  ;;  %4073 = vmatpush2.bf16.msra.mxu1 %v8505_v61  ;;  %v8920_v59 = vpop.permute.xlu1 %2825  ;;  %v2351_v61 = vsel %vm8485_vm3, %v8690_v34, 0  ;;  %vm8967_vm3 = vcmp.ne.s16.totalorder %v1851_v50, 0  ;;  %vm9097_vm2 = vcmp.lt.s32.totalorder %v563_v49, 63 }
 0x1d7   : > { %v2824_v13 = vpop.permute.xlu0 %2823  ;;  %6378 = vmatprep.subr.msk.bf16.mxu0 %vm8439_vm13, %v8731_v41  ;;  %6390 = vmatprep.subr.msk.bf16.mxu1 %vm8623_vm5, %v8805_v37  ;;  %vm8940_vm13 = vcmp.gt.s32.totalorder %v542_v31, 0  ;;  %v8951_v37 = vsel %vm1617_vm4, %v8734_v28, %v8903_v21  ;;  %v1847_v28 = vrot.slane %v1772_v16, %v6833_v44  ;;  %v9057_v41 = vld [vmem:[%s11824_s2 + $0x8] ss:$12 sps:$4 sm:$0xff]  }
 0x1d8   : > { %2016 = vrot.lane.b32.xlu1 %v8745_v30, %s6579_s18  ;;  %vm1206_vm9 = vmpackc.low %vm8944_vm11, %vm8940_vm13  ;;  %v8986_v31 = vsel %vm1617_vm4, %v2822_v29, %v2824_v13  ;;  %v8994_v58 = vsel %vm1617_vm4, %v2824_v13, %v8920_v59 }
 0x1d9   : > { %1595 = vrot.lane.b32.xlu0 %v8760_v45, %s6575_s14  ;;  %v1222_v40 = vsel %vm1206_vm9, 65537, %v11935_v62  ;;  %vm9008_vm5 = vcmp.ne.s16.totalorder %v1847_v28, 0  ;;  %vm1757_vm11 = vmpackc.low %vm9097_vm2, %vm9093_vm8  ;;  %vm12111_vm8 = vcmask 7168  }
 0x1da   : > { %3991 = vmatpush2.bf16.msra.mxu0 %v2351_v61  ;;  %4075 = vmatpush2.bf16.msra.mxu1 %v2642_v6  ;;  %v8956_v7 = vpop.permute.xlu1 %1458  ;;  %v1301_v46 = vrot.slane %v1222_v40, %v6829_v43  ;;  %v3329_v48 = vsel %vm9008_vm5, %v8986_v31, 0  ;;  %v1297_v61 = vrot.slane %v1222_v40, %v6833_v44  ;;  %vm12112_vm2 = vmmov %vm12111_vm8 }
 0x1db   : > { %v1457_v34 = vpop.permute.xlu0 %1456  ;;  %6391 = vmatprep.subr.msk.bf16.mxu1 %vm8653_vm15, %v8951_v37  ;;  %6392 = vmatprep.subr.msk.bf16.mxu0 %vm8653_vm15, %v8954_v15  ;;  %vm9036_vm15 = vcmp.gt.s32.totalorder %v563_v49, 0 }
 0x1dc   : > { %1597 = vrot.lane.b32.xlu1 %v8745_v30, %s6575_s14  ;;  %v9024_v20 = vsel %vm1486_vm6, %v1457_v34, %v8956_v7  ;;  %vm9043_vm0 = vcmp.ne.s16.totalorder %v1301_v46, 0  ;;  %v9063_v28 = vsel %vm1486_vm6, %v8550_v17, %v1457_v34  ;;  %v9084_v17 = vld [vmem:[%s6642_s10 + $0xe0] sm:$0xff]  ;;  %vm1207_vm1 = vmpackc.low %vm9036_vm15, %vm9032_vm14  ;;  %vm9107_vm13 = vcmp.ne.s16.totalorder %v1297_v61, 0 }
 0x1dd   : > { %2018 = vrot.lane.b32.xlu0 %v8828_v32, %s6579_s18  ;;  %3993 = vmatmul.mubr.bf16.vlgmr.msra.gmra.mxu0 %v8452_v22  ;;  %v9129_v2 = vcombine.low %v9081_v12, %v9084_v17  ;;  %v1223_v49 = vsel %vm1207_vm1, 65537, %v11935_v62  ;;  %v1773_v34 = vsel %vm1757_vm11, 65537, %v11935_v62  ;;  %vm12113_vm11 = vmmov %vm12112_vm2 }
 0x1de   : > { %4077 = vmatpush2.bf16.msra.mxu1 %v2353_v42  ;;  %4102 = vmatpush1.bf16.msra.mxu0 %v3327_v5  ;;  %v8996_v0 = vpop.permute.xlu1 %2696 }
 0x1df   : > { %v2695_v3 = vpop.permute.xlu0 %2694  ;;  %4103 = vmatprep.subr.bf16.mxu0 %v8990_v38  ;;  %6405 = vmatprep.subr.msk.bf16.mxu1 %vm8967_vm3, %v8994_v58  ;;  %12102 = vst [vmem:[#allocation4_spill] sm:$0xff] %v9129_v2 }
 0x1e0   : > { %2541 = vrot.lane.b32.xlu1 %v8726_v54, %s6577_s16  ;;  %4121 = vmatprep.mubr.bf16.mxu0 %v11935_v62  ;;  %v9028_v13 = vsel %vm1486_vm6, %v2695_v3, %v8996_v0  ;;  %v9067_v26 = vsel %vm1486_vm6, %v8901_v9, %v2695_v3 }
 0x1e1   : > { %1599 = vrot.lane.b32.xlu0 %v8828_v32, %s6575_s14  ;;  %4079 = vmatmul.mubr.bf16.vlgmr.msra.gmra.mxu1 %v8452_v22 }
 0x1e2   : > { %4104 = vmatpush1.bf16.msra.mxu0 %v2738_v4  ;;  %4188 = vmatpush1.bf16.msra.mxu1 %v3329_v48  ;;  %v1039_v16 = vpop.permute.xlu1 %1038 }
 0x1e3   : > { %v1037_v50 = vpop.permute.xlu0 %1036  ;;  %4132 = vmatprep.subr.bf16.mxu0 %v9024_v20  ;;  %4189 = vmatprep.subr.bf16.mxu1 %v9028_v13 }
 0x1e4   : > { %3153 = vrot.lane.b32.xlu1 %v8726_v54, %s6578_s17  ;;  %4207 = vmatprep.mubr.bf16.mxu1 %v11935_v62  ;;  %v9071_v25 = vsel %vm1066_vm12, %v8621_v19, %v1037_v50  ;;  %v9076_v42 = vsel %vm1066_vm12, %v1037_v50, %v1039_v16  ;;  %v1309_v50 = vrot.slane %v1223_v49, %v6829_v43 }
 0x1e5   : > { %2543 = vrot.lane.b32.xlu0 %v8716_v33, %s6577_s16  ;;  %6393 = vmatmul.mubr.msk.bf16.vlgmr.msra.gmra.mxu0 %vm3440_vm10, %v9057_v41  ;;  %v2317_v48 = vsel %vm9107_vm13, %v9071_v25, 0 }
 0x1e6   : > { %4133 = vmatpush1.bf16.msra.mxu0 %v9063_v28  ;;  %4190 = vmatpush1.bf16.msra.mxu1 %v9067_v26  ;;  %v9078_v5 = vpop.permute.xlu1 %1462  ;;  %vm9156_vm9 = vcmp.ne.s16.totalorder %v1309_v50, 0 }
 0x1e7   : > { %v1461_v19 = vpop.permute.xlu0 %1460  ;;  %6394 = vmatprep.subr.msk.bf16.mxu0 %vm9043_vm0, %v9076_v42  ;;  %4164 = vmatprep.mubr.bf16.mxu0 %v9104_v18 }
 0x1e8   : > { %2545 = vrot.lane.b32.xlu1 %v9049_v36, %s6577_s16  ;;  %v9115_v40 = vsel %vm1486_vm6, %v1461_v19, %v9078_v5  ;;  %v9119_v46 = vsel %vm1486_vm6, %v8956_v7, %v1461_v19  ;;  %v1305_v19 = vrot.slane %v1223_v49, %v6833_v44  ;;  %v1859_v49 = vrot.slane %v1773_v34, %v6829_v43 }
 0x1e9   : > { %12101 = vst [vmem:[#allocation11_spill] sm:$0xff] %v9115_v40  ;;  %3155 = vrot.lane.b32.xlu0 %v8716_v33, %s6578_s17  ;;  %4218 = vmatprep.subr.bf16.mxu1 %v9115_v40 }
 0x1ea   : > { %4135 = vmatpush1.bf16.msra.mxu0 %v2317_v48  ;;  %6406 = vmatmul.mubr.msk.bf16.vlgmr.msra.gmra.mxu1 %vm3440_vm10, %v9057_v41  ;;  %v2172_v7 = vpop.permute.xlu1 %2171  ;;  %vm9171_vm14 = vcmp.ne.s16.totalorder %v1305_v19, 0  ;;  %vm9186_vm15 = vcmp.ne.s16.totalorder %v1859_v49, 0  ;;  %v9513_v19 = vld [vmem:[%s11824_s2] ss:$12 sps:$4 sm:$0xff]  }
 0x1eb   : > { %4219 = vmatpush1.bf16.msra.mxu1 %v9119_v46  ;;  %v2170_v22 = vpop.permute.xlu0 %2169  ;;  %4250 = vmatprep.mubr.bf16.mxu1 %v9104_v18 }
 0x1ec   : > { %v2216_v4 = vsel %vm2199_vm7, %v8651_v51, %v2170_v22  ;;  %3157 = vrot.lane.b32.xlu1 %v9049_v36, %s6578_s17  ;;  %v2217_v61 = vsel %vm2199_vm7, %v2170_v22, %v2172_v7 }
 0x1ed   : > { %2547 = vrot.lane.b32.xlu0 %v9129_v2, %s6577_s16  ;;  %6395 = vmatprep.subr.msk.bf16.mxu0 %vm8967_vm3, %v2217_v61  ;;  %v2282_v9 = vsel %vm9008_vm5, %v2216_v4, 0  ;;  %v1855_v61 = vrot.slane %v1773_v34, %v6833_v44 }
 0x1ee   : > { %4137 = vmatpush1.bf16.msra.mxu0 %v2282_v9  ;;  %v9154_v51 = vpop.permute.xlu1 %1042 }
 0x1ef   : > { %v1041_v22 = vpop.permute.xlu0 %1040  ;;  %4138 = vmatprep.subr.bf16.mxu0 %v8232_v53  ;;  %vm9194_vm1 = vcmp.ne.s16.totalorder %v1855_v61, 0 }
 0x1f0   : > { %v9163_v40 = vsel %vm1066_vm12, %v1039_v16, %v1041_v22  ;;  %2990 = vrot.lane.b32.xlu1 %v8596_v14, %s6579_s18  ;;  %v9169_v4 = vsel %vm1066_vm12, %v1041_v22, %v9154_v51 }
 0x1f1   : > { %3159 = vrot.lane.b32.xlu0 %v9129_v2, %s6578_s17  ;;  %6407 = vmatprep.subr.msk.bf16.mxu1 %vm9156_vm9, %v9169_v4  ;;  %v2319_v53 = vsel %vm9171_vm14, %v9163_v40, 0 }
 0x1f2   : > { %4221 = vmatpush1.bf16.msra.mxu1 %v2319_v53  ;;  %v9184_v16 = vpop.permute.xlu1 %2175  ;;  %4139 = vmatpush1.bf16.msra.mxu0 %v7757_v24 }
 0x1f3   : > { %v2174_v9 = vpop.permute.xlu0 %2173 }
 0x1f4   : > { %v2218_v34 = vsel %vm2199_vm7, %v2172_v7, %v2174_v9  ;;  %2994 = vrot.lane.b32.xlu1 %v8716_v33, %s6579_s18  ;;  %v2219_v53 = vsel %vm2199_vm7, %v2174_v9, %v9184_v16  ;;  %v358_v33 = vld [vmem:[%s6647_s13 + $0xe8] sm:$0xff] }
 0x1f5   : > { %2992 = vrot.lane.b32.xlu0 %v8726_v54, %s6579_s18  ;;  %6408 = vmatprep.subr.msk.bf16.mxu1 %vm9186_vm15, %v2219_v53  ;;  %v2284_v24 = vsel %vm9194_vm1, %v2218_v34, 0 }
 0x1f6   : > { %4223 = vmatpush1.bf16.msra.mxu1 %v2284_v24  ;;  %v2007_v7 = vpop.permute.xlu1 %2006  ;;  %v9234_v24 = vld [vmem:[%s6642_s10 + $0x68] sm:$0xff] }
 0x1f7   : > { %v2005_v49 = vpop.permute.xlu0 %2004  ;;  %4224 = vmatprep.subr.bf16.mxu1 %v8300_v11 }
 0x1f8   : > { %v2052_v61 = vsel %vm12111_vm8, %v8707_v63, %v2005_v49  ;;  %2835 = vrot.lane.b32.xlu1 %v9049_v36, %s6575_s14  ;;  %v2053_v9 = vsel %vm12112_vm2, %v2005_v49, %v2007_v7  ;;  %v9237_v49 = vld [vmem:[%s6642_s10 + $0xe8] sm:$0xff]  ;;  %vm12114_vm8 = vmmov %vm12112_vm2 }
 0x1f9   : > { %2996 = vrot.lane.b32.xlu0 %v9049_v36, %s6579_s18  ;;  %6396 = vmatprep.subr.msk.bf16.mxu0 %vm9043_vm0, %v2053_v9  ;;  %v2119_v34 = vsel %vm9107_vm13, %v2052_v61, 0 }
 0x1fa   : > { %4141 = vmatpush1.bf16.msra.mxu0 %v2119_v34  ;;  %v2009_v11 = vpop.permute.xlu1 %2008  ;;  %4225 = vmatpush1.bf16.msra.mxu1 %v8217_v8  ;;  %v1956_v8 = vsel %vm9008_vm5, %v8951_v37, 0  ;;  %v9249_v37 = vcombine.low %v9234_v24, %v9237_v49 }
 0x1fb   : > { %v1588_v63 = vpop.permute.xlu0 %1587 }
 0x1fc   : > { %2837 = vrot.lane.b32.xlu1 %v9129_v2, %s6575_s14  ;;  %v9223_v53 = vsel %vm1617_vm4, %v8903_v21, %v1588_v63  ;;  %v2054_v21 = vsel %vm12113_vm11, %v2007_v7, %v2009_v11  ;;  %12115 = vst [vmem:[#allocation12_spill] sm:$0xff] %v9249_v37  ;;  %vm12119_vm11 = vmmov %vm12112_vm2 }
 0x1fd   : > { %2706 = vrot.lane.b32.xlu0 %v9049_v36, %s6576_s15  ;;  %6397 = vmatprep.subr.msk.bf16.mxu0 %vm8967_vm3, %v9223_v53  ;;  %v2121_v7 = vsel %vm9171_vm14, %v2054_v21, 0 }
 0x1fe   : > { %4143 = vmatpush1.bf16.msra.mxu0 %v1956_v8  ;;  %v1590_v61 = vpop.permute.xlu1 %1589  ;;  %v342_v8 = vld [vmem:[%s6647_s13 + $0x68] sm:$0xff] }
 0x1ff   : > { %v9240_v9 = vpop.permute.xlu0 %2010  ;;  %4144 = vmatprep.subr.bf16.mxu0 %v9063_v28  ;;  %v9259_v28 = vcombine.high %v9081_v12, %v9084_v17  ;;  %v9278_v17 = vcombine.low %v342_v8, %v358_v33 }
 0x200   : > { %2708 = vrot.lane.b32.xlu1 %v9129_v2, %s6576_s15  ;;  %v2055_v34 = vsel %vm12114_vm8, %v2009_v11, %v9240_v9  ;;  %v9264_v11 = vsel %vm1617_vm4, %v1588_v63, %v1590_v61  ;;  %v9293_v63 = vcombine.high %v8799_v55, %v8802_v1  ;;  %vm12120_vm8 = vmmov %vm12112_vm2 }
 0x201   : > { %1601 = vrot.lane.b32.xlu0 %v8818_v60, %s6575_s14  ;;  %6409 = vmatprep.subr.msk.bf16.mxu1 %vm9156_vm9, %v2055_v34 }
 0x202   : > { %4145 = vmatpush1.bf16.msra.mxu0 %v8582_v27  ;;  %4227 = vmatpush1.bf16.msra.mxu1 %v2121_v7  ;;  %v2534_v36 = vpop.permute.xlu1 %2533  ;;  %v1406_v27 = vsel %vm9107_vm13, %v8636_v47, 0  ;;  %v9332_v7 = vld [vmem:[%s6647_s13 + $0x70] sm:$0xff] }
 0x203   : > { %v9267_v14 = vpop.permute.xlu0 %1591  ;;  %6398 = vmatprep.subr.msk.bf16.mxu0 %vm9043_vm0, %v9071_v25  ;;  %v1958_v25 = vsel %vm9194_vm1, %v9264_v11, 0  ;;  %v9297_v21 = vsel %vm1066_vm12, %v8807_v23, %v2534_v36 }
 0x204   : > { %2841 = vrot.lane.b32.xlu1 %v9249_v37, %s6575_s14  ;;  %v9276_v12 = vsel %vm1617_vm4, %v1590_v61, %v9267_v14  ;;  %v3291_v55 = vsel %vm9107_vm13, %v9297_v21, 0 }
 0x205   : > { %2839 = vrot.lane.b32.xlu0 %v9259_v28, %s6575_s14  ;;  %6410 = vmatprep.subr.msk.bf16.mxu1 %vm9186_vm15, %v9276_v12 }
 0x206   : > { %4147 = vmatpush1.bf16.msra.mxu0 %v1406_v27  ;;  %4229 = vmatpush1.bf16.msra.mxu1 %v1958_v25  ;;  %v3146_v61 = vpop.permute.xlu1 %3145 }
 0x207   : > { %v2536_v34 = vpop.permute.xlu0 %2535  ;;  %4230 = vmatprep.subr.bf16.mxu1 %v9119_v46  ;;  %v3191_v1 = vsel %vm2199_vm7, %v8832_v10, %v3146_v61 }
 0x208   : > { %1474 = vrot.lane.b32.xlu1 %v9278_v17, %s6576_s15  ;;  %v9303_v47 = vsel %vm1066_vm12, %v2534_v36, %v2536_v34  ;;  %v3256_v10 = vsel %vm9008_vm5, %v3191_v1, 0 }
 0x209   : > { %1472 = vrot.lane.b32.xlu0 %v9293_v63, %s6576_s15  ;;  %6399 = vmatprep.subr.msk.bf16.mxu0 %vm9043_vm0, %v9303_v47  ;;  %v2646_v39 = vsel %vm9171_vm14, %v9303_v47, 0 }
 0x20a   : > { %4149 = vmatpush2.bf16.msra.mxu0 %v3291_v55  ;;  %4231 = vmatpush1.bf16.msra.mxu1 %v9024_v20  ;;  %v2538_v23 = vpop.permute.xlu1 %2537  ;;  %v1408_v20 = vsel %vm9171_vm14, %v9076_v42, 0 }
 0x20b   : > { %v3148_v36 = vpop.permute.xlu0 %3147  ;;  %6411 = vmatprep.subr.msk.bf16.mxu1 %vm9156_vm9, %v9163_v40  ;;  %v9335_v40 = vld [vmem:[%s6647_s13 + $0xf0] sm:$0xff]  ;;  %v9338_v27 = vsel %vm1066_vm12, %v2536_v34, %v2538_v23  ;;  %v9361_v34 = vcombine.high %v342_v8, %v358_v33 }
 0x20c   : > { %2712 = vrot.lane.b32.xlu1 %v9249_v37, %s6576_s15  ;;  %v3192_v46 = vsel %vm2199_vm7, %v3146_v61, %v3148_v36  ;;  %v9351_v55 = vcombine.low %v9332_v7, %v9335_v40 }
 0x20d   : > { %2710 = vrot.lane.b32.xlu0 %v9259_v28, %s6576_s15  ;;  %6400 = vmatprep.subr.msk.bf16.mxu0 %vm8967_vm3, %v3192_v46  ;;  %v12117_v46 = vld [vmem:[#allocation5_spill] sm:$0xff] }
 0x20e   : > { %4151 = vmatpush2.bf16.msra.mxu0 %v3256_v10  ;;  %4233 = vmatpush1.bf16.msra.mxu1 %v1408_v20  ;;  %v3150_v25 = vpop.permute.xlu1 %3149 }
 0x20f   : > { %v9340_v61 = vpop.permute.xlu0 %2539  ;;  %4152 = vmatprep.subr.bf16.mxu0 %v8198_v57  ;;  %v3293_v57 = vsel %vm9171_vm14, %v9338_v27, 0  ;;  %v3193_v1 = vsel %vm2199_vm7, %v3148_v36, %v3150_v25 }
 0x210   : > { %1054 = vrot.lane.b32.xlu1 %v9278_v17, %s6577_s16  ;;  %v9347_v42 = vsel %vm1066_vm12, %v2538_v23, %v9340_v61  ;;  %v3258_v33 = vsel %vm9194_vm1, %v3193_v1, 0 }
 0x211   : > { %12116 = vst [vmem:[#allocation9_spill] sm:$0xff] %v9347_v42  ;;  %1052 = vrot.lane.b32.xlu0 %v9293_v63, %s6577_s16  ;;  %6412 = vmatprep.subr.msk.bf16.mxu1 %vm9156_vm9, %v9347_v42  ;;  %v415_v42 = vadd.s32 2688, %v6803_v35 }
 0x212   : > { %4235 = vmatpush2.bf16.msra.mxu1 %v3293_v57  ;;  %v2983_v23 = vpop.permute.xlu1 %2982  ;;  %4153 = vmatpush2.bf16.msra.mxu0 %v12117_v46  ;;  %v12118_v46 = vld [vmem:[#allocation6_spill] sm:$0xff] }
 0x213   : > { %v9365_v10 = vpop.permute.xlu0 %3151  ;;  %v3029_v8 = vsel %vm12112_vm2, %v8858_v56, %v2983_v23 }
 0x214   : > { %1478 = vrot.lane.b32.xlu1 %v9351_v55, %s6576_s15  ;;  %v3194_v20 = vsel %vm2199_vm7, %v3150_v25, %v9365_v10  ;;  %v3095_v1 = vsel %vm9107_vm13, %v3029_v8, 0 }
 0x215   : > { %1476 = vrot.lane.b32.xlu0 %v9361_v34, %s6576_s15  ;;  %6413 = vmatprep.subr.msk.bf16.mxu1 %vm9186_vm15, %v3194_v20  ;;  %v12121_v20 = vld [vmem:[#allocation3_spill] sm:$0xff] }
 0x216   : > { %4237 = vmatpush2.bf16.msra.mxu1 %v3258_v33  ;;  %v2987_v36 = vpop.permute.xlu1 %2986 }
 0x217   : > { %v2985_v57 = vpop.permute.xlu0 %2984  ;;  %4238 = vmatprep.subr.bf16.mxu1 %v12118_v46 }
 0x218   : > { %2187 = vrot.lane.b32.xlu1 %v9278_v17, %s6578_s17  ;;  %v3030_v25 = vsel %vm12119_vm11, %v2983_v23, %v2985_v57  ;;  %v3031_v56 = vsel %vm12120_vm8, %v2985_v57, %v2987_v36  ;;  %v414_v23 = vadd.s32 2560, %v6803_v35 }
 0x219   : > { %2185 = vrot.lane.b32.xlu0 %v9293_v63, %s6578_s17  ;;  %6401 = vmatprep.subr.msk.bf16.mxu0 %vm9043_vm0, %v3030_v25  ;;  %v3097_v57 = vsel %vm9171_vm14, %v3031_v56, 0 }
 0x21a   : > { %4155 = vmatpush2.bf16.msra.mxu0 %v3095_v1  ;;  %4239 = vmatpush2.bf16.msra.mxu1 %v12121_v20  ;;  %v2828_v33 = vpop.permute.xlu1 %2827  ;;  %v570_v20 = vand.u32 63, %v414_v23 }
 0x21b   : > { %v9391_v46 = vpop.permute.xlu0 %2988  ;;  %6402 = vmatprep.subr.msk.bf16.mxu0 %vm8967_vm3, %v8986_v31  ;;  %v2934_v31 = vsel %vm9008_vm5, %v8954_v15, 0  ;;  %v2871_v25 = vsel %vm1617_vm4, %v8920_v59, %v2828_v33  ;;  %v2936_v15 = vsel %vm9194_vm1, %v8994_v58, 0 }
 0x21c   : > { %1058 = vrot.lane.b32.xlu1 %v9351_v55, %s6577_s16  ;;  %v3032_v8 = vsel %vm12112_vm2, %v2987_v36, %v9391_v46  ;;  %vm9423_vm11 = vcmp.lt.s32.totalorder %v570_v20, 63 }
 0x21d   : > { %1056 = vrot.lane.b32.xlu0 %v9361_v34, %s6577_s16  ;;  %6414 = vmatprep.subr.msk.bf16.mxu1 %vm9156_vm9, %v3032_v8  ;;  %v577_v8 = vand.u32 63, %v415_v42 }
 0x21e   : > { %4157 = vmatpush2.bf16.msra.mxu0 %v2934_v31  ;;  %4241 = vmatpush2.bf16.msra.mxu1 %v3097_v57  ;;  %v2830_v1 = vpop.permute.xlu1 %2829  ;;  %v3331_v31 = vsel %vm9194_vm1, %v2871_v25, 0  ;;  %v416_v57 = vadd.s32 2816, %v6803_v35 }
 0x21f   : > { %v2699_v36 = vpop.permute.xlu0 %2698  ;;  %4158 = vmatprep.subr.bf16.mxu0 %v9067_v26  ;;  %6415 = vmatprep.subr.msk.bf16.mxu1 %vm9186_vm15, %v2871_v25  ;;  %vm9427_vm8 = vcmp.lt.s32.totalorder %v577_v8, 63  ;;  %v9487_v29 = vsel %vm1617_vm4, %v2828_v33, %v2830_v1  ;;  %v2357_v33 = vsel %vm9194_vm1, %v9276_v12, 0 }
 0x220   : > { %2191 = vrot.lane.b32.xlu1 %v9351_v55, %s6578_s17  ;;  %v2742_v42 = vsel %vm1486_vm6, %v8996_v0, %v2699_v36  ;;  %vm1758_vm2 = vmpackc.low %vm9427_vm8, %vm9423_vm11 }
 0x221   : > { %2189 = vrot.lane.b32.xlu0 %v9361_v34, %s6578_s17 }
 0x222   : > { %4159 = vmatpush2.bf16.msra.mxu0 %v8990_v38  ;;  %4243 = vmatpush2.bf16.msra.mxu1 %v2936_v15  ;;  %v9434_v56 = vpop.permute.xlu1 %2700  ;;  %v12126_v38 = vld [vmem:[#allocation7_spill] sm:$0xff] }
 0x223   : > { %v9436_v23 = vpop.permute.xlu0 %1593  ;;  %6403 = vmatprep.subr.msk.bf16.mxu0 %vm9043_vm0, %v9297_v21  ;;  %4244 = vmatprep.subr.bf16.mxu1 %v2742_v42  ;;  %v2644_v58 = vsel %vm9107_vm13, %v12126_v38, 0  ;;  %v1774_v21 = vsel %vm1758_vm2, 65537, %v11935_v62  ;;  %vm9477_vm0 = vcmp.gt.s32.totalorder %v577_v8, 0  ;;  %v9528_v15 = vsel %vm1486_vm6, %v2699_v36, %v9434_v56 }
 0x224   : > { %2022 = vrot.lane.b32.xlu1 %v9293_v63, %s6579_s18  ;;  %v1867_v3 = vrot.slane %v1774_v21, %v6829_v43  ;;  %v584_v38 = vand.u32 63, %v416_v57 }
 0x225   : > { %2020 = vrot.lane.b32.xlu0 %v8818_v60, %s6579_s18 }
 0x226   : > { %4161 = vmatpush2.bf16.msra.mxu0 %v2644_v58  ;;  %4245 = vmatpush2.bf16.msra.mxu1 %v9028_v13  ;;  %v9453_v0 = vpop.permute.xlu1 %2833  ;;  %v2355_v13 = vsel %vm9008_vm5, %v9223_v53, 0  ;;  %vm9500_vm5 = vcmp.ne.s16.totalorder %v1867_v3, 0  ;;  %vm9570_vm14 = vcmp.gt.s32.totalorder %v584_v38, 0  ;;  %vm9626_vm8 = vcmp.lt.s32.totalorder %v584_v38, 63 }
 0x227   : > { %v2832_v6 = vpop.permute.xlu0 %2831  ;;  %6404 = vmatprep.subr.msk.bf16.mxu0 %vm8967_vm3, %v9264_v11  ;;  %6416 = vmatprep.subr.msk.bf16.mxu1 %vm9156_vm9, %v9338_v27  ;;  %vm9473_vm3 = vcmp.gt.s32.totalorder %v570_v20, 0  ;;  %v9484_v27 = vsel %vm1617_vm4, %v9267_v14, %v9436_v23  ;;  %v1863_v14 = vrot.slane %v1774_v21, %v6833_v44  ;;  %v417_v20 = vadd.s32 2944, %v6803_v35 }
 0x228   : > { %2024 = vrot.lane.b32.xlu1 %v9278_v17, %s6579_s18  ;;  %vm1208_vm13 = vmpackc.low %vm9477_vm0, %vm9473_vm3  ;;  %v9524_v8 = vsel %vm1617_vm4, %v2830_v1, %v2832_v6  ;;  %v9532_v59 = vsel %vm1617_vm4, %v2832_v6, %v9453_v0 }
 0x229   : > { %1603 = vrot.lane.b32.xlu0 %v9293_v63, %s6575_s14  ;;  %v1224_v25 = vsel %vm1208_vm13, 65537, %v11935_v62  ;;  %vm9546_vm9 = vcmp.ne.s16.totalorder %v1863_v14, 0  ;;  %v591_v58 = vand.u32 63, %v417_v20  ;;  %v9587_v14 = vcombine.high %v9234_v24, %v9237_v49  ;;  %v9614_v20 = vld [vmem:[%s6642_s10 + $0x70] sm:$0xff] }
 0x22a   : > { %4163 = vmatpush2.bf16.msra.mxu0 %v2355_v13  ;;  %4247 = vmatpush2.bf16.msra.mxu1 %v2646_v39  ;;  %v9489_v50 = vpop.permute.xlu1 %1466  ;;  %v1317_v36 = vrot.slane %v1224_v25, %v6829_v43  ;;  %v3333_v26 = vsel %vm9546_vm9, %v9524_v8, 0  ;;  %v1313_v48 = vrot.slane %v1224_v25, %v6833_v44 }
 0x22b   : > { %v1465_v53 = vpop.permute.xlu0 %1464  ;;  %6417 = vmatprep.subr.msk.bf16.mxu1 %vm9186_vm15, %v9484_v27  ;;  %6418 = vmatprep.subr.msk.bf16.mxu0 %vm9186_vm15, %v9487_v29  ;;  %vm9574_vm15 = vcmp.gt.s32.totalorder %v591_v58, 0  ;;  %12141 = vst [vmem:[#allocation5_spill] sm:$0xff] %v9587_v14  ;;  %vm9630_vm2 = vcmp.lt.s32.totalorder %v591_v58, 63 }
 0x22c   : > { %1605 = vrot.lane.b32.xlu1 %v9278_v17, %s6575_s14  ;;  %v9562_v6 = vsel %vm1486_vm6, %v1465_v53, %v9489_v50  ;;  %vm9581_vm1 = vcmp.ne.s16.totalorder %v1317_v36, 0  ;;  %vm1209_vm11 = vmpackc.low %vm9574_vm15, %vm9570_vm14  ;;  %vm9635_vm3 = vcmp.ne.s16.totalorder %v1313_v48, 0 }
 0x22d   : > { %2026 = vrot.lane.b32.xlu0 %v9361_v34, %s6579_s18  ;;  %4165 = vmatmul.mubr.bf16.vlgmr.msra.gmra.mxu0 %v9513_v19  ;;  %v1225_v58 = vsel %vm1209_vm11, 65537, %v11935_v62  ;;  %vm1759_vm0 = vmpackc.low %vm9630_vm2, %vm9626_vm8  ;;  %vm12156_vm8 = vcmask 7168  }
 0x22e   : > { %4249 = vmatpush2.bf16.msra.mxu1 %v2357_v33  ;;  %4274 = vmatpush1.bf16.msra.mxu0 %v3331_v31  ;;  %v9534_v12 = vpop.permute.xlu1 %2704  ;;  %v9596_v33 = vsel %vm1486_vm6, %v9078_v5, %v1465_v53  ;;  %v9617_v5 = vld [vmem:[%s6642_s10 + $0xf0] sm:$0xff]  ;;  %v1321_v48 = vrot.slane %v1225_v58, %v6833_v44  ;;  %vm12157_vm2 = vmmov %vm12156_vm8 }
 0x22f   : > { %v2703_v22 = vpop.permute.xlu0 %2702  ;;  %4275 = vmatprep.subr.bf16.mxu0 %v9528_v15  ;;  %6431 = vmatprep.subr.msk.bf16.mxu1 %vm9500_vm5, %v9532_v59  ;;  %v9657_v38 = vcombine.low %v9614_v20, %v9617_v5 }
 0x230   : > { %2549 = vrot.lane.b32.xlu1 %v9259_v28, %s6577_s16  ;;  %4293 = vmatprep.mubr.bf16.mxu0 %v11935_v62  ;;  %v9566_v21 = vsel %vm1486_vm6, %v2703_v22, %v9534_v12  ;;  %v9600_v31 = vsel %vm1486_vm6, %v9434_v56, %v2703_v22  ;;  %vm9699_vm14 = vcmp.ne.s16.totalorder %v1321_v48, 0 }
 0x231   : > { %1607 = vrot.lane.b32.xlu0 %v9361_v34, %s6575_s14  ;;  %4251 = vmatmul.mubr.bf16.vlgmr.msra.gmra.mxu1 %v9513_v19 }
 0x232   : > { %4276 = vmatpush1.bf16.msra.mxu0 %v2742_v42  ;;  %4360 = vmatpush1.bf16.msra.mxu1 %v3333_v26  ;;  %v1047_v3 = vpop.permute.xlu1 %1046 }
 0x233   : > { %v1045_v13 = vpop.permute.xlu0 %1044  ;;  %4304 = vmatprep.subr.bf16.mxu0 %v9562_v6  ;;  %4361 = vmatprep.subr.bf16.mxu1 %v9566_v21 }
 0x234   : > { %3161 = vrot.lane.b32.xlu1 %v9259_v28, %s6578_s17  ;;  %4379 = vmatprep.mubr.bf16.mxu1 %v11935_v62  ;;  %v9604_v24 = vsel %vm1066_vm12, %v9154_v51, %v1045_v13  ;;  %v9609_v49 = vsel %vm1066_vm12, %v1045_v13, %v1047_v3  ;;  %v1325_v13 = vrot.slane %v1225_v58, %v6829_v43 }
 0x235   : > { %2551 = vrot.lane.b32.xlu0 %v9249_v37, %s6577_s16  ;;  %6419 = vmatmul.mubr.msk.bf16.vlgmr.msra.gmra.mxu0 %vm3440_vm10, %v9057_v41  ;;  %v2321_v26 = vsel %vm9635_vm3, %v9604_v24, 0 }
 0x236   : > { %4305 = vmatpush1.bf16.msra.mxu0 %v9596_v33  ;;  %4362 = vmatpush1.bf16.msra.mxu1 %v9600_v31  ;;  %v9611_v57 = vpop.permute.xlu1 %1470  ;;  %vm9684_vm13 = vcmp.ne.s16.totalorder %v1325_v13, 0 }
 0x237   : > { %v1469_v51 = vpop.permute.xlu0 %1468  ;;  %6420 = vmatprep.subr.msk.bf16.mxu0 %vm9581_vm1, %v9609_v49  ;;  %4336 = vmatprep.mubr.bf16.mxu0 %v9104_v18 }
 0x238   : > { %2553 = vrot.lane.b32.xlu1 %v9587_v14, %s6577_s16  ;;  %v9643_v25 = vsel %vm1486_vm6, %v1469_v51, %v9611_v57  ;;  %v9647_v36 = vsel %vm1486_vm6, %v9489_v50, %v1469_v51 }
 0x239   : > { %3163 = vrot.lane.b32.xlu0 %v9249_v37, %s6578_s17  ;;  %4390 = vmatprep.subr.bf16.mxu1 %v9643_v25 }
 0x23a   : > { %4307 = vmatpush1.bf16.msra.mxu0 %v2321_v26  ;;  %6432 = vmatmul.mubr.msk.bf16.vlgmr.msra.gmra.mxu1 %vm3440_vm10, %v9057_v41  ;;  %v2180_v50 = vpop.permute.xlu1 %2179 }
 0x23b   : > { %4391 = vmatpush1.bf16.msra.mxu1 %v9647_v36  ;;  %v2178_v39 = vpop.permute.xlu0 %2177  ;;  %4422 = vmatprep.mubr.bf16.mxu1 %v9104_v18  ;;  %v1775_v18 = vsel %vm1759_vm0, 65537, %v11935_v62  ;;  %vm12158_vm0 = vmmov %vm12157_vm2 }
 0x23c   : > { %v2220_v42 = vsel %vm2199_vm7, %v9184_v16, %v2178_v39  ;;  %3165 = vrot.lane.b32.xlu1 %v9587_v14, %s6578_s17  ;;  %v2221_v41 = vsel %vm2199_vm7, %v2178_v39, %v2180_v50  ;;  %v1875_v53 = vrot.slane %v1775_v18, %v6829_v43 }
 0x23d   : > { %2555 = vrot.lane.b32.xlu0 %v9657_v38, %s6577_s16  ;;  %6421 = vmatprep.subr.msk.bf16.mxu0 %vm9500_vm5, %v2221_v41  ;;  %v2286_v51 = vsel %vm9546_vm9, %v2220_v42, 0  ;;  %v1871_v42 = vrot.slane %v1775_v18, %v6833_v44  ;;  %v420_v41 = vadd.s32 3328, %v6803_v35 }
 0x23e   : > { %4309 = vmatpush1.bf16.msra.mxu0 %v2286_v51  ;;  %v9682_v16 = vpop.permute.xlu1 %1050  ;;  %vm9714_vm15 = vcmp.ne.s16.totalorder %v1875_v53, 0 }
 0x23f   : > { %v1049_v26 = vpop.permute.xlu0 %1048  ;;  %4310 = vmatprep.subr.bf16.mxu0 %v8760_v45  ;;  %vm9722_vm11 = vcmp.ne.s16.totalorder %v1871_v42, 0 }
 0x240   : > { %v9691_v58 = vsel %vm1066_vm12, %v1047_v3, %v1049_v26  ;;  %2998 = vrot.lane.b32.xlu1 %v9129_v2, %s6579_s18  ;;  %v9697_v39 = vsel %vm1066_vm12, %v1049_v26, %v9682_v16 }
 0x241   : > { %3167 = vrot.lane.b32.xlu0 %v9657_v38, %s6578_s17  ;;  %6433 = vmatprep.subr.msk.bf16.mxu1 %vm9684_vm13, %v9697_v39  ;;  %v2323_v45 = vsel %vm9699_vm14, %v9691_v58, 0 }
 0x242   : > { %4393 = vmatpush1.bf16.msra.mxu1 %v2323_v45  ;;  %v9712_v3 = vpop.permute.xlu1 %2183  ;;  %4311 = vmatpush1.bf16.msra.mxu0 %v8290_v52 }
 0x243   : > { %v2182_v48 = vpop.permute.xlu0 %2181 }
 0x244   : > { %v2222_v51 = vsel %vm2199_vm7, %v2180_v50, %v2182_v48  ;;  %3002 = vrot.lane.b32.xlu1 %v9249_v37, %s6579_s18  ;;  %v2223_v26 = vsel %vm2199_vm7, %v2182_v48, %v9712_v3  ;;  %v12160_v37 = vld [vmem:[#allocation11_spill] sm:$0xff] }
 0x245   : > { %3000 = vrot.lane.b32.xlu0 %v9259_v28, %s6579_s18  ;;  %6434 = vmatprep.subr.msk.bf16.mxu1 %vm9714_vm15, %v2223_v26  ;;  %v2288_v52 = vsel %vm9722_vm11, %v2222_v51, 0  ;;  %v9762_v26 = vld [vmem:[%s6642_s10 + $0x78] sm:$0xff] }
 0x246   : > { %4395 = vmatpush1.bf16.msra.mxu1 %v2288_v52  ;;  %v2015_v50 = vpop.permute.xlu1 %2014  ;;  %v9765_v52 = vld [vmem:[%s6642_s10 + $0xf8] sm:$0xff] }
 0x247   : > { %v2013_v53 = vpop.permute.xlu0 %2012  ;;  %4396 = vmatprep.subr.bf16.mxu1 %v8828_v32 }
 0x248   : > { %v2056_v42 = vsel %vm12156_vm8, %v9240_v9, %v2013_v53  ;;  %2843 = vrot.lane.b32.xlu1 %v9587_v14, %s6575_s14  ;;  %v2057_v45 = vsel %vm12157_vm2, %v2013_v53, %v2015_v50  ;;  %vm12159_vm8 = vmmov %vm12158_vm0 }
 0x249   : > { %3004 = vrot.lane.b32.xlu0 %v9587_v14, %s6579_s18  ;;  %6422 = vmatprep.subr.msk.bf16.mxu0 %vm9581_vm1, %v2057_v45  ;;  %v2123_v48 = vsel %vm9635_vm3, %v2056_v42, 0  ;;  %vm12162_vm2 = vmmov %vm12158_vm0 }
 0x24a   : > { %4313 = vmatpush1.bf16.msra.mxu0 %v2123_v48  ;;  %v2017_v32 = vpop.permute.xlu1 %2016  ;;  %4397 = vmatpush1.bf16.msra.mxu1 %v8745_v30  ;;  %v1960_v30 = vsel %vm9546_vm9, %v9484_v27, 0  ;;  %v9777_v27 = vcombine.low %v9762_v26, %v9765_v52  ;;  %v344_v48 = vld [vmem:[%s6647_s13 + $0x78] sm:$0xff] }
 0x24b   : > { %v1596_v9 = vpop.permute.xlu0 %1595 }
 0x24c   : > { %2845 = vrot.lane.b32.xlu1 %v9657_v38, %s6575_s14  ;;  %v9751_v51 = vsel %vm1617_vm4, %v9436_v23, %v1596_v9  ;;  %v2058_v23 = vsel %vm12158_vm0, %v2015_v50, %v2017_v32 }
 0x24d   : > { %2714 = vrot.lane.b32.xlu0 %v9587_v14, %s6576_s15  ;;  %6423 = vmatprep.subr.msk.bf16.mxu0 %vm9500_vm5, %v9751_v51  ;;  %v2125_v50 = vsel %vm9699_vm14, %v2058_v23, 0  ;;  %v2359_v47 = vsel %vm9546_vm9, %v9751_v51, 0  ;;  %v421_v51 = vadd.s32 3456, %v6803_v35 }
 0x24e   : > { %4315 = vmatpush1.bf16.msra.mxu0 %v1960_v30  ;;  %v1598_v53 = vpop.permute.xlu1 %1597  ;;  %v360_v30 = vld [vmem:[%s6647_s13 + $0xf8] sm:$0xff] }
 0x24f   : > { %v9768_v42 = vpop.permute.xlu0 %2018  ;;  %4316 = vmatprep.subr.bf16.mxu0 %v9596_v33  ;;  %v9787_v33 = vcombine.high %v9614_v20, %v9617_v5  ;;  %v9806_v5 = vcombine.low %v344_v48, %v360_v30 }
 0x250   : > { %2716 = vrot.lane.b32.xlu1 %v9657_v38, %s6576_s15  ;;  %v2059_v45 = vsel %vm12159_vm8, %v2017_v32, %v9768_v42  ;;  %v9792_v32 = vsel %vm1617_vm4, %v1596_v9, %v1598_v53  ;;  %v9821_v9 = vcombine.high %v9332_v7, %v9335_v40  ;;  %vm12164_vm8 = vmmov %vm12158_vm0 }
 0x251   : > { %1609 = vrot.lane.b32.xlu0 %v9351_v55, %s6575_s14  ;;  %6435 = vmatprep.subr.msk.bf16.mxu1 %vm9684_vm13, %v2059_v45 }
 0x252   : > { %4317 = vmatpush1.bf16.msra.mxu0 %v12160_v37  ;;  %4399 = vmatpush1.bf16.msra.mxu1 %v2125_v50  ;;  %v2542_v14 = vpop.permute.xlu1 %2541  ;;  %v1410_v37 = vsel %vm9635_vm3, %v9169_v4, 0 }
 0x253   : > { %v9795_v2 = vpop.permute.xlu0 %1599  ;;  %6424 = vmatprep.subr.msk.bf16.mxu0 %vm9581_vm1, %v9604_v24  ;;  %v1962_v24 = vsel %vm9722_vm11, %v9792_v32, 0  ;;  %v9825_v23 = vsel %vm1066_vm12, %v9340_v61, %v2542_v14 }
 0x254   : > { %2849 = vrot.lane.b32.xlu1 %v9777_v27, %s6575_s14  ;;  %v9804_v20 = vsel %vm1617_vm4, %v1598_v53, %v9795_v2  ;;  %v3295_v7 = vsel %vm9635_vm3, %v9825_v23, 0 }
 0x255   : > { %2847 = vrot.lane.b32.xlu0 %v9787_v33, %s6575_s14  ;;  %6436 = vmatprep.subr.msk.bf16.mxu1 %vm9714_vm15, %v9804_v20 }
 0x256   : > { %4319 = vmatpush1.bf16.msra.mxu0 %v1410_v37  ;;  %4401 = vmatpush1.bf16.msra.mxu1 %v1962_v24  ;;  %v3154_v53 = vpop.permute.xlu1 %3153 }
 0x257   : > { %v2544_v45 = vpop.permute.xlu0 %2543  ;;  %4402 = vmatprep.subr.bf16.mxu1 %v9647_v36  ;;  %v3195_v40 = vsel %vm2199_vm7, %v9365_v10, %v3154_v53 }
 0x258   : > { %1482 = vrot.lane.b32.xlu1 %v9806_v5, %s6576_s15  ;;  %v9831_v4 = vsel %vm1066_vm12, %v2542_v14, %v2544_v45  ;;  %v3260_v10 = vsel %vm9546_vm9, %v3195_v40, 0 }
 0x259   : > { %1480 = vrot.lane.b32.xlu0 %v9821_v9, %s6576_s15  ;;  %6425 = vmatprep.subr.msk.bf16.mxu0 %vm9581_vm1, %v9831_v4  ;;  %v2650_v56 = vsel %vm9699_vm14, %v9831_v4, 0  ;;  %v2361_v4 = vsel %vm9722_vm11, %v9804_v20, 0 }
 0x25a   : > { %4321 = vmatpush2.bf16.msra.mxu0 %v3295_v7  ;;  %4403 = vmatpush1.bf16.msra.mxu1 %v9562_v6  ;;  %v2546_v61 = vpop.permute.xlu1 %2545  ;;  %v1412_v6 = vsel %vm9699_vm14, %v9609_v49, 0  ;;  %v12161_v7 = vld [vmem:[#allocation10_spill] sm:$0xff] }
 0x25b   : > { %v3156_v14 = vpop.permute.xlu0 %3155  ;;  %6437 = vmatprep.subr.msk.bf16.mxu1 %vm9684_vm13, %v9691_v58  ;;  %v9860_v58 = vsel %vm1066_vm12, %v2544_v45, %v2546_v61 }
 0x25c   : > { %2720 = vrot.lane.b32.xlu1 %v9777_v27, %s6576_s15  ;;  %v3196_v36 = vsel %vm2199_vm7, %v3154_v53, %v3156_v14  ;;  %v3297_v49 = vsel %vm9699_vm14, %v9860_v58, 0  ;;  %v9879_v53 = vcombine.high %v344_v48, %v360_v30 }
 0x25d   : > { %2718 = vrot.lane.b32.xlu0 %v9787_v33, %s6576_s15  ;;  %6426 = vmatprep.subr.msk.bf16.mxu0 %vm9500_vm5, %v3196_v36 }
 0x25e   : > { %4323 = vmatpush2.bf16.msra.mxu0 %v3260_v10  ;;  %4405 = vmatpush1.bf16.msra.mxu1 %v1412_v6  ;;  %v3158_v50 = vpop.permute.xlu1 %3157  ;;  %v12163_v10 = vld [vmem:[#allocation2_spill] sm:$0xff] }
 0x25f   : > { %v9862_v37 = vpop.permute.xlu0 %2547  ;;  %4324 = vmatprep.subr.bf16.mxu0 %v8726_v54  ;;  %v3197_v54 = vsel %vm2199_vm7, %v3156_v14, %v3158_v50 }
 0x260   : > { %v9867_v24 = vsel %vm1066_vm12, %v2546_v61, %v9862_v37  ;;  %1062 = vrot.lane.b32.xlu1 %v9806_v5, %s6577_s16  ;;  %v3262_v48 = vsel %vm9722_vm11, %v3197_v54, 0 }
 0x261   : > { %1060 = vrot.lane.b32.xlu0 %v9821_v9, %s6577_s16  ;;  %6438 = vmatprep.subr.msk.bf16.mxu1 %vm9684_vm13, %v9867_v24 }
 0x262   : > { %4407 = vmatpush2.bf16.msra.mxu1 %v3297_v49  ;;  %v2991_v45 = vpop.permute.xlu1 %2990  ;;  %4325 = vmatpush2.bf16.msra.mxu0 %v12161_v7  ;;  %v12165_v49 = vld [vmem:[#allocation8_spill] sm:$0xff]  ;;  %v419_v7 = vadd.s32 3200, %v6803_v35 }
 0x263   : > { %v9883_v40 = vpop.permute.xlu0 %3159  ;;  %v3033_v30 = vsel %vm12162_vm2, %v9391_v46, %v2991_v45  ;;  %vm12166_vm2 = vmmov %vm12158_vm0 }
 0x264   : > { %v3198_v61 = vsel %vm2199_vm7, %v3158_v50, %v9883_v40  ;;  %2193 = vrot.lane.b32.xlu1 %v9821_v9, %s6578_s17  ;;  %v3099_v50 = vsel %vm9635_vm3, %v3033_v30, 0 }
 0x265   : > { %1484 = vrot.lane.b32.xlu0 %v9879_v53, %s6576_s15  ;;  %6439 = vmatprep.subr.msk.bf16.mxu1 %vm9714_vm15, %v3198_v61 }
 0x266   : > { %4409 = vmatpush2.bf16.msra.mxu1 %v3262_v48  ;;  %v2995_v14 = vpop.permute.xlu1 %2994 }
 0x267   : > { %v2993_v36 = vpop.permute.xlu0 %2992  ;;  %4410 = vmatprep.subr.bf16.mxu1 %v12163_v10 }
 0x268   : > { %v3034_v6 = vsel %vm12158_vm0, %v2991_v45, %v2993_v36  ;;  %1064 = vrot.lane.b32.xlu1 %v9879_v53, %s6577_s16  ;;  %v3035_v46 = vsel %vm12164_vm8, %v2993_v36, %v2995_v14  ;;  %v418_v45 = vadd.s32 3072, %v6803_v35  ;;  %v2938_v36 = vsel %vm9546_vm9, %v9487_v29, 0 }
 0x269   : > { %2195 = vrot.lane.b32.xlu0 %v9806_v5, %s6578_s17  ;;  %6427 = vmatprep.subr.msk.bf16.mxu0 %vm9581_vm1, %v3034_v6  ;;  %v3101_v30 = vsel %vm9699_vm14, %v3035_v46, 0  ;;  %v605_v6 = vand.u32 63, %v419_v7  ;;  %v2940_v29 = vsel %vm9722_vm11, %v9532_v59, 0  ;;  %v10116_v7 = vld [vmem:[%s11824_s2 + $0x8] ss:$12 sps:$4 sm:$0xff]  }
 0x26a   : > { %4327 = vmatpush2.bf16.msra.mxu0 %v3099_v50  ;;  %4411 = vmatpush2.bf16.msra.mxu1 %v12165_v49  ;;  %v2836_v54 = vpop.permute.xlu1 %2835  ;;  %v598_v10 = vand.u32 63, %v418_v45 }
 0x26b   : > { %v9911_v61 = vpop.permute.xlu0 %2996  ;;  %6428 = vmatprep.subr.msk.bf16.mxu0 %vm9500_vm5, %v9524_v8  ;;  %v2875_v8 = vsel %vm1617_vm4, %v9453_v0, %v2836_v54  ;;  %vm9940_vm8 = vcmp.lt.s32.totalorder %v605_v6, 63  ;;  %v612_v0 = vand.u32 63, %v420_v41 }
 0x26c   : > { %v3036_v48 = vsel %vm12166_vm2, %v2995_v14, %v9911_v61  ;;  %2028 = vrot.lane.b32.xlu1 %v9351_v55, %s6579_s18  ;;  %vm9936_vm0 = vcmp.lt.s32.totalorder %v598_v10, 63  ;;  %v3335_v13 = vsel %vm9722_vm11, %v2875_v8, 0 }
 0x26d   : > { %2197 = vrot.lane.b32.xlu0 %v9879_v53, %s6578_s17  ;;  %6440 = vmatprep.subr.msk.bf16.mxu1 %vm9684_vm13, %v3036_v48  ;;  %vm1760_vm2 = vmpackc.low %vm9940_vm8, %vm9936_vm0  ;;  %vm10087_vm14 = vcmp.gt.s32.totalorder %v612_v0, 0  ;;  %vm10135_vm8 = vcmp.lt.s32.totalorder %v612_v0, 63 }
 0x26e   : > { %4329 = vmatpush2.bf16.msra.mxu0 %v2938_v36  ;;  %4413 = vmatpush2.bf16.msra.mxu1 %v3101_v30  ;;  %v2838_v14 = vpop.permute.xlu1 %2837  ;;  %v1776_v11 = vsel %vm1760_vm2, 65537, %v11935_v62 }
 0x26f   : > { %v2707_v50 = vpop.permute.xlu0 %2706  ;;  %4330 = vmatprep.subr.bf16.mxu0 %v9600_v31  ;;  %6441 = vmatprep.subr.msk.bf16.mxu1 %vm9714_vm15, %v2875_v8  ;;  %v1883_v22 = vrot.slane %v1776_v11, %v6829_v43 }
 0x270   : > { %1611 = vrot.lane.b32.xlu1 %v9821_v9, %s6575_s14  ;;  %v2746_v31 = vsel %vm1486_vm6, %v9534_v12, %v2707_v50 }
 0x271   : > { %2030 = vrot.lane.b32.xlu0 %v9821_v9, %s6579_s18  ;;  %vm10022_vm9 = vcmp.ne.s16.totalorder %v1883_v22, 0 }
 0x272   : > { %4331 = vmatpush2.bf16.msra.mxu0 %v9528_v15  ;;  %4415 = vmatpush2.bf16.msra.mxu1 %v2940_v29  ;;  %v9952_v49 = vpop.permute.xlu1 %2708  ;;  %v12171_v15 = vld [vmem:[#allocation9_spill] sm:$0xff]  ;;  %v619_v29 = vand.u32 63, %v421_v51 }
 0x273   : > { %v9954_v45 = vpop.permute.xlu0 %1601  ;;  %6429 = vmatprep.subr.msk.bf16.mxu0 %vm9581_vm1, %v9825_v23  ;;  %4416 = vmatprep.subr.bf16.mxu1 %v2746_v31  ;;  %v2648_v59 = vsel %vm9635_vm3, %v12171_v15, 0  ;;  %vm9983_vm1 = vcmp.gt.s32.totalorder %v598_v10, 0  ;;  %vm9987_vm3 = vcmp.gt.s32.totalorder %v605_v6, 0  ;;  %v10045_v8 = vsel %vm1486_vm6, %v2707_v50, %v9952_v49 }
 0x274   : > { %2034 = vrot.lane.b32.xlu1 %v9879_v53, %s6579_s18  ;;  %v10068_v6 = vcombine.high %v9762_v26, %v9765_v52  ;;  %vm10139_vm2 = vcmp.lt.s32.totalorder %v619_v29, 63 }
 0x275   : > { %2032 = vrot.lane.b32.xlu0 %v9806_v5, %s6579_s18 }
 0x276   : > { %4333 = vmatpush2.bf16.msra.mxu0 %v2648_v59  ;;  %4417 = vmatpush2.bf16.msra.mxu1 %v9566_v21  ;;  %v9971_v12 = vpop.permute.xlu1 %2841 }
 0x277   : > { %v2840_v23 = vpop.permute.xlu0 %2839  ;;  %6430 = vmatprep.subr.msk.bf16.mxu0 %vm9500_vm5, %v9792_v32  ;;  %6442 = vmatprep.subr.msk.bf16.mxu1 %vm9684_vm13, %v9860_v58  ;;  %v10000_v32 = vsel %vm1617_vm4, %v2836_v54, %v2838_v14  ;;  %v10005_v58 = vsel %vm1617_vm4, %v9795_v2, %v9954_v45  ;;  %vm1210_vm5 = vmpackc.low %vm9987_vm3, %vm9983_vm1  ;;  %v1879_v2 = vrot.slane %v1776_v11, %v6833_v44 }
 0x278   : > { %1615 = vrot.lane.b32.xlu1 %v9879_v53, %s6575_s14  ;;  %v10037_v54 = vsel %vm1617_vm4, %v2838_v14, %v2840_v23  ;;  %v10041_v36 = vsel %vm1617_vm4, %v2840_v23, %v9971_v12  ;;  %v1226_v18 = vsel %vm1210_vm5, 65537, %v11935_v62  ;;  %vm1761_vm3 = vmpackc.low %vm10139_vm2, %vm10135_vm8  ;;  %vm12200_vm8 = vcmask 7168  }
 0x279   : > { %1613 = vrot.lane.b32.xlu0 %v9806_v5, %s6575_s14  ;;  %vm10059_vm13 = vcmp.ne.s16.totalorder %v1879_v2, 0  ;;  %v1333_v50 = vrot.slane %v1226_v18, %v6829_v43  ;;  %v10149_v2 = vld [vmem:[%s11824_s2 + $0x4] ss:$12 sps:$4 sm:$0xff]   ;;  %vm12201_vm2 = vmmov %vm12200_vm8  ;;  %v424_v23 = vadd.s32 3840, %v6803_v35 }
 0x27a   : > { %4335 = vmatpush2.bf16.msra.mxu0 %v2359_v47  ;;  %4419 = vmatpush2.bf16.msra.mxu1 %v2650_v56  ;;  %v10007_v48 = vpop.permute.xlu1 %1474  ;;  %v3337_v46 = vsel %vm10059_vm13, %v10037_v54, 0 }
 0x27b   : > { %v1473_v30 = vpop.permute.xlu0 %1472  ;;  %6443 = vmatprep.subr.msk.bf16.mxu1 %vm9714_vm15, %v10005_v58  ;;  %6444 = vmatprep.subr.msk.bf16.mxu0 %vm9714_vm15, %v10000_v32  ;;  %vm10091_vm15 = vcmp.gt.s32.totalorder %v619_v29, 0  ;;  %vm10098_vm11 = vcmp.ne.s16.totalorder %v1333_v50, 0 }
 0x27c   : > { %2559 = vrot.lane.b32.xlu1 %v9777_v27, %s6577_s16  ;;  %v10079_v15 = vsel %vm1486_vm6, %v1473_v30, %v10007_v48  ;;  %v10105_v22 = vsel %vm1486_vm6, %v9611_v57, %v1473_v30  ;;  %vm1211_vm0 = vmpackc.low %vm10091_vm15, %vm10087_vm14 }
 0x27d   : > { %2557 = vrot.lane.b32.xlu0 %v9787_v33, %s6577_s16  ;;  %4337 = vmatmul.mubr.bf16.vlgmr.msra.gmra.mxu0 %v9513_v19 }
 0x27e   : > { %4421 = vmatpush2.bf16.msra.mxu1 %v2361_v4  ;;  %4446 = vmatpush1.bf16.msra.mxu0 %v3335_v13  ;;  %v10047_v10 = vpop.permute.xlu1 %2712 }
 0x27f   : > { %v2711_v20 = vpop.permute.xlu0 %2710  ;;  %4447 = vmatprep.subr.bf16.mxu0 %v10045_v8  ;;  %6457 = vmatprep.subr.msk.bf16.mxu1 %vm10022_vm9, %v10041_v36 }
 0x280   : > { %3171 = vrot.lane.b32.xlu1 %v9777_v27, %s6578_s17  ;;  %4465 = vmatprep.mubr.bf16.mxu0 %v11935_v62  ;;  %v10083_v26 = vsel %vm1486_vm6, %v2711_v20, %v10047_v10  ;;  %v10109_v21 = vsel %vm1486_vm6, %v9952_v49, %v2711_v20 }
 0x281   : > { %3169 = vrot.lane.b32.xlu0 %v9787_v33, %s6578_s17  ;;  %4423 = vmatmul.mubr.bf16.vlgmr.msra.gmra.mxu1 %v9513_v19 }
 0x282   : > { %4448 = vmatpush1.bf16.msra.mxu0 %v2746_v31  ;;  %4532 = vmatpush1.bf16.msra.mxu1 %v3337_v46  ;;  %v1055_v52 = vpop.permute.xlu1 %1054  ;;  %v1329_v31 = vrot.slane %v1226_v18, %v6833_v44  ;;  %v1227_v18 = vsel %vm1211_vm0, 65537, %v11935_v62 }
 0x283   : > { %v1053_v59 = vpop.permute.xlu0 %1052  ;;  %4476 = vmatprep.subr.bf16.mxu0 %v10079_v15  ;;  %4533 = vmatprep.subr.bf16.mxu1 %v10083_v26  ;;  %v1341_v20 = vrot.slane %v1227_v18, %v6829_v43  ;;  %v1337_v46 = vrot.slane %v1227_v18, %v6833_v44 }
 0x284   : > { %3173 = vrot.lane.b32.xlu1 %v10068_v6, %s6578_s17  ;;  %4551 = vmatprep.mubr.bf16.mxu1 %v11935_v62  ;;  %v10122_v47 = vsel %vm1066_vm12, %v9682_v16, %v1053_v59  ;;  %v10129_v57 = vsel %vm1066_vm12, %v1053_v59, %v1055_v52  ;;  %vm10152_vm1 = vcmp.ne.s16.totalorder %v1329_v31, 0  ;;  %v1777_v59 = vsel %vm1761_vm3, 65537, %v11935_v62  ;;  %vm12202_vm3 = vmmov %vm12201_vm2 }
 0x285   : > { %2561 = vrot.lane.b32.xlu0 %v10068_v6, %s6577_s16  ;;  %6445 = vmatmul.mubr.msk.bf16.vlgmr.msra.gmra.mxu0 %vm3440_vm10, %v10116_v7  ;;  %v2325_v4 = vsel %vm10152_vm1, %v10122_v47, 0  ;;  %vm10202_vm5 = vcmp.ne.s16.totalorder %v1341_v20, 0  ;;  %v1891_v31 = vrot.slane %v1777_v59, %v6829_v43  ;;  %v1887_v16 = vrot.slane %v1777_v59, %v6833_v44 }
 0x286   : > { %4477 = vmatpush1.bf16.msra.mxu0 %v10105_v22  ;;  %4534 = vmatpush1.bf16.msra.mxu1 %v10109_v21  ;;  %v10133_v49 = vpop.permute.xlu1 %1478  ;;  %vm10209_vm14 = vcmp.ne.s16.totalorder %v1337_v46, 0 }
 0x287   : > { %v1477_v30 = vpop.permute.xlu0 %1476  ;;  %6446 = vmatprep.subr.msk.bf16.mxu0 %vm10098_vm11, %v10129_v57  ;;  %4508 = vmatprep.mubr.bf16.mxu0 %v10149_v2  ;;  %vm10238_vm15 = vcmp.ne.s16.totalorder %v1891_v31, 0  ;;  %vm10243_vm0 = vcmp.ne.s16.totalorder %v1887_v16, 0 }
 0x288   : > { %v10158_v41 = vsel %vm1486_vm6, %v10007_v48, %v1477_v30  ;;  %3008 = vrot.lane.b32.xlu1 %v9787_v33, %s6579_s18  ;;  %v10164_v51 = vsel %vm1486_vm6, %v1477_v30, %v10133_v49 }
 0x289   : > { %3006 = vrot.lane.b32.xlu0 %v9657_v38, %s6579_s18  ;;  %4562 = vmatprep.subr.bf16.mxu1 %v10164_v51 }
 0x28a   : > { %4479 = vmatpush1.bf16.msra.mxu0 %v2325_v4  ;;  %6458 = vmatmul.mubr.msk.bf16.vlgmr.msra.gmra.mxu1 %vm3440_vm10, %v10116_v7  ;;  %v2188_v48 = vpop.permute.xlu1 %2187 }
 0x28b   : > { %4563 = vmatpush1.bf16.msra.mxu1 %v10158_v41  ;;  %v2186_v50 = vpop.permute.xlu0 %2185  ;;  %4594 = vmatprep.mubr.bf16.mxu1 %v10149_v2 }
 0x28c   : > { %v2224_v0 = vsel %vm2199_vm7, %v9712_v3, %v2186_v50  ;;  %v2225_v29 = vsel %vm2199_vm7, %v2186_v50, %v2188_v48  ;;  %3012 = vrot.lane.b32.xlu1 %v10068_v6, %s6579_s18  ;;  %v3413_v50 = vld [vmem:[%s11825_s3] sm:$0xff] }
 0x28d   : > { %v2290_v11 = vsel %vm10059_vm13, %v2224_v0, 0  ;;  %3010 = vrot.lane.b32.xlu0 %v9777_v27, %s6579_s18  ;;  %6447 = vmatprep.subr.msk.bf16.mxu0 %vm10022_vm9, %v2225_v29 }
 0x28e   : > { %4481 = vmatpush1.bf16.msra.mxu0 %v2290_v11  ;;  %v10200_v19 = vpop.permute.xlu1 %1058 }
 0x28f   : > { %v1057_v56 = vpop.permute.xlu0 %1056  ;;  %4482 = vmatprep.subr.bf16.mxu0 %v9293_v63 }
 0x290   : > { %v10214_v4 = vsel %vm1066_vm12, %v1055_v52, %v1057_v56  ;;  %v10218_v18 = vsel %vm1066_vm12, %v1057_v56, %v10200_v19  ;;  %2722 = vrot.lane.b32.xlu1 %v10068_v6, %s6576_s15  ;;  %v3414_v52 = vld [vmem:[%s11825_s3 + $0x8] sm:$0xff] }
 0x291   : > { %v2327_v63 = vsel %vm10209_vm14, %v10214_v4, 0  ;;  %2851 = vrot.lane.b32.xlu0 %v10068_v6, %s6575_s14  ;;  %6459 = vmatprep.subr.msk.bf16.mxu1 %vm10202_vm5, %v10218_v18 }
 0x292   : > { %4565 = vmatpush1.bf16.msra.mxu1 %v2327_v63  ;;  %v10233_v20 = vpop.permute.xlu1 %2191  ;;  %4483 = vmatpush1.bf16.msra.mxu0 %v8818_v60 }
 0x293   : > { %v2190_v0 = vpop.permute.xlu0 %2189 }
 0x294   : > { %v2226_v59 = vsel %vm2199_vm7, %v2188_v48, %v2190_v0  ;;  %v2227_v11 = vsel %vm2199_vm7, %v2190_v0, %v10233_v20  ;;  %3422 = vperm.xlu1 %6548, %v3414_v52  }
 0x295   : > { %v2292_v56 = vsel %vm10243_vm0, %v2226_v59, 0  ;;  %3417 = vperm.xlu0 %6547, %v3413_v50   ;;  %6460 = vmatprep.subr.msk.bf16.mxu1 %vm10238_vm15, %v2227_v11 }
 0x296   : > { %4567 = vmatpush1.bf16.msra.mxu1 %v2292_v56  ;;  %v2023_v60 = vpop.permute.xlu1 %2022 }
 0x297   : > { %v2021_v31 = vpop.permute.xlu0 %2020  ;;  %4568 = vmatprep.subr.bf16.mxu1 %v9361_v34  ;;  %v1964_v34 = vsel %vm10059_vm13, %v10005_v58, 0 }
 0x298   : > { %v2060_v16 = vsel %vm12200_vm8, %v9768_v42, %v2021_v31  ;;  %v2061_v48 = vsel %vm12201_vm2, %v2021_v31, %v2023_v60  ;;  %vm12203_vm8 = vmmov %vm12201_vm2 }
 0x299   : > { %v2127_v63 = vsel %vm10152_vm1, %v2060_v16, 0  ;;  %6448 = vmatprep.subr.msk.bf16.mxu0 %vm10098_vm11, %v2061_v48 }
 0x29a   : > { %4485 = vmatpush1.bf16.msra.mxu0 %v2127_v63  ;;  %v2025_v52 = vpop.permute.xlu1 %2024  ;;  %4569 = vmatpush1.bf16.msra.mxu1 %v9278_v17 }
 0x29b   : > { %v1604_v50 = vpop.permute.xlu0 %1603  ;;  %v2062_v42 = vsel %vm12202_vm3, %v2023_v60, %v2025_v52  ;;  %vm12206_vm3 = vmmov %vm12201_vm2 }
 0x29c   : > { %v10265_v0 = vsel %vm1617_vm4, %v9954_v45, %v1604_v50  ;;  %v2129_v45 = vsel %vm10209_vm14, %v2062_v42, 0 }
 0x29d   : > { %6449 = vmatprep.subr.msk.bf16.mxu0 %vm10022_vm9, %v10265_v0  ;;  %v2363_v1 = vsel %vm10059_vm13, %v10265_v0, 0 }
 0x29e   : > { %4487 = vmatpush1.bf16.msra.mxu0 %v1964_v34  ;;  %v1606_v59 = vpop.permute.xlu1 %1605  ;;  %v1416_v34 = vsel %vm10209_vm14, %v10129_v57, 0 }
 0x29f   : > { %v10274_v11 = vpop.permute.xlu0 %2026  ;;  %4488 = vmatprep.subr.bf16.mxu0 %v10105_v22  ;;  %v10284_v58 = vsel %vm1617_vm4, %v1604_v50, %v1606_v59 }
 0x2a0   : > { %v2063_v17 = vsel %vm12203_vm8, %v2025_v52, %v10274_v11  ;;  %v1966_v31 = vsel %vm10243_vm0, %v10284_v58, 0  ;;  %vm12207_vm8 = vmmov %vm12201_vm2 }
 0x2a1   : > { %6461 = vmatprep.subr.msk.bf16.mxu1 %vm10202_vm5, %v2063_v17 }
 0x2a2   : > { %4489 = vmatpush1.bf16.msra.mxu0 %v9643_v25  ;;  %4571 = vmatpush1.bf16.msra.mxu1 %v2129_v45  ;;  %v2550_v56 = vpop.permute.xlu1 %2549  ;;  %v1414_v25 = vsel %vm10152_vm1, %v9697_v39, 0 }
 0x2a3   : > { %v10287_v60 = vpop.permute.xlu0 %1607  ;;  %6450 = vmatprep.subr.msk.bf16.mxu0 %vm10098_vm11, %v10122_v47  ;;  %v10307_v16 = vsel %vm1066_vm12, %v9862_v37, %v2550_v56 }
 0x2a4   : > { %v10294_v22 = vsel %vm1617_vm4, %v1606_v59, %v10287_v60  ;;  %v3299_v52 = vsel %vm10152_vm1, %v10307_v16, 0 }
 0x2a5   : > { %6462 = vmatprep.subr.msk.bf16.mxu1 %vm10238_vm15, %v10294_v22 }
 0x2a6   : > { %4491 = vmatpush1.bf16.msra.mxu0 %v1414_v25  ;;  %4573 = vmatpush1.bf16.msra.mxu1 %v1966_v31  ;;  %v3162_v47 = vpop.permute.xlu1 %3161 }
 0x2a7   : > { %v2552_v48 = vpop.permute.xlu0 %2551  ;;  %4574 = vmatprep.subr.bf16.mxu1 %v10158_v41  ;;  %v3199_v39 = vsel %vm2199_vm7, %v9883_v40, %v3162_v47 }
 0x2a8   : > { %v10311_v63 = vsel %vm1066_vm12, %v2550_v56, %v2552_v48  ;;  %v3264_v42 = vsel %vm10059_vm13, %v3199_v39, 0  ;;  %v12204_v56 = vld [vmem:[#allocation4_spill] sm:$0xff]  ;;  %v12205_v39 = vld [vmem:[#allocation5_spill] sm:$0xff] }
 0x2a9   : > { %6451 = vmatprep.subr.msk.bf16.mxu0 %vm10098_vm11, %v10311_v63  ;;  %v2654_v3 = vsel %vm10209_vm14, %v10311_v63, 0  ;;  %v10464_v63 = vld [vmem:[%s11824_s2] ss:$12 sps:$4 sm:$0xff]  }
 0x2aa   : > { %4493 = vmatpush2.bf16.msra.mxu0 %v3299_v52  ;;  %4575 = vmatpush1.bf16.msra.mxu1 %v10079_v15  ;;  %v2554_v37 = vpop.permute.xlu1 %2553 }
 0x2ab   : > { %v3164_v50 = vpop.permute.xlu0 %3163  ;;  %6463 = vmatprep.subr.msk.bf16.mxu1 %vm10202_vm5, %v10214_v4  ;;  %v10334_v40 = vsel %vm1066_vm12, %v2552_v48, %v2554_v37 }
 0x2ac   : > { %v3200_v41 = vsel %vm2199_vm7, %v3162_v47, %v3164_v50  ;;  %v3301_v57 = vsel %vm10209_vm14, %v10334_v40, 0 }
 0x2ad   : > { %6452 = vmatprep.subr.msk.bf16.mxu0 %vm10022_vm9, %v3200_v41 }
 0x2ae   : > { %4495 = vmatpush2.bf16.msra.mxu0 %v3264_v42  ;;  %4577 = vmatpush1.bf16.msra.mxu1 %v1416_v34  ;;  %v3166_v15 = vpop.permute.xlu1 %3165  ;;  %v12208_v34 = vld [vmem:[#allocation12_spill] sm:$0xff] }
 0x2af   : > { %v10336_v59 = vpop.permute.xlu0 %2555  ;;  %4496 = vmatprep.subr.bf16.mxu0 %v9259_v28  ;;  %v3201_v17 = vsel %vm2199_vm7, %v3164_v50, %v3166_v15 }
 0x2b0   : > { %v10341_v4 = vsel %vm1066_vm12, %v2554_v37, %v10336_v59  ;;  %v3266_v25 = vsel %vm10243_vm0, %v3201_v17, 0 }
 0x2b1   : > { %6464 = vmatprep.subr.msk.bf16.mxu1 %vm10202_vm5, %v10341_v4 }
 0x2b2   : > { %4579 = vmatpush2.bf16.msra.mxu1 %v3301_v57  ;;  %v2999_v45 = vpop.permute.xlu1 %2998  ;;  %4497 = vmatpush2.bf16.msra.mxu0 %v12204_v56 }
 0x2b3   : > { %v10351_v31 = vpop.permute.xlu0 %3167  ;;  %v3037_v47 = vsel %vm12201_vm2, %v9911_v61, %v2999_v45  ;;  %v422_v61 = vadd.s32 3584, %v6803_v35 }
 0x2b4   : > { %v3202_v28 = vsel %vm2199_vm7, %v3166_v15, %v10351_v31  ;;  %v3103_v50 = vsel %vm10152_vm1, %v3037_v47, 0  ;;  %v423_v15 = vadd.s32 3712, %v6803_v35 }
 0x2b5   : > { %6465 = vmatprep.subr.msk.bf16.mxu1 %vm10238_vm15, %v3202_v28 }
 0x2b6   : > { %4581 = vmatpush2.bf16.msra.mxu1 %v3266_v25  ;;  %v3003_v48 = vpop.permute.xlu1 %3002  ;;  %v633_v47 = vand.u32 63, %v423_v15 }
 0x2b7   : > { %v3001_v52 = vpop.permute.xlu0 %3000  ;;  %4582 = vmatprep.subr.bf16.mxu1 %v12205_v39 }
 0x2b8   : > { %v3038_v37 = vsel %vm12206_vm3, %v2999_v45, %v3001_v52  ;;  %v3039_v41 = vsel %vm12207_vm8, %v3001_v52, %v3003_v48  ;;  %v2942_v45 = vsel %vm10059_vm13, %v10000_v32, 0  ;;  %v2944_v32 = vsel %vm10243_vm0, %v10041_v36, 0 }
 0x2b9   : > { %6453 = vmatprep.subr.msk.bf16.mxu0 %vm10098_vm11, %v3038_v37  ;;  %v3105_v56 = vsel %vm10209_vm14, %v3039_v41, 0  ;;  %vm871_vm8 = vcmp.lt.s32.totalorder %v633_v47, 63  ;;  %v2652_v36 = vsel %vm10152_vm1, %v9867_v24, 0  ;;  %v425_v24 = vadd.s32 3968, %v6803_v35 }
 0x2ba   : > { %4499 = vmatpush2.bf16.msra.mxu0 %v3103_v50  ;;  %4583 = vmatpush2.bf16.msra.mxu1 %v12208_v34  ;;  %v2844_v42 = vpop.permute.xlu1 %2843  ;;  %vm10423_vm1 = vcmp.gt.s32.totalorder %v633_v47, 0  ;;  %v640_v37 = vand.u32 63, %v424_v23 }
 0x2bb   : > { %v10371_v57 = vpop.permute.xlu0 %3004  ;;  %6454 = vmatprep.subr.msk.bf16.mxu0 %vm10022_vm9, %v10037_v54  ;;  %v2879_v28 = vsel %vm1617_vm4, %v9971_v12, %v2844_v42  ;;  %v626_v54 = vand.u32 63, %v422_v61  ;;  %v647_v30 = vand.u32 63, %v425_v24 }
 0x2bc   : > { %v3040_v17 = vsel %vm12201_vm2, %v3003_v48, %v10371_v57  ;;  %v3339_v46 = vsel %vm10243_vm0, %v2879_v28, 0 }
 0x2bd   : > { %6466 = vmatprep.subr.msk.bf16.mxu1 %vm10202_vm5, %v3040_v17  ;;  %vm870_vm3 = vcmp.lt.s32.totalorder %v626_v54, 63  ;;  %vm10484_vm14 = vcmp.gt.s32.totalorder %v647_v30, 0 }
 0x2be   : > { %4501 = vmatpush2.bf16.msra.mxu0 %v2942_v45  ;;  %4585 = vmatpush2.bf16.msra.mxu1 %v3105_v56  ;;  %v2846_v25 = vpop.permute.xlu1 %2845  ;;  %vm1762_vm2 = vmpackc.low %vm871_vm8, %vm870_vm3  ;;  %vm10519_vm3 = vcmp.lt.s32.totalorder %v640_v37, 63  ;;  %vm10523_vm8 = vcmp.lt.s32.totalorder %v647_v30, 63 }
 0x2bf   : > { %v2715_v52 = vpop.permute.xlu0 %2714  ;;  %4502 = vmatprep.subr.bf16.mxu0 %v10109_v21  ;;  %6467 = vmatprep.subr.msk.bf16.mxu1 %vm10238_vm15, %v2879_v28  ;;  %v10434_v35 = vsel %vm1617_vm4, %v2844_v42, %v2846_v25 }
 0x2c0   : > { %v2750_v12 = vsel %vm1486_vm6, %v10047_v10, %v2715_v52  ;;  %v1778_v10 = vsel %vm1762_vm2, 65537, %v11935_v62 }
 0x2c1   : > { %v1899_v13 = vrot.slane %v1778_v10, %v6829_v43  ;;  %v1895_v14 = vrot.slane %v1778_v10, %v6833_v44 }
 0x2c2   : > { %4503 = vmatpush2.bf16.msra.mxu0 %v10045_v8  ;;  %4587 = vmatpush2.bf16.msra.mxu1 %v2944_v32  ;;  %v10396_v48 = vpop.permute.xlu1 %2716 }
 0x2c3   : > { %v10398_v39 = vpop.permute.xlu0 %1609  ;;  %6455 = vmatprep.subr.msk.bf16.mxu0 %vm10098_vm11, %v10307_v16  ;;  %4588 = vmatprep.subr.bf16.mxu1 %v2750_v12  ;;  %vm10419_vm11 = vcmp.gt.s32.totalorder %v626_v54, 0  ;;  %vm10452_vm13 = vcmp.ne.s16.totalorder %v1899_v13, 0  ;;  %v10480_v29 = vsel %vm1486_vm6, %v2715_v52, %v10396_v48 }
 0x2c6   : > { %4505 = vmatpush2.bf16.msra.mxu0 %v2652_v36  ;;  %4589 = vmatpush2.bf16.msra.mxu1 %v10083_v26  ;;  %v10407_v8 = vpop.permute.xlu1 %2849 }
 0x2c7   : > { %v2848_v21 = vpop.permute.xlu0 %2847  ;;  %6456 = vmatprep.subr.msk.bf16.mxu0 %vm10022_vm9, %v10284_v58  ;;  %6468 = vmatprep.subr.msk.bf16.mxu1 %vm10202_vm5, %v10334_v40  ;;  %v10439_v58 = vsel %vm1617_vm4, %v10287_v60, %v10398_v39  ;;  %vm1212_vm9 = vmpackc.low %vm10423_vm1, %vm10419_vm11  ;;  %v2365_v60 = vsel %vm10243_vm0, %v10294_v22, 0  ;;  %vm10467_vm5 = vcmp.gt.s32.totalorder %v640_v37, 0 }
 0x2c8   : > { %v10472_v34 = vsel %vm1617_vm4, %v2846_v25, %v2848_v21  ;;  %v10476_v22 = vsel %vm1617_vm4, %v2848_v21, %v10407_v8  ;;  %v1228_v15 = vsel %vm1212_vm9, 65537, %v11935_v62  ;;  %vm1213_vm0 = vmpackc.low %vm10484_vm14, %vm10467_vm5 }
 0x2c9   : > { %v1349_v56 = vrot.slane %v1228_v15, %v6829_v43  ;;  %v1229_v10 = vsel %vm1213_vm0, 65537, %v11935_v62  ;;  %vm1763_vm11 = vmpackc.low %vm10523_vm8, %vm10519_vm3  ;;  %vm12237_vm3 = vcmask 7168  }
 0x2ca   : > { %4507 = vmatpush2.bf16.msra.mxu0 %v2363_v1  ;;  %4591 = vmatpush2.bf16.msra.mxu1 %v2654_v3  ;;  %v1483_v40 = vpop.permute.xlu1 %1482  ;;  %v1357_v13 = vrot.slane %v1229_v10, %v6829_v43  ;;  %v1353_v16 = vrot.slane %v1229_v10, %v6833_v44  ;;  %v1779_v37 = vsel %vm1763_vm11, 65537, %v11935_v62  ;;  %vm12238_vm8 = vmmov %vm12237_vm3 }
 0x2cb   : > { %v1481_v50 = vpop.permute.xlu0 %1480  ;;  %6469 = vmatprep.subr.msk.bf16.mxu1 %vm10238_vm15, %v10439_v58  ;;  %6470 = vmatprep.subr.msk.bf16.mxu0 %vm10238_vm15, %v10434_v35  ;;  %vm10498_vm15 = vcmp.ne.s16.totalorder %v1895_v14, 0  ;;  %vm10531_vm2 = vcmp.ne.s16.totalorder %v1349_v56, 0  ;;  %vm12239_vm11 = vmmov %vm12237_vm3 }
 0x2cc   : > { %v3341_v28 = vsel %vm10498_vm15, %v10472_v34, 0  ;;  %v10513_v25 = vsel %vm1486_vm6, %v1481_v50, %v1483_v40  ;;  %v10538_v23 = vsel %vm1486_vm6, %v10133_v49, %v1481_v50  ;;  %vm10579_vm9 = vcmp.ne.s16.totalorder %v1357_v13, 0 }
 0x2cd   : > { %4509 = vmatmul.mubr.bf16.vlgmr.msra.gmra.mxu0 %v10464_v63  ;;  %vm10587_vm5 = vcmp.ne.s16.totalorder %v1353_v16, 0 }
 0x2ce   : > { %4593 = vmatpush2.bf16.msra.mxu1 %v2365_v60  ;;  %4618 = vmatpush1.bf16.msra.mxu0 %v3339_v46  ;;  %v10482_v42 = vpop.permute.xlu1 %2720  ;;  %v1907_v60 = vrot.slane %v1779_v37, %v6829_v43 }
 0x2cf   : > { %v2719_v17 = vpop.permute.xlu0 %2718  ;;  %4619 = vmatprep.subr.bf16.mxu0 %v10480_v29  ;;  %6483 = vmatprep.subr.msk.bf16.mxu1 %vm10452_vm13, %v10476_v22 }
 0x2d0   : > { %4637 = vmatprep.mubr.bf16.mxu0 %v11935_v62  ;;  %v10517_v54 = vsel %vm1486_vm6, %v2719_v17, %v10482_v42  ;;  %v10542_v24 = vsel %vm1486_vm6, %v10396_v48, %v2719_v17  ;;  %vm10607_vm14 = vcmp.ne.s16.totalorder %v1907_v60, 0 }
 0x2d1   : > { %4595 = vmatmul.mubr.bf16.vlgmr.msra.gmra.mxu1 %v10464_v63 }
 0x2d2   : > { %4620 = vmatpush1.bf16.msra.mxu0 %v2750_v12  ;;  %4704 = vmatpush1.bf16.msra.mxu1 %v3341_v28  ;;  %v1063_v47 = vpop.permute.xlu1 %1062  ;;  %v1345_v12 = vrot.slane %v1228_v15, %v6833_v44 }
 0x2d3   : > { %v1061_v36 = vpop.permute.xlu0 %1060  ;;  %4648 = vmatprep.subr.bf16.mxu0 %v10513_v25  ;;  %4705 = vmatprep.subr.bf16.mxu1 %v10517_v54 }
 0x2d4   : > { %4723 = vmatprep.mubr.bf16.mxu1 %v11935_v62  ;;  %v10553_v26 = vsel %vm1066_vm12, %v10200_v19, %v1061_v36  ;;  %v10556_v49 = vsel %vm1066_vm12, %v1061_v36, %v1063_v47  ;;  %vm10565_vm1 = vcmp.ne.s16.totalorder %v1345_v12, 0 }
 0x2d5   : > { %6471 = vmatmul.mubr.msk.bf16.vlgmr.msra.gmra.mxu0 %vm3440_vm10, %v10116_v7  ;;  %v2329_v50 = vsel %vm10565_vm1, %v10553_v26, 0 }
 0x2d6   : > { %4649 = vmatpush1.bf16.msra.mxu0 %v10538_v23  ;;  %4706 = vmatpush1.bf16.msra.mxu1 %v10542_v24  ;;  %v2194_v48 = vpop.permute.xlu1 %2193 }
 0x2d7   : > { %v1485_v1 = vpop.permute.xlu0 %1484  ;;  %6472 = vmatprep.subr.msk.bf16.mxu0 %vm10531_vm2, %v10556_v49  ;;  %4680 = vmatprep.mubr.bf16.mxu0 %v10149_v2  ;;  %v2228_v30 = vsel %vm2199_vm7, %v10233_v20, %v2194_v48  ;;  %v1903_v20 = vrot.slane %v1779_v37, %v6833_v44  ;;  %v1968_v37 = vsel %vm10498_vm15, %v10439_v58, 0 }
 0x2d8   : > { %v10570_v3 = vsel %vm1486_vm6, %v1483_v40, %v1485_v1  ;;  %6485 = vmatprep.subr.msk.bf16.mxu1 %vm1486_vm6, %v1485_v1  ;;  %v2294_v56 = vsel %vm10498_vm15, %v2228_v30, 0 }
 0x2d9   : > { %6484 = vmatmul.mubr.msk.bf16.vlgmr.msra.gmra.mxu1 %vm3440_vm10, %v10116_v7  ;;  %vm10612_vm0 = vcmp.ne.s16.totalorder %v1903_v20, 0 }
 0x2da   : > { %4651 = vmatpush1.bf16.msra.mxu0 %v2329_v50  ;;  %4735 = vmatpush1.bf16.msra.mxu1 %v10570_v3  ;;  %v1065_v40 = vpop.permute.xlu1 %1064 }
 0x2db   : > { %v2196_v41 = vpop.permute.xlu0 %2195  ;;  %v10592_v61 = vsel %vm1066_vm12, %v1063_v47, %v1065_v40  ;;  %v2299_v15 = vsel %vm1066_vm12, %v1065_v40, 0  ;;  %4766 = vmatprep.mubr.bf16.mxu1 %v10149_v2 }
 0x2dc   : > { %v2229_v17 = vsel %vm2199_vm7, %v2194_v48, %v2196_v41  ;;  %v2331_v43 = vsel %vm10587_vm5, %v10592_v61, 0  ;;  %6486 = vmatprep.subr.msk.bf16.mxu1 %vm10579_vm9, %v2299_v15  ;;  %v1418_v15 = vsel %vm10565_vm1, %v10218_v18, 0  ;;  %v1420_v18 = vsel %vm10587_vm5, %v10556_v49, 0 }
 0x2dd   : > { %6473 = vmatprep.subr.msk.bf16.mxu0 %vm10452_vm13, %v2229_v17 }
 0x2de   : > { %4653 = vmatpush1.bf16.msra.mxu0 %v2294_v56  ;;  %4737 = vmatpush1.bf16.msra.mxu1 %v2331_v43  ;;  %v2029_v2 = vpop.permute.xlu1 %2028 }
 0x2df   : > { %v2198_v28 = vpop.permute.xlu0 %2197  ;;  %4654 = vmatprep.subr.bf16.mxu0 %v9821_v9  ;;  %v2064_v12 = vsel %vm12237_vm3, %v10274_v11, %v2029_v2 }
 0x2e0   : > { %v2230_v52 = vsel %vm2199_vm7, %v2196_v41, %v2198_v28  ;;  %v2264_v32 = vsel %vm2199_vm7, %v2198_v28, 0  ;;  %v2131_v48 = vsel %vm10565_vm1, %v2064_v12, 0 }
 0x2e1   : > { %v2296_v36 = vsel %vm10612_vm0, %v2230_v52, 0  ;;  %6487 = vmatprep.subr.msk.bf16.mxu1 %vm10607_vm14, %v2264_v32 }
 0x2e2   : > { %4655 = vmatpush1.bf16.msra.mxu0 %v9351_v55  ;;  %4739 = vmatpush1.bf16.msra.mxu1 %v2296_v36  ;;  %v1612_v9 = vpop.permute.xlu1 %1611 }
 0x2e3   : > { %v2031_v10 = vpop.permute.xlu0 %2030  ;;  %4740 = vmatprep.subr.bf16.mxu1 %v9879_v53  ;;  %v10633_v16 = vsel %vm1617_vm4, %v10398_v39, %v1612_v9 }
 0x2e4   : > { %v2065_v13 = vsel %vm12238_vm8, %v2029_v2, %v2031_v10  ;;  %vm12241_vm8 = vmmov %vm12237_vm3 }
 0x2e5   : > { %6474 = vmatprep.subr.msk.bf16.mxu0 %vm10531_vm2, %v2065_v13 }
 0x2e6   : > { %4657 = vmatpush1.bf16.msra.mxu0 %v2131_v48  ;;  %4741 = vmatpush1.bf16.msra.mxu1 %v9806_v5  ;;  %v2035_v55 = vpop.permute.xlu1 %2034 }
 0x2e7   : > { %v2033_v11 = vpop.permute.xlu0 %2032  ;;  %6475 = vmatprep.subr.msk.bf16.mxu0 %vm10452_vm13, %v10633_v16 }
 0x2e8   : > { %v2066_v53 = vsel %vm12239_vm11, %v2031_v10, %v2033_v11  ;;  %v2067_v1 = vsel %vm12237_vm3, %v2033_v11, %v2035_v55  ;;  %vm12243_vm11 = vmmov %vm12237_vm3 }
 0x2e9   : > { %v2133_v39 = vsel %vm10587_vm5, %v2066_v53, 0  ;;  %6488 = vmatprep.subr.msk.bf16.mxu1 %vm10579_vm9, %v2067_v1  ;;  %v10726_v53 = vpop.f32.mrf.mxu0 }
 0x2ea   : > { %4659 = vmatpush1.bf16.msra.mxu0 %v1968_v37  ;;  %4743 = vmatpush1.bf16.msra.mxu1 %v2133_v39  ;;  %v10648_v5 = vpop.permute.xlu1 %1615 }
 0x2eb   : > { %v1614_v50 = vpop.permute.xlu0 %1613  ;;  %4660 = vmatprep.subr.bf16.mxu0 %v10538_v23  ;;  %v10742_v39 = vpop.f32.mrf.mxu0 }
 0x2ec   : > { %v10652_v30 = vsel %vm1617_vm4, %v1612_v9, %v1614_v50  ;;  %v10656_v40 = vsel %vm1617_vm4, %v1614_v50, %v10648_v5 }
 0x2ed   : > { %v1970_v58 = vsel %vm10612_vm0, %v10652_v30, 0  ;;  %6489 = vmatprep.subr.msk.bf16.mxu1 %vm10607_vm14, %v10656_v40  ;;  %v2369_v19 = vsel %vm10612_vm0, %v10656_v40, 0 }
 0x2ee   : > { %4661 = vmatpush1.bf16.msra.mxu0 %v10164_v51  ;;  %4745 = vmatpush1.bf16.msra.mxu1 %v1970_v58  ;;  %v2560_v60 = vpop.permute.xlu1 %2559 }
 0x2ef   : > { %v2558_v23 = vpop.permute.xlu0 %2557  ;;  %6476 = vmatprep.subr.msk.bf16.mxu0 %vm10531_vm2, %v10553_v26  ;;  %4746 = vmatprep.subr.bf16.mxu1 %v10570_v3 }
 0x2f0   : > { %v10670_v41 = vsel %vm1066_vm12, %v2558_v23, %v2560_v60  ;;  %v10677_v20 = vsel %vm1066_vm12, %v10336_v59, %v2558_v23  ;;  %v2656_v23 = vsel %vm10565_vm1, %v10341_v4, 0 }
 0x2f1   : > { %v3303_v59 = vsel %vm10565_vm1, %v10677_v20, 0  ;;  %v2658_v4 = vsel %vm10587_vm5, %v10670_v41, 0 }
 0x2f2   : > { %4663 = vmatpush1.bf16.msra.mxu0 %v1418_v15  ;;  %4747 = vmatpush1.bf16.msra.mxu1 %v10513_v25  ;;  %v3172_v51 = vpop.permute.xlu1 %3171 }
 0x2f3   : > { %v3170_v17 = vpop.permute.xlu0 %3169  ;;  %6477 = vmatprep.subr.msk.bf16.mxu0 %vm10531_vm2, %v10670_v41  ;;  %6490 = vmatprep.subr.msk.bf16.mxu1 %vm10579_vm9, %v10592_v61 }
 0x2f4   : > { %v3204_v26 = vsel %vm2199_vm7, %v3170_v17, %v3172_v51  ;;  %v3203_v25 = vsel %vm2199_vm7, %v10351_v31, %v3170_v17  ;;  %v10706_v31 = vpop.f32.mrf.mxu1 }
 0x2f5   : > { %v3268_v2 = vsel %vm10498_vm15, %v3203_v25, 0 }
 0x2f6   : > { %4665 = vmatpush2.bf16.msra.mxu0 %v3303_v59  ;;  %4749 = vmatpush1.bf16.msra.mxu1 %v1420_v18  ;;  %v3174_v3 = vpop.permute.xlu1 %3173  ;;  %v10715_v10 = vpop.f32.mrf.mxu1 }
 0x2f7   : > { %v2562_v43 = vpop.permute.xlu0 %2561  ;;  %6478 = vmatprep.subr.msk.bf16.mxu0 %vm10452_vm13, %v3204_v26  ;;  %v3238_v49 = vsel %vm2199_vm7, %v3174_v3, 0  ;;  %v3205_v52 = vsel %vm2199_vm7, %v3172_v51, %v3174_v3  ;;  %vm12242_vm7 = vmmov %vm12237_vm3 }
 0x2f8   : > { %v2593_v61 = vsel %vm1066_vm12, %v2560_v60, %v2562_v43  ;;  %v3273_v56 = vsel %vm1066_vm12, %v2562_v43, 0  ;;  %vm12240_vm12 = vmmov %vm12237_vm3  ;;  %v3270_v9 = vsel %vm10612_vm0, %v3205_v52, 0  ;;  %v10756_v60 = vpop.f32.mrf.mxu0 }
 0x2f9   : > { %v3305_v28 = vsel %vm10587_vm5, %v2593_v61, 0  ;;  %6491 = vmatprep.subr.msk.bf16.mxu1 %vm10579_vm9, %v3273_v56 }
 0x2fa   : > { %4667 = vmatpush2.bf16.msra.mxu0 %v3268_v2  ;;  %4751 = vmatpush2.bf16.msra.mxu1 %v3305_v28  ;;  %v3009_v32 = vpop.permute.xlu1 %3008 }
 0x2fb   : > { %v3007_v36 = vpop.permute.xlu0 %3006  ;;  %4668 = vmatprep.subr.bf16.mxu0 %v9787_v33  ;;  %6492 = vmatprep.subr.msk.bf16.mxu1 %vm10607_vm14, %v3238_v49 }
 0x2fc   : > { %v3042_v12 = vsel %vm12240_vm12, %v3007_v36, %v3009_v32  ;;  %v3041_v13 = vsel %vm12241_vm8, %v10371_v57, %v3007_v36 }
 0x2fd   : > { %v3107_v11 = vsel %vm10565_vm1, %v3041_v13, 0 }
 0x2fe   : > { %4669 = vmatpush2.bf16.msra.mxu0 %v9657_v38  ;;  %4753 = vmatpush2.bf16.msra.mxu1 %v3270_v9  ;;  %v3013_v55 = vpop.permute.xlu1 %3012  ;;  %v10730_v38 = vpop.f32.mrf.mxu1 }
 0x2ff   : > { %v3011_v48 = vpop.permute.xlu0 %3010  ;;  %6479 = vmatprep.subr.msk.bf16.mxu0 %vm10531_vm2, %v3042_v12  ;;  %4754 = vmatprep.subr.bf16.mxu1 %v10068_v6  ;;  %v2946_v6 = vsel %vm10498_vm15, %v10434_v35, 0  ;;  %v2948_v35 = vsel %vm10612_vm0, %v10476_v22, 0  ;;  %v10769_v22 = vpop.f32.mrf.mxu0 }
 0x300   : > { %v3044_v33 = vsel %vm12242_vm7, %v3011_v48, %v3013_v55  ;;  %v3043_v1 = vsel %vm12243_vm11, %v3009_v32, %v3011_v48  ;;  %v10746_v50 = vpop.f32.mrf.mxu1 }
 0x301   : > { %v3109_v37 = vsel %vm10587_vm5, %v3043_v1, 0  ;;  %v10785_v21 = vpop.f32.mrf.mxu0 }
 0x302   : > { %4671 = vmatpush2.bf16.msra.mxu0 %v3107_v11  ;;  %4755 = vmatpush2.bf16.msra.mxu1 %v9777_v27  ;;  %v10751_v58 = vpop.f32.mrf.mxu1 }
 0x303   : > { %v2852_v57 = vpop.permute.xlu0 %2851  ;;  %6480 = vmatprep.subr.msk.bf16.mxu0 %vm10452_vm13, %v10472_v34  ;;  %6493 = vmatprep.subr.msk.bf16.mxu1 %vm10579_vm9, %v3044_v33  ;;  %v2723_v34 = vpop.permute.xlu1 %2722 }
 0x304   : > { %v2883_v27 = vsel %vm1617_vm4, %v10407_v8, %v2852_v57  ;;  %v2754_v8 = vsel %vm1486_vm6, %v10482_v42, %v2723_v34  ;;  %v2367_v42 = vsel %vm10498_vm15, %v10633_v16, 0  ;;  %v3311_v0 = vsel %vm1617_vm4, %v2852_v57, 0  ;;  %v10802_v46 = vpop.f32.mrf.mxu0 }
 0x305   : > { %v3343_v14 = vsel %vm10612_vm0, %v2883_v27, 0  ;;  %vm5401_vm15 = vcmask 130048  }
 0x306   : > { %4673 = vmatpush2.bf16.msra.mxu0 %v2946_v6  ;;  %4757 = vmatpush2.bf16.msra.mxu1 %v3109_v37  ;;  %v10809_v16 = vpop.f32.mrf.mxu0 }
 0x307   : > { %4674 = vmatprep.subr.bf16.mxu0 %v10542_v24  ;;  %6494 = vmatprep.subr.msk.bf16.mxu1 %vm10607_vm14, %v2883_v27  ;;  %v10764_v24 = vpop.f32.mrf.mxu1 }
 0x30a   : > { %4675 = vmatpush2.bf16.msra.mxu0 %v10480_v29  ;;  %4759 = vmatpush2.bf16.msra.mxu1 %v2948_v35  ;;  %v10777_v29 = vpop.f32.mrf.mxu1 }
 0x30b   : > { %6481 = vmatprep.subr.msk.bf16.mxu0 %vm10531_vm2, %v10677_v20  ;;  %4760 = vmatprep.subr.bf16.mxu1 %v2754_v8 }
 0x30c   : > { %v10794_v45 = vpop.f32.mrf.mxu1 }
 0x30e   : > { %4677 = vmatpush2.bf16.msra.mxu0 %v2656_v23  ;;  %4761 = vmatpush2.bf16.msra.mxu1 %v10517_v54  ;;  %v2337_v54 = vsel %vm1617_vm4, %v10648_v5, 0  ;;  %v10806_v44 = vpop.f32.mrf.mxu1  ;;  %v10816_v5 = vpop.f32.mrf.mxu0  ;;  %vm12307_vm4 = vmmov %vm12237_vm3 }
 0x30f   : > { %6482 = vmatprep.subr.msk.bf16.mxu0 %vm10452_vm13, %v10652_v30  ;;  %6495 = vmatprep.subr.msk.bf16.mxu1 %vm10579_vm9, %v2593_v61  ;;  %vm12310_vm13 = vmmov %vm12237_vm3 }
 0x310   : > { %v10812_v47 = vpop.f32.mrf.mxu1  ;;  %v10819_v30 = vpop.f32.mrf.mxu0 }
 0x312   : > { %4679 = vmatpush2.bf16.msra.mxu0 %v2367_v42  ;;  %4763 = vmatpush2.bf16.msra.mxu1 %v2658_v4  ;;  %v10821_v40 = vpop.f32.mrf.mxu1  ;;  %v10823_v41 = vpop.f32.mrf.mxu0 }
 0x313   : > { %6496 = vmatprep.subr.msk.bf16.mxu1 %vm10607_vm14, %v2337_v54  ;;  %6497 = vmatprep.subr.msk.bf16.mxu0 %vm10607_vm14, %v3311_v0  ;;  %v10903_v0 = vpop.permute.xlu0 %3417 }
 0x314   : > { %v10829_v20 = vpop.f32.mrf.mxu0 }
 0x315   : > { %4681 = vmatmul.mubr.bf16.vlgmr.msra.gmra.mxu0 %v10464_v63 }
 0x316   : > { %4765 = vmatpush2.bf16.msra.mxu1 %v2369_v19  ;;  %4790 = vmatpush1.bf16.msra.mxu0 %v3343_v14  ;;  %v10833_v17 = vpop.f32.mrf.mxu0  ;;  %v10905_v19 = vpop.permute.xlu1 %3422 }
 0x317   : > { %6498 = vmatprep.subr.msk.bf16.mxu0 %vm1486_vm6, %v2723_v34  ;;  %4809 = vmatprep.mubr.bf16.mxu0 %v11935_v62  ;;  %vm12308_vm6 = vmmov %vm12237_vm3 }
 0x318   : > { %v10837_v26 = vpop.f32.mrf.mxu0 }
 0x319   : > { %4767 = vmatmul.mubr.bf16.vlgmr.msra.gmra.mxu1 %v10464_v63  ;;  %v10825_v63 = vpop.f32.mrf.mxu1 }
 0x31a   : > { %4792 = vmatpush1.bf16.msra.mxu0 %v2754_v8  ;;  %5478 = vmatprep.mubr.bf16.mxu1 %v11935_v62  ;;  %v10841_v59 = vpop.f32.mrf.mxu0 }
 0x31b   : > { %v10827_v15 = vpop.f32.mrf.mxu1 }
 0x31c   : > { %v10845_v3 = vpop.f32.mrf.mxu0 }
 0x31d   : > { %6499 = vmatmul.mubr.msk.bf16.vlgmr.msra.gmra.mxu0 %vm3440_vm10, %v10116_v7  ;;  %v10831_v51 = vpop.f32.mrf.mxu1  ;;  %vm12309_vm10 = vmmov %vm12237_vm3 }
 0x31e   : > { %5437 = vmatprep.mubr.bf16.mxu0 %v11935_v62  ;;  %v10849_v61 = vpop.f32.mrf.mxu0 }
 0x31f   : > { %v10835_v7 = vpop.f32.mrf.mxu1 }
 0x320   : > { %v10851_v56 = vpop.f32.mrf.mxu0 }
 0x321   : > { %v10839_v18 = vpop.f32.mrf.mxu1 }
 0x322   : > { %v10855_v2 = vpop.f32.mrf.mxu0 }
 0x323   : > { %v10843_v25 = vpop.f32.mrf.mxu1 }
 0x324   : > { %v10861_v32 = vpop.f32.mrf.mxu0 }
 0x325   : > { %v10847_v43 = vpop.f32.mrf.mxu1 }
 0x326   : > { %v10865_v12 = vpop.f32.mrf.mxu0 }
 0x327   : > { %v10853_v49 = vpop.f32.mrf.mxu1 }
 0x328   : > { %v10869_v13 = vpop.f32.mrf.mxu0 }
 0x329   : > { %v10857_v28 = vpop.f32.mrf.mxu1 }
 0x32a   : > { %v10873_v55 = vpop.f32.mrf.mxu0 }
 0x32b   : > { %v10859_v52 = vpop.f32.mrf.mxu1 }
 0x32c   : > { %v10877_v11 = vpop.f32.mrf.mxu0 }
 0x32d   : > { %v10863_v36 = vpop.f32.mrf.mxu1 }
 0x32e   : > { %v10881_v57 = vpop.f32.mrf.mxu0 }
 0x32f   : > { %v10867_v9 = vpop.f32.mrf.mxu1 }
 0x330   : > { %v10883_v6 = vpop.f32.mrf.mxu0 }
 0x331   : > { %v10871_v48 = vpop.f32.mrf.mxu1 }
 0x332   : > { %v10887_v27 = vpop.f32.mrf.mxu0 }
 0x333   : > { %v10875_v33 = vpop.f32.mrf.mxu1 }
 0x334   : > { %v10893_v8 = vpop.f32.mrf.mxu0 }
 0x335   : > { %v10879_v1 = vpop.f32.mrf.mxu1 }
 0x336   : > { %12244 = vst [vmem:[#allocation6_spill] sm:$0xff] %v10879_v1  ;;  %v10897_v42 = vpop.f32.mrf.mxu0 }
 0x337   : > { %v10885_v37 = vpop.f32.mrf.mxu1 }
 0x338   : > { %12245 = vst [vmem:[#allocation3_spill] sm:$0xff] %v10885_v37  ;;  %v10901_v54 = vpop.f32.mrf.mxu0 }
 0x339   : > { %v10889_v34 = vpop.f32.mrf.mxu1  ;;  %12250 = vst [vmem:[#allocation8_spill] sm:$0xff] %v10901_v54  ;;  %v3485_v54 = vadd.f32 %v10769_v22, %v10905_v19 }
 0x33a   : > { %12246 = vst [vmem:[#allocation7_spill] sm:$0xff] %v10889_v34  ;;  %v10909_v62 = vpop.f32.mrf.mxu0  ;;  %v3479_v34 = vadd.f32 %v10726_v53, %v10903_v0 }
 0x33b   : > { %v10891_v35 = vpop.f32.mrf.mxu1  ;;  %12252 = vst [vmem:[#allocation4_spill] sm:$0xff] %v10909_v62 }
 0x33c   : > { %12247 = vst [vmem:[#allocation11_spill] sm:$0xff] %v10891_v35  ;;  %v3483_v35 = vadd.f32 %v10756_v60, %v10905_v19  ;;  %v10921_v1 = vpop.f32.mrf.mxu0  ;;  %v3565_v60 = vadd.f32 %v10751_v58, %v10903_v0 }
 0x33d   : > { %v10895_v23 = vpop.f32.mrf.mxu1  ;;  %12254 = vst [vmem:[#allocation12_spill] sm:$0xff] %v10921_v1 }
 0x33e   : > { %12248 = vst [vmem:[#allocation10_spill] sm:$0xff] %v10895_v23  ;;  %v3481_v23 = vadd.f32 %v10742_v39, %v10903_v0  ;;  %v10930_v53 = vadd.f32 %v10730_v38, %v3483_v35  ;;  %v10933_v39 = vadd.f32 %v10746_v50, %v3485_v54  ;;  %v10941_v1 = vpop.f32.mrf.mxu0  ;;  %v10958_v35 = vadd.f32 %v10785_v21, %v3565_v60 }
 0x33f   : > { %v10899_v4 = vpop.f32.mrf.mxu1  ;;  %12258 = vst [vmem:[#allocation16_spill] sm:$0xff] %v10941_v1  ;;  %v3571_v54 = vadd.f32 %v10794_v45, %v10905_v19  ;;  %v3651_v21 = vadd.f32 %v10819_v30, %v10903_v0  ;;  %v3655_v60 = vadd.f32 %v10829_v20, %v10905_v19 }
 0x340   : > { %12249 = vst [vmem:[#allocation2_spill] sm:$0xff] %v10899_v4  ;;  %v10927_v62 = vadd.f32 %v10715_v10, %v3481_v23  ;;  %v4922_v50 = vmul.f32 %v10930_v53, %v10930_v53  ;;  %v4923_v58 = vmul.f32 %v10933_v39, %v10933_v39  ;;  %v4892_v45 = vmul.f32 %v10958_v35, %v10958_v35 }
 0x341   : > { %v10907_v14 = vpop.f32.mrf.mxu1 }
 0x342   : > { %12251 = vst [vmem:[#allocation9_spill] sm:$0xff] %v10907_v14  ;;  %v10924_v14 = vadd.f32 %v10706_v31, %v3479_v34  ;;  %12256 = vst [vmem:[#allocation14_spill] sm:$0xff] %v10927_v62  ;;  %v4891_v10 = vmul.f32 %v10927_v62, %v10927_v62  ;;  %v10953_v34 = vpop.f32.mrf.mxu0 }
 0x343   : > { %v10919_v4 = vpop.f32.mrf.mxu1  ;;  %12259 = vst [vmem:[#allocation17_spill] sm:$0xff] %v10953_v34  ;;  %v4987_v34 = vadd.f32 %v4923_v58, %v4922_v50 }
 0x344   : > { %12253 = vst [vmem:[#allocation5_spill] sm:$0xff] %v10919_v4  ;;  %12255 = vst [vmem:[#allocation13_spill] sm:$0xff] %v10924_v14  ;;  %v3569_v4 = vadd.f32 %v10777_v29, %v10905_v19  ;;  %v4890_v31 = vmul.f32 %v10924_v14, %v10924_v14  ;;  %v4824_v38 = vadd.f32 %v10927_v62, %v10924_v14  ;;  %v10970_v37 = vpop.f32.mrf.mxu0 }
 0x345   : > { %v10937_v22 = vpop.f32.mrf.mxu1  ;;  %v3567_v29 = vadd.f32 %v10764_v24, %v10903_v0 }
 0x346   : > { %12257 = vst [vmem:[#allocation15_spill] sm:$0xff] %v10937_v22  ;;  %v10965_v14 = vadd.f32 %v10809_v16, %v3569_v4  ;;  %v4954_v62 = vadd.f32 %v4891_v10, %v4890_v31  ;;  %v4857_v22 = vadd.f32 %v10933_v39, %v10930_v53  ;;  %v4825_v1 = vadd.f32 %v4824_v38, %v10958_v35  ;;  %v10992_v58 = vpop.f32.mrf.mxu0 }
 0x347   : > { %v10960_v23 = vpop.f32.mrf.mxu1  ;;  %v10973_v24 = vadd.f32 %v10802_v46, %v3567_v29  ;;  %v10982_v4 = vadd.f32 %v10816_v5, %v3571_v54  ;;  %v3653_v5 = vadd.f32 %v10823_v41, %v10903_v0  ;;  %v10997_v29 = vadd.f32 %v10806_v44, %v3651_v21 }
 0x348   : > { %v4924_v31 = vmul.f32 %v10965_v14, %v10965_v14  ;;  %v4955_v10 = vadd.f32 %v4954_v62, %v4892_v45  ;;  %v4858_v46 = vadd.f32 %v4857_v22, %v10965_v14  ;;  %v3657_v62 = vadd.f32 %v10833_v17, %v10905_v19  ;;  %v11012_v21 = vpop.f32.mrf.mxu0 }
 0x349   : > { %v10979_v16 = vpop.f32.mrf.mxu1  ;;  %v4826_v30 = vadd.f32 %v4825_v1, %v10973_v24  ;;  %v4893_v20 = vmul.f32 %v10973_v24, %v10973_v24  ;;  %v11004_v22 = vadd.f32 %v10821_v40, %v3655_v60  ;;  %v4925_v1 = vmul.f32 %v10982_v4, %v10982_v4 }
 0x34a   : > { %v4988_v50 = vadd.f32 %v4987_v34, %v4924_v31  ;;  %v4859_v54 = vadd.f32 %v4858_v46, %v10982_v4  ;;  %v11015_v31 = vadd.f32 %v10812_v47, %v3653_v5  ;;  %v3737_v40 = vadd.f32 %v10827_v15, %v10903_v0 }
 0x34b   : > { %v10989_v38 = vpop.f32.mrf.mxu1  ;;  %v4956_v34 = vadd.f32 %v4955_v10, %v4893_v20  ;;  %v4827_v44 = vadd.f32 %v4826_v30, %v10997_v29  ;;  %v4894_v17 = vmul.f32 %v10997_v29, %v10997_v29  ;;  %v11022_v60 = vadd.f32 %v10825_v63, %v3657_v62  ;;  %v11032_v20 = vpop.f32.mrf.mxu0 }
 0x34c   : > { %v4989_v41 = vadd.f32 %v4988_v50, %v4925_v1  ;;  %v3741_v10 = vadd.f32 %v10835_v7, %v10905_v19  ;;  %v4926_v46 = vmul.f32 %v11004_v22, %v11004_v22  ;;  %v4860_v50 = vadd.f32 %v4859_v54, %v11004_v22 }
 0x34d   : > { %v11009_v45 = vpop.f32.mrf.mxu1  ;;  %v4957_v30 = vadd.f32 %v4956_v34, %v4894_v17  ;;  %v4828_v5 = vadd.f32 %v4827_v44, %v11015_v31  ;;  %v3739_v63 = vadd.f32 %v10831_v51, %v10903_v0  ;;  %v11037_v62 = vadd.f32 %v10837_v26, %v3737_v40  ;;  %v11052_v40 = vpop.f32.mrf.mxu0 }
 0x34e   : > { %v4990_v15 = vadd.f32 %v4989_v41, %v4926_v46  ;;  %v4895_v7 = vmul.f32 %v11015_v31, %v11015_v31  ;;  %v3743_v1 = vadd.f32 %v10839_v18, %v10905_v19  ;;  %v11044_v34 = vadd.f32 %v10845_v3, %v3741_v10 }
 0x34f   : > { %v11029_v47 = vpop.f32.mrf.mxu1  ;;  %v4927_v54 = vmul.f32 %v11022_v60, %v11022_v60  ;;  %v4861_v41 = vadd.f32 %v4860_v50, %v11022_v60  ;;  %v4829_v51 = vadd.f32 %v4828_v5, %v11037_v62  ;;  %v11055_v46 = vadd.f32 %v10841_v59, %v3739_v63 }
 0x350   : > { %12260 = vst [vmem:[#allocation18_spill] sm:$0xff] %v11044_v34  ;;  %v4958_v44 = vadd.f32 %v4957_v30, %v4895_v7  ;;  %v3823_v18 = vadd.f32 %v10851_v56, %v10903_v0  ;;  %v4896_v3 = vmul.f32 %v11037_v62, %v11037_v62  ;;  %v11062_v10 = vadd.f32 %v10849_v61, %v3743_v1  ;;  %v11072_v7 = vpop.f32.mrf.mxu0 }
 0x351   : > { %v11049_v17 = vpop.f32.mrf.mxu1  ;;  %v4991_v26 = vadd.f32 %v4990_v15, %v4927_v54  ;;  %v3827_v30 = vadd.f32 %v10861_v32, %v10905_v19  ;;  %v4928_v50 = vmul.f32 %v11044_v34, %v11044_v34  ;;  %v4862_v15 = vadd.f32 %v4861_v41, %v11044_v34  ;;  %v12286_v34 = vld [vmem:[#allocation16_spill] sm:$0xff] }
 0x352   : > { %v4959_v5 = vadd.f32 %v4958_v44, %v4896_v3  ;;  %v4830_v63 = vadd.f32 %v4829_v51, %v11055_v46  ;;  %v3825_v61 = vadd.f32 %v10855_v2, %v10903_v0  ;;  %v11077_v1 = vadd.f32 %v10843_v25, %v3823_v18  ;;  %v11092_v18 = vpop.f32.mrf.mxu0 }
 0x353   : > { %v11069_v59 = vpop.f32.mrf.mxu1  ;;  %v4992_v56 = vadd.f32 %v4991_v26, %v4928_v50  ;;  %v4897_v32 = vmul.f32 %v11055_v46, %v11055_v46  ;;  %v3829_v54 = vadd.f32 %v10865_v12, %v10905_v19  ;;  %v11084_v44 = vadd.f32 %v10853_v49, %v3827_v30 }
 0x354   : > { %12261 = vst [vmem:[#allocation19_spill] sm:$0xff] %v11077_v1  ;;  %v4929_v41 = vmul.f32 %v11062_v10, %v11062_v10  ;;  %v4863_v26 = vadd.f32 %v4862_v15, %v11062_v10  ;;  %v4831_v25 = vadd.f32 %v4830_v63, %v11077_v1  ;;  %v11095_v50 = vadd.f32 %v10847_v43, %v3825_v61  ;;  %v11108_v63 = vpop.f32.mrf.mxu0 }
 0x355   : > { %12262 = vst [vmem:[#allocation20_spill] sm:$0xff] %v11084_v44  ;;  %v4960_v51 = vadd.f32 %v4959_v5, %v4897_v32  ;;  %v11089_v3 = vpop.f32.mrf.mxu1  ;;  %v3909_v49 = vadd.f32 %v10859_v52, %v10903_v0  ;;  %v4898_v12 = vmul.f32 %v11077_v1, %v11077_v1  ;;  %v11102_v30 = vadd.f32 %v10857_v28, %v3829_v54 }
 0x356   : > { %v4993_v2 = vadd.f32 %v4992_v56, %v4929_v41  ;;  %12263 = vst [vmem:[#allocation21_spill] sm:$0xff] %v11095_v50  ;;  %v3913_v5 = vadd.f32 %v10867_v9, %v10905_v19  ;;  %v4930_v15 = vmul.f32 %v11084_v44, %v11084_v44  ;;  %v4864_v43 = vadd.f32 %v4863_v26, %v11084_v44  ;;  %v12275_v44 = vld [vmem:[#allocation7_spill] sm:$0xff] }
 0x357   : > { %12264 = vst [vmem:[#allocation22_spill] sm:$0xff] %v11102_v30  ;;  %v4961_v56 = vadd.f32 %v4960_v51, %v4898_v12  ;;  %v11111_v61 = vpop.f32.mrf.mxu1  ;;  %v4832_v52 = vadd.f32 %v4831_v25, %v11095_v50  ;;  %v3911_v28 = vadd.f32 %v10863_v36, %v10903_v0  ;;  %v11117_v54 = vadd.f32 %v10869_v13, %v3909_v49 }
 0x358   : > { %v4994_v32 = vadd.f32 %v4993_v2, %v4930_v15  ;;  %v4899_v9 = vmul.f32 %v11095_v50, %v11095_v50  ;;  %v3915_v41 = vadd.f32 %v10871_v48, %v10905_v19  ;;  %v11124_v51 = vadd.f32 %v10877_v11, %v3913_v5  ;;  %v11128_v2 = vpop.f32.mrf.mxu0 }
 0x359   : > { %12265 = vst [vmem:[#allocation23_spill] sm:$0xff] %v11117_v54  ;;  %v4931_v26 = vmul.f32 %v11102_v30, %v11102_v30  ;;  %v4865_v36 = vadd.f32 %v4864_v43, %v11102_v30  ;;  %v11131_v12 = vpop.f32.mrf.mxu1  ;;  %v4833_v13 = vadd.f32 %v4832_v52, %v11117_v54  ;;  %v11135_v15 = vadd.f32 %v10873_v55, %v3911_v28 }
 0x35a   : > { %12266 = vst [vmem:[#allocation24_spill] sm:$0xff] %v11124_v51  ;;  %v4962_v25 = vadd.f32 %v4961_v56, %v4899_v9  ;;  %v3995_v48 = vadd.f32 %v10883_v6, %v10903_v0  ;;  %v4900_v11 = vmul.f32 %v11117_v54, %v11117_v54  ;;  %v11142_v5 = vadd.f32 %v10881_v57, %v3915_v41  ;;  %v11150_v55 = vpop.f32.mrf.mxu0 }
 0x35b   : > { %v4995_v49 = vadd.f32 %v4994_v32, %v4931_v26  ;;  %12267 = vst [vmem:[#allocation25_spill] sm:$0xff] %v11135_v15  ;;  %v3999_v56 = vadd.f32 %v10893_v8, %v10905_v19  ;;  %v4932_v43 = vmul.f32 %v11124_v51, %v11124_v51  ;;  %v11148_v52 = vpop.f32.mrf.mxu1  ;;  %v4866_v28 = vadd.f32 %v4865_v36, %v11124_v51  ;;  %v12272_v51 = vld [vmem:[#allocation6_spill] sm:$0xff] }
 0x35c   : > { %12268 = vst [vmem:[#allocation26_spill] sm:$0xff] %v11142_v5  ;;  %v4963_v32 = vadd.f32 %v4962_v25, %v4900_v11  ;;  %v4834_v6 = vadd.f32 %v4833_v13, %v11135_v15  ;;  %v3997_v57 = vadd.f32 %v10887_v27, %v10903_v0  ;;  %v11157_v41 = vadd.f32 %v10875_v33, %v3995_v48  ;;  %v12270_v25 = vld [vmem:[#allocation3_spill] sm:$0xff] }
 0x35d   : > { %v4996_v9 = vadd.f32 %v4995_v49, %v4932_v43  ;;  %v4901_v8 = vmul.f32 %v11135_v15, %v11135_v15  ;;  %v4001_v26 = vadd.f32 %v10897_v42, %v10905_v19  ;;  %v11164_v11 = vadd.f32 %v12270_v25, %v3999_v56  ;;  %v11168_v13 = vpop.f32.mrf.mxu1  ;;  %v11171_v43 = vpop.f32.mrf.mxu0  ;;  %v12274_v42 = vld [vmem:[#allocation11_spill] sm:$0xff]  ;;  %v12280_v15 = vld [vmem:[#allocation9_spill] sm:$0xff] }
 0x35e   : > { %12269 = vst [vmem:[#allocation27_spill] sm:$0xff] %v11157_v41  ;;  %v4933_v36 = vmul.f32 %v11142_v5, %v11142_v5  ;;  %v4867_v27 = vadd.f32 %v4866_v28, %v11142_v5  ;;  %v4835_v33 = vadd.f32 %v4834_v6, %v11157_v41  ;;  %v11175_v54 = vadd.f32 %v12272_v51, %v3997_v57 }
 0x35f   : > { %12271 = vst [vmem:[#allocation3_spill] sm:$0xff] %v11164_v11  ;;  %v4964_v49 = vadd.f32 %v4963_v32, %v4901_v8  ;;  %v4081_v56 = vadd.f32 %v12274_v42, %v10903_v0  ;;  %v4902_v25 = vmul.f32 %v11157_v41, %v11157_v41  ;;  %v11182_v1 = vadd.f32 %v12275_v44, %v4001_v26  ;;  %v12276_v32 = vld [vmem:[#allocation2_spill] sm:$0xff]  ;;  %v11188_v6 = vpop.f32.mrf.mxu1  ;;  %v11191_v57 = vpop.f32.mrf.mxu0  ;;  %v12278_v26 = vld [vmem:[#allocation8_spill] sm:$0xff] }
 0x360   : > { %v4997_v48 = vadd.f32 %v4996_v9, %v4933_v36  ;;  %12273 = vst [vmem:[#allocation6_spill] sm:$0xff] %v11175_v54  ;;  %v4085_v28 = vadd.f32 %v12276_v32, %v10905_v19  ;;  %v4934_v8 = vmul.f32 %v11164_v11, %v11164_v11  ;;  %v4868_v51 = vadd.f32 %v4867_v27, %v11164_v11  ;;  %v12277_v41 = vld [vmem:[#allocation10_spill] sm:$0xff] }
 0x361   : > { %v4965_v9 = vadd.f32 %v4964_v49, %v4902_v25  ;;  %v4836_v36 = vadd.f32 %v4835_v33, %v11175_v54  ;;  %v4083_v44 = vadd.f32 %v12277_v41, %v10903_v0  ;;  %v11197_v5 = vadd.f32 %v12278_v26, %v4081_v56  ;;  %v12281_v49 = vld [vmem:[#allocation12_spill] sm:$0xff]  ;;  %v11208_v33 = vpop.f32.mrf.mxu1 }
 0x362   : > { %v4998_v42 = vadd.f32 %v4997_v48, %v4934_v8  ;;  %v4903_v32 = vmul.f32 %v11175_v54, %v11175_v54  ;;  %v4087_v30 = vadd.f32 %v12280_v15, %v10905_v19  ;;  %v11204_v25 = vadd.f32 %v12281_v49, %v4085_v28  ;;  %v11211_v8 = vpop.f32.mrf.mxu0  ;;  %v12283_v54 = vld [vmem:[#allocation4_spill] sm:$0xff]  ;;  %v12285_v28 = vld [vmem:[#allocation17_spill] sm:$0xff] }
 0x363   : > { %12279 = vst [vmem:[#allocation11_spill] sm:$0xff] %v11197_v5  ;;  %v4935_v27 = vmul.f32 %v11182_v1, %v11182_v1  ;;  %v4869_v41 = vadd.f32 %v4868_v51, %v11182_v1  ;;  %v4837_v56 = vadd.f32 %v4836_v36, %v11197_v5  ;;  %v11214_v11 = vpop.f32.mrf.mxu1  ;;  %v11217_v15 = vadd.f32 %v12283_v54, %v4083_v44 }
 0x364   : > { %12282 = vst [vmem:[#allocation7_spill] sm:$0xff] %v11204_v25  ;;  %v4966_v48 = vadd.f32 %v4965_v9, %v4903_v32  ;;  %v4167_v49 = vadd.f32 %v12285_v28, %v10903_v0  ;;  %v4904_v50 = vmul.f32 %v11197_v5, %v11197_v5  ;;  %v11224_v9 = vadd.f32 %v12286_v34, %v4087_v30  ;;  %v11231_v54 = vpop.f32.mrf.mxu0  ;;  %v12287_v30 = vld [vmem:[#allocation5_spill] sm:$0xff] }
 0x365   : > { %v4999_v26 = vadd.f32 %v4998_v42, %v4935_v27  ;;  %12284 = vst [vmem:[#allocation2_spill] sm:$0xff] %v11217_v15  ;;  %v4171_v51 = vadd.f32 %v10992_v58, %v10905_v19  ;;  %v4936_v36 = vmul.f32 %v11204_v25, %v11204_v25  ;;  %v4870_v32 = vadd.f32 %v4869_v41, %v11204_v25  ;;  %v11234_v28 = vpop.f32.mrf.mxu1  ;;  %v12289_v25 = vld [vmem:[#allocation15_spill] sm:$0xff] }
 0x366   : > { %v4967_v42 = vadd.f32 %v4966_v48, %v4904_v50  ;;  %v4838_v44 = vadd.f32 %v4837_v56, %v11217_v15  ;;  %v4169_v34 = vadd.f32 %v10970_v37, %v10903_v0  ;;  %v11239_v5 = vadd.f32 %v12287_v30, %v4167_v49 }
 0x367   : > { %v5000_v27 = vadd.f32 %v4999_v26, %v4936_v36  ;;  %v4905_v58 = vmul.f32 %v11217_v15, %v11217_v15  ;;  %v4173_v50 = vadd.f32 %v11012_v21, %v10905_v19  ;;  %v11246_v48 = vadd.f32 %v10960_v23, %v4171_v51  ;;  %v11251_v36 = vpop.f32.mrf.mxu0  ;;  %v11254_v30 = vpop.f32.mrf.mxu1 }
 0x368   : > { %v4937_v41 = vmul.f32 %v11224_v9, %v11224_v9  ;;  %v4871_v26 = vadd.f32 %v4870_v32, %v11224_v9  ;;  %v4839_v37 = vadd.f32 %v4838_v44, %v11239_v5  ;;  %v11257_v15 = vadd.f32 %v12289_v25, %v4169_v34 }
 0x369   : > { %12288 = vst [vmem:[#allocation10_spill] sm:$0xff] %v11246_v48  ;;  %v4968_v56 = vadd.f32 %v4967_v42, %v4905_v58  ;;  %v4253_v23 = vadd.f32 %v10989_v38, %v10903_v0  ;;  %v4906_v21 = vmul.f32 %v11239_v5, %v11239_v5  ;;  %v11264_v42 = vadd.f32 %v10979_v16, %v4173_v50  ;;  %v11272_v38 = vpop.f32.mrf.mxu1 }
 0x36a   : > { %v5001_v49 = vadd.f32 %v5000_v27, %v4937_v41  ;;  %v4257_v32 = vadd.f32 %v11029_v47, %v10905_v19  ;;  %v4938_v44 = vmul.f32 %v11246_v48, %v11246_v48  ;;  %v4872_v25 = vadd.f32 %v4871_v26, %v11246_v48 }
 0x36b   : > { %v4969_v27 = vadd.f32 %v4968_v56, %v4906_v21  ;;  %v4840_v34 = vadd.f32 %v4839_v37, %v11257_v15  ;;  %v4255_v41 = vadd.f32 %v11009_v45, %v10903_v0  ;;  %v11277_v16 = vadd.f32 %v11032_v20, %v4253_v23 }
 0x36c   : > { %v5002_v58 = vadd.f32 %v5001_v49, %v4938_v44  ;;  %v4339_v47 = vadd.f32 %v11108_v63, %v10903_v0  ;;  %v4907_v50 = vmul.f32 %v11257_v15, %v11257_v15  ;;  %v4259_v26 = vadd.f32 %v11049_v17, %v10905_v19 }
 0x36d   : > { %v11286_v37 = vadd.f32 %v11072_v7, %v4257_v32  ;;  %v4343_v49 = vadd.f32 %v11150_v55, %v10905_v19  ;;  %v4939_v45 = vmul.f32 %v11264_v42, %v11264_v42  ;;  %v4873_v63 = vadd.f32 %v4872_v25, %v11264_v42 }
 0x36e   : > { %v4970_v23 = vadd.f32 %v4969_v27, %v4907_v50  ;;  %v4841_v21 = vadd.f32 %v4840_v34, %v11277_v16  ;;  %v11297_v48 = vadd.f32 %v11052_v40, %v4255_v41  ;;  %v11300_v17 = vadd.f32 %v11069_v59, %v4339_v47 }
 0x36f   : > { %v5003_v44 = vadd.f32 %v5002_v58, %v4939_v45  ;;  %v4908_v7 = vmul.f32 %v11277_v16, %v11277_v16  ;;  %v4341_v55 = vadd.f32 %v11128_v2, %v10903_v0  ;;  %v11307_v27 = vadd.f32 %v11092_v18, %v4259_v26 }
 0x370   : > { %12290 = vst [vmem:[#allocation8_spill] sm:$0xff] %v11300_v17  ;;  %v11310_v25 = vadd.f32 %v11111_v61, %v4343_v49  ;;  %v4940_v40 = vmul.f32 %v11286_v37, %v11286_v37  ;;  %v4345_v59 = vadd.f32 %v11171_v43, %v10905_v19  ;;  %v4874_v41 = vadd.f32 %v4873_v63, %v11286_v37 }
 0x371   : > { %v4971_v58 = vadd.f32 %v4970_v23, %v4908_v7  ;;  %v4425_v2 = vadd.f32 %v11148_v52, %v10903_v0  ;;  %v4842_v18 = vadd.f32 %v4841_v21, %v11297_v48  ;;  %v4429_v61 = vadd.f32 %v11188_v6, %v10905_v19 }
 0x372   : > { %v5004_v47 = vadd.f32 %v5003_v44, %v4940_v40  ;;  %v4909_v50 = vmul.f32 %v11297_v48, %v11297_v48  ;;  %v4910_v43 = vmul.f32 %v11300_v17, %v11300_v17  ;;  %v11329_v26 = vadd.f32 %v11089_v3, %v4341_v55 }
 0x373   : > { %v4843_v45 = vadd.f32 %v4842_v18, %v11300_v17  ;;  %v4941_v52 = vmul.f32 %v11307_v27, %v11307_v27  ;;  %v4942_v23 = vmul.f32 %v11310_v25, %v11310_v25  ;;  %v11337_v6 = vadd.f32 %v11131_v12, %v4345_v59 }
 0x374   : > { %v4972_v21 = vadd.f32 %v4971_v58, %v4909_v50  ;;  %v4875_v44 = vadd.f32 %v4874_v41, %v11307_v27  ;;  %v4427_v3 = vadd.f32 %v11168_v13, %v10903_v0  ;;  %v11343_v7 = vadd.f32 %v11191_v57, %v4425_v2 }
 0x375   : > { %v5005_v55 = vadd.f32 %v5004_v47, %v4941_v52  ;;  %v4431_v40 = vadd.f32 %v11208_v33, %v10905_v19  ;;  %v11348_v18 = vadd.f32 %v11231_v54, %v4429_v61  ;;  %v4911_v12 = vmul.f32 %v11329_v26, %v11329_v26 }
 0x376   : > { %v4973_v17 = vadd.f32 %v4972_v21, %v4910_v43  ;;  %v4876_v59 = vadd.f32 %v4875_v44, %v11310_v25  ;;  %v4943_v57 = vmul.f32 %v11337_v6, %v11337_v6  ;;  %v4844_v2 = vadd.f32 %v4843_v45, %v11329_v26 }
 0x377   : > { %v5006_v13 = vadd.f32 %v5005_v55, %v4942_v23  ;;  %v4912_v54 = vmul.f32 %v11343_v7, %v11343_v7  ;;  %v11361_v61 = vadd.f32 %v11211_v8, %v4427_v3  ;;  %v11367_v43 = vadd.f32 %v11251_v36, %v4431_v40 }
 0x378   : > { %v4845_v50 = vadd.f32 %v4844_v2, %v11343_v7  ;;  %v4974_v52 = vadd.f32 %v4973_v17, %v4911_v12  ;;  %v4877_v45 = vadd.f32 %v4876_v59, %v11337_v6 }
 0x379   : > { %v5007_v44 = vadd.f32 %v5006_v13, %v4943_v57  ;;  %v4913_v36 = vmul.f32 %v11361_v61, %v11361_v61 }
 0x37a   : > { %v4975_v2 = vadd.f32 %v4974_v52, %v4912_v54  ;;  %v4878_v17 = vadd.f32 %v4877_v45, %v11348_v18  ;;  %v4846_v40 = vadd.f32 %v4845_v50, %v11361_v61 }
 0x37c   : > { %v4976_v50 = vadd.f32 %v4975_v2, %v4913_v36 }
 0x38d   : > { %v4510_v51 = vpop.f32.mrf.mxu0 }
 0x38e   : > { %v4511_v58 = vadd.f32 %v4510_v51, %v10903_v0  ;;  %v4944_v51 = vmul.f32 %v11348_v18, %v11348_v18 }
 0x38f   : > { %v4512_v56 = vpop.f32.mrf.mxu0 }
 0x390   : > { %v4513_v23 = vadd.f32 %v4512_v56, %v10903_v0  ;;  %v4945_v56 = vmul.f32 %v11367_v43, %v11367_v43 }
 0x391   : > { %v11292_v20 = vpop.f32.mrf.mxu1  ;;  %v4514_v32 = vpop.f32.mrf.mxu0 }
 0x392   : > { %v4515_v33 = vadd.f32 %v4514_v32, %v10905_v19  ;;  %v11371_v32 = vadd.f32 %v11214_v11, %v4511_v58  ;;  %v5008_v11 = vadd.f32 %v5007_v44, %v4944_v51  ;;  %v4597_v12 = vadd.f32 %v11292_v20, %v10903_v0 }
 0x393   : > { %v11316_v34 = vpop.f32.mrf.mxu1  ;;  %v4516_v49 = vpop.f32.mrf.mxu0  ;;  %v4879_v20 = vadd.f32 %v4878_v17, %v11367_v43 }
 0x394   : > { %12291 = vst [vmem:[#allocation9_spill] sm:$0xff] %v11371_v32  ;;  %v11375_v8 = vadd.f32 %v11254_v30, %v4515_v33  ;;  %v4517_v3 = vadd.f32 %v4516_v49, %v10905_v19  ;;  %v4914_v30 = vmul.f32 %v11371_v32, %v11371_v32  ;;  %v11389_v49 = vadd.f32 %v11234_v28, %v4513_v23 }
 0x395   : > { %v4600_v63 = vpop.f32.mrf.mxu1  ;;  %v4639_v41 = vpop.f32.mrf.mxu0  ;;  %v4847_v58 = vadd.f32 %v4846_v40, %v11371_v32  ;;  %v4599_v51 = vadd.f32 %v11316_v34, %v10903_v0  ;;  %v5009_v28 = vadd.f32 %v5008_v11, %v4945_v56 }
 0x396   : > { %12292 = vst [vmem:[#allocation12_spill] sm:$0xff] %v11375_v8  ;;  %12293 = vst [vmem:[#allocation4_spill] sm:$0xff] %v11389_v49  ;;  %v4946_v13 = vmul.f32 %v11375_v8, %v11375_v8  ;;  %v11395_v57 = vadd.f32 %v11272_v38, %v4517_v3  ;;  %v4601_v33 = vadd.f32 %v4600_v63, %v10905_v19 }
 0x397   : > { %v4602_v47 = vpop.f32.mrf.mxu1  ;;  %v4641_v21 = vpop.f32.mrf.mxu0  ;;  %v11401_v52 = vadd.f32 %v4639_v41, %v4597_v12  ;;  %v4977_v23 = vadd.f32 %v4976_v50, %v4914_v30  ;;  %v4915_v44 = vmul.f32 %v11389_v49, %v11389_v49  ;;  %v4880_v38 = vadd.f32 %v4879_v20, %v11375_v8 }
 0x398   : > { %12294 = vst [vmem:[#allocation17_spill] sm:$0xff] %v11395_v57  ;;  %v5010_v63 = vadd.f32 %v5009_v28, %v4946_v13  ;;  %v4947_v2 = vmul.f32 %v11395_v57, %v11395_v57  ;;  %v4848_v36 = vadd.f32 %v4847_v58, %v11389_v49  ;;  %v4603_v34 = vadd.f32 %v4602_v47, %v10905_v19 }
 0x399   : > { %v4725_v55 = vpop.f32.mrf.mxu1  ;;  %v4643_v59 = vpop.f32.mrf.mxu0  ;;  %12295 = vst [vmem:[#allocation16_spill] sm:$0xff] %v11401_v52  ;;  %v11412_v41 = vadd.f32 %v4641_v21, %v4599_v51  ;;  %v4916_v11 = vmul.f32 %v11401_v52, %v11401_v52  ;;  %v4978_v13 = vadd.f32 %v4977_v23, %v4915_v44 }
 0x39a   : > { %v11403_v45 = vadd.f32 %v4643_v59, %v4601_v33  ;;  %v4849_v40 = vadd.f32 %v4848_v36, %v11401_v52  ;;  %v4881_v59 = vadd.f32 %v4880_v38, %v11395_v57  ;;  %v5011_v47 = vadd.f32 %v5010_v63, %v4947_v2 }
 0x39b   : > { %v4727_v54 = vpop.f32.mrf.mxu1  ;;  %v4645_v3 = vpop.f32.mrf.mxu0  ;;  %12297 = vst [vmem:[#allocation15_spill] sm:$0xff] %v11412_v41  ;;  %v4917_v50 = vmul.f32 %v11412_v41, %v11412_v41 }
 0x39c   : > { %12296 = vst [vmem:[#allocation5_spill] sm:$0xff] %v11403_v45  ;;  %v4948_v56 = vmul.f32 %v11403_v45, %v11403_v45  ;;  %v11419_v12 = vadd.f32 %v4645_v3, %v4603_v34  ;;  %v4882_v20 = vadd.f32 %v4881_v59, %v11403_v45  ;;  %v4979_v3 = vadd.f32 %v4978_v13, %v4916_v11 }
 0x39d   : > { %v4729_v17 = vpop.f32.mrf.mxu1  ;;  %v4850_v36 = vadd.f32 %v4849_v40, %v11412_v41 }
 0x39e   : > { %12298 = vst [vmem:[#allocation28_spill] sm:$0xff] %v11419_v12  ;;  %v5012_v34 = vadd.f32 %v5011_v47, %v4948_v56  ;;  %v4949_v38 = vmul.f32 %v11419_v12, %v11419_v12  ;;  %v4883_v11 = vadd.f32 %v4882_v20, %v11419_v12  ;;  %v4980_v13 = vadd.f32 %v4979_v3, %v4917_v50 }
 0x39f   : > { %v4731_v33 = vpop.f32.mrf.mxu1 }
 0x3a0   : > { %v5013_v47 = vadd.f32 %v5012_v34, %v4949_v38 }
 0x3d5   : > { %v4682_v30 = vpop.f32.mrf.mxu0 }
 0x3d6   : > { %v4683_v58 = vadd.f32 %v4682_v30, %v10903_v0 }
 0x3d7   : > { %v4684_v21 = vpop.f32.mrf.mxu0 }
 0x3d8   : > { %v11426_v51 = vadd.f32 %v4725_v55, %v4683_v58  ;;  %v4685_v28 = vadd.f32 %v4684_v21, %v10903_v0 }
 0x3d9   : > { %v4686_v23 = vpop.f32.mrf.mxu0  ;;  %v4768_v44 = vpop.f32.mrf.mxu1 }
 0x3da   : > { %12299 = vst [vmem:[#allocation29_spill] sm:$0xff] %v11426_v51  ;;  %v4687_v63 = vadd.f32 %v4686_v23, %v10905_v19  ;;  %v4851_v2 = vadd.f32 %v4850_v36, %v11426_v51  ;;  %v4918_v30 = vmul.f32 %v11426_v51, %v11426_v51  ;;  %v11436_v55 = vadd.f32 %v4727_v54, %v4685_v28 }
 0x3db   : > { %v4688_v59 = vpop.f32.mrf.mxu0  ;;  %v4770_v58 = vpop.f32.mrf.mxu1  ;;  %v4769_v21 = vadd.f32 %v4768_v44, %v10903_v0 }
 0x3dc   : > { %12300 = vst [vmem:[#allocation30_spill] sm:$0xff] %v11436_v55  ;;  %v11439_v40 = vadd.f32 %v4729_v17, %v4687_v63  ;;  %v4689_v56 = vadd.f32 %v4688_v59, %v10905_v19  ;;  %v4771_v51 = vadd.f32 %v4770_v58, %v10903_v0  ;;  %v4981_v20 = vadd.f32 %v4980_v13, %v4918_v30 }
 0x3dd   : > { %v4772_v23 = vpop.f32.mrf.mxu1  ;;  %v4811_v45 = vpop.f32.mrf.mxu0  ;;  %v4919_v17 = vmul.f32 %v11436_v55, %v11436_v55  ;;  %v4852_v50 = vadd.f32 %v4851_v2, %v11436_v55 }
 0x3de   : > { %12301 = vst [vmem:[#allocation31_spill] sm:$0xff] %v11439_v40  ;;  %v4884_v36 = vadd.f32 %v4883_v11, %v11439_v40  ;;  %v4950_v54 = vmul.f32 %v11439_v40, %v11439_v40  ;;  %v11446_v28 = vadd.f32 %v4731_v33, %v4689_v56  ;;  %v11451_v63 = vadd.f32 %v4811_v45, %v4769_v21 }
 0x3df   : > { %v4774_v3 = vpop.f32.mrf.mxu1  ;;  %v4813_v34 = vpop.f32.mrf.mxu0  ;;  %v4773_v59 = vadd.f32 %v4772_v23, %v10905_v19 }
 0x3e0   : > { %12302 = vst [vmem:[#allocation32_spill] sm:$0xff] %v11446_v28  ;;  %12303 = vst [vmem:[#allocation33_spill] sm:$0xff] %v11451_v63  ;;  %v5014_v38 = vadd.f32 %v5013_v47, %v4950_v54  ;;  %v4951_v44 = vmul.f32 %v11446_v28, %v11446_v28  ;;  %v11457_v33 = vadd.f32 %v4813_v34, %v4771_v51 }
 0x3e1   : > { %v4853_v0 = vadd.f32 %v4852_v50, %v11451_v63  ;;  %v4815_v30 = vpop.f32.mrf.mxu0  ;;  %v4920_v58 = vmul.f32 %v11451_v63, %v11451_v63  ;;  %v4775_v45 = vadd.f32 %v4774_v3, %v10905_v19  ;;  %v4885_v2 = vadd.f32 %v4884_v36, %v11446_v28 }
 0x3e2   : > { %12304 = vst [vmem:[#allocation34_spill] sm:$0xff] %v11457_v33  ;;  %v11463_v11 = vadd.f32 %v4815_v30, %v4773_v59  ;;  %v4982_v47 = vadd.f32 %v4981_v20, %v4919_v17  ;;  %v5015_v54 = vadd.f32 %v5014_v38, %v4951_v44  ;;  %v4921_v50 = vmul.f32 %v11457_v33, %v11457_v33 }
 0x3e3   : > { %v4817_v56 = vpop.f32.mrf.mxu0  ;;  %v4854_v13 = vadd.f32 %v4853_v0, %v11457_v33 }
 0x3e4   : > { %12305 = vst [vmem:[#allocation35_spill] sm:$0xff] %v11463_v11  ;;  %v4886_v21 = vadd.f32 %v4885_v2, %v11463_v11  ;;  %v4952_v51 = vmul.f32 %v11463_v11, %v11463_v11  ;;  %v11470_v23 = vadd.f32 %v4817_v56, %v4775_v45  ;;  %v4983_v34 = vadd.f32 %v4982_v47, %v4920_v58 }
 0x3e5   : > { %4855 = vadd.xlane.f32.xlu1 %v4854_v13 }
 0x3e6   : > { %12306 = vst [vmem:[#allocation36_spill] sm:$0xff] %v11470_v23  ;;  %v4953_v19 = vmul.f32 %v11470_v23, %v11470_v23  ;;  %v4887_v36 = vadd.f32 %v4886_v21, %v11470_v23  ;;  %v5016_v3 = vadd.f32 %v5015_v54, %v4952_v51  ;;  %v4984_v17 = vadd.f32 %v4983_v34, %v4921_v50 }
 0x3e8   : > { %4888 = vadd.xlane.f32.xlu0 %v4887_v36  ;;  %v5017_v20 = vadd.f32 %v5016_v3, %v4953_v19 }
 0x3ea   : > { %5018 = vadd.xlane.f32.xlu1 %v5017_v20 }
 0x3ec   : > { %4985 = vadd.xlane.f32.xlu0 %v4984_v17 }
 0x46e   : > { %v4856_v59 = vpop.xlane.xlu1 %4855 }
 0x46f   : > { %v5020_v0 = vsel %vm12307_vm4, %v4856_v59, 0.0 }
 0x470   : > { %5021 = vadd.xlane.f32.xlu0 %v5020_v0 }
 0x471   : > { %v4889_v38 = vpop.xlane.xlu0 %4888 }
 0x472   : > { %v5031_v44 = vsel %vm12308_vm6, %v4889_v38, 0.0 }
 0x473   : > { %5032 = vadd.xlane.f32.xlu1 %v5031_v44  ;;  %v5019_v30 = vpop.xlane.xlu1 %5018 }
 0x474   : > { %v5055_v2 = vsel %vm12309_vm10, %v5019_v30, 0.0 }
 0x475   : > { %v4986_v45 = vpop.xlane.xlu0 %4985 }
 0x476   : > { %v5042_v56 = vsel %vm12310_vm13, %v4986_v45, 0.0 }
 0x477   : > { %5043 = vadd.xlane.f32.xlu0 %v5042_v56  ;;  %5056 = vadd.xlane.f32.xlu1 %v5055_v2 }
 0x4f9   : > { %v5022_v58 = vpop.xlane.xlu0 %5021 }
 0x4fa   : > { %v5023_v13 = vrot.slane %v5022_v58, 4 }
 0x4fc   : > { %v5024_v47 = vadd.f32 %v5023_v13, %v5022_v58  ;;  %v5033_v21 = vpop.xlane.xlu1 %5032 }
 0x4fd   : > { %v5034_v51 = vrot.slane %v5033_v21, 4 }
 0x4fe   : > { %v5025_v54 = vrot.slane %v5024_v47, 2 }
 0x4ff   : > { %v5035_v50 = vadd.f32 %v5034_v51, %v5033_v21 }
 0x500   : > { %v5044_v19 = vpop.xlane.xlu0 %5043  ;;  %v5057_v36 = vpop.xlane.xlu1 %5056  ;;  %v5026_v3 = vadd.f32 %v5025_v54, %v5024_v47 }
 0x501   : > { %v5036_v34 = vrot.slane %v5035_v50, 2  ;;  %v5045_v20 = vrot.slane %v5044_v19, 4  ;;  %v5058_v17 = vrot.slane %v5057_v36, 4 }
 0x502   : > { %v5027_v59 = vrot.slane %v5026_v3, 1 }
 0x503   : > { %v5046_v0 = vadd.f32 %v5045_v20, %v5044_v19  ;;  %v5059_v38 = vadd.f32 %v5058_v17, %v5057_v36  ;;  %v5037_v44 = vadd.f32 %v5036_v34, %v5035_v50  ;;  %v4820_v19 = vld [vmem:[%s11826_s4] sm:$0xff]  ;;  %v4821_v36 = vld [vmem:[%s11826_s4 + $0x8] sm:$0xff] }
 0x504   : > { %v5028_v30 = vadd.f32 %v5027_v59, %v5026_v3  ;;  %v4822_v59 = vld [vmem:[%s11827_s5] sm:$0xff] }
 0x505   : > { %v5047_v45 = vrot.slane %v5046_v0, 2  ;;  %v5060_v2 = vrot.slane %v5059_v38, 2  ;;  %v5038_v56 = vrot.slane %v5037_v44, 1 }
 0x506   : > { %6521 = vpush %v5028_v30  ;;  %v4823_v30 = vld [vmem:[%s11827_s5 + $0x8] sm:$0xff] }
 0x507   : > { %v5039_v58 = vadd.f32 %v5038_v56, %v5037_v44  ;;  %v5048_v13 = vadd.f32 %v5047_v45, %v5046_v0  ;;  %v5061_v11 = vadd.f32 %v5060_v2, %v5059_v38 }
 0x509   : > { %6523 = vpush %v5039_v58  ;;  %v5049_v21 = vrot.slane %v5048_v13, 1  ;;  %v5062_v51 = vrot.slane %v5061_v11, 1  ;;  %v5395_v58 = vld [vmem:[%s11829_s7] sm:$0xf] }
 0x50b   : > { %v5050_v63 = vadd.f32 %v5049_v21, %v5048_v13  ;;  %v5063_v47 = vadd.f32 %v5062_v51, %v5061_v11  ;;  %v12311_v51 = vld [vmem:[#allocation14_spill] sm:$0xff] }
 0x50d   : > { %6525 = vpush %v5050_v63 }
 0x50e   : > { %6527 = vpush %v5063_v47 }
 0x537   : > { %s6522_s29 = spop %6521 }
 0x538   : > { %s11481_s30 = smul.f32 3.0517578e-05, %s6522_s29 }
 0x53a   : > { %s6524_s9 = spop %6523  ;;  %s5053_s12 = smul.f32 %s11481_s30, %s11481_s30  ;;  %v5078_v17 = vstv %s11481_s30 }
 0x53b   : > { %s11483_s11 = smul.f32 3.0517578e-05, %s6524_s9 }
 0x53d   : > { %s5066_s19 = smul.f32 %s11483_s11, %s11483_s11  ;;  %v5079_v38 = vstv %s11483_s11 }
 0x53e   : > { %s6526_s20 = spop %6525 }
 0x53f   : > { %s5052_s21 = smul.f32 3.0517578e-05, %s6526_s20  ;;  %s6528_s22 = spop %6527 }
 0x540   : > { %s5065_s23 = smul.f32 3.0517578e-05, %s6528_s22  ;;  %s6520_s22 = sshll.u32 %s12348_s28, 7 }
 0x541   : > { %s5054_s10 = ssub.f32 %s5052_s21, %s5053_s12 }
 0x542   : > { %s5067_s13 = ssub.f32 %s5065_s23, %s5066_s19 }
 0x543   : > { %s5068_s16 = sadd.f32 1e-05, %s5054_s10 }
 0x544   : > { %s5072_s17 = sadd.f32 1e-05, %s5067_s13  ;;  %s11771_s13 = scalar_lea.vmem %s11830_s8, %s6520_s22 }
 0x545   : > { %v5069_v63 = vstv %s5068_s16 }
 0x546   : > { %6553 = vrsqrt.f32 %v5069_v63  ;;  %v5073_v11 = vstv %s5072_s17 }
 0x547   : > { %6555 = vrsqrt.f32 %v5073_v11  ;;  %v12312_v11 = vld [vmem:[#allocation13_spill] sm:$0xff] }
 0x553   : > { %v6554_v54 = vpop.eup %6553 }
 0x554   : > { %v6556_v50 = vpop.eup %6555  ;;  %6529 = vpush %v6554_v54 }
 0x555   : > { %6531 = vpush %v6556_v50 }
 0x585   : > { %s6530_s25 = spop %6529 }
 0x586   : > { %v5076_v3 = vstv %s6530_s25  ;;  %s6532_s26 = spop %6531 }
 0x587   : > { %v5080_v34 = vmul.f32 %v5076_v3, %v4820_v19  ;;  %v5077_v20 = vstv %s6532_s26 }
 0x588   : > { %v5081_v0 = vmul.f32 %v5077_v20, %v4821_v36 }
 0x589   : > { %v5082_v44 = vmul.f32 %v5080_v34, %v5078_v17  ;;  %5088 = vperm.xlu0 %6547, %v5080_v34   ;;  %v12313_v17 = vld [vmem:[#allocation18_spill] sm:$0xff] }
 0x58a   : > { %v5083_v45 = vmul.f32 %v5081_v0, %v5079_v38  ;;  %5093 = vperm.xlu1 %6548, %v5081_v0  }
 0x58b   : > { %v5084_v2 = vsub.f32 %v4822_v59, %v5082_v44 }
 0x58c   : > { %v5085_v56 = vsub.f32 %v4823_v30, %v5083_v45 }
 0x58e   : > { %5162 = vperm.xlu1 %6548, %v5084_v2   ;;  %5167 = vperm.xlu0 %6547, %v5085_v56  }
 0x592   : > { %5398 = vperm.xlu1 %6548, %v5395_v58  }
 0x604   : > { %v11506_v13 = vpop.permute.xlu0 %5088 }
 0x605   : > { %v11508_v21 = vpop.permute.xlu1 %5093  ;;  %v5097_v47 = vmul.f32 %v11506_v13, %v12311_v51  ;;  %v5099_v63 = vmul.f32 %v11506_v13, %v10973_v24  ;;  %v5096_v54 = vmul.f32 %v11506_v13, %v12312_v11  ;;  %v5098_v50 = vmul.f32 %v11506_v13, %v10958_v35 }
 0x606   : > { %v5129_v19 = vmul.f32 %v11508_v21, %v10933_v39  ;;  %v5131_v36 = vmul.f32 %v11508_v21, %v10982_v4  ;;  %v5128_v3 = vmul.f32 %v11508_v21, %v10930_v53  ;;  %v5130_v34 = vmul.f32 %v11508_v21, %v10965_v14 }
 0x607   : > { %v5101_v24 = vmul.f32 %v11506_v13, %v11015_v31  ;;  %v5133_v20 = vmul.f32 %v11508_v21, %v11022_v60  ;;  %v5103_v35 = vmul.f32 %v11506_v13, %v11055_v46  ;;  %v5135_v39 = vmul.f32 %v11508_v21, %v11062_v10  ;;  %v12314_v46 = vld [vmem:[#allocation21_spill] sm:$0xff]  ;;  %v12315_v10 = vld [vmem:[#allocation22_spill] sm:$0xff] }
 0x608   : > { %v5100_v4 = vmul.f32 %v11506_v13, %v10997_v29  ;;  %v5132_v53 = vmul.f32 %v11508_v21, %v11004_v22  ;;  %v5102_v14 = vmul.f32 %v11506_v13, %v11037_v62  ;;  %v5134_v31 = vmul.f32 %v11508_v21, %v12313_v17  ;;  %v12316_v29 = vld [vmem:[#allocation25_spill] sm:$0xff]  ;;  %v12317_v22 = vld [vmem:[#allocation26_spill] sm:$0xff] }
 0x609   : > { %v11542_v59 = vpop.permute.xlu1 %5162  ;;  %v11544_v60 = vpop.permute.xlu0 %5167  ;;  %v5105_v0 = vmul.f32 %v11506_v13, %v12314_v46  ;;  %v5137_v38 = vmul.f32 %v11508_v21, %v12315_v10  ;;  %v11552_v44 = vmul.f32 %v11506_v13, %v12316_v29  ;;  %v11556_v62 = vmul.f32 %v11508_v21, %v12317_v22 }
 0x60a   : > { %v5171_v30 = vadd.f32 %v11542_v59, %v5097_v47  ;;  %v5203_v45 = vadd.f32 %v11544_v60, %v5129_v19  ;;  %v5173_v2 = vadd.f32 %v11542_v59, %v5099_v63  ;;  %v5205_v56 = vadd.f32 %v11544_v60, %v5131_v36 }
 0x60b   : > { %v5170_v58 = vadd.f32 %v11542_v59, %v5096_v54  ;;  %v5202_v51 = vadd.f32 %v11544_v60, %v5128_v3  ;;  %v5172_v11 = vadd.f32 %v11542_v59, %v5098_v50  ;;  %v5204_v17 = vadd.f32 %v11544_v60, %v5130_v34 }
 0x60c   : > { %v5235_v46 = vmul.f32 0.2, %v5171_v30  ;;  %v5267_v10 = vmul.f32 0.2, %v5203_v45  ;;  %v5237_v29 = vmul.f32 0.2, %v5173_v2  ;;  %v5175_v47 = vadd.f32 %v11542_v59, %v5101_v24 }
 0x60d   : > { %v5269_v22 = vmul.f32 0.2, %v5205_v56  ;;  %v5234_v19 = vmul.f32 0.2, %v5170_v58  ;;  %v5266_v40 = vmul.f32 0.2, %v5202_v51  ;;  %v5207_v63 = vadd.f32 %v11544_v60, %v5133_v20 }
 0x60e   : > { %v5299_v36 = vmax.f32 %v5171_v30, %v5235_v46  ;;  %v5331_v23 = vmax.f32 %v5203_v45, %v5267_v10  ;;  %v5301_v54 = vmax.f32 %v5173_v2, %v5237_v29  ;;  %v5236_v33 = vmul.f32 0.2, %v5172_v11 }
 0x60f   : > { %v5333_v3 = vmax.f32 %v5205_v56, %v5269_v22  ;;  %v5298_v28 = vmax.f32 %v5170_v58, %v5234_v19  ;;  %v5330_v50 = vmax.f32 %v5202_v51, %v5266_v40  ;;  %v5268_v55 = vmul.f32 0.2, %v5204_v17 }
 0x610   : > { %v5364_v34 = vpack.c.bf16 %v5331_v23, %v5299_v36  ;;  %v5300_v52 = vmax.f32 %v5172_v11, %v5236_v33  ;;  %v5239_v8 = vmul.f32 0.2, %v5175_v47  ;;  %v5271_v32 = vmul.f32 0.2, %v5207_v63  ;;  %v11574_v33 = vld [vmem:[%s11828_s6] sm:$0x3] }
 0x611   : > { %v5366_v12 = vpack.c.bf16 %v5333_v3, %v5301_v54  ;;  %v5363_v41 = vpack.c.bf16 %v5330_v50, %v5298_v28  ;;  %v5332_v24 = vmax.f32 %v5204_v17, %v5268_v55  ;;  %v5177_v57 = vadd.f32 %v11542_v59, %v5103_v35  ;;  %v12320_v36 = vld [vmem:[#allocation20_spill] sm:$0xff] }
 0x612   : > { %5419 = vmatprep.subr.bf16.mxu0 %v5364_v34  ;;  %v5303_v49 = vmax.f32 %v5175_v47, %v5239_v8  ;;  %v5335_v20 = vmax.f32 %v5207_v63, %v5271_v32  ;;  %v5209_v30 = vadd.f32 %v11544_v60, %v5135_v39  ;;  %v5174_v45 = vadd.f32 %v11542_v59, %v5100_v4  ;;  %v12319_v47 = vld [vmem:[#allocation19_spill] sm:$0xff] }
 0x613   : > { %5460 = vmatprep.subr.bf16.mxu1 %v5366_v12  ;;  %5420 = vmatpush1.bf16.msra.mxu0 %v5363_v41  ;;  %v5365_v40 = vpack.c.bf16 %v5332_v24, %v5300_v52  ;;  %v5241_v2 = vmul.f32 0.2, %v5177_v57  ;;  %v5206_v55 = vadd.f32 %v11544_v60, %v5132_v53  ;;  %v5176_v28 = vadd.f32 %v11542_v59, %v5102_v14  ;;  %v12322_v24 = vld [vmem:[#allocation24_spill] sm:$0xff] }
 0x614   : > { %v5368_v23 = vpack.c.bf16 %v5335_v20, %v5303_v49  ;;  %v5273_v8 = vmul.f32 0.2, %v5209_v30  ;;  %v5238_v32 = vmul.f32 0.2, %v5174_v45  ;;  %v5208_v35 = vadd.f32 %v11544_v60, %v5134_v31 }
 0x615   : > { %5461 = vmatpush1.bf16.msra.mxu1 %v5365_v40  ;;  %v5305_v39 = vmax.f32 %v5177_v57, %v5241_v2  ;;  %v5270_v12 = vmul.f32 0.2, %v5206_v55  ;;  %v5240_v41 = vmul.f32 0.2, %v5176_v28  ;;  %v5179_v52 = vadd.f32 %v11542_v59, %v5105_v0  ;;  %v12323_v2 = vld [vmem:[#allocation6_spill] sm:$0xff] }
 0x616   : > { %5501 = vmatprep.subr.bf16.mxu0 %v5368_v23  ;;  %v5337_v4 = vmax.f32 %v5209_v30, %v5273_v8  ;;  %6500 = vmatmul.mubr.msk.bf16.vlgmr.msra.gmra.mxu0 %vm5401_vm15, %v11574_v33  ;;  %v5302_v56 = vmax.f32 %v5174_v45, %v5238_v32  ;;  %v5272_v53 = vmul.f32 0.2, %v5208_v35  ;;  %v5211_v14 = vadd.f32 %v11544_v60, %v5137_v38 }
 0x617   : > { %v5334_v49 = vmax.f32 %v5206_v55, %v5270_v12  ;;  %v5304_v58 = vmax.f32 %v5176_v28, %v5240_v41  ;;  %v5243_v51 = vmul.f32 0.2, %v5179_v52  ;;  %v5181_v31 = vadd.f32 %v11542_v59, %v11552_v44  ;;  %v12324_v41 = vld [vmem:[#allocation2_spill] sm:$0xff] }
 0x618   : > { %v12318_v57 = vmov 0   ;;  %v5370_v11 = vpack.c.bf16 %v5337_v4, %v5305_v39  ;;  %6501 = vmatmul.mubr.msk.bf16.vlgmr.msra.gmra.mxu1 %vm5401_vm15, %v11574_v33  ;;  %v5336_v0 = vmax.f32 %v5208_v35, %v5272_v53  ;;  %v5275_v17 = vmul.f32 0.2, %v5211_v14 }
 0x619   : > { %5519 = vmatprep.mubr.bf16.mxu0 %v12318_v57  ;;  %v5213_v46 = vadd.f32 %v11544_v60, %v11556_v62  ;;  %v5367_v10 = vpack.c.bf16 %v5334_v49, %v5302_v56  ;;  %v5307_v29 = vmax.f32 %v5179_v52, %v5243_v51  ;;  %v5245_v38 = vmul.f32 0.2, %v5181_v31  ;;  %5560 = vmatprep.mubr.bf16.mxu1 %v12318_v57  ;;  %v12321_v62 = vld [vmem:[#allocation23_spill] sm:$0xff] }
 0x61a   : > { %v5104_v22 = vmul.f32 %v11506_v13, %v12319_v47  ;;  %5542 = vmatprep.subr.bf16.mxu1 %v5370_v11  ;;  %v5369_v44 = vpack.c.bf16 %v5336_v0, %v5304_v58  ;;  %v5339_v19 = vmax.f32 %v5211_v14, %v5275_v17  ;;  %v5136_v54 = vmul.f32 %v11508_v21, %v12320_v36  ;;  %v12325_v17 = vld [vmem:[#allocation27_spill] sm:$0xff] }
 0x61b   : > { %v5277_v63 = vmul.f32 0.2, %v5213_v46  ;;  %5502 = vmatpush1.bf16.msra.mxu0 %v5367_v10  ;;  %v5309_v3 = vmax.f32 %v5181_v31, %v5245_v38  ;;  %v5106_v34 = vmul.f32 %v11506_v13, %v12321_v62  ;;  %v5138_v20 = vmul.f32 %v11508_v21, %v12322_v24  ;;  %v12328_v62 = vld [vmem:[#allocation7_spill] sm:$0xff] }
 0x61c   : > { %v5178_v50 = vadd.f32 %v11542_v59, %v5104_v22  ;;  %5543 = vmatpush1.bf16.msra.mxu1 %v5369_v44  ;;  %v5372_v30 = vpack.c.bf16 %v5339_v19, %v5307_v29  ;;  %v5210_v40 = vadd.f32 %v11544_v60, %v5136_v54  ;;  %v5109_v55 = vmul.f32 %v11506_v13, %v12323_v2  ;;  %v12326_v19 = vld [vmem:[#allocation3_spill] sm:$0xff] }
 0x61d   : > { %v5341_v45 = vmax.f32 %v5213_v46, %v5277_v63  ;;  %v5180_v23 = vadd.f32 %v11542_v59, %v5106_v34  ;;  %v5212_v8 = vadd.f32 %v11544_v60, %v5138_v20  ;;  %v5141_v32 = vmul.f32 %v11508_v21, %v11182_v1 }
 0x61e   : > { %v5242_v28 = vmul.f32 0.2, %v5178_v50  ;;  %5583 = vmatprep.subr.bf16.mxu0 %v5372_v30  ;;  %6502 = vmatmul.mubr.msk.bf16.vlgmr.msra.gmra.mxu0 %vm5401_vm15, %v11574_v33  ;;  %v5274_v39 = vmul.f32 0.2, %v5210_v40  ;;  %v5183_v12 = vadd.f32 %v11542_v59, %v5109_v55  ;;  %v5111_v52 = vmul.f32 %v11506_v13, %v12324_v41 }
 0x61f   : > { %v5374_v35 = vpack.c.bf16 %v5341_v45, %v5309_v3  ;;  %v5244_v56 = vmul.f32 0.2, %v5180_v23  ;;  %v5276_v53 = vmul.f32 0.2, %v5212_v8  ;;  %v5215_v14 = vadd.f32 %v11544_v60, %v5141_v32  ;;  %5601 = vmatprep.mubr.bf16.mxu0 %v12318_v57  ;;  %v12327_v3 = vld [vmem:[#allocation11_spill] sm:$0xff] }
 0x620   : > { %v5306_v4 = vmax.f32 %v5178_v50, %v5242_v28  ;;  %6503 = vmatmul.mubr.msk.bf16.vlgmr.msra.gmra.mxu1 %vm5401_vm15, %v11574_v33  ;;  %v5338_v1 = vmax.f32 %v5210_v40, %v5274_v39  ;;  %v5247_v49 = vmul.f32 0.2, %v5183_v12  ;;  %v5143_v58 = vmul.f32 %v11508_v21, %v11224_v9 }
 0x621   : > { %5624 = vmatprep.subr.bf16.mxu1 %v5374_v35  ;;  %v5185_v51 = vadd.f32 %v11542_v59, %v5111_v52  ;;  %v5308_v31 = vmax.f32 %v5180_v23, %v5244_v56  ;;  %v5340_v11 = vmax.f32 %v5212_v8, %v5276_v53  ;;  %v5279_v0 = vmul.f32 0.2, %v5215_v14  ;;  %5642 = vmatprep.mubr.bf16.mxu1 %v12318_v57 }
 0x622   : > { %v5108_v46 = vmul.f32 %v11506_v13, %v12325_v17  ;;  %v5371_v10 = vpack.c.bf16 %v5338_v1, %v5306_v4  ;;  %v5311_v29 = vmax.f32 %v5183_v12, %v5247_v49  ;;  %v5217_v38 = vadd.f32 %v11544_v60, %v5143_v58  ;;  %v12329_v17 = vld [vmem:[#allocation10_spill] sm:$0xff] }
 0x623   : > { %v5249_v47 = vmul.f32 0.2, %v5185_v51  ;;  %v5373_v22 = vpack.c.bf16 %v5340_v11, %v5308_v31  ;;  %v5343_v44 = vmax.f32 %v5215_v14, %v5279_v0  ;;  %v5140_v9 = vmul.f32 %v11508_v21, %v12326_v19 }
 0x624   : > { %v5182_v63 = vadd.f32 %v11542_v59, %v5108_v46  ;;  %5584 = vmatpush1.bf16.msra.mxu0 %v5371_v10  ;;  %v5281_v36 = vmul.f32 0.2, %v5217_v38  ;;  %v5110_v50 = vmul.f32 %v11506_v13, %v12327_v3  ;;  %v5142_v34 = vmul.f32 %v11508_v21, %v12328_v62 }
 0x625   : > { %v5313_v54 = vmax.f32 %v5185_v51, %v5249_v47  ;;  %5625 = vmatpush1.bf16.msra.mxu1 %v5373_v22  ;;  %v5376_v24 = vpack.c.bf16 %v5343_v44, %v5311_v29  ;;  %v5214_v20 = vadd.f32 %v11544_v60, %v5140_v9  ;;  %v5113_v45 = vmul.f32 %v11506_v13, %v11257_v15 }
 0x626   : > { %v5246_v30 = vmul.f32 0.2, %v5182_v63  ;;  %v5345_v40 = vmax.f32 %v5217_v38, %v5281_v36  ;;  %v5184_v2 = vadd.f32 %v11542_v59, %v5110_v50  ;;  %v5216_v55 = vadd.f32 %v11544_v60, %v5142_v34 }
 0x627   : > { %v5145_v28 = vmul.f32 %v11508_v21, %v11264_v42  ;;  %5665 = vmatprep.subr.bf16.mxu0 %v5376_v24  ;;  %6504 = vmatmul.mubr.msk.bf16.vlgmr.msra.gmra.mxu0 %vm5401_vm15, %v11574_v33  ;;  %v5278_v23 = vmul.f32 0.2, %v5214_v20  ;;  %v5187_v32 = vadd.f32 %v11542_v59, %v5113_v45  ;;  %v5115_v35 = vmul.f32 %v11506_v13, %v11297_v48 }
 0x628   : > { %v5310_v8 = vmax.f32 %v5182_v63, %v5246_v30  ;;  %v5378_v15 = vpack.c.bf16 %v5345_v40, %v5313_v54  ;;  %6505 = vmatmul.mubr.msk.bf16.vlgmr.msra.gmra.mxu1 %vm5401_vm15, %v11574_v33  ;;  %v5248_v39 = vmul.f32 0.2, %v5184_v2  ;;  %v5280_v12 = vmul.f32 0.2, %v5216_v55  ;;  %5683 = vmatprep.mubr.bf16.mxu0 %v12318_v57 }
 0x629   : > { %v5219_v41 = vadd.f32 %v11544_v60, %v5145_v28  ;;  %v5342_v42 = vmax.f32 %v5214_v20, %v5278_v23  ;;  %v5251_v52 = vmul.f32 0.2, %v5187_v32  ;;  %v5147_v4 = vmul.f32 %v11508_v21, %v11307_v27  ;;  %5724 = vmatprep.mubr.bf16.mxu1 %v12318_v57 }
 0x62a   : > { %v5189_v56 = vadd.f32 %v11542_v59, %v5115_v35  ;;  %5706 = vmatprep.subr.bf16.mxu1 %v5378_v15  ;;  %v5312_v48 = vmax.f32 %v5184_v2, %v5248_v39  ;;  %v5344_v53 = vmax.f32 %v5216_v55, %v5280_v12  ;;  %v5112_v1 = vmul.f32 %v11506_v13, %v11239_v5  ;;  %v12330_v55 = vld [vmem:[#allocation8_spill] sm:$0xff] }
 0x62b   : > { %v5283_v14 = vmul.f32 0.2, %v5219_v41  ;;  %v5375_v49 = vpack.c.bf16 %v5342_v42, %v5310_v8  ;;  %v5315_v58 = vmax.f32 %v5187_v32, %v5251_v52  ;;  %v5221_v51 = vadd.f32 %v11544_v60, %v5147_v4 }
 0x62c   : > { %v5253_v31 = vmul.f32 0.2, %v5189_v56  ;;  %v5377_v11 = vpack.c.bf16 %v5344_v53, %v5312_v48  ;;  %v5144_v27 = vmul.f32 %v11508_v21, %v12329_v17  ;;  %v5186_v46 = vadd.f32 %v11542_v59, %v5112_v1 }
 0x62d   : > { %v5347_v0 = vmax.f32 %v5219_v41, %v5283_v14  ;;  %5666 = vmatpush1.bf16.msra.mxu0 %v5375_v49  ;;  %v5285_v10 = vmul.f32 0.2, %v5221_v51  ;;  %v5114_v38 = vmul.f32 %v11506_v13, %v11277_v16  ;;  %v5146_v5 = vmul.f32 %v11508_v21, %v11286_v37  ;;  %v12331_v14 = vld [vmem:[#allocation4_spill] sm:$0xff] }
 0x62e   : > { %v5317_v29 = vmax.f32 %v5189_v56, %v5253_v31  ;;  %5707 = vmatpush1.bf16.msra.mxu1 %v5377_v11  ;;  %v5218_v22 = vadd.f32 %v11544_v60, %v5144_v27  ;;  %v5250_v44 = vmul.f32 0.2, %v5186_v46  ;;  %v5117_v19 = vmul.f32 %v11506_v13, %v11329_v26 }
 0x62f   : > { %v5380_v47 = vpack.c.bf16 %v5347_v0, %v5315_v58  ;;  %v5349_v9 = vmax.f32 %v5221_v51, %v5285_v10  ;;  %v5188_v63 = vadd.f32 %v11542_v59, %v5114_v38  ;;  %v5220_v36 = vadd.f32 %v11544_v60, %v5146_v5  ;;  %v12332_v51 = vld [vmem:[#allocation17_spill] sm:$0xff]  ;;  %v12333_v0 = vld [vmem:[#allocation15_spill] sm:$0xff] }
 0x630   : > { %v5149_v54 = vmul.f32 %v11508_v21, %v11337_v6  ;;  %6506 = vmatmul.mubr.msk.bf16.vlgmr.msra.gmra.mxu0 %vm5401_vm15, %v11574_v33  ;;  %v5282_v16 = vmul.f32 0.2, %v5218_v22  ;;  %v5314_v37 = vmax.f32 %v5186_v46, %v5250_v44  ;;  %v5191_v3 = vadd.f32 %v11542_v59, %v5117_v19 }
 0x631   : > { %5747 = vmatprep.subr.bf16.mxu0 %v5380_v47  ;;  %v5119_v50 = vmul.f32 %v11506_v13, %v11361_v61  ;;  %v5382_v26 = vpack.c.bf16 %v5349_v9, %v5317_v29  ;;  %6507 = vmatmul.mubr.msk.bf16.vlgmr.msra.gmra.mxu1 %vm5401_vm15, %v11574_v33  ;;  %v5252_v62 = vmul.f32 0.2, %v5188_v63  ;;  %v5284_v34 = vmul.f32 0.2, %v5220_v36  ;;  %v12334_v47 = vld [vmem:[#allocation28_spill] sm:$0xff] }
 0x632   : > { %v5223_v24 = vadd.f32 %v11544_v60, %v5149_v54  ;;  %5765 = vmatprep.mubr.bf16.mxu0 %v12318_v57  ;;  %v5346_v6 = vmax.f32 %v5218_v22, %v5282_v16  ;;  %v5255_v20 = vmul.f32 0.2, %v5191_v3  ;;  %v5151_v30 = vmul.f32 %v11508_v21, %v11367_v43  ;;  %5806 = vmatprep.mubr.bf16.mxu1 %v12318_v57 }
 0x633   : > { %v5193_v45 = vadd.f32 %v11542_v59, %v5119_v50  ;;  %5788 = vmatprep.subr.bf16.mxu1 %v5382_v26  ;;  %v5316_v61 = vmax.f32 %v5188_v63, %v5252_v62  ;;  %v5348_v40 = vmax.f32 %v5220_v36, %v5284_v34  ;;  %v5116_v28 = vmul.f32 %v11506_v13, %v12330_v55  ;;  %v12335_v36 = vld [vmem:[#allocation9_spill] sm:$0xff]  ;;  %v12336_v34 = vld [vmem:[#allocation12_spill] sm:$0xff] }
 0x634   : > { %v5287_v2 = vmul.f32 0.2, %v5223_v24  ;;  %v5379_v23 = vpack.c.bf16 %v5346_v6, %v5314_v37  ;;  %v5319_v8 = vmax.f32 %v5191_v3, %v5255_v20  ;;  %v5225_v32 = vadd.f32 %v11544_v60, %v5151_v30 }
 0x635   : > { %v5257_v35 = vmul.f32 0.2, %v5193_v45  ;;  %v5381_v15 = vpack.c.bf16 %v5348_v40, %v5316_v61  ;;  %v5148_v43 = vmul.f32 %v11508_v21, %v11310_v25  ;;  %v5190_v12 = vadd.f32 %v11542_v59, %v5116_v28  ;;  %v12338_v40 = vld [vmem:[#allocation5_spill] sm:$0xff] }
 0x636   : > { %v5351_v39 = vmax.f32 %v5223_v24, %v5287_v2  ;;  %5748 = vmatpush1.bf16.msra.mxu0 %v5379_v23  ;;  %v5289_v41 = vmul.f32 0.2, %v5225_v32  ;;  %v5118_v52 = vmul.f32 %v11506_v13, %v11343_v7  ;;  %v5150_v4 = vmul.f32 %v11508_v21, %v11348_v18 }
 0x637   : > { %v5321_v42 = vmax.f32 %v5193_v45, %v5257_v35  ;;  %5789 = vmatpush1.bf16.msra.mxu1 %v5381_v15  ;;  %v5222_v48 = vadd.f32 %v11544_v60, %v5148_v43  ;;  %v5254_v53 = vmul.f32 0.2, %v5190_v12  ;;  %v5121_v1 = vmul.f32 %v11506_v13, %v12331_v14  ;;  %v12337_v45 = vld [vmem:[#allocation16_spill] sm:$0xff] }
 0x638   : > { %v5384_v56 = vpack.c.bf16 %v5351_v39, %v5319_v8  ;;  %v5353_v25 = vmax.f32 %v5225_v32, %v5289_v41  ;;  %v5192_v49 = vadd.f32 %v11542_v59, %v5118_v52  ;;  %v5224_v58 = vadd.f32 %v11544_v60, %v5150_v4  ;;  %v12339_v8 = vld [vmem:[#allocation30_spill] sm:$0xff]  ;;  %v12340_v43 = vld [vmem:[#allocation32_spill] sm:$0xff] }
 0x639   : > { %v5153_v31 = vmul.f32 %v11508_v21, %v12332_v51  ;;  %6508 = vmatmul.mubr.msk.bf16.vlgmr.msra.gmra.mxu0 %vm5401_vm15, %v11574_v33  ;;  %v5286_v7 = vmul.f32 0.2, %v5222_v48  ;;  %v5318_v18 = vmax.f32 %v5190_v12, %v5254_v53  ;;  %v5195_v11 = vadd.f32 %v11542_v59, %v5121_v1  ;;  %v12341_v4 = vld [vmem:[#allocation34_spill] sm:$0xff] }
 0x63a   : > { %5829 = vmatprep.subr.bf16.mxu0 %v5384_v56  ;;  %v5123_v17 = vmul.f32 %v11506_v13, %v12333_v0  ;;  %v5386_v27 = vpack.c.bf16 %v5353_v25, %v5321_v42  ;;  %6509 = vmatmul.mubr.msk.bf16.vlgmr.msra.gmra.mxu1 %vm5401_vm15, %v11574_v33  ;;  %v5256_v46 = vmul.f32 0.2, %v5192_v49  ;;  %v5288_v10 = vmul.f32 0.2, %v5224_v58  ;;  %v12343_v0 = vld [vmem:[#allocation29_spill] sm:$0xff] }
 0x63b   : > { %v5227_v29 = vadd.f32 %v11544_v60, %v5153_v31  ;;  %5847 = vmatprep.mubr.bf16.mxu0 %v12318_v57  ;;  %v5350_v38 = vmax.f32 %v5222_v48, %v5286_v7  ;;  %v5259_v5 = vmul.f32 0.2, %v5195_v11  ;;  %v5155_v22 = vmul.f32 %v11508_v21, %v12334_v47  ;;  %5888 = vmatprep.mubr.bf16.mxu1 %v12318_v57  ;;  %v12344_v47 = vld [vmem:[#allocation31_spill] sm:$0xff] }
 0x63c   : > { %v5197_v44 = vadd.f32 %v11542_v59, %v5123_v17  ;;  %5870 = vmatprep.subr.bf16.mxu1 %v5386_v27  ;;  %v5320_v19 = vmax.f32 %v5192_v49, %v5256_v46  ;;  %v5352_v9 = vmax.f32 %v5224_v58, %v5288_v10  ;;  %v5120_v54 = vmul.f32 %v11506_v13, %v12335_v36  ;;  %v12342_v58 = vld [vmem:[#allocation36_spill] sm:$0xff] }
 0x63d   : > { %v5291_v63 = vmul.f32 0.2, %v5227_v29  ;;  %v5383_v16 = vpack.c.bf16 %v5350_v38, %v5318_v18  ;;  %v5323_v37 = vmax.f32 %v5195_v11, %v5259_v5  ;;  %v5229_v3 = vadd.f32 %v11544_v60, %v5155_v22 }
 0x63e   : > { %v5261_v50 = vmul.f32 0.2, %v5197_v44  ;;  %v5385_v26 = vpack.c.bf16 %v5352_v9, %v5320_v19  ;;  %v5152_v24 = vmul.f32 %v11508_v21, %v12336_v34  ;;  %v5194_v6 = vadd.f32 %v11542_v59, %v5120_v54  ;;  %v12346_v54 = vld [vmem:[#allocation35_spill] sm:$0xff] }
 0x63f   : > { %v5355_v62 = vmax.f32 %v5227_v29, %v5291_v63  ;;  %5830 = vmatpush1.bf16.msra.mxu0 %v5383_v16  ;;  %v5293_v20 = vmul.f32 0.2, %v5229_v3  ;;  %v5122_v61 = vmul.f32 %v11506_v13, %v12337_v45  ;;  %v5154_v2 = vmul.f32 %v11508_v21, %v12338_v40  ;;  %v12345_v63 = vld [vmem:[#allocation33_spill] sm:$0xff] }
 0x640   : > { %v5325_v30 = vmax.f32 %v5197_v44, %v5261_v50  ;;  %5871 = vmatpush1.bf16.msra.mxu1 %v5385_v26  ;;  %v5226_v28 = vadd.f32 %v11544_v60, %v5152_v24  ;;  %v5258_v23 = vmul.f32 0.2, %v5194_v6  ;;  %v5125_v32 = vmul.f32 %v11506_v13, %v12339_v8 }
 0x641   : > { %v5388_v55 = vpack.c.bf16 %v5355_v62, %v5323_v37  ;;  %v5357_v35 = vmax.f32 %v5229_v3, %v5293_v20  ;;  %v5196_v15 = vadd.f32 %v11542_v59, %v5122_v61  ;;  %v5228_v39 = vadd.f32 %v11544_v60, %v5154_v2  ;;  %v11763_v2 = vpop.permute.xlu1 %5398 }
 0x642   : > { %v5157_v12 = vmul.f32 %v11508_v21, %v12340_v43  ;;  %6510 = vmatmul.mubr.msk.bf16.vlgmr.msra.gmra.mxu0 %vm5401_vm15, %v11574_v33  ;;  %v5290_v41 = vmul.f32 0.2, %v5226_v28  ;;  %v5322_v42 = vmax.f32 %v5194_v6, %v5258_v23  ;;  %v5199_v52 = vadd.f32 %v11542_v59, %v5125_v32 }
 0x643   : > { %5911 = vmatprep.subr.bf16.mxu0 %v5388_v55  ;;  %v5127_v56 = vmul.f32 %v11506_v13, %v12341_v4  ;;  %v5390_v48 = vpack.c.bf16 %v5357_v35, %v5325_v30  ;;  %6511 = vmatmul.mubr.msk.bf16.vlgmr.msra.gmra.mxu1 %vm5401_vm15, %v11574_v33  ;;  %v5260_v53 = vmul.f32 0.2, %v5196_v15  ;;  %v5292_v14 = vmul.f32 0.2, %v5228_v39 }
 0x644   : > { %v5231_v1 = vadd.f32 %v11544_v60, %v5157_v12  ;;  %5929 = vmatprep.mubr.bf16.mxu0 %v12318_v57  ;;  %v5354_v25 = vmax.f32 %v5226_v28, %v5290_v41  ;;  %v5263_v49 = vmul.f32 0.2, %v5199_v52  ;;  %v5159_v51 = vmul.f32 %v11508_v21, %v12342_v58  ;;  %5970 = vmatprep.mubr.bf16.mxu1 %v12318_v57 }
 0x645   : > { %v5201_v31 = vadd.f32 %v11542_v59, %v5127_v56  ;;  %5952 = vmatprep.subr.bf16.mxu1 %v5390_v48  ;;  %v5324_v7 = vmax.f32 %v5196_v15, %v5260_v53  ;;  %v5356_v18 = vmax.f32 %v5228_v39, %v5292_v14  ;;  %v5124_v17 = vmul.f32 %v11506_v13, %v12343_v0 }
 0x646   : > { %v5295_v11 = vmul.f32 0.2, %v5231_v1  ;;  %v5387_v27 = vpack.c.bf16 %v5354_v25, %v5322_v42  ;;  %v5327_v46 = vmax.f32 %v5199_v52, %v5263_v49  ;;  %v5233_v10 = vadd.f32 %v11544_v60, %v5159_v51 }
 0x647   : > { %v5265_v29 = vmul.f32 0.2, %v5201_v31  ;;  %v5389_v38 = vpack.c.bf16 %v5356_v18, %v5324_v7  ;;  %v5156_v22 = vmul.f32 %v11508_v21, %v12344_v47  ;;  %v5198_v44 = vadd.f32 %v11542_v59, %v5124_v17 }
 0x648   : > { %v5359_v5 = vmax.f32 %v5231_v1, %v5295_v11  ;;  %5912 = vmatpush1.bf16.msra.mxu0 %v5387_v27  ;;  %v5297_v19 = vmul.f32 0.2, %v5233_v10  ;;  %v5126_v36 = vmul.f32 %v11506_v13, %v12345_v63  ;;  %v5158_v16 = vmul.f32 %v11508_v21, %v12346_v54 }
 0x649   : > { %v5329_v9 = vmax.f32 %v5201_v31, %v5265_v29  ;;  %5953 = vmatpush1.bf16.msra.mxu1 %v5389_v38  ;;  %v5230_v3 = vadd.f32 %v11544_v60, %v5156_v22  ;;  %v5262_v50 = vmul.f32 0.2, %v5198_v44 }
 0x64a   : > { %v5392_v37 = vpack.c.bf16 %v5359_v5, %v5327_v46  ;;  %v5361_v26 = vmax.f32 %v5233_v10, %v5297_v19  ;;  %v5200_v62 = vadd.f32 %v11542_v59, %v5126_v36  ;;  %v5232_v34 = vadd.f32 %v11544_v60, %v5158_v16 }
 0x64b   : > { %6512 = vmatmul.mubr.msk.bf16.vlgmr.msra.gmra.mxu0 %vm5401_vm15, %v11574_v33  ;;  %v5294_v24 = vmul.f32 0.2, %v5230_v3  ;;  %v5326_v6 = vmax.f32 %v5198_v44, %v5262_v50 }
 0x64c   : > { %5993 = vmatprep.subr.bf16.mxu0 %v5392_v37  ;;  %v5394_v13 = vpack.c.bf16 %v5361_v26, %v5329_v9  ;;  %6513 = vmatmul.mubr.msk.bf16.vlgmr.msra.gmra.mxu1 %vm5401_vm15, %v11574_v33  ;;  %v5264_v21 = vmul.f32 0.2, %v5200_v62  ;;  %v5296_v20 = vmul.f32 0.2, %v5232_v34 }
 0x64d   : > { %6011 = vmatprep.mubr.bf16.mxu0 %v12318_v57  ;;  %v5358_v30 = vmax.f32 %v5230_v3, %v5294_v24  ;;  %6052 = vmatprep.mubr.bf16.mxu1 %v12318_v57 }
 0x64e   : > { %6034 = vmatprep.subr.bf16.mxu1 %v5394_v13  ;;  %v5328_v59 = vmax.f32 %v5200_v62, %v5264_v21  ;;  %v5360_v60 = vmax.f32 %v5232_v34, %v5296_v20 }
 0x64f   : > { %v5391_v45 = vpack.c.bf16 %v5358_v30, %v5326_v6 }
 0x650   : > { %v5393_v61 = vpack.c.bf16 %v5360_v60, %v5328_v59 }
 0x651   : > { %5994 = vmatpush1.bf16.msra.mxu0 %v5391_v45 }
 0x652   : > { %6035 = vmatpush1.bf16.msra.mxu1 %v5393_v61 }
 0x654   : > { %6514 = vmatmul.mubr.msk.bf16.vlgmr.msra.gmra.mxu0 %vm5401_vm15, %v11574_v33 }
 0x655   : > { %6515 = vmatmul.mubr.msk.bf16.vlgmr.msra.gmra.mxu1 %vm5401_vm15, %v11574_v33 }
 0x6d6   : > { %v5439_v40 = vpop.f32.mrf.mxu0 }
 0x6d7   : > { %v5440_v57 = vadd.f32 %v5439_v40, %v11763_v2 }
 0x6d8   : > { %v5480_v55 = vpop.f32.mrf.mxu1  ;;  %v5441_v28 = vpop.f32.mrf.mxu0 }
 0x6d9   : > { %v5442_v23 = vadd.f32 %v5441_v28, %v11763_v2  ;;  %v5481_v33 = vadd.f32 %v5480_v55, %v11763_v2 }
 0x6da   : > { %v5482_v8 = vpop.f32.mrf.mxu1  ;;  %v5443_v32 = vpop.f32.mrf.mxu0 }
 0x6db   : > { %v6093_v35 = vcombine.low %v5440_v57, %v5442_v23  ;;  %v5483_v15 = vadd.f32 %v5482_v8, %v11763_v2 }
 0x6dc   : > { %v5484_v39 = vpop.f32.mrf.mxu1  ;;  %v5444_v43 = vpop.f32.mrf.mxu0 }
 0x6dd   : > { %6125 = vst [vmem:[%s11771_s13] sm:$0xff] %v6093_v35  ;;  %v6094_v12 = vcombine.low %v5481_v33, %v5483_v15 }
 0x6de   : > { %v5485_v41 = vpop.f32.mrf.mxu1  ;;  %v5521_v42 = vpop.f32.mrf.mxu0 }
 0x6df   : > { %6126 = vst [vmem:[%s11771_s13 + $0x8] sm:$0xff] %v6094_v12  ;;  %v5522_v56 = vadd.f32 %v5521_v42, %v11763_v2 }
 0x6e0   : > { %v5562_v52 = vpop.f32.mrf.mxu1  ;;  %v5523_v4 = vpop.f32.mrf.mxu0 }
 0x6e1   : > { %v5524_v48 = vadd.f32 %v5523_v4, %v11763_v2  ;;  %v5563_v1 = vadd.f32 %v5562_v52, %v11763_v2 }
 0x6e2   : > { %v5564_v53 = vpop.f32.mrf.mxu1  ;;  %v5525_v14 = vpop.f32.mrf.mxu0 }
 0x6e3   : > { %v6095_v25 = vcombine.low %v5522_v56, %v5524_v48  ;;  %v5565_v49 = vadd.f32 %v5564_v53, %v11763_v2 }
 0x6e4   : > { %v5566_v58 = vpop.f32.mrf.mxu1  ;;  %v5526_v51 = vpop.f32.mrf.mxu0 }
 0x6e5   : > { %6127 = vst [vmem:[%s11771_s13 + $0x10] sm:$0xff] %v6095_v25  ;;  %v6096_v31 = vcombine.low %v5563_v1, %v5565_v49 }
 0x6e6   : > { %v5567_v7 = vpop.f32.mrf.mxu1 }
 0x6e7   : > { %6128 = vst [vmem:[%s11771_s13 + $0x18] sm:$0xff] %v6096_v31  ;;  %v5603_v18 = vpop.f32.mrf.mxu0 }
 0x6e8   : > { %v5644_v11 = vpop.f32.mrf.mxu1  ;;  %v5604_v17 = vadd.f32 %v5603_v18, %v11763_v2 }
 0x6e9   : > { %v5605_v0 = vpop.f32.mrf.mxu0  ;;  %v5645_v10 = vadd.f32 %v5644_v11, %v11763_v2 }
 0x6ea   : > { %v5606_v27 = vadd.f32 %v5605_v0, %v11763_v2  ;;  %v5646_v46 = vpop.f32.mrf.mxu1 }
 0x6eb   : > { %v5647_v29 = vadd.f32 %v5646_v46, %v11763_v2  ;;  %v5607_v38 = vpop.f32.mrf.mxu0 }
 0x6ec   : > { %v6097_v5 = vcombine.low %v5604_v17, %v5606_v27  ;;  %v5648_v47 = vpop.f32.mrf.mxu1 }
 0x6ed   : > { %v6098_v22 = vcombine.low %v5645_v10, %v5647_v29  ;;  %v5608_v44 = vpop.f32.mrf.mxu0 }
 0x6ee   : > { %6129 = vst [vmem:[%s11771_s13 + $0x20] sm:$0xff] %v6097_v5  ;;  %v5649_v19 = vpop.f32.mrf.mxu1 }
 0x6ef   : > { %6130 = vst [vmem:[%s11771_s13 + $0x28] sm:$0xff] %v6098_v22 }
 0x6f0   : > { %v5685_v9 = vpop.f32.mrf.mxu0 }
 0x6f1   : > { %v5726_v63 = vpop.f32.mrf.mxu1  ;;  %v5686_v54 = vadd.f32 %v5685_v9, %v11763_v2 }
 0x6f2   : > { %v5687_v36 = vpop.f32.mrf.mxu0  ;;  %v5727_v3 = vadd.f32 %v5726_v63, %v11763_v2 }
 0x6f3   : > { %v5688_v16 = vadd.f32 %v5687_v36, %v11763_v2  ;;  %v5728_v37 = vpop.f32.mrf.mxu1 }
 0x6f4   : > { %v5729_v50 = vadd.f32 %v5728_v37, %v11763_v2  ;;  %v5689_v26 = vpop.f32.mrf.mxu0 }
 0x6f5   : > { %v6099_v62 = vcombine.low %v5686_v54, %v5688_v16  ;;  %v5730_v34 = vpop.f32.mrf.mxu1 }
 0x6f6   : > { %v6100_v24 = vcombine.low %v5727_v3, %v5729_v50  ;;  %v5690_v6 = vpop.f32.mrf.mxu0 }
 0x6f7   : > { %6131 = vst [vmem:[%s11771_s13 + $0x30] sm:$0xff] %v6099_v62  ;;  %v5731_v13 = vpop.f32.mrf.mxu1 }
 0x6f8   : > { %6132 = vst [vmem:[%s11771_s13 + $0x38] sm:$0xff] %v6100_v24 }
 0x6f9   : > { %v5767_v21 = vpop.f32.mrf.mxu0 }
 0x6fa   : > { %v5808_v20 = vpop.f32.mrf.mxu1  ;;  %v5768_v59 = vadd.f32 %v5767_v21, %v11763_v2 }
 0x6fb   : > { %v5769_v30 = vpop.f32.mrf.mxu0  ;;  %v5809_v61 = vadd.f32 %v5808_v20, %v11763_v2 }
 0x6fc   : > { %v5770_v60 = vadd.f32 %v5769_v30, %v11763_v2  ;;  %v5810_v45 = vpop.f32.mrf.mxu1 }
 0x6fd   : > { %v5811_v40 = vadd.f32 %v5810_v45, %v11763_v2  ;;  %v5771_v55 = vpop.f32.mrf.mxu0 }
 0x6fe   : > { %v6101_v28 = vcombine.low %v5768_v59, %v5770_v60  ;;  %v5812_v57 = vpop.f32.mrf.mxu1 }
 0x6ff   : > { %v6102_v23 = vcombine.low %v5809_v61, %v5811_v40  ;;  %v5772_v8 = vpop.f32.mrf.mxu0 }
 0x700   : > { %6133 = vst [vmem:[%s11771_s13 + $0x40] sm:$0xff] %v6101_v28  ;;  %v5813_v32 = vpop.f32.mrf.mxu1 }
 0x701   : > { %6134 = vst [vmem:[%s11771_s13 + $0x48] sm:$0xff] %v6102_v23 }
 0x702   : > { %v5849_v33 = vpop.f32.mrf.mxu0 }
 0x703   : > { %v5890_v35 = vpop.f32.mrf.mxu1  ;;  %v5850_v39 = vadd.f32 %v5849_v33, %v11763_v2 }
 0x704   : > { %v5851_v15 = vpop.f32.mrf.mxu0  ;;  %v5891_v41 = vadd.f32 %v5890_v35, %v11763_v2 }
 0x705   : > { %v5852_v43 = vadd.f32 %v5851_v15, %v11763_v2  ;;  %v5892_v12 = vpop.f32.mrf.mxu1 }
 0x706   : > { %v5893_v42 = vadd.f32 %v5892_v12, %v11763_v2  ;;  %v5853_v52 = vpop.f32.mrf.mxu0 }
 0x707   : > { %v6103_v4 = vcombine.low %v5850_v39, %v5852_v43  ;;  %v5894_v56 = vpop.f32.mrf.mxu1 }
 0x708   : > { %v6104_v48 = vcombine.low %v5891_v41, %v5893_v42  ;;  %v5854_v53 = vpop.f32.mrf.mxu0 }
 0x709   : > { %6135 = vst [vmem:[%s11771_s13 + $0x50] sm:$0xff] %v6103_v4  ;;  %v5895_v14 = vpop.f32.mrf.mxu1 }
 0x70a   : > { %6136 = vst [vmem:[%s11771_s13 + $0x58] sm:$0xff] %v6104_v48 }
 0x70b   : > { %v5931_v1 = vpop.f32.mrf.mxu0 }
 0x70c   : > { %v5972_v25 = vpop.f32.mrf.mxu1  ;;  %v5932_v58 = vadd.f32 %v5931_v1, %v11763_v2 }
 0x70d   : > { %v5933_v49 = vpop.f32.mrf.mxu0  ;;  %v5973_v7 = vadd.f32 %v5972_v25, %v11763_v2 }
 0x70e   : > { %v5934_v51 = vadd.f32 %v5933_v49, %v11763_v2  ;;  %v5974_v31 = vpop.f32.mrf.mxu1 }
 0x70f   : > { %v5975_v18 = vadd.f32 %v5974_v31, %v11763_v2  ;;  %v5935_v11 = vpop.f32.mrf.mxu0 }
 0x710   : > { %v6105_v0 = vcombine.low %v5932_v58, %v5934_v51  ;;  %v5976_v17 = vpop.f32.mrf.mxu1 }
 0x711   : > { %v6106_v27 = vcombine.low %v5973_v7, %v5975_v18  ;;  %v5936_v46 = vpop.f32.mrf.mxu0 }
 0x712   : > { %6137 = vst [vmem:[%s11771_s13 + $0x60] sm:$0xff] %v6105_v0  ;;  %v5977_v10 = vpop.f32.mrf.mxu1 }
 0x713   : > { %6138 = vst [vmem:[%s11771_s13 + $0x68] sm:$0xff] %v6106_v27 }
 0x714   : > { %v6013_v29 = vpop.f32.mrf.mxu0 }
 0x715   : > { %v6054_v38 = vpop.f32.mrf.mxu1  ;;  %v6014_v47 = vadd.f32 %v6013_v29, %v11763_v2 }
 0x716   : > { %v6015_v5 = vpop.f32.mrf.mxu0  ;;  %v6055_v19 = vadd.f32 %v6054_v38, %v11763_v2 }
 0x717   : > { %v6016_v22 = vadd.f32 %v6015_v5, %v11763_v2  ;;  %v6056_v44 = vpop.f32.mrf.mxu1 }
 0x718   : > { %v6057_v9 = vadd.f32 %v6056_v44, %v11763_v2  ;;  %v6017_v63 = vpop.f32.mrf.mxu0 }
 0x719   : > { %v6107_v36 = vcombine.low %v6014_v47, %v6016_v22  ;;  %v6058_v54 = vpop.f32.mrf.mxu1 }
 0x71a   : > { %v6108_v16 = vcombine.low %v6055_v19, %v6057_v9  ;;  %v6018_v37 = vpop.f32.mrf.mxu0 }
 0x71b   : > { %6139 = vst [vmem:[%s11771_s13 + $0x70] sm:$0xff] %v6107_v36  ;;  %v6059_v3 = vpop.f32.mrf.mxu1 }
 0x71c   : > { %6140 = vst [vmem:[%s11771_s13 + $0x78] sm:$0xff] %v6108_v16 }
 0x71d PF: > { %s18_s27 = sadd.s32 1, %s6572_s27  }
 0x71e   : > { %p15_p4 = scmp.ge.s32.totalorder %s18_s27, 4  }
 0x720   :  { %17 = sbr.rel (!%p15_p4) target bundleno = 1 (0x1), region = 85 }

</bundles_post_ra>
